<compile_context>
chip_gen: v5e
topology: v5e:2x2
jax: 0.10.0
libtpu: 0.0.40
codegen_flags: <defaults>
</compile_context>

<pallas_src>
import functools
import math

import jax
import jax.numpy as jnp
import numpy as np
from jax import lax
from jax.experimental import pallas as pl
from jax.experimental.pallas import tpu as pltpu

CONV_CFG = [(8, 3), (8, 8), (16, 8), (32, 16), (32, 32), (64, 32)]  # (Cout, Cin)
NUM_CLASSES = 15


def layer_dims(hw):
    """Per-layer static dims for a square hw x hw input."""
    dims = []
    h = hw
    for co, ci in CONV_CFG:
        dims.append(dict(H=h, Wh=h // 2, Cin=max(8, ci), Co=co,
                         Hp=(h - 2) // 2, Wp=(h - 2) // 2))
        h = (h - 2) // 2
    return dims


def stack_conv_weights(w, b, cin_pad):
    """w: (Co, Ci, 3, 3), b: (Co,) -> Wstack (4*Co, 16*cin_pad), bstack (4*Co, 1).

    Folds the 3x3 taps, the 2x2 pooling-window offsets (a, b) and the input channels
    into a single MXU contraction:
      Wstack[(a*2+b)*Co + co, (cc*4 + rt)*cin_pad + ci] = w[co, ci, rt - a, cc - b]
    (zero where the tap falls outside the 3x3 kernel or ci >= Ci)."""
    w = np.asarray(w, np.float32)
    b = np.asarray(b, np.float32)
    co, ci = w.shape[0], w.shape[1]
    wst = np.zeros((4 * co, 16 * cin_pad), np.float32)
    for a in (0, 1):
        for bb in (0, 1):
            g = a * 2 + bb
            for rt in range(4):
                for cc in range(4):
                    dy, dx = rt - a, cc - bb
                    if 0 <= dy <= 2 and 0 <= dx <= 2:
                        k0 = (cc * 4 + rt) * cin_pad
                        wst[g * co:(g + 1) * co, k0:k0 + ci] = w[:, :, dy, dx]
    bst = np.tile(b, 4).reshape(4 * co, 1)
    return jnp.asarray(wst), jnp.asarray(bst)


# ----------------------------------------------------------------------------------
# The fused whole-network kernel (one grid step = one batch element).
# Activation storage inside the kernel: 2-D buffers (H*C, W/2) per column parity,
# row index = h*C + c (C on sublanes), half-width W on lanes.
# ----------------------------------------------------------------------------------
def _network_kernel(*refs, dims):
    nl = len(dims)
    xe_ref, xo_ref = refs[0], refs[1]
    w_refs = [refs[2 + 2 * l] for l in range(nl)]
    b_refs = [refs[3 + 2 * l] for l in range(nl)]
    wfc_ref = refs[2 + 2 * nl]
    bfc_ref = refs[3 + 2 * nl]
    o_ref = refs[4 + 2 * nl]
    scr = refs[5 + 2 * nl:]
    of_refs = list(scr[:nl])                                   # full-width pooled outputs
    pe_refs = [xe_ref] + [scr[nl + 2 * l] for l in range(nl - 1)]   # even-column inputs
    po_refs = [xo_ref] + [scr[nl + 2 * l + 1] for l in range(nl - 1)]  # odd-column inputs

    for l in range(nl):
        d = dims[l]
        cin, co, hp, wp = d["Cin"], d["Co"], d["Hp"], d["Wp"]
        pe, po, of = pe_refs[l], po_refs[l], of_refs[l]
        wst = w_refs[l][...]                                   # (4*Co, 16*Cin)
        bst = b_refs[l][...]                                   # (4*Co, 1)

        def row_body(i, carry, pe=pe, po=po, of=of, wst=wst, bst=bst,
                     cin=cin, co=co, wp=wp):
            # 4 consecutive input rows (h = 2i .. 2i+3), all channels, both parities.
            start = pl.multiple_of(2 * i * cin, 8)
            rows_e = pe[pl.ds(start, 4 * cin), :]              # (4*Cin, Wh)
            rows_o = po[pl.ds(start, 4 * cin), :]
            # rhs R[(cc*4+rt)*Cin + ci, j] = x[2i+rt, ci, 2j+cc]: 16 aligned slices.
            pieces = []
            for cc in range(4):
                src = rows_e if cc % 2 == 0 else rows_o
                off = cc // 2
                for rt in range(4):
                    pieces.append(src[rt * cin:(rt + 1) * cin, off:off + wp])
            rmat = jnp.concatenate(pieces, axis=0)             # (16*Cin, Wp)
            # One MXU matmul gives all 4 (row, col) pooling-window positions at once.
            z = jnp.dot(wst, rmat, preferred_element_type=jnp.float32)   # (4*Co, Wp)
            y = jnp.maximum(z + bst, 0.0)                      # bias + ReLU
            pooled = jnp.maximum(jnp.maximum(y[0:co], y[co:2 * co]),
                                 jnp.maximum(y[2 * co:3 * co], y[3 * co:4 * co]))
            of[pl.ds(pl.multiple_of(i * co, 8), co), :] = pooled
            return carry

        lax.fori_loop(0, hp, row_body, 0, unroll=(hp <= 4))

        if l + 1 < nl:
            # Split the pooled output into even/odd columns for the next layer with
            # exact 0/1 selection matmuls (no lane-strided memory access needed).
            whn = wp // 2
            full = of[...]                                     # (Hp*Co, Wp)
            ri = lax.broadcasted_iota(jnp.int32, (wp, whn), 0)
            ci_ = lax.broadcasted_iota(jnp.int32, (wp, whn), 1)
            sel_e = (ri == 2 * ci_).astype(jnp.float32)
            sel_o = (ri == 2 * ci_ + 1).astype(jnp.float32)
            pe_refs[l + 1][...] = jnp.dot(full, sel_e, preferred_element_type=jnp.float32)
            po_refs[l + 1][...] = jnp.dot(full, sel_o, preferred_element_type=jnp.float32)

    # Final layer output is (Co_last, 1) == torch.flatten(x, 1) for this image.
    feat = of_refs[nl - 1][...]
    o_ref[...] = (jnp.dot(wfc_ref[...], feat, preferred_element_type=jnp.float32)
                  + bfc_ref[...])


def _forward_pallas(xe, xo, kparams, dims):
    B = xe.shape[0]
    flat_w = []
    for wst, bst in kparams["convs"]:
        flat_w += [wst, bst]
    wfc, bfc = kparams["fc"]

    in_specs = [pl.BlockSpec((None,) + tuple(xe.shape[1:]), lambda n: (n, 0, 0)),
                pl.BlockSpec((None,) + tuple(xo.shape[1:]), lambda n: (n, 0, 0))]
    for arr in flat_w + [wfc, bfc]:
        in_specs.append(pl.BlockSpec(arr.shape, lambda n: (0, 0)))

    scratch = [pltpu.VMEM((d["Hp"] * d["Co"], d["Wp"]), jnp.float32) for d in dims]
    for d in dims[1:]:
        scratch.append(pltpu.VMEM((d["H"] * d["Cin"], d["Wh"]), jnp.float32))  # even cols
        scratch.append(pltpu.VMEM((d["H"] * d["Cin"], d["Wh"]), jnp.float32))  # odd cols

    out = pl.pallas_call(
        functools.partial(_network_kernel, dims=tuple(dims)),
        grid=(B,),
        in_specs=in_specs,
        out_specs=pl.BlockSpec((None, NUM_CLASSES, 1), lambda n: (n, 0, 0)),
        out_shape=jax.ShapeDtypeStruct((B, NUM_CLASSES, 1), jnp.float32),
        scratch_shapes=scratch,
        compiler_params=pltpu.CompilerParams(
            dimension_semantics=("parallel",),
            vmem_limit_bytes=40 * 1024 * 1024),
    )(xe, xo, *flat_w, wfc, bfc)
    return out[:, :, 0]


@jax.jit
def network_forward(x_nchw, kparams):
    B, C, H, W = x_nchw.shape
    dims = layer_dims(H)
    assert dims[-1]["Hp"] == 1 and dims[-1]["Wp"] == 1, "kernel FC assumes 1x1 final map"
    cin_pad = dims[0]["Cin"]
    x = jnp.transpose(x_nchw, (0, 2, 1, 3))                       # NCHW -> (B, H, C, W)
    x = jnp.pad(x, ((0, 0), (0, 0), (0, cin_pad - C), (0, 0)))    # pad C: 3 -> 8
    xe = x[..., 0::2].reshape(B, H * cin_pad, W // 2)             # even input columns
    xo = x[..., 1::2].reshape(B, H * cin_pad, W // 2)             # odd input columns
    return _forward_pallas(xe, xo, kparams, dims)


# ----------------------------------------------------------------------------------
# Parameters (deterministic, PyTorch-style uniform(-1/sqrt(fan_in), 1/sqrt(fan_in))).
# ----------------------------------------------------------------------------------
def init_params(key, input_hw):
    params = {"convs": [], "fc": None}
    for co, ci in CONV_CFG:
        key, kw, kb = jax.random.split(key, 3)
        bound = 1.0 / math.sqrt(ci * 9)
        w = jax.random.uniform(kw, (co, ci, 3, 3), jnp.float32, -bound, bound)  # OIHW
        b = jax.random.uniform(kb, (co,), jnp.float32, -bound, bound)
        params["convs"].append((w, b))
    s = input_hw
    for _ in CONV_CFG:
        s = (s - 2) // 2
    flat = CONV_CFG[-1][0] * s * s
    # TODO(synk): nn.Linear(1000, 15) in the PyTorch spec is dimensionally inconsistent
    # with the conv stack (flatten width is 64*s*s, never 1000), so fc1's in_features is
    # adapted to the actual flatten width to keep forward() well defined.
    key, kw, kb = jax.random.split(key, 3)
    bound = 1.0 / math.sqrt(flat)
    wfc = jax.random.uniform(kw, (NUM_CLASSES, flat), jnp.float32, -bound, bound)
    bfc = jax.random.uniform(kb, (NUM_CLASSES,), jnp.float32, -bound, bound)
    params["fc"] = (wfc, bfc)
    return params


def prepare_kernel_params(params):
    convs = []
    for (w, b), (co, ci) in zip(params["convs"], CONV_CFG):
        convs.append(stack_conv_weights(w, b, max(8, ci)))
    wfc, bfc = params["fc"]
    return {"convs": convs,
            "fc": (jnp.asarray(wfc, jnp.float32),
                   jnp.asarray(bfc, jnp.float32).reshape(-1, 1))}


def reference_forward(x_nchw, params):
    """Plain-JAX reference reproducing the PyTorch forward pass."""
    x = x_nchw
    for w, b in params["convs"]:
        x = lax.conv_general_dilated(x, w, (1, 1), "VALID",
                                     dimension_numbers=("NCHW", "OIHW", "NCHW"))
        x = jnp.maximum(x + b[None, :, None, None], 0.0)
        x = lax.reduce_window(x, -jnp.inf, lax.max, (1, 1, 2, 2), (1, 1, 2, 2), "VALID")
    x = x.reshape(x.shape[0], -1)
    wfc, bfc = params["fc"]
    return x @ wfc.T + bfc


if __name__ == "__main__":
    key = jax.random.PRNGKey(0)
    key, kx = jax.random.split(key)
    # 190x190 is the smallest spatial size the 6x(conv3x3-valid + pool/2) stack supports.
    x = jax.random.normal(kx, (2, 3, 190, 190), jnp.float32)
    params = init_params(key, 190)
    kparams = prepare_kernel_params(params)

    out = jax.block_until_ready(network_forward(x, kparams))
    ref = jax.block_until_ready(reference_forward(x, params))

    assert out.shape == (2, NUM_CLASSES), out.shape
    max_err = float(jnp.max(jnp.abs(out - ref)))
    if max_err < 2e-3:
        print("KERNEL_OK")
    else:
        raise SystemExit(f"mismatch vs reference: max abs err = {max_err}")
</pallas_src>

<mosaic_0001>
module attributes {stable_mosaic.version = 11 : i64} {
  func.func @_network_kernel(%arg0: i32, %arg1: memref<1x1520x95xf32, #tpu.memory_space<vmem>>, %arg2: memref<1x1520x95xf32, #tpu.memory_space<vmem>>, %arg3: memref<32x128xf32, #tpu.memory_space<vmem>>, %arg4: memref<32x1xf32, #tpu.memory_space<vmem>>, %arg5: memref<32x128xf32, #tpu.memory_space<vmem>>, %arg6: memref<32x1xf32, #tpu.memory_space<vmem>>, %arg7: memref<64x128xf32, #tpu.memory_space<vmem>>, %arg8: memref<64x1xf32, #tpu.memory_space<vmem>>, %arg9: memref<128x256xf32, #tpu.memory_space<vmem>>, %arg10: memref<128x1xf32, #tpu.memory_space<vmem>>, %arg11: memref<128x512xf32, #tpu.memory_space<vmem>>, %arg12: memref<128x1xf32, #tpu.memory_space<vmem>>, %arg13: memref<256x512xf32, #tpu.memory_space<vmem>>, %arg14: memref<256x1xf32, #tpu.memory_space<vmem>>, %arg15: memref<15x64xf32, #tpu.memory_space<vmem>>, %arg16: memref<15x1xf32, #tpu.memory_space<vmem>>, %arg17: memref<1x15x1xf32, #tpu.memory_space<vmem>>, %arg18: memref<752x94xf32, #tpu.memory_space<vmem>>, %arg19: memref<368x46xf32, #tpu.memory_space<vmem>>, %arg20: memref<352x22xf32, #tpu.memory_space<vmem>>, %arg21: memref<320x10xf32, #tpu.memory_space<vmem>>, %arg22: memref<128x4xf32, #tpu.memory_space<vmem>>, %arg23: memref<64x1xf32, #tpu.memory_space<vmem>>, %arg24: memref<752x47xf32, #tpu.memory_space<vmem>>, %arg25: memref<752x47xf32, #tpu.memory_space<vmem>>, %arg26: memref<368x23xf32, #tpu.memory_space<vmem>>, %arg27: memref<368x23xf32, #tpu.memory_space<vmem>>, %arg28: memref<352x11xf32, #tpu.memory_space<vmem>>, %arg29: memref<352x11xf32, #tpu.memory_space<vmem>>, %arg30: memref<320x5xf32, #tpu.memory_space<vmem>>, %arg31: memref<320x5xf32, #tpu.memory_space<vmem>>, %arg32: memref<128x2xf32, #tpu.memory_space<vmem>>, %arg33: memref<128x2xf32, #tpu.memory_space<vmem>>) attributes {dimension_semantics = [#tpu.dimension_semantics<parallel>], iteration_bounds = array<i64: 2>, scalar_prefetch = 0 : i64, scratch_operands = 16 : i64, tpu.core_type = #tpu.core_type<tc>, window_params = [{transform_indices = @transform_0, window_bounds = array<i64: 1, 1520, 95>}, {transform_indices = @transform_1, window_bounds = array<i64: 1, 1520, 95>}, {pipeline_mode = #tpu.pipeline_mode<synchronous>, transform_indices = @transform_2, window_bounds = array<i64: 32, 128>}, {pipeline_mode = #tpu.pipeline_mode<synchronous>, transform_indices = @transform_3, window_bounds = array<i64: 32, 1>}, {pipeline_mode = #tpu.pipeline_mode<synchronous>, transform_indices = @transform_4, window_bounds = array<i64: 32, 128>}, {pipeline_mode = #tpu.pipeline_mode<synchronous>, transform_indices = @transform_5, window_bounds = array<i64: 32, 1>}, {pipeline_mode = #tpu.pipeline_mode<synchronous>, transform_indices = @transform_6, window_bounds = array<i64: 64, 128>}, {pipeline_mode = #tpu.pipeline_mode<synchronous>, transform_indices = @transform_7, window_bounds = array<i64: 64, 1>}, {pipeline_mode = #tpu.pipeline_mode<synchronous>, transform_indices = @transform_8, window_bounds = array<i64: 128, 256>}, {pipeline_mode = #tpu.pipeline_mode<synchronous>, transform_indices = @transform_9, window_bounds = array<i64: 128, 1>}, {pipeline_mode = #tpu.pipeline_mode<synchronous>, transform_indices = @transform_10, window_bounds = array<i64: 128, 512>}, {pipeline_mode = #tpu.pipeline_mode<synchronous>, transform_indices = @transform_11, window_bounds = array<i64: 128, 1>}, {pipeline_mode = #tpu.pipeline_mode<synchronous>, transform_indices = @transform_12, window_bounds = array<i64: 256, 512>}, {pipeline_mode = #tpu.pipeline_mode<synchronous>, transform_indices = @transform_13, window_bounds = array<i64: 256, 1>}, {pipeline_mode = #tpu.pipeline_mode<synchronous>, transform_indices = @transform_14, window_bounds = array<i64: 15, 64>}, {pipeline_mode = #tpu.pipeline_mode<synchronous>, transform_indices = @transform_15, window_bounds = array<i64: 15, 1>}, {transform_indices = @transform_16, window_bounds = array<i64: 1, 15, 1>}]} {
    %c0 = arith.constant 0 : index
    %c0_0 = arith.constant 0 : index
    %0 = vector.load %arg3[%c0, %c0_0] : memref<32x128xf32, #tpu.memory_space<vmem>>, vector<32x128xf32>
    %c0_1 = arith.constant 0 : index
    %c0_2 = arith.constant 0 : index
    %1 = vector.load %arg4[%c0_1, %c0_2] : memref<32x1xf32, #tpu.memory_space<vmem>>, vector<32x1xf32>
    %c0_i32 = arith.constant 0 : i32
    %c94_i32 = arith.constant 94 : i32
    %2 = arith.addi %c0_i32, %c94_i32 : i32
    %c1_i32 = arith.constant 1 : i32
    scf.for %arg34 = %c0_i32 to %2 step %c1_i32  : i32 {
      %c2_i32_139 = arith.constant 2 : i32
      %318 = arith.muli %c2_i32_139, %arg34 : i32
      %c8_i32 = arith.constant 8 : i32
      %319 = arith.muli %318, %c8_i32 : i32
      %320 = tpu.assume_multiple %319, 8 : i32
      %c0_140 = arith.constant 0 : index
      %321 = arith.index_cast %320 : i32 to index
      %c0_141 = arith.constant 0 : index
      %322 = vector.load %arg1[%c0_140, %321, %c0_141] : memref<1x1520x95xf32, #tpu.memory_space<vmem>>, vector<1x32x95xf32>
      %323 = vector.shape_cast %322 : vector<1x32x95xf32> to vector<32x95xf32>
      %c0_142 = arith.constant 0 : index
      %324 = arith.index_cast %320 : i32 to index
      %c0_143 = arith.constant 0 : index
      %325 = vector.load %arg2[%c0_142, %324, %c0_143] : memref<1x1520x95xf32, #tpu.memory_space<vmem>>, vector<1x32x95xf32>
      %326 = vector.shape_cast %325 : vector<1x32x95xf32> to vector<32x95xf32>
      %327 = vector.extract_strided_slice %323 {offsets = [0, 0], sizes = [8, 94], strides = [1, 1]} : vector<32x95xf32> to vector<8x94xf32>
      %328 = vector.extract_strided_slice %323 {offsets = [8, 0], sizes = [8, 94], strides = [1, 1]} : vector<32x95xf32> to vector<8x94xf32>
      %329 = vector.extract_strided_slice %323 {offsets = [16, 0], sizes = [8, 94], strides = [1, 1]} : vector<32x95xf32> to vector<8x94xf32>
      %330 = vector.extract_strided_slice %323 {offsets = [24, 0], sizes = [8, 94], strides = [1, 1]} : vector<32x95xf32> to vector<8x94xf32>
      %331 = vector.extract_strided_slice %326 {offsets = [0, 0], sizes = [8, 94], strides = [1, 1]} : vector<32x95xf32> to vector<8x94xf32>
      %332 = vector.extract_strided_slice %326 {offsets = [8, 0], sizes = [8, 94], strides = [1, 1]} : vector<32x95xf32> to vector<8x94xf32>
      %333 = vector.extract_strided_slice %326 {offsets = [16, 0], sizes = [8, 94], strides = [1, 1]} : vector<32x95xf32> to vector<8x94xf32>
      %334 = vector.extract_strided_slice %326 {offsets = [24, 0], sizes = [8, 94], strides = [1, 1]} : vector<32x95xf32> to vector<8x94xf32>
      %335 = vector.extract_strided_slice %323 {offsets = [0, 1], sizes = [8, 94], strides = [1, 1]} : vector<32x95xf32> to vector<8x94xf32>
      %336 = vector.extract_strided_slice %323 {offsets = [8, 1], sizes = [8, 94], strides = [1, 1]} : vector<32x95xf32> to vector<8x94xf32>
      %337 = vector.extract_strided_slice %323 {offsets = [16, 1], sizes = [8, 94], strides = [1, 1]} : vector<32x95xf32> to vector<8x94xf32>
      %338 = vector.extract_strided_slice %323 {offsets = [24, 1], sizes = [8, 94], strides = [1, 1]} : vector<32x95xf32> to vector<8x94xf32>
      %339 = vector.extract_strided_slice %326 {offsets = [0, 1], sizes = [8, 94], strides = [1, 1]} : vector<32x95xf32> to vector<8x94xf32>
      %340 = vector.extract_strided_slice %326 {offsets = [8, 1], sizes = [8, 94], strides = [1, 1]} : vector<32x95xf32> to vector<8x94xf32>
      %341 = vector.extract_strided_slice %326 {offsets = [16, 1], sizes = [8, 94], strides = [1, 1]} : vector<32x95xf32> to vector<8x94xf32>
      %342 = vector.extract_strided_slice %326 {offsets = [24, 1], sizes = [8, 94], strides = [1, 1]} : vector<32x95xf32> to vector<8x94xf32>
      %343 = tpu.concatenate %327, %328, %329, %330, %331, %332, %333, %334, %335, %336, %337, %338, %339, %340, %341, %342 in 0 : vector<8x94xf32>, vector<8x94xf32>, vector<8x94xf32>, vector<8x94xf32>, vector<8x94xf32>, vector<8x94xf32>, vector<8x94xf32>, vector<8x94xf32>, vector<8x94xf32>, vector<8x94xf32>, vector<8x94xf32>, vector<8x94xf32>, vector<8x94xf32>, vector<8x94xf32>, vector<8x94xf32>, vector<8x94xf32> -> vector<128x94xf32>
      %cst_144 = arith.constant dense<0.000000e+00> : vector<32x94xf32>
      %344 = tpu.matmul %0, %343, %cst_144 {dimension_numbers = #tpu.dot_dimension_numbers<[1], [0], [0], [1], [0, 0, 1, 1], [], []>} : vector<32x128xf32>, vector<128x94xf32>, vector<32x94xf32> -> vector<32x94xf32>
      %345 = vector.broadcast %1 : vector<32x1xf32> to vector<32x94xf32>
      %346 = arith.addf %344, %345 : vector<32x94xf32>
      %cst_145 = arith.constant 0.000000e+00 : f32
      %347 = vector.broadcast %cst_145 : f32 to vector<32x94xf32>
      %348 = arith.maximumf %346, %347 : vector<32x94xf32>
      %349 = vector.extract_strided_slice %348 {offsets = [0, 0], sizes = [8, 94], strides = [1, 1]} : vector<32x94xf32> to vector<8x94xf32>
      %350 = vector.extract_strided_slice %348 {offsets = [8, 0], sizes = [8, 94], strides = [1, 1]} : vector<32x94xf32> to vector<8x94xf32>
      %351 = arith.maximumf %349, %350 : vector<8x94xf32>
      %352 = vector.extract_strided_slice %348 {offsets = [16, 0], sizes = [8, 94], strides = [1, 1]} : vector<32x94xf32> to vector<8x94xf32>
      %353 = vector.extract_strided_slice %348 {offsets = [24, 0], sizes = [8, 94], strides = [1, 1]} : vector<32x94xf32> to vector<8x94xf32>
      %354 = arith.maximumf %352, %353 : vector<8x94xf32>
      %355 = arith.maximumf %351, %354 : vector<8x94xf32>
      %c8_i32_146 = arith.constant 8 : i32
      %356 = arith.muli %arg34, %c8_i32_146 : i32
      %357 = tpu.assume_multiple %356, 8 : i32
      %358 = arith.index_cast %357 : i32 to index
      %c0_147 = arith.constant 0 : index
      %359 = vector.load %arg18[%358, %c0_147] : memref<752x94xf32, #tpu.memory_space<vmem>>, vector<8x94xf32>
      tpu.vector_store %arg18[%358, %c0_147], %355 {strides = array<i32>} : memref<752x94xf32, #tpu.memory_space<vmem>>, vector<8x94xf32>,
    }
    %c94_i32_3 = arith.constant 94 : i32
    %c0_4 = arith.constant 0 : index
    %c0_5 = arith.constant 0 : index
    %3 = vector.load %arg18[%c0_4, %c0_5] : memref<752x94xf32, #tpu.memory_space<vmem>>, vector<752x94xf32>
    %4 = tpu.iota {dimensions = array<i32: 0>} : vector<94x47xi32>
    %5 = tpu.iota {dimensions = array<i32: 1>} : vector<94x47xi32>
    %c2_i32 = arith.constant 2 : i32
    %6 = vector.broadcast %c2_i32 : i32 to vector<94x47xi32>
    %7 = arith.muli %6, %5 : vector<94x47xi32>
    %8 = arith.cmpi eq, %4, %7 : vector<94x47xi32>
    %9 = arith.extui %8 : vector<94x47xi1> to vector<94x47xi32>
    %10 = arith.sitofp %9 : vector<94x47xi32> to vector<94x47xf32>
    %c2_i32_6 = arith.constant 2 : i32
    %11 = vector.broadcast %c2_i32_6 : i32 to vector<94x47xi32>
    %12 = arith.muli %11, %5 : vector<94x47xi32>
    %c1_i32_7 = arith.constant 1 : i32
    %13 = vector.broadcast %c1_i32_7 : i32 to vector<94x47xi32>
    %14 = arith.addi %12, %13 : vector<94x47xi32>
    %15 = arith.cmpi eq, %4, %14 : vector<94x47xi32>
    %16 = arith.extui %15 : vector<94x47xi1> to vector<94x47xi32>
    %17 = arith.sitofp %16 : vector<94x47xi32> to vector<94x47xf32>
    %cst = arith.constant dense<0.000000e+00> : vector<752x47xf32>
    %18 = tpu.matmul %3, %10, %cst {dimension_numbers = #tpu.dot_dimension_numbers<[1], [0], [0], [1], [0, 0, 1, 1], [], []>} : vector<752x94xf32>, vector<94x47xf32>, vector<752x47xf32> -> vector<752x47xf32>
    %c0_8 = arith.constant 0 : index
    %c0_9 = arith.constant 0 : index
    %19 = vector.load %arg24[%c0_8, %c0_9] : memref<752x47xf32, #tpu.memory_space<vmem>>, vector<752x47xf32>
    tpu.vector_store %arg24[%c0_8, %c0_9], %18 {strides = array<i32>} : memref<752x47xf32, #tpu.memory_space<vmem>>, vector<752x47xf32>,
    %cst_10 = arith.constant dense<0.000000e+00> : vector<752x47xf32>
    %20 = tpu.matmul %3, %17, %cst_10 {dimension_numbers = #tpu.dot_dimension_numbers<[1], [0], [0], [1], [0, 0, 1, 1], [], []>} : vector<752x94xf32>, vector<94x47xf32>, vector<752x47xf32> -> vector<752x47xf32>
    %c0_11 = arith.constant 0 : index
    %c0_12 = arith.constant 0 : index
    %21 = vector.load %arg25[%c0_11, %c0_12] : memref<752x47xf32, #tpu.memory_space<vmem>>, vector<752x47xf32>
    tpu.vector_store %arg25[%c0_11, %c0_12], %20 {strides = array<i32>} : memref<752x47xf32, #tpu.memory_space<vmem>>, vector<752x47xf32>,
    %c0_13 = arith.constant 0 : index
    %c0_14 = arith.constant 0 : index
    %22 = vector.load %arg5[%c0_13, %c0_14] : memref<32x128xf32, #tpu.memory_space<vmem>>, vector<32x128xf32>
    %c0_15 = arith.constant 0 : index
    %c0_16 = arith.constant 0 : index
    %23 = vector.load %arg6[%c0_15, %c0_16] : memref<32x1xf32, #tpu.memory_space<vmem>>, vector<32x1xf32>
    %c0_i32_17 = arith.constant 0 : i32
    %c46_i32 = arith.constant 46 : i32
    %24 = arith.addi %c0_i32_17, %c46_i32 : i32
    %c1_i32_18 = arith.constant 1 : i32
    scf.for %arg34 = %c0_i32_17 to %24 step %c1_i32_18  : i32 {
      %c2_i32_139 = arith.constant 2 : i32
      %318 = arith.muli %c2_i32_139, %arg34 : i32
      %c8_i32 = arith.constant 8 : i32
      %319 = arith.muli %318, %c8_i32 : i32
      %320 = tpu.assume_multiple %319, 8 : i32
      %321 = arith.index_cast %320 : i32 to index
      %c0_140 = arith.constant 0 : index
      %322 = vector.load %arg24[%321, %c0_140] : memref<752x47xf32, #tpu.memory_space<vmem>>, vector<32x47xf32>
      %323 = arith.index_cast %320 : i32 to index
      %c0_141 = arith.constant 0 : index
      %324 = vector.load %arg25[%323, %c0_141] : memref<752x47xf32, #tpu.memory_space<vmem>>, vector<32x47xf32>
      %325 = vector.extract_strided_slice %322 {offsets = [0, 0], sizes = [8, 46], strides = [1, 1]} : vector<32x47xf32> to vector<8x46xf32>
      %326 = vector.extract_strided_slice %322 {offsets = [8, 0], sizes = [8, 46], strides = [1, 1]} : vector<32x47xf32> to vector<8x46xf32>
      %327 = vector.extract_strided_slice %322 {offsets = [16, 0], sizes = [8, 46], strides = [1, 1]} : vector<32x47xf32> to vector<8x46xf32>
      %328 = vector.extract_strided_slice %322 {offsets = [24, 0], sizes = [8, 46], strides = [1, 1]} : vector<32x47xf32> to vector<8x46xf32>
      %329 = vector.extract_strided_slice %324 {offsets = [0, 0], sizes = [8, 46], strides = [1, 1]} : vector<32x47xf32> to vector<8x46xf32>
      %330 = vector.extract_strided_slice %324 {offsets = [8, 0], sizes = [8, 46], strides = [1, 1]} : vector<32x47xf32> to vector<8x46xf32>
      %331 = vector.extract_strided_slice %324 {offsets = [16, 0], sizes = [8, 46], strides = [1, 1]} : vector<32x47xf32> to vector<8x46xf32>
      %332 = vector.extract_strided_slice %324 {offsets = [24, 0], sizes = [8, 46], strides = [1, 1]} : vector<32x47xf32> to vector<8x46xf32>
      %333 = vector.extract_strided_slice %322 {offsets = [0, 1], sizes = [8, 46], strides = [1, 1]} : vector<32x47xf32> to vector<8x46xf32>
      %334 = vector.extract_strided_slice %322 {offsets = [8, 1], sizes = [8, 46], strides = [1, 1]} : vector<32x47xf32> to vector<8x46xf32>
      %335 = vector.extract_strided_slice %322 {offsets = [16, 1], sizes = [8, 46], strides = [1, 1]} : vector<32x47xf32> to vector<8x46xf32>
      %336 = vector.extract_strided_slice %322 {offsets = [24, 1], sizes = [8, 46], strides = [1, 1]} : vector<32x47xf32> to vector<8x46xf32>
      %337 = vector.extract_strided_slice %324 {offsets = [0, 1], sizes = [8, 46], strides = [1, 1]} : vector<32x47xf32> to vector<8x46xf32>
      %338 = vector.extract_strided_slice %324 {offsets = [8, 1], sizes = [8, 46], strides = [1, 1]} : vector<32x47xf32> to vector<8x46xf32>
      %339 = vector.extract_strided_slice %324 {offsets = [16, 1], sizes = [8, 46], strides = [1, 1]} : vector<32x47xf32> to vector<8x46xf32>
      %340 = vector.extract_strided_slice %324 {offsets = [24, 1], sizes = [8, 46], strides = [1, 1]} : vector<32x47xf32> to vector<8x46xf32>
      %341 = tpu.concatenate %325, %326, %327, %328, %329, %330, %331, %332, %333, %334, %335, %336, %337, %338, %339, %340 in 0 : vector<8x46xf32>, vector<8x46xf32>, vector<8x46xf32>, vector<8x46xf32>, vector<8x46xf32>, vector<8x46xf32>, vector<8x46xf32>, vector<8x46xf32>, vector<8x46xf32>, vector<8x46xf32>, vector<8x46xf32>, vector<8x46xf32>, vector<8x46xf32>, vector<8x46xf32>, vector<8x46xf32>, vector<8x46xf32> -> vector<128x46xf32>
      %cst_142 = arith.constant dense<0.000000e+00> : vector<32x46xf32>
      %342 = tpu.matmul %22, %341, %cst_142 {dimension_numbers = #tpu.dot_dimension_numbers<[1], [0], [0], [1], [0, 0, 1, 1], [], []>} : vector<32x128xf32>, vector<128x46xf32>, vector<32x46xf32> -> vector<32x46xf32>
      %343 = vector.broadcast %23 : vector<32x1xf32> to vector<32x46xf32>
      %344 = arith.addf %342, %343 : vector<32x46xf32>
      %cst_143 = arith.constant 0.000000e+00 : f32
      %345 = vector.broadcast %cst_143 : f32 to vector<32x46xf32>
      %346 = arith.maximumf %344, %345 : vector<32x46xf32>
      %347 = vector.extract_strided_slice %346 {offsets = [0, 0], sizes = [8, 46], strides = [1, 1]} : vector<32x46xf32> to vector<8x46xf32>
      %348 = vector.extract_strided_slice %346 {offsets = [8, 0], sizes = [8, 46], strides = [1, 1]} : vector<32x46xf32> to vector<8x46xf32>
      %349 = arith.maximumf %347, %348 : vector<8x46xf32>
      %350 = vector.extract_strided_slice %346 {offsets = [16, 0], sizes = [8, 46], strides = [1, 1]} : vector<32x46xf32> to vector<8x46xf32>
      %351 = vector.extract_strided_slice %346 {offsets = [24, 0], sizes = [8, 46], strides = [1, 1]} : vector<32x46xf32> to vector<8x46xf32>
      %352 = arith.maximumf %350, %351 : vector<8x46xf32>
      %353 = arith.maximumf %349, %352 : vector<8x46xf32>
      %c8_i32_144 = arith.constant 8 : i32
      %354 = arith.muli %arg34, %c8_i32_144 : i32
      %355 = tpu.assume_multiple %354, 8 : i32
      %356 = arith.index_cast %355 : i32 to index
      %c0_145 = arith.constant 0 : index
      %357 = vector.load %arg19[%356, %c0_145] : memref<368x46xf32, #tpu.memory_space<vmem>>, vector<8x46xf32>
      tpu.vector_store %arg19[%356, %c0_145], %353 {strides = array<i32>} : memref<368x46xf32, #tpu.memory_space<vmem>>, vector<8x46xf32>,
    }
    %c46_i32_19 = arith.constant 46 : i32
    %c0_20 = arith.constant 0 : index
    %c0_21 = arith.constant 0 : index
    %25 = vector.load %arg19[%c0_20, %c0_21] : memref<368x46xf32, #tpu.memory_space<vmem>>, vector<368x46xf32>
    %26 = tpu.iota {dimensions = array<i32: 0>} : vector<46x23xi32>
    %27 = tpu.iota {dimensions = array<i32: 1>} : vector<46x23xi32>
    %c2_i32_22 = arith.constant 2 : i32
    %28 = vector.broadcast %c2_i32_22 : i32 to vector<46x23xi32>
    %29 = arith.muli %28, %27 : vector<46x23xi32>
    %30 = arith.cmpi eq, %26, %29 : vector<46x23xi32>
    %31 = arith.extui %30 : vector<46x23xi1> to vector<46x23xi32>
    %32 = arith.sitofp %31 : vector<46x23xi32> to vector<46x23xf32>
    %c2_i32_23 = arith.constant 2 : i32
    %33 = vector.broadcast %c2_i32_23 : i32 to vector<46x23xi32>
    %34 = arith.muli %33, %27 : vector<46x23xi32>
    %c1_i32_24 = arith.constant 1 : i32
    %35 = vector.broadcast %c1_i32_24 : i32 to vector<46x23xi32>
    %36 = arith.addi %34, %35 : vector<46x23xi32>
    %37 = arith.cmpi eq, %26, %36 : vector<46x23xi32>
    %38 = arith.extui %37 : vector<46x23xi1> to vector<46x23xi32>
    %39 = arith.sitofp %38 : vector<46x23xi32> to vector<46x23xf32>
    %cst_25 = arith.constant dense<0.000000e+00> : vector<368x23xf32>
    %40 = tpu.matmul %25, %32, %cst_25 {dimension_numbers = #tpu.dot_dimension_numbers<[1], [0], [0], [1], [0, 0, 1, 1], [], []>} : vector<368x46xf32>, vector<46x23xf32>, vector<368x23xf32> -> vector<368x23xf32>
    %c0_26 = arith.constant 0 : index
    %c0_27 = arith.constant 0 : index
    %41 = vector.load %arg26[%c0_26, %c0_27] : memref<368x23xf32, #tpu.memory_space<vmem>>, vector<368x23xf32>
    tpu.vector_store %arg26[%c0_26, %c0_27], %40 {strides = array<i32>} : memref<368x23xf32, #tpu.memory_space<vmem>>, vector<368x23xf32>,
    %cst_28 = arith.constant dense<0.000000e+00> : vector<368x23xf32>
    %42 = tpu.matmul %25, %39, %cst_28 {dimension_numbers = #tpu.dot_dimension_numbers<[1], [0], [0], [1], [0, 0, 1, 1], [], []>} : vector<368x46xf32>, vector<46x23xf32>, vector<368x23xf32> -> vector<368x23xf32>
    %c0_29 = arith.constant 0 : index
    %c0_30 = arith.constant 0 : index
    %43 = vector.load %arg27[%c0_29, %c0_30] : memref<368x23xf32, #tpu.memory_space<vmem>>, vector<368x23xf32>
    tpu.vector_store %arg27[%c0_29, %c0_30], %42 {strides = array<i32>} : memref<368x23xf32, #tpu.memory_space<vmem>>, vector<368x23xf32>,
    %c0_31 = arith.constant 0 : index
    %c0_32 = arith.constant 0 : index
    %44 = vector.load %arg7[%c0_31, %c0_32] : memref<64x128xf32, #tpu.memory_space<vmem>>, vector<64x128xf32>
    %c0_33 = arith.constant 0 : index
    %c0_34 = arith.constant 0 : index
    %45 = vector.load %arg8[%c0_33, %c0_34] : memref<64x1xf32, #tpu.memory_space<vmem>>, vector<64x1xf32>
    %c0_i32_35 = arith.constant 0 : i32
    %c22_i32 = arith.constant 22 : i32
    %46 = arith.addi %c0_i32_35, %c22_i32 : i32
    %c1_i32_36 = arith.constant 1 : i32
    scf.for %arg34 = %c0_i32_35 to %46 step %c1_i32_36  : i32 {
      %c2_i32_139 = arith.constant 2 : i32
      %318 = arith.muli %c2_i32_139, %arg34 : i32
      %c8_i32 = arith.constant 8 : i32
      %319 = arith.muli %318, %c8_i32 : i32
      %320 = tpu.assume_multiple %319, 8 : i32
      %321 = arith.index_cast %320 : i32 to index
      %c0_140 = arith.constant 0 : index
      %322 = vector.load %arg26[%321, %c0_140] : memref<368x23xf32, #tpu.memory_space<vmem>>, vector<32x23xf32>
      %323 = arith.index_cast %320 : i32 to index
      %c0_141 = arith.constant 0 : index
      %324 = vector.load %arg27[%323, %c0_141] : memref<368x23xf32, #tpu.memory_space<vmem>>, vector<32x23xf32>
      %325 = vector.extract_strided_slice %322 {offsets = [0, 0], sizes = [8, 22], strides = [1, 1]} : vector<32x23xf32> to vector<8x22xf32>
      %326 = vector.extract_strided_slice %322 {offsets = [8, 0], sizes = [8, 22], strides = [1, 1]} : vector<32x23xf32> to vector<8x22xf32>
      %327 = vector.extract_strided_slice %322 {offsets = [16, 0], sizes = [8, 22], strides = [1, 1]} : vector<32x23xf32> to vector<8x22xf32>
      %328 = vector.extract_strided_slice %322 {offsets = [24, 0], sizes = [8, 22], strides = [1, 1]} : vector<32x23xf32> to vector<8x22xf32>
      %329 = vector.extract_strided_slice %324 {offsets = [0, 0], sizes = [8, 22], strides = [1, 1]} : vector<32x23xf32> to vector<8x22xf32>
      %330 = vector.extract_strided_slice %324 {offsets = [8, 0], sizes = [8, 22], strides = [1, 1]} : vector<32x23xf32> to vector<8x22xf32>
      %331 = vector.extract_strided_slice %324 {offsets = [16, 0], sizes = [8, 22], strides = [1, 1]} : vector<32x23xf32> to vector<8x22xf32>
      %332 = vector.extract_strided_slice %324 {offsets = [24, 0], sizes = [8, 22], strides = [1, 1]} : vector<32x23xf32> to vector<8x22xf32>
      %333 = vector.extract_strided_slice %322 {offsets = [0, 1], sizes = [8, 22], strides = [1, 1]} : vector<32x23xf32> to vector<8x22xf32>
      %334 = vector.extract_strided_slice %322 {offsets = [8, 1], sizes = [8, 22], strides = [1, 1]} : vector<32x23xf32> to vector<8x22xf32>
      %335 = vector.extract_strided_slice %322 {offsets = [16, 1], sizes = [8, 22], strides = [1, 1]} : vector<32x23xf32> to vector<8x22xf32>
      %336 = vector.extract_strided_slice %322 {offsets = [24, 1], sizes = [8, 22], strides = [1, 1]} : vector<32x23xf32> to vector<8x22xf32>
      %337 = vector.extract_strided_slice %324 {offsets = [0, 1], sizes = [8, 22], strides = [1, 1]} : vector<32x23xf32> to vector<8x22xf32>
      %338 = vector.extract_strided_slice %324 {offsets = [8, 1], sizes = [8, 22], strides = [1, 1]} : vector<32x23xf32> to vector<8x22xf32>
      %339 = vector.extract_strided_slice %324 {offsets = [16, 1], sizes = [8, 22], strides = [1, 1]} : vector<32x23xf32> to vector<8x22xf32>
      %340 = vector.extract_strided_slice %324 {offsets = [24, 1], sizes = [8, 22], strides = [1, 1]} : vector<32x23xf32> to vector<8x22xf32>
      %341 = tpu.concatenate %325, %326, %327, %328, %329, %330, %331, %332, %333, %334, %335, %336, %337, %338, %339, %340 in 0 : vector<8x22xf32>, vector<8x22xf32>, vector<8x22xf32>, vector<8x22xf32>, vector<8x22xf32>, vector<8x22xf32>, vector<8x22xf32>, vector<8x22xf32>, vector<8x22xf32>, vector<8x22xf32>, vector<8x22xf32>, vector<8x22xf32>, vector<8x22xf32>, vector<8x22xf32>, vector<8x22xf32>, vector<8x22xf32> -> vector<128x22xf32>
      %cst_142 = arith.constant dense<0.000000e+00> : vector<64x22xf32>
      %342 = tpu.matmul %44, %341, %cst_142 {dimension_numbers = #tpu.dot_dimension_numbers<[1], [0], [0], [1], [0, 0, 1, 1], [], []>} : vector<64x128xf32>, vector<128x22xf32>, vector<64x22xf32> -> vector<64x22xf32>
      %343 = vector.broadcast %45 : vector<64x1xf32> to vector<64x22xf32>
      %344 = arith.addf %342, %343 : vector<64x22xf32>
      %cst_143 = arith.constant 0.000000e+00 : f32
      %345 = vector.broadcast %cst_143 : f32 to vector<64x22xf32>
      %346 = arith.maximumf %344, %345 : vector<64x22xf32>
      %347 = vector.extract_strided_slice %346 {offsets = [0, 0], sizes = [16, 22], strides = [1, 1]} : vector<64x22xf32> to vector<16x22xf32>
      %348 = vector.extract_strided_slice %346 {offsets = [16, 0], sizes = [16, 22], strides = [1, 1]} : vector<64x22xf32> to vector<16x22xf32>
      %349 = arith.maximumf %347, %348 : vector<16x22xf32>
      %350 = vector.extract_strided_slice %346 {offsets = [32, 0], sizes = [16, 22], strides = [1, 1]} : vector<64x22xf32> to vector<16x22xf32>
      %351 = vector.extract_strided_slice %346 {offsets = [48, 0], sizes = [16, 22], strides = [1, 1]} : vector<64x22xf32> to vector<16x22xf32>
      %352 = arith.maximumf %350, %351 : vector<16x22xf32>
      %353 = arith.maximumf %349, %352 : vector<16x22xf32>
      %c16_i32 = arith.constant 16 : i32
      %354 = arith.muli %arg34, %c16_i32 : i32
      %355 = tpu.assume_multiple %354, 8 : i32
      %356 = arith.index_cast %355 : i32 to index
      %c0_144 = arith.constant 0 : index
      %357 = vector.load %arg20[%356, %c0_144] : memref<352x22xf32, #tpu.memory_space<vmem>>, vector<16x22xf32>
      tpu.vector_store %arg20[%356, %c0_144], %353 {strides = array<i32>} : memref<352x22xf32, #tpu.memory_space<vmem>>, vector<16x22xf32>,
    }
    %c22_i32_37 = arith.constant 22 : i32
    %c0_38 = arith.constant 0 : index
    %c0_39 = arith.constant 0 : index
    %47 = vector.load %arg20[%c0_38, %c0_39] : memref<352x22xf32, #tpu.memory_space<vmem>>, vector<352x22xf32>
    %48 = tpu.iota {dimensions = array<i32: 0>} : vector<22x11xi32>
    %49 = tpu.iota {dimensions = array<i32: 1>} : vector<22x11xi32>
    %c2_i32_40 = arith.constant 2 : i32
    %50 = vector.broadcast %c2_i32_40 : i32 to vector<22x11xi32>
    %51 = arith.muli %50, %49 : vector<22x11xi32>
    %52 = arith.cmpi eq, %48, %51 : vector<22x11xi32>
    %53 = arith.extui %52 : vector<22x11xi1> to vector<22x11xi32>
    %54 = arith.sitofp %53 : vector<22x11xi32> to vector<22x11xf32>
    %c2_i32_41 = arith.constant 2 : i32
    %55 = vector.broadcast %c2_i32_41 : i32 to vector<22x11xi32>
    %56 = arith.muli %55, %49 : vector<22x11xi32>
    %c1_i32_42 = arith.constant 1 : i32
    %57 = vector.broadcast %c1_i32_42 : i32 to vector<22x11xi32>
    %58 = arith.addi %56, %57 : vector<22x11xi32>
    %59 = arith.cmpi eq, %48, %58 : vector<22x11xi32>
    %60 = arith.extui %59 : vector<22x11xi1> to vector<22x11xi32>
    %61 = arith.sitofp %60 : vector<22x11xi32> to vector<22x11xf32>
    %cst_43 = arith.constant dense<0.000000e+00> : vector<352x11xf32>
    %62 = tpu.matmul %47, %54, %cst_43 {dimension_numbers = #tpu.dot_dimension_numbers<[1], [0], [0], [1], [0, 0, 1, 1], [], []>} : vector<352x22xf32>, vector<22x11xf32>, vector<352x11xf32> -> vector<352x11xf32>
    %c0_44 = arith.constant 0 : index
    %c0_45 = arith.constant 0 : index
    %63 = vector.load %arg28[%c0_44, %c0_45] : memref<352x11xf32, #tpu.memory_space<vmem>>, vector<352x11xf32>
    tpu.vector_store %arg28[%c0_44, %c0_45], %62 {strides = array<i32>} : memref<352x11xf32, #tpu.memory_space<vmem>>, vector<352x11xf32>,
    %cst_46 = arith.constant dense<0.000000e+00> : vector<352x11xf32>
    %64 = tpu.matmul %47, %61, %cst_46 {dimension_numbers = #tpu.dot_dimension_numbers<[1], [0], [0], [1], [0, 0, 1, 1], [], []>} : vector<352x22xf32>, vector<22x11xf32>, vector<352x11xf32> -> vector<352x11xf32>
    %c0_47 = arith.constant 0 : index
    %c0_48 = arith.constant 0 : index
    %65 = vector.load %arg29[%c0_47, %c0_48] : memref<352x11xf32, #tpu.memory_space<vmem>>, vector<352x11xf32>
    tpu.vector_store %arg29[%c0_47, %c0_48], %64 {strides = array<i32>} : memref<352x11xf32, #tpu.memory_space<vmem>>, vector<352x11xf32>,
    %c0_49 = arith.constant 0 : index
    %c0_50 = arith.constant 0 : index
    %66 = vector.load %arg9[%c0_49, %c0_50] : memref<128x256xf32, #tpu.memory_space<vmem>>, vector<128x256xf32>
    %c0_51 = arith.constant 0 : index
    %c0_52 = arith.constant 0 : index
    %67 = vector.load %arg10[%c0_51, %c0_52] : memref<128x1xf32, #tpu.memory_space<vmem>>, vector<128x1xf32>
    %c0_i32_53 = arith.constant 0 : i32
    %c10_i32 = arith.constant 10 : i32
    %68 = arith.addi %c0_i32_53, %c10_i32 : i32
    %c1_i32_54 = arith.constant 1 : i32
    scf.for %arg34 = %c0_i32_53 to %68 step %c1_i32_54  : i32 {
      %c2_i32_139 = arith.constant 2 : i32
      %318 = arith.muli %c2_i32_139, %arg34 : i32
      %c16_i32 = arith.constant 16 : i32
      %319 = arith.muli %318, %c16_i32 : i32
      %320 = tpu.assume_multiple %319, 8 : i32
      %321 = arith.index_cast %320 : i32 to index
      %c0_140 = arith.constant 0 : index
      %322 = vector.load %arg28[%321, %c0_140] : memref<352x11xf32, #tpu.memory_space<vmem>>, vector<64x11xf32>
      %323 = arith.index_cast %320 : i32 to index
      %c0_141 = arith.constant 0 : index
      %324 = vector.load %arg29[%323, %c0_141] : memref<352x11xf32, #tpu.memory_space<vmem>>, vector<64x11xf32>
      %325 = vector.extract_strided_slice %322 {offsets = [0, 0], sizes = [16, 10], strides = [1, 1]} : vector<64x11xf32> to vector<16x10xf32>
      %326 = vector.extract_strided_slice %322 {offsets = [16, 0], sizes = [16, 10], strides = [1, 1]} : vector<64x11xf32> to vector<16x10xf32>
      %327 = vector.extract_strided_slice %322 {offsets = [32, 0], sizes = [16, 10], strides = [1, 1]} : vector<64x11xf32> to vector<16x10xf32>
      %328 = vector.extract_strided_slice %322 {offsets = [48, 0], sizes = [16, 10], strides = [1, 1]} : vector<64x11xf32> to vector<16x10xf32>
      %329 = vector.extract_strided_slice %324 {offsets = [0, 0], sizes = [16, 10], strides = [1, 1]} : vector<64x11xf32> to vector<16x10xf32>
      %330 = vector.extract_strided_slice %324 {offsets = [16, 0], sizes = [16, 10], strides = [1, 1]} : vector<64x11xf32> to vector<16x10xf32>
      %331 = vector.extract_strided_slice %324 {offsets = [32, 0], sizes = [16, 10], strides = [1, 1]} : vector<64x11xf32> to vector<16x10xf32>
      %332 = vector.extract_strided_slice %324 {offsets = [48, 0], sizes = [16, 10], strides = [1, 1]} : vector<64x11xf32> to vector<16x10xf32>
      %333 = vector.extract_strided_slice %322 {offsets = [0, 1], sizes = [16, 10], strides = [1, 1]} : vector<64x11xf32> to vector<16x10xf32>
      %334 = vector.extract_strided_slice %322 {offsets = [16, 1], sizes = [16, 10], strides = [1, 1]} : vector<64x11xf32> to vector<16x10xf32>
      %335 = vector.extract_strided_slice %322 {offsets = [32, 1], sizes = [16, 10], strides = [1, 1]} : vector<64x11xf32> to vector<16x10xf32>
      %336 = vector.extract_strided_slice %322 {offsets = [48, 1], sizes = [16, 10], strides = [1, 1]} : vector<64x11xf32> to vector<16x10xf32>
      %337 = vector.extract_strided_slice %324 {offsets = [0, 1], sizes = [16, 10], strides = [1, 1]} : vector<64x11xf32> to vector<16x10xf32>
      %338 = vector.extract_strided_slice %324 {offsets = [16, 1], sizes = [16, 10], strides = [1, 1]} : vector<64x11xf32> to vector<16x10xf32>
      %339 = vector.extract_strided_slice %324 {offsets = [32, 1], sizes = [16, 10], strides = [1, 1]} : vector<64x11xf32> to vector<16x10xf32>
      %340 = vector.extract_strided_slice %324 {offsets = [48, 1], sizes = [16, 10], strides = [1, 1]} : vector<64x11xf32> to vector<16x10xf32>
      %341 = tpu.concatenate %325, %326, %327, %328, %329, %330, %331, %332, %333, %334, %335, %336, %337, %338, %339, %340 in 0 : vector<16x10xf32>, vector<16x10xf32>, vector<16x10xf32>, vector<16x10xf32>, vector<16x10xf32>, vector<16x10xf32>, vector<16x10xf32>, vector<16x10xf32>, vector<16x10xf32>, vector<16x10xf32>, vector<16x10xf32>, vector<16x10xf32>, vector<16x10xf32>, vector<16x10xf32>, vector<16x10xf32>, vector<16x10xf32> -> vector<256x10xf32>
      %cst_142 = arith.constant dense<0.000000e+00> : vector<128x10xf32>
      %342 = tpu.matmul %66, %341, %cst_142 {dimension_numbers = #tpu.dot_dimension_numbers<[1], [0], [0], [1], [0, 0, 1, 1], [], []>} : vector<128x256xf32>, vector<256x10xf32>, vector<128x10xf32> -> vector<128x10xf32>
      %343 = vector.broadcast %67 : vector<128x1xf32> to vector<128x10xf32>
      %344 = arith.addf %342, %343 : vector<128x10xf32>
      %cst_143 = arith.constant 0.000000e+00 : f32
      %345 = vector.broadcast %cst_143 : f32 to vector<128x10xf32>
      %346 = arith.maximumf %344, %345 : vector<128x10xf32>
      %347 = vector.extract_strided_slice %346 {offsets = [0, 0], sizes = [32, 10], strides = [1, 1]} : vector<128x10xf32> to vector<32x10xf32>
      %348 = vector.extract_strided_slice %346 {offsets = [32, 0], sizes = [32, 10], strides = [1, 1]} : vector<128x10xf32> to vector<32x10xf32>
      %349 = arith.maximumf %347, %348 : vector<32x10xf32>
      %350 = vector.extract_strided_slice %346 {offsets = [64, 0], sizes = [32, 10], strides = [1, 1]} : vector<128x10xf32> to vector<32x10xf32>
      %351 = vector.extract_strided_slice %346 {offsets = [96, 0], sizes = [32, 10], strides = [1, 1]} : vector<128x10xf32> to vector<32x10xf32>
      %352 = arith.maximumf %350, %351 : vector<32x10xf32>
      %353 = arith.maximumf %349, %352 : vector<32x10xf32>
      %c32_i32_144 = arith.constant 32 : i32
      %354 = arith.muli %arg34, %c32_i32_144 : i32
      %355 = tpu.assume_multiple %354, 8 : i32
      %356 = arith.index_cast %355 : i32 to index
      %c0_145 = arith.constant 0 : index
      %357 = vector.load %arg21[%356, %c0_145] : memref<320x10xf32, #tpu.memory_space<vmem>>, vector<32x10xf32>
      tpu.vector_store %arg21[%356, %c0_145], %353 {strides = array<i32>} : memref<320x10xf32, #tpu.memory_space<vmem>>, vector<32x10xf32>,
    }
    %c10_i32_55 = arith.constant 10 : i32
    %c0_56 = arith.constant 0 : index
    %c0_57 = arith.constant 0 : index
    %69 = vector.load %arg21[%c0_56, %c0_57] : memref<320x10xf32, #tpu.memory_space<vmem>>, vector<320x10xf32>
    %70 = tpu.iota {dimensions = array<i32: 0>} : vector<10x5xi32>
    %71 = tpu.iota {dimensions = array<i32: 1>} : vector<10x5xi32>
    %c2_i32_58 = arith.constant 2 : i32
    %72 = vector.broadcast %c2_i32_58 : i32 to vector<10x5xi32>
    %73 = arith.muli %72, %71 : vector<10x5xi32>
    %74 = arith.cmpi eq, %70, %73 : vector<10x5xi32>
    %75 = arith.extui %74 : vector<10x5xi1> to vector<10x5xi32>
    %76 = arith.sitofp %75 : vector<10x5xi32> to vector<10x5xf32>
    %c2_i32_59 = arith.constant 2 : i32
    %77 = vector.broadcast %c2_i32_59 : i32 to vector<10x5xi32>
    %78 = arith.muli %77, %71 : vector<10x5xi32>
    %c1_i32_60 = arith.constant 1 : i32
    %79 = vector.broadcast %c1_i32_60 : i32 to vector<10x5xi32>
    %80 = arith.addi %78, %79 : vector<10x5xi32>
    %81 = arith.cmpi eq, %70, %80 : vector<10x5xi32>
    %82 = arith.extui %81 : vector<10x5xi1> to vector<10x5xi32>
    %83 = arith.sitofp %82 : vector<10x5xi32> to vector<10x5xf32>
    %cst_61 = arith.constant dense<0.000000e+00> : vector<320x5xf32>
    %84 = tpu.matmul %69, %76, %cst_61 {dimension_numbers = #tpu.dot_dimension_numbers<[1], [0], [0], [1], [0, 0, 1, 1], [], []>} : vector<320x10xf32>, vector<10x5xf32>, vector<320x5xf32> -> vector<320x5xf32>
    %c0_62 = arith.constant 0 : index
    %c0_63 = arith.constant 0 : index
    %85 = vector.load %arg30[%c0_62, %c0_63] : memref<320x5xf32, #tpu.memory_space<vmem>>, vector<320x5xf32>
    tpu.vector_store %arg30[%c0_62, %c0_63], %84 {strides = array<i32>} : memref<320x5xf32, #tpu.memory_space<vmem>>, vector<320x5xf32>,
    %cst_64 = arith.constant dense<0.000000e+00> : vector<320x5xf32>
    %86 = tpu.matmul %69, %83, %cst_64 {dimension_numbers = #tpu.dot_dimension_numbers<[1], [0], [0], [1], [0, 0, 1, 1], [], []>} : vector<320x10xf32>, vector<10x5xf32>, vector<320x5xf32> -> vector<320x5xf32>
    %c0_65 = arith.constant 0 : index
    %c0_66 = arith.constant 0 : index
    %87 = vector.load %arg31[%c0_65, %c0_66] : memref<320x5xf32, #tpu.memory_space<vmem>>, vector<320x5xf32>
    tpu.vector_store %arg31[%c0_65, %c0_66], %86 {strides = array<i32>} : memref<320x5xf32, #tpu.memory_space<vmem>>, vector<320x5xf32>,
    %c0_67 = arith.constant 0 : index
    %c0_68 = arith.constant 0 : index
    %88 = vector.load %arg11[%c0_67, %c0_68] : memref<128x512xf32, #tpu.memory_space<vmem>>, vector<128x512xf32>
    %c0_69 = arith.constant 0 : index
    %c0_70 = arith.constant 0 : index
    %89 = vector.load %arg12[%c0_69, %c0_70] : memref<128x1xf32, #tpu.memory_space<vmem>>, vector<128x1xf32>
    %c0_i32_71 = arith.constant 0 : i32
    %c2_i32_72 = arith.constant 2 : i32
    %90 = arith.muli %c2_i32_72, %c0_i32_71 : i32
    %c32_i32 = arith.constant 32 : i32
    %91 = arith.muli %90, %c32_i32 : i32
    %92 = tpu.assume_multiple %91, 8 : i32
    %93 = arith.index_cast %92 : i32 to index
    %c0_73 = arith.constant 0 : index
    %94 = vector.load %arg30[%93, %c0_73] : memref<320x5xf32, #tpu.memory_space<vmem>>, vector<128x5xf32>
    %95 = arith.index_cast %92 : i32 to index
    %c0_74 = arith.constant 0 : index
    %96 = vector.load %arg31[%95, %c0_74] : memref<320x5xf32, #tpu.memory_space<vmem>>, vector<128x5xf32>
    %97 = vector.extract_strided_slice %94 {offsets = [0, 0], sizes = [32, 4], strides = [1, 1]} : vector<128x5xf32> to vector<32x4xf32>
    %98 = vector.extract_strided_slice %94 {offsets = [32, 0], sizes = [32, 4], strides = [1, 1]} : vector<128x5xf32> to vector<32x4xf32>
    %99 = vector.extract_strided_slice %94 {offsets = [64, 0], sizes = [32, 4], strides = [1, 1]} : vector<128x5xf32> to vector<32x4xf32>
    %100 = vector.extract_strided_slice %94 {offsets = [96, 0], sizes = [32, 4], strides = [1, 1]} : vector<128x5xf32> to vector<32x4xf32>
    %101 = vector.extract_strided_slice %96 {offsets = [0, 0], sizes = [32, 4], strides = [1, 1]} : vector<128x5xf32> to vector<32x4xf32>
    %102 = vector.extract_strided_slice %96 {offsets = [32, 0], sizes = [32, 4], strides = [1, 1]} : vector<128x5xf32> to vector<32x4xf32>
    %103 = vector.extract_strided_slice %96 {offsets = [64, 0], sizes = [32, 4], strides = [1, 1]} : vector<128x5xf32> to vector<32x4xf32>
    %104 = vector.extract_strided_slice %96 {offsets = [96, 0], sizes = [32, 4], strides = [1, 1]} : vector<128x5xf32> to vector<32x4xf32>
    %105 = vector.extract_strided_slice %94 {offsets = [0, 1], sizes = [32, 4], strides = [1, 1]} : vector<128x5xf32> to vector<32x4xf32>
    %106 = vector.extract_strided_slice %94 {offsets = [32, 1], sizes = [32, 4], strides = [1, 1]} : vector<128x5xf32> to vector<32x4xf32>
    %107 = vector.extract_strided_slice %94 {offsets = [64, 1], sizes = [32, 4], strides = [1, 1]} : vector<128x5xf32> to vector<32x4xf32>
    %108 = vector.extract_strided_slice %94 {offsets = [96, 1], sizes = [32, 4], strides = [1, 1]} : vector<128x5xf32> to vector<32x4xf32>
    %109 = vector.extract_strided_slice %96 {offsets = [0, 1], sizes = [32, 4], strides = [1, 1]} : vector<128x5xf32> to vector<32x4xf32>
    %110 = vector.extract_strided_slice %96 {offsets = [32, 1], sizes = [32, 4], strides = [1, 1]} : vector<128x5xf32> to vector<32x4xf32>
    %111 = vector.extract_strided_slice %96 {offsets = [64, 1], sizes = [32, 4], strides = [1, 1]} : vector<128x5xf32> to vector<32x4xf32>
    %112 = vector.extract_strided_slice %96 {offsets = [96, 1], sizes = [32, 4], strides = [1, 1]} : vector<128x5xf32> to vector<32x4xf32>
    %113 = tpu.concatenate %97, %98, %99, %100, %101, %102, %103, %104, %105, %106, %107, %108, %109, %110, %111, %112 in 0 : vector<32x4xf32>, vector<32x4xf32>, vector<32x4xf32>, vector<32x4xf32>, vector<32x4xf32>, vector<32x4xf32>, vector<32x4xf32>, vector<32x4xf32>, vector<32x4xf32>, vector<32x4xf32>, vector<32x4xf32>, vector<32x4xf32>, vector<32x4xf32>, vector<32x4xf32>, vector<32x4xf32>, vector<32x4xf32> -> vector<512x4xf32>
    %cst_75 = arith.constant dense<0.000000e+00> : vector<128x4xf32>
    %114 = tpu.matmul %88, %113, %cst_75 {dimension_numbers = #tpu.dot_dimension_numbers<[1], [0], [0], [1], [0, 0, 1, 1], [], []>} : vector<128x512xf32>, vector<512x4xf32>, vector<128x4xf32> -> vector<128x4xf32>
    %115 = vector.broadcast %89 : vector<128x1xf32> to vector<128x4xf32>
    %116 = arith.addf %114, %115 : vector<128x4xf32>
    %cst_76 = arith.constant 0.000000e+00 : f32
    %117 = vector.broadcast %cst_76 : f32 to vector<128x4xf32>
    %118 = arith.maximumf %116, %117 : vector<128x4xf32>
    %119 = vector.extract_strided_slice %118 {offsets = [0, 0], sizes = [32, 4], strides = [1, 1]} : vector<128x4xf32> to vector<32x4xf32>
    %120 = vector.extract_strided_slice %118 {offsets = [32, 0], sizes = [32, 4], strides = [1, 1]} : vector<128x4xf32> to vector<32x4xf32>
    %121 = arith.maximumf %119, %120 : vector<32x4xf32>
    %122 = vector.extract_strided_slice %118 {offsets = [64, 0], sizes = [32, 4], strides = [1, 1]} : vector<128x4xf32> to vector<32x4xf32>
    %123 = vector.extract_strided_slice %118 {offsets = [96, 0], sizes = [32, 4], strides = [1, 1]} : vector<128x4xf32> to vector<32x4xf32>
    %124 = arith.maximumf %122, %123 : vector<32x4xf32>
    %125 = arith.maximumf %121, %124 : vector<32x4xf32>
    %c32_i32_77 = arith.constant 32 : i32
    %126 = arith.muli %c0_i32_71, %c32_i32_77 : i32
    %127 = tpu.assume_multiple %126, 8 : i32
    %128 = arith.index_cast %127 : i32 to index
    %c0_78 = arith.constant 0 : index
    %129 = vector.load %arg22[%128, %c0_78] : memref<128x4xf32, #tpu.memory_space<vmem>>, vector<32x4xf32>
    tpu.vector_store %arg22[%128, %c0_78], %125 {strides = array<i32>} : memref<128x4xf32, #tpu.memory_space<vmem>>, vector<32x4xf32>,
    %c1_i32_79 = arith.constant 1 : i32
    %c2_i32_80 = arith.constant 2 : i32
    %130 = arith.muli %c2_i32_80, %c1_i32_79 : i32
    %c32_i32_81 = arith.constant 32 : i32
    %131 = arith.muli %130, %c32_i32_81 : i32
    %132 = tpu.assume_multiple %131, 8 : i32
    %133 = arith.index_cast %132 : i32 to index
    %c0_82 = arith.constant 0 : index
    %134 = vector.load %arg30[%133, %c0_82] : memref<320x5xf32, #tpu.memory_space<vmem>>, vector<128x5xf32>
    %135 = arith.index_cast %132 : i32 to index
    %c0_83 = arith.constant 0 : index
    %136 = vector.load %arg31[%135, %c0_83] : memref<320x5xf32, #tpu.memory_space<vmem>>, vector<128x5xf32>
    %137 = vector.extract_strided_slice %134 {offsets = [0, 0], sizes = [32, 4], strides = [1, 1]} : vector<128x5xf32> to vector<32x4xf32>
    %138 = vector.extract_strided_slice %134 {offsets = [32, 0], sizes = [32, 4], strides = [1, 1]} : vector<128x5xf32> to vector<32x4xf32>
    %139 = vector.extract_strided_slice %134 {offsets = [64, 0], sizes = [32, 4], strides = [1, 1]} : vector<128x5xf32> to vector<32x4xf32>
    %140 = vector.extract_strided_slice %134 {offsets = [96, 0], sizes = [32, 4], strides = [1, 1]} : vector<128x5xf32> to vector<32x4xf32>
    %141 = vector.extract_strided_slice %136 {offsets = [0, 0], sizes = [32, 4], strides = [1, 1]} : vector<128x5xf32> to vector<32x4xf32>
    %142 = vector.extract_strided_slice %136 {offsets = [32, 0], sizes = [32, 4], strides = [1, 1]} : vector<128x5xf32> to vector<32x4xf32>
    %143 = vector.extract_strided_slice %136 {offsets = [64, 0], sizes = [32, 4], strides = [1, 1]} : vector<128x5xf32> to vector<32x4xf32>
    %144 = vector.extract_strided_slice %136 {offsets = [96, 0], sizes = [32, 4], strides = [1, 1]} : vector<128x5xf32> to vector<32x4xf32>
    %145 = vector.extract_strided_slice %134 {offsets = [0, 1], sizes = [32, 4], strides = [1, 1]} : vector<128x5xf32> to vector<32x4xf32>
    %146 = vector.extract_strided_slice %134 {offsets = [32, 1], sizes = [32, 4], strides = [1, 1]} : vector<128x5xf32> to vector<32x4xf32>
    %147 = vector.extract_strided_slice %134 {offsets = [64, 1], sizes = [32, 4], strides = [1, 1]} : vector<128x5xf32> to vector<32x4xf32>
    %148 = vector.extract_strided_slice %134 {offsets = [96, 1], sizes = [32, 4], strides = [1, 1]} : vector<128x5xf32> to vector<32x4xf32>
    %149 = vector.extract_strided_slice %136 {offsets = [0, 1], sizes = [32, 4], strides = [1, 1]} : vector<128x5xf32> to vector<32x4xf32>
    %150 = vector.extract_strided_slice %136 {offsets = [32, 1], sizes = [32, 4], strides = [1, 1]} : vector<128x5xf32> to vector<32x4xf32>
    %151 = vector.extract_strided_slice %136 {offsets = [64, 1], sizes = [32, 4], strides = [1, 1]} : vector<128x5xf32> to vector<32x4xf32>
    %152 = vector.extract_strided_slice %136 {offsets = [96, 1], sizes = [32, 4], strides = [1, 1]} : vector<128x5xf32> to vector<32x4xf32>
    %153 = tpu.concatenate %137, %138, %139, %140, %141, %142, %143, %144, %145, %146, %147, %148, %149, %150, %151, %152 in 0 : vector<32x4xf32>, vector<32x4xf32>, vector<32x4xf32>, vector<32x4xf32>, vector<32x4xf32>, vector<32x4xf32>, vector<32x4xf32>, vector<32x4xf32>, vector<32x4xf32>, vector<32x4xf32>, vector<32x4xf32>, vector<32x4xf32>, vector<32x4xf32>, vector<32x4xf32>, vector<32x4xf32>, vector<32x4xf32> -> vector<512x4xf32>
    %cst_84 = arith.constant dense<0.000000e+00> : vector<128x4xf32>
    %154 = tpu.matmul %88, %153, %cst_84 {dimension_numbers = #tpu.dot_dimension_numbers<[1], [0], [0], [1], [0, 0, 1, 1], [], []>} : vector<128x512xf32>, vector<512x4xf32>, vector<128x4xf32> -> vector<128x4xf32>
    %155 = vector.broadcast %89 : vector<128x1xf32> to vector<128x4xf32>
    %156 = arith.addf %154, %155 : vector<128x4xf32>
    %cst_85 = arith.constant 0.000000e+00 : f32
    %157 = vector.broadcast %cst_85 : f32 to vector<128x4xf32>
    %158 = arith.maximumf %156, %157 : vector<128x4xf32>
    %159 = vector.extract_strided_slice %158 {offsets = [0, 0], sizes = [32, 4], strides = [1, 1]} : vector<128x4xf32> to vector<32x4xf32>
    %160 = vector.extract_strided_slice %158 {offsets = [32, 0], sizes = [32, 4], strides = [1, 1]} : vector<128x4xf32> to vector<32x4xf32>
    %161 = arith.maximumf %159, %160 : vector<32x4xf32>
    %162 = vector.extract_strided_slice %158 {offsets = [64, 0], sizes = [32, 4], strides = [1, 1]} : vector<128x4xf32> to vector<32x4xf32>
    %163 = vector.extract_strided_slice %158 {offsets = [96, 0], sizes = [32, 4], strides = [1, 1]} : vector<128x4xf32> to vector<32x4xf32>
    %164 = arith.maximumf %162, %163 : vector<32x4xf32>
    %165 = arith.maximumf %161, %164 : vector<32x4xf32>
    %c32_i32_86 = arith.constant 32 : i32
    %166 = arith.muli %c1_i32_79, %c32_i32_86 : i32
    %167 = tpu.assume_multiple %166, 8 : i32
    %168 = arith.index_cast %167 : i32 to index
    %c0_87 = arith.constant 0 : index
    %169 = vector.load %arg22[%168, %c0_87] : memref<128x4xf32, #tpu.memory_space<vmem>>, vector<32x4xf32>
    tpu.vector_store %arg22[%168, %c0_87], %165 {strides = array<i32>} : memref<128x4xf32, #tpu.memory_space<vmem>>, vector<32x4xf32>,
    %c2_i32_88 = arith.constant 2 : i32
    %c2_i32_89 = arith.constant 2 : i32
    %170 = arith.muli %c2_i32_89, %c2_i32_88 : i32
    %c32_i32_90 = arith.constant 32 : i32
    %171 = arith.muli %170, %c32_i32_90 : i32
    %172 = tpu.assume_multiple %171, 8 : i32
    %173 = arith.index_cast %172 : i32 to index
    %c0_91 = arith.constant 0 : index
    %174 = vector.load %arg30[%173, %c0_91] : memref<320x5xf32, #tpu.memory_space<vmem>>, vector<128x5xf32>
    %175 = arith.index_cast %172 : i32 to index
    %c0_92 = arith.constant 0 : index
    %176 = vector.load %arg31[%175, %c0_92] : memref<320x5xf32, #tpu.memory_space<vmem>>, vector<128x5xf32>
    %177 = vector.extract_strided_slice %174 {offsets = [0, 0], sizes = [32, 4], strides = [1, 1]} : vector<128x5xf32> to vector<32x4xf32>
    %178 = vector.extract_strided_slice %174 {offsets = [32, 0], sizes = [32, 4], strides = [1, 1]} : vector<128x5xf32> to vector<32x4xf32>
    %179 = vector.extract_strided_slice %174 {offsets = [64, 0], sizes = [32, 4], strides = [1, 1]} : vector<128x5xf32> to vector<32x4xf32>
    %180 = vector.extract_strided_slice %174 {offsets = [96, 0], sizes = [32, 4], strides = [1, 1]} : vector<128x5xf32> to vector<32x4xf32>
    %181 = vector.extract_strided_slice %176 {offsets = [0, 0], sizes = [32, 4], strides = [1, 1]} : vector<128x5xf32> to vector<32x4xf32>
    %182 = vector.extract_strided_slice %176 {offsets = [32, 0], sizes = [32, 4], strides = [1, 1]} : vector<128x5xf32> to vector<32x4xf32>
    %183 = vector.extract_strided_slice %176 {offsets = [64, 0], sizes = [32, 4], strides = [1, 1]} : vector<128x5xf32> to vector<32x4xf32>
    %184 = vector.extract_strided_slice %176 {offsets = [96, 0], sizes = [32, 4], strides = [1, 1]} : vector<128x5xf32> to vector<32x4xf32>
    %185 = vector.extract_strided_slice %174 {offsets = [0, 1], sizes = [32, 4], strides = [1, 1]} : vector<128x5xf32> to vector<32x4xf32>
    %186 = vector.extract_strided_slice %174 {offsets = [32, 1], sizes = [32, 4], strides = [1, 1]} : vector<128x5xf32> to vector<32x4xf32>
    %187 = vector.extract_strided_slice %174 {offsets = [64, 1], sizes = [32, 4], strides = [1, 1]} : vector<128x5xf32> to vector<32x4xf32>
    %188 = vector.extract_strided_slice %174 {offsets = [96, 1], sizes = [32, 4], strides = [1, 1]} : vector<128x5xf32> to vector<32x4xf32>
    %189 = vector.extract_strided_slice %176 {offsets = [0, 1], sizes = [32, 4], strides = [1, 1]} : vector<128x5xf32> to vector<32x4xf32>
    %190 = vector.extract_strided_slice %176 {offsets = [32, 1], sizes = [32, 4], strides = [1, 1]} : vector<128x5xf32> to vector<32x4xf32>
    %191 = vector.extract_strided_slice %176 {offsets = [64, 1], sizes = [32, 4], strides = [1, 1]} : vector<128x5xf32> to vector<32x4xf32>
    %192 = vector.extract_strided_slice %176 {offsets = [96, 1], sizes = [32, 4], strides = [1, 1]} : vector<128x5xf32> to vector<32x4xf32>
    %193 = tpu.concatenate %177, %178, %179, %180, %181, %182, %183, %184, %185, %186, %187, %188, %189, %190, %191, %192 in 0 : vector<32x4xf32>, vector<32x4xf32>, vector<32x4xf32>, vector<32x4xf32>, vector<32x4xf32>, vector<32x4xf32>, vector<32x4xf32>, vector<32x4xf32>, vector<32x4xf32>, vector<32x4xf32>, vector<32x4xf32>, vector<32x4xf32>, vector<32x4xf32>, vector<32x4xf32>, vector<32x4xf32>, vector<32x4xf32> -> vector<512x4xf32>
    %cst_93 = arith.constant dense<0.000000e+00> : vector<128x4xf32>
    %194 = tpu.matmul %88, %193, %cst_93 {dimension_numbers = #tpu.dot_dimension_numbers<[1], [0], [0], [1], [0, 0, 1, 1], [], []>} : vector<128x512xf32>, vector<512x4xf32>, vector<128x4xf32> -> vector<128x4xf32>
    %195 = vector.broadcast %89 : vector<128x1xf32> to vector<128x4xf32>
    %196 = arith.addf %194, %195 : vector<128x4xf32>
    %cst_94 = arith.constant 0.000000e+00 : f32
    %197 = vector.broadcast %cst_94 : f32 to vector<128x4xf32>
    %198 = arith.maximumf %196, %197 : vector<128x4xf32>
    %199 = vector.extract_strided_slice %198 {offsets = [0, 0], sizes = [32, 4], strides = [1, 1]} : vector<128x4xf32> to vector<32x4xf32>
    %200 = vector.extract_strided_slice %198 {offsets = [32, 0], sizes = [32, 4], strides = [1, 1]} : vector<128x4xf32> to vector<32x4xf32>
    %201 = arith.maximumf %199, %200 : vector<32x4xf32>
    %202 = vector.extract_strided_slice %198 {offsets = [64, 0], sizes = [32, 4], strides = [1, 1]} : vector<128x4xf32> to vector<32x4xf32>
    %203 = vector.extract_strided_slice %198 {offsets = [96, 0], sizes = [32, 4], strides = [1, 1]} : vector<128x4xf32> to vector<32x4xf32>
    %204 = arith.maximumf %202, %203 : vector<32x4xf32>
    %205 = arith.maximumf %201, %204 : vector<32x4xf32>
    %c32_i32_95 = arith.constant 32 : i32
    %206 = arith.muli %c2_i32_88, %c32_i32_95 : i32
    %207 = tpu.assume_multiple %206, 8 : i32
    %208 = arith.index_cast %207 : i32 to index
    %c0_96 = arith.constant 0 : index
    %209 = vector.load %arg22[%208, %c0_96] : memref<128x4xf32, #tpu.memory_space<vmem>>, vector<32x4xf32>
    tpu.vector_store %arg22[%208, %c0_96], %205 {strides = array<i32>} : memref<128x4xf32, #tpu.memory_space<vmem>>, vector<32x4xf32>,
    %c3_i32 = arith.constant 3 : i32
    %c2_i32_97 = arith.constant 2 : i32
    %210 = arith.muli %c2_i32_97, %c3_i32 : i32
    %c32_i32_98 = arith.constant 32 : i32
    %211 = arith.muli %210, %c32_i32_98 : i32
    %212 = tpu.assume_multiple %211, 8 : i32
    %213 = arith.index_cast %212 : i32 to index
    %c0_99 = arith.constant 0 : index
    %214 = vector.load %arg30[%213, %c0_99] : memref<320x5xf32, #tpu.memory_space<vmem>>, vector<128x5xf32>
    %215 = arith.index_cast %212 : i32 to index
    %c0_100 = arith.constant 0 : index
    %216 = vector.load %arg31[%215, %c0_100] : memref<320x5xf32, #tpu.memory_space<vmem>>, vector<128x5xf32>
    %217 = vector.extract_strided_slice %214 {offsets = [0, 0], sizes = [32, 4], strides = [1, 1]} : vector<128x5xf32> to vector<32x4xf32>
    %218 = vector.extract_strided_slice %214 {offsets = [32, 0], sizes = [32, 4], strides = [1, 1]} : vector<128x5xf32> to vector<32x4xf32>
    %219 = vector.extract_strided_slice %214 {offsets = [64, 0], sizes = [32, 4], strides = [1, 1]} : vector<128x5xf32> to vector<32x4xf32>
    %220 = vector.extract_strided_slice %214 {offsets = [96, 0], sizes = [32, 4], strides = [1, 1]} : vector<128x5xf32> to vector<32x4xf32>
    %221 = vector.extract_strided_slice %216 {offsets = [0, 0], sizes = [32, 4], strides = [1, 1]} : vector<128x5xf32> to vector<32x4xf32>
    %222 = vector.extract_strided_slice %216 {offsets = [32, 0], sizes = [32, 4], strides = [1, 1]} : vector<128x5xf32> to vector<32x4xf32>
    %223 = vector.extract_strided_slice %216 {offsets = [64, 0], sizes = [32, 4], strides = [1, 1]} : vector<128x5xf32> to vector<32x4xf32>
    %224 = vector.extract_strided_slice %216 {offsets = [96, 0], sizes = [32, 4], strides = [1, 1]} : vector<128x5xf32> to vector<32x4xf32>
    %225 = vector.extract_strided_slice %214 {offsets = [0, 1], sizes = [32, 4], strides = [1, 1]} : vector<128x5xf32> to vector<32x4xf32>
    %226 = vector.extract_strided_slice %214 {offsets = [32, 1], sizes = [32, 4], strides = [1, 1]} : vector<128x5xf32> to vector<32x4xf32>
    %227 = vector.extract_strided_slice %214 {offsets = [64, 1], sizes = [32, 4], strides = [1, 1]} : vector<128x5xf32> to vector<32x4xf32>
    %228 = vector.extract_strided_slice %214 {offsets = [96, 1], sizes = [32, 4], strides = [1, 1]} : vector<128x5xf32> to vector<32x4xf32>
    %229 = vector.extract_strided_slice %216 {offsets = [0, 1], sizes = [32, 4], strides = [1, 1]} : vector<128x5xf32> to vector<32x4xf32>
    %230 = vector.extract_strided_slice %216 {offsets = [32, 1], sizes = [32, 4], strides = [1, 1]} : vector<128x5xf32> to vector<32x4xf32>
    %231 = vector.extract_strided_slice %216 {offsets = [64, 1], sizes = [32, 4], strides = [1, 1]} : vector<128x5xf32> to vector<32x4xf32>
    %232 = vector.extract_strided_slice %216 {offsets = [96, 1], sizes = [32, 4], strides = [1, 1]} : vector<128x5xf32> to vector<32x4xf32>
    %233 = tpu.concatenate %217, %218, %219, %220, %221, %222, %223, %224, %225, %226, %227, %228, %229, %230, %231, %232 in 0 : vector<32x4xf32>, vector<32x4xf32>, vector<32x4xf32>, vector<32x4xf32>, vector<32x4xf32>, vector<32x4xf32>, vector<32x4xf32>, vector<32x4xf32>, vector<32x4xf32>, vector<32x4xf32>, vector<32x4xf32>, vector<32x4xf32>, vector<32x4xf32>, vector<32x4xf32>, vector<32x4xf32>, vector<32x4xf32> -> vector<512x4xf32>
    %cst_101 = arith.constant dense<0.000000e+00> : vector<128x4xf32>
    %234 = tpu.matmul %88, %233, %cst_101 {dimension_numbers = #tpu.dot_dimension_numbers<[1], [0], [0], [1], [0, 0, 1, 1], [], []>} : vector<128x512xf32>, vector<512x4xf32>, vector<128x4xf32> -> vector<128x4xf32>
    %235 = vector.broadcast %89 : vector<128x1xf32> to vector<128x4xf32>
    %236 = arith.addf %234, %235 : vector<128x4xf32>
    %cst_102 = arith.constant 0.000000e+00 : f32
    %237 = vector.broadcast %cst_102 : f32 to vector<128x4xf32>
    %238 = arith.maximumf %236, %237 : vector<128x4xf32>
    %239 = vector.extract_strided_slice %238 {offsets = [0, 0], sizes = [32, 4], strides = [1, 1]} : vector<128x4xf32> to vector<32x4xf32>
    %240 = vector.extract_strided_slice %238 {offsets = [32, 0], sizes = [32, 4], strides = [1, 1]} : vector<128x4xf32> to vector<32x4xf32>
    %241 = arith.maximumf %239, %240 : vector<32x4xf32>
    %242 = vector.extract_strided_slice %238 {offsets = [64, 0], sizes = [32, 4], strides = [1, 1]} : vector<128x4xf32> to vector<32x4xf32>
    %243 = vector.extract_strided_slice %238 {offsets = [96, 0], sizes = [32, 4], strides = [1, 1]} : vector<128x4xf32> to vector<32x4xf32>
    %244 = arith.maximumf %242, %243 : vector<32x4xf32>
    %245 = arith.maximumf %241, %244 : vector<32x4xf32>
    %c32_i32_103 = arith.constant 32 : i32
    %246 = arith.muli %c3_i32, %c32_i32_103 : i32
    %247 = tpu.assume_multiple %246, 8 : i32
    %248 = arith.index_cast %247 : i32 to index
    %c0_104 = arith.constant 0 : index
    %249 = vector.load %arg22[%248, %c0_104] : memref<128x4xf32, #tpu.memory_space<vmem>>, vector<32x4xf32>
    tpu.vector_store %arg22[%248, %c0_104], %245 {strides = array<i32>} : memref<128x4xf32, #tpu.memory_space<vmem>>, vector<32x4xf32>,
    %c4_i32 = arith.constant 4 : i32
    %c0_105 = arith.constant 0 : index
    %c0_106 = arith.constant 0 : index
    %250 = vector.load %arg22[%c0_105, %c0_106] : memref<128x4xf32, #tpu.memory_space<vmem>>, vector<128x4xf32>
    %251 = tpu.iota {dimensions = array<i32: 0>} : vector<4x2xi32>
    %252 = tpu.iota {dimensions = array<i32: 1>} : vector<4x2xi32>
    %c2_i32_107 = arith.constant 2 : i32
    %253 = vector.broadcast %c2_i32_107 : i32 to vector<4x2xi32>
    %254 = arith.muli %253, %252 : vector<4x2xi32>
    %255 = arith.cmpi eq, %251, %254 : vector<4x2xi32>
    %256 = arith.extui %255 : vector<4x2xi1> to vector<4x2xi32>
    %257 = arith.sitofp %256 : vector<4x2xi32> to vector<4x2xf32>
    %c2_i32_108 = arith.constant 2 : i32
    %258 = vector.broadcast %c2_i32_108 : i32 to vector<4x2xi32>
    %259 = arith.muli %258, %252 : vector<4x2xi32>
    %c1_i32_109 = arith.constant 1 : i32
    %260 = vector.broadcast %c1_i32_109 : i32 to vector<4x2xi32>
    %261 = arith.addi %259, %260 : vector<4x2xi32>
    %262 = arith.cmpi eq, %251, %261 : vector<4x2xi32>
    %263 = arith.extui %262 : vector<4x2xi1> to vector<4x2xi32>
    %264 = arith.sitofp %263 : vector<4x2xi32> to vector<4x2xf32>
    %cst_110 = arith.constant dense<0.000000e+00> : vector<128x2xf32>
    %265 = tpu.matmul %250, %257, %cst_110 {dimension_numbers = #tpu.dot_dimension_numbers<[1], [0], [0], [1], [0, 0, 1, 1], [], []>} : vector<128x4xf32>, vector<4x2xf32>, vector<128x2xf32> -> vector<128x2xf32>
    %c0_111 = arith.constant 0 : index
    %c0_112 = arith.constant 0 : index
    %266 = vector.load %arg32[%c0_111, %c0_112] : memref<128x2xf32, #tpu.memory_space<vmem>>, vector<128x2xf32>
    tpu.vector_store %arg32[%c0_111, %c0_112], %265 {strides = array<i32>} : memref<128x2xf32, #tpu.memory_space<vmem>>, vector<128x2xf32>,
    %cst_113 = arith.constant dense<0.000000e+00> : vector<128x2xf32>
    %267 = tpu.matmul %250, %264, %cst_113 {dimension_numbers = #tpu.dot_dimension_numbers<[1], [0], [0], [1], [0, 0, 1, 1], [], []>} : vector<128x4xf32>, vector<4x2xf32>, vector<128x2xf32> -> vector<128x2xf32>
    %c0_114 = arith.constant 0 : index
    %c0_115 = arith.constant 0 : index
    %268 = vector.load %arg33[%c0_114, %c0_115] : memref<128x2xf32, #tpu.memory_space<vmem>>, vector<128x2xf32>
    tpu.vector_store %arg33[%c0_114, %c0_115], %267 {strides = array<i32>} : memref<128x2xf32, #tpu.memory_space<vmem>>, vector<128x2xf32>,
    %c0_116 = arith.constant 0 : index
    %c0_117 = arith.constant 0 : index
    %269 = vector.load %arg13[%c0_116, %c0_117] : memref<256x512xf32, #tpu.memory_space<vmem>>, vector<256x512xf32>
    %c0_118 = arith.constant 0 : index
    %c0_119 = arith.constant 0 : index
    %270 = vector.load %arg14[%c0_118, %c0_119] : memref<256x1xf32, #tpu.memory_space<vmem>>, vector<256x1xf32>
    %c0_i32_120 = arith.constant 0 : i32
    %c2_i32_121 = arith.constant 2 : i32
    %271 = arith.muli %c2_i32_121, %c0_i32_120 : i32
    %c32_i32_122 = arith.constant 32 : i32
    %272 = arith.muli %271, %c32_i32_122 : i32
    %273 = tpu.assume_multiple %272, 8 : i32
    %274 = arith.index_cast %273 : i32 to index
    %c0_123 = arith.constant 0 : index
    %275 = vector.load %arg32[%274, %c0_123] : memref<128x2xf32, #tpu.memory_space<vmem>>, vector<128x2xf32>
    %276 = arith.index_cast %273 : i32 to index
    %c0_124 = arith.constant 0 : index
    %277 = vector.load %arg33[%276, %c0_124] : memref<128x2xf32, #tpu.memory_space<vmem>>, vector<128x2xf32>
    %278 = vector.extract_strided_slice %275 {offsets = [0, 0], sizes = [32, 1], strides = [1, 1]} : vector<128x2xf32> to vector<32x1xf32>
    %279 = vector.extract_strided_slice %275 {offsets = [32, 0], sizes = [32, 1], strides = [1, 1]} : vector<128x2xf32> to vector<32x1xf32>
    %280 = vector.extract_strided_slice %275 {offsets = [64, 0], sizes = [32, 1], strides = [1, 1]} : vector<128x2xf32> to vector<32x1xf32>
    %281 = vector.extract_strided_slice %275 {offsets = [96, 0], sizes = [32, 1], strides = [1, 1]} : vector<128x2xf32> to vector<32x1xf32>
    %282 = vector.extract_strided_slice %277 {offsets = [0, 0], sizes = [32, 1], strides = [1, 1]} : vector<128x2xf32> to vector<32x1xf32>
    %283 = vector.extract_strided_slice %277 {offsets = [32, 0], sizes = [32, 1], strides = [1, 1]} : vector<128x2xf32> to vector<32x1xf32>
    %284 = vector.extract_strided_slice %277 {offsets = [64, 0], sizes = [32, 1], strides = [1, 1]} : vector<128x2xf32> to vector<32x1xf32>
    %285 = vector.extract_strided_slice %277 {offsets = [96, 0], sizes = [32, 1], strides = [1, 1]} : vector<128x2xf32> to vector<32x1xf32>
    %286 = vector.extract_strided_slice %275 {offsets = [0, 1], sizes = [32, 1], strides = [1, 1]} : vector<128x2xf32> to vector<32x1xf32>
    %287 = vector.extract_strided_slice %275 {offsets = [32, 1], sizes = [32, 1], strides = [1, 1]} : vector<128x2xf32> to vector<32x1xf32>
    %288 = vector.extract_strided_slice %275 {offsets = [64, 1], sizes = [32, 1], strides = [1, 1]} : vector<128x2xf32> to vector<32x1xf32>
    %289 = vector.extract_strided_slice %275 {offsets = [96, 1], sizes = [32, 1], strides = [1, 1]} : vector<128x2xf32> to vector<32x1xf32>
    %290 = vector.extract_strided_slice %277 {offsets = [0, 1], sizes = [32, 1], strides = [1, 1]} : vector<128x2xf32> to vector<32x1xf32>
    %291 = vector.extract_strided_slice %277 {offsets = [32, 1], sizes = [32, 1], strides = [1, 1]} : vector<128x2xf32> to vector<32x1xf32>
    %292 = vector.extract_strided_slice %277 {offsets = [64, 1], sizes = [32, 1], strides = [1, 1]} : vector<128x2xf32> to vector<32x1xf32>
    %293 = vector.extract_strided_slice %277 {offsets = [96, 1], sizes = [32, 1], strides = [1, 1]} : vector<128x2xf32> to vector<32x1xf32>
    %294 = tpu.concatenate %278, %279, %280, %281, %282, %283, %284, %285, %286, %287, %288, %289, %290, %291, %292, %293 in 0 : vector<32x1xf32>, vector<32x1xf32>, vector<32x1xf32>, vector<32x1xf32>, vector<32x1xf32>, vector<32x1xf32>, vector<32x1xf32>, vector<32x1xf32>, vector<32x1xf32>, vector<32x1xf32>, vector<32x1xf32>, vector<32x1xf32>, vector<32x1xf32>, vector<32x1xf32>, vector<32x1xf32>, vector<32x1xf32> -> vector<512x1xf32>
    %cst_125 = arith.constant dense<0.000000e+00> : vector<256x1xf32>
    %295 = tpu.matmul %269, %294, %cst_125 {dimension_numbers = #tpu.dot_dimension_numbers<[1], [0], [0], [1], [0, 0, 1, 1], [], []>} : vector<256x512xf32>, vector<512x1xf32>, vector<256x1xf32> -> vector<256x1xf32>
    %296 = arith.addf %295, %270 : vector<256x1xf32>
    %cst_126 = arith.constant 0.000000e+00 : f32
    %297 = vector.broadcast %cst_126 : f32 to vector<256x1xf32>
    %298 = arith.maximumf %296, %297 : vector<256x1xf32>
    %299 = vector.extract_strided_slice %298 {offsets = [0, 0], sizes = [64, 1], strides = [1, 1]} : vector<256x1xf32> to vector<64x1xf32>
    %300 = vector.extract_strided_slice %298 {offsets = [64, 0], sizes = [64, 1], strides = [1, 1]} : vector<256x1xf32> to vector<64x1xf32>
    %301 = arith.maximumf %299, %300 : vector<64x1xf32>
    %302 = vector.extract_strided_slice %298 {offsets = [128, 0], sizes = [64, 1], strides = [1, 1]} : vector<256x1xf32> to vector<64x1xf32>
    %303 = vector.extract_strided_slice %298 {offsets = [192, 0], sizes = [64, 1], strides = [1, 1]} : vector<256x1xf32> to vector<64x1xf32>
    %304 = arith.maximumf %302, %303 : vector<64x1xf32>
    %305 = arith.maximumf %301, %304 : vector<64x1xf32>
    %c64_i32 = arith.constant 64 : i32
    %306 = arith.muli %c0_i32_120, %c64_i32 : i32
    %307 = tpu.assume_multiple %306, 8 : i32
    %308 = arith.index_cast %307 : i32 to index
    %c0_127 = arith.constant 0 : index
    %309 = vector.load %arg23[%308, %c0_127] : memref<64x1xf32, #tpu.memory_space<vmem>>, vector<64x1xf32>
    tpu.vector_store %arg23[%308, %c0_127], %305 {strides = array<i32>} : memref<64x1xf32, #tpu.memory_space<vmem>>, vector<64x1xf32>,
    %c1_i32_128 = arith.constant 1 : i32
    %c0_129 = arith.constant 0 : index
    %c0_130 = arith.constant 0 : index
    %310 = vector.load %arg23[%c0_129, %c0_130] : memref<64x1xf32, #tpu.memory_space<vmem>>, vector<64x1xf32>
    %c0_131 = arith.constant 0 : index
    %c0_132 = arith.constant 0 : index
    %311 = vector.load %arg15[%c0_131, %c0_132] : memref<15x64xf32, #tpu.memory_space<vmem>>, vector<15x64xf32>
    %cst_133 = arith.constant dense<0.000000e+00> : vector<15x1xf32>
    %312 = tpu.matmul %311, %310, %cst_133 {dimension_numbers = #tpu.dot_dimension_numbers<[1], [0], [0], [1], [0, 0, 1, 1], [], []>} : vector<15x64xf32>, vector<64x1xf32>, vector<15x1xf32> -> vector<15x1xf32>
    %c0_134 = arith.constant 0 : index
    %c0_135 = arith.constant 0 : index
    %313 = vector.load %arg16[%c0_134, %c0_135] : memref<15x1xf32, #tpu.memory_space<vmem>>, vector<15x1xf32>
    %314 = arith.addf %312, %313 : vector<15x1xf32>
    %c0_136 = arith.constant 0 : index
    %c0_137 = arith.constant 0 : index
    %c0_138 = arith.constant 0 : index
    %315 = vector.load %arg17[%c0_136, %c0_137, %c0_138] : memref<1x15x1xf32, #tpu.memory_space<vmem>>, vector<1x15x1xf32>
    %316 = vector.shape_cast %315 : vector<1x15x1xf32> to vector<15x1xf32>
    %317 = vector.shape_cast %314 : vector<15x1xf32> to vector<1x15x1xf32>
    tpu.vector_store %arg17[%c0_136, %c0_137, %c0_138], %317 {strides = array<i32>} : memref<1x15x1xf32, #tpu.memory_space<vmem>>, vector<1x15x1xf32>,
    return
  }
  func.func @transform_0(%arg0: i32) -> (i32, i32, i32) {
    %c0_i32 = arith.constant 0 : i32
    %c0_i32_0 = arith.constant 0 : i32
    %c0_i32_1 = arith.constant 0 : i32
    return %arg0, %c0_i32, %c0_i32_0 : i32, i32, i32
  }
  func.func @transform_1(%arg0: i32) -> (i32, i32, i32) {
    %c0_i32 = arith.constant 0 : i32
    %c0_i32_0 = arith.constant 0 : i32
    %c0_i32_1 = arith.constant 0 : i32
    return %arg0, %c0_i32, %c0_i32_0 : i32, i32, i32
  }
  func.func @transform_2(%arg0: i32) -> (i32, i32) {
    %c0_i32 = arith.constant 0 : i32
    %c0_i32_0 = arith.constant 0 : i32
    %c0_i32_1 = arith.constant 0 : i32
    return %c0_i32, %c0_i32_0 : i32, i32
  }
  func.func @transform_3(%arg0: i32) -> (i32, i32) {
    %c0_i32 = arith.constant 0 : i32
    %c0_i32_0 = arith.constant 0 : i32
    %c0_i32_1 = arith.constant 0 : i32
    return %c0_i32, %c0_i32_0 : i32, i32
  }
  func.func @transform_4(%arg0: i32) -> (i32, i32) {
    %c0_i32 = arith.constant 0 : i32
    %c0_i32_0 = arith.constant 0 : i32
    %c0_i32_1 = arith.constant 0 : i32
    return %c0_i32, %c0_i32_0 : i32, i32
  }
  func.func @transform_5(%arg0: i32) -> (i32, i32) {
    %c0_i32 = arith.constant 0 : i32
    %c0_i32_0 = arith.constant 0 : i32
    %c0_i32_1 = arith.constant 0 : i32
    return %c0_i32, %c0_i32_0 : i32, i32
  }
  func.func @transform_6(%arg0: i32) -> (i32, i32) {
    %c0_i32 = arith.constant 0 : i32
    %c0_i32_0 = arith.constant 0 : i32
    %c0_i32_1 = arith.constant 0 : i32
    return %c0_i32, %c0_i32_0 : i32, i32
  }
  func.func @transform_7(%arg0: i32) -> (i32, i32) {
    %c0_i32 = arith.constant 0 : i32
    %c0_i32_0 = arith.constant 0 : i32
    %c0_i32_1 = arith.constant 0 : i32
    return %c0_i32, %c0_i32_0 : i32, i32
  }
  func.func @transform_8(%arg0: i32) -> (i32, i32) {
    %c0_i32 = arith.constant 0 : i32
    %c0_i32_0 = arith.constant 0 : i32
    %c0_i32_1 = arith.constant 0 : i32
    return %c0_i32, %c0_i32_0 : i32, i32
  }
  func.func @transform_9(%arg0: i32) -> (i32, i32) {
    %c0_i32 = arith.constant 0 : i32
    %c0_i32_0 = arith.constant 0 : i32
    %c0_i32_1 = arith.constant 0 : i32
    return %c0_i32, %c0_i32_0 : i32, i32
  }
  func.func @transform_10(%arg0: i32) -> (i32, i32) {
    %c0_i32 = arith.constant 0 : i32
    %c0_i32_0 = arith.constant 0 : i32
    %c0_i32_1 = arith.constant 0 : i32
    return %c0_i32, %c0_i32_0 : i32, i32
  }
  func.func @transform_11(%arg0: i32) -> (i32, i32) {
    %c0_i32 = arith.constant 0 : i32
    %c0_i32_0 = arith.constant 0 : i32
    %c0_i32_1 = arith.constant 0 : i32
    return %c0_i32, %c0_i32_0 : i32, i32
  }
  func.func @transform_12(%arg0: i32) -> (i32, i32) {
    %c0_i32 = arith.constant 0 : i32
    %c0_i32_0 = arith.constant 0 : i32
    %c0_i32_1 = arith.constant 0 : i32
    return %c0_i32, %c0_i32_0 : i32, i32
  }
  func.func @transform_13(%arg0: i32) -> (i32, i32) {
    %c0_i32 = arith.constant 0 : i32
    %c0_i32_0 = arith.constant 0 : i32
    %c0_i32_1 = arith.constant 0 : i32
    return %c0_i32, %c0_i32_0 : i32, i32
  }
  func.func @transform_14(%arg0: i32) -> (i32, i32) {
    %c0_i32 = arith.constant 0 : i32
    %c0_i32_0 = arith.constant 0 : i32
    %c0_i32_1 = arith.constant 0 : i32
    return %c0_i32, %c0_i32_0 : i32, i32
  }
  func.func @transform_15(%arg0: i32) -> (i32, i32) {
    %c0_i32 = arith.constant 0 : i32
    %c0_i32_0 = arith.constant 0 : i32
    %c0_i32_1 = arith.constant 0 : i32
    return %c0_i32, %c0_i32_0 : i32, i32
  }
  func.func @transform_16(%arg0: i32) -> (i32, i32, i32) {
    %c0_i32 = arith.constant 0 : i32
    %c0_i32_0 = arith.constant 0 : i32
    %c0_i32_1 = arith.constant 0 : i32
    return %arg0, %c0_i32, %c0_i32_0 : i32, i32, i32
  }
}

</mosaic_0001>

<bundles_post_ra>
// kernel: network_forward.1
= control target key start
LH: loop header
LB: loop body
LE: loop exit
PB: predicated region body
PF: predicated region fallthrough
CT: control target
= control target key end

     0   :  { %s9102_s21 = smov 0   ;;  %s13752_s0 = inlined_call_operand.vmem [shape: f32[2,1520,95], index: 0, kind: input, shape index: {}]   ;;  %s13753_s1 = inlined_call_operand.vmem [shape: f32[2,1520,95], index: 1, kind: input, shape index: {}]   ;;  %s13754_s2 = inlined_call_operand.vmem [shape: f32[32,128], index: 2, kind: input, shape index: {}]   ;;  %s13755_s3 = inlined_call_operand.vmem [shape: f32[32,1], index: 3, kind: input, shape index: {}]   ;;  %s13756_s4 = inlined_call_operand.vmem [shape: f32[32,128], index: 4, kind: input, shape index: {}]   ;;  %s13757_s5 = inlined_call_operand.vmem [shape: f32[32,1], index: 5, kind: input, shape index: {}]   ;;  %s13758_s6 = inlined_call_operand.vmem [shape: f32[64,128], index: 6, kind: input, shape index: {}]   ;;  %s13759_s7 = inlined_call_operand.vmem [shape: f32[64,1], index: 7, kind: input, shape index: {}]   ;;  %s13760_s8 = inlined_call_operand.vmem [shape: f32[128,256], index: 8, kind: input, shape index: {}]   ;;  %s13761_s9 = inlined_call_operand.vmem [shape: f32[128,1], index: 9, kind: input, shape index: {}]   ;;  %s13762_s10 = inlined_call_operand.vmem [shape: f32[128,512], index: 10, kind: input, shape index: {}]   ;;  %s13763_s11 = inlined_call_operand.vmem [shape: f32[128,1], index: 11, kind: input, shape index: {}]   ;;  %s13764_s12 = inlined_call_operand.vmem [shape: f32[256,512], index: 12, kind: input, shape index: {}]   ;;  %s13765_s13 = inlined_call_operand.vmem [shape: f32[256,1], index: 13, kind: input, shape index: {}]   ;;  %s13766_s14 = inlined_call_operand.vmem [shape: f32[15,64], index: 14, kind: input, shape index: {}]   ;;  %s13767_s15 = inlined_call_operand.vmem [shape: f32[15,1], index: 15, kind: input, shape index: {}]   ;;  %s13768_s16 = inlined_call_operand.vmem [shape: f32[2,15,1], index: 16, kind: output, shape index: {}]  }
   0x1   :  { %13850 = sst [smem:[#allocation63_spill]] %s13752_s0 }
   0x2   :  { %13851 = sst [smem:[#allocation64_spill]] %s13754_s2 }
   0x3 LB: > { %s7473_s22 = sadd.s32 4294967295, %s8987_s21   ;;  %p7477_p0 = scmp.ge.s32.totalorder %s8987_s21, 1  ;;  %s8987_s21 = sphi %s9102_s21, %s26_s21  }
   0x4   : > { %p472_p1 = scmp.lt.s32.totalorder %s8987_s21, 3 }
   0x6   : > { %p473_p2 = pnand %p7477_p0, %p472_p1 }
   0x8   : > { %476 = sbr.rel (%p473_p2) target bundleno = 4358 (0x1106), region = 84 }
   0xd   : > { %p527_p3 = scmp.lt.s32.totalorder %s7473_s22, 1  ;;  %s13852_s2 = sld [smem:[#allocation64_spill]]  ;;  %v9133_v4 = vld [vmem:[%s13755_s3] sm:$0xff]  ;;  %v9138_v5 = vld [vmem:[%s13755_s3 + $0x8] sm:$0xff]  ;;  %v9143_v6 = vld [vmem:[%s13755_s3 + $0x10] sm:$0xff] }
   0xe   : > { %v9148_v7 = vld [vmem:[%s13755_s3 + $0x18] sm:$0xff]  ;;  %s13853_s18 = sld [smem:[#allocation63_spill]]  ;;  %s9165_s24 = smov 0  }
   0xf   : > { %s14096_s22 = smov (!%p527_p3, %s7473_s22), 1 }
  0x10   : > { %s8303_s26 = smul.u32 1520, %s14096_s22  ;;  %s8044_s27 = sshll.u32 %s14096_s22, 4 }
  0x11   : > { %s9153_s30 = scalar_lea.vmem %s13768_s16, %s8044_s27 }
  0x13   : > { %v9113_v0 = vld [vmem:[%s13852_s2] sm:$0xff]  ;;  %v9118_v1 = vld [vmem:[%s13852_s2 + $0x8] sm:$0xff]  ;;  %v9123_v2 = vld [vmem:[%s13852_s2 + $0x10] sm:$0xff] }
  0x14   : > { %v9128_v3 = vld [vmem:[%s13852_s2 + $0x18] sm:$0xff]  ;;  %s9158_s19 = scalar_lea.vmem %s13853_s18, %s8303_s26  ;;  %s9163_s2 = scalar_lea.vmem %s13753_s1, %s8303_s26 }
  0x15 LB: >> { %s7482_s22 = sshll.u32 %s8991_s24, 4  ;;  %s9005_s26 = smov 127   ;;  %v9006_v26 = vmov 0   ;;  %vm657_vm0 = vcmask 769024   ;;  %s8991_s24 = sphi %s9165_s24, %s555_s24  }
  0x16   : >> { %s562_s25 = scalar_lea.vmem %s9163_s2, %s7482_s22  ;;  %s557_s27 = scalar_lea.vmem %s9158_s19, %s7482_s22  ;;  %8378 = vset.pattern.permute.xlu1 %v9006_v26  ;;  %8377 = vset.pattern.permute.xlu0 %v9006_v26 }
  0x17   : >> { %v9173_v8 = vld [vmem:[%s562_s25 + $0x10] sm:$0xff]  ;;  %v9175_v9 = vld [vmem:[%s562_s25 + $0x18] sm:$0xff]  ;;  %v9185_v14 = vld [vmem:[%s562_s25] sm:$0xff]  ;;  %8376 = vset.pattern.permute.xlu2 %v9006_v26  ;;  %s7483_s28 = sshll.u32 %s8991_s24, 3  ;;  %s555_s24 = sadd.s32 1, %s8991_s24  }
  0x18   : >> { %v8356_v10 = vpack.i.bf16 %v9173_v8, %v9175_v9  ;;  %v9179_v11 = vld [vmem:[%s557_s27 + $0x10] sm:$0xff]  ;;  %v9181_v12 = vld [vmem:[%s557_s27 + $0x18] sm:$0xff]  ;;  %v9187_v15 = vld [vmem:[%s562_s25 + $0x8] sm:$0xff]  ;;  %601 = vperm.xlu2 %8376, %v9133_v4   ;;  %s656_s29 = scalar_lea.vmem [#allocation2], %s7483_s28  ;;  %p552_p4 = scmp.ge.s32.totalorder %s555_s24, 94  }
  0x19   : >> { %v8366_v13 = vpack.i.bf16 %v9179_v11, %v9181_v12  ;;  %v9189_v16 = vld [vmem:[%s557_s27] sm:$0xff]  ;;  %v9191_v17 = vld [vmem:[%s557_s27 + $0x8] sm:$0xff]  ;;  %v8361_v18 = vpack.i.bf16 %v9185_v14, %v9187_v15  ;;  %v753_v52 = vlaneseq (%p552_p4)  ;;  %vm1125_vm1 = vcmask (%p552_p4), 1045504   ;;  %s9921_s17 = smov (%p552_p4), 0  }
  0x1a   : >> { %8357 = vrot.lane.b32.xlu0 %v8356_v10, %s9005_s26  ;;  %v8371_v19 = vpack.i.bf16 %v9189_v16, %v9191_v17 }
  0x1b   : >> { %8367 = vrot.lane.b32.xlu1 %v8366_v13, %s9005_s26  ;;  %v9245_v53 = vshrl.u32 (%p552_p4), %v753_v52, 7  ;;  %v767_v54 = vand.u32 (%p552_p4), 127, %v753_v52  ;;  %v13862_v13 = vmov (%p552_p4), 0 }
  0x1d   : > { %v765_v55 = vadd.s32 (%p552_p4), 88, %v9245_v53  ;;  %v9248_v56 = vmul.u32 (%p552_p4), 2, %v767_v54  ;;  %v764_v57 = vadd.s32 (%p552_p4), 80, %v9245_v53  ;;  %v763_v58 = vadd.s32 (%p552_p4), 72, %v9245_v53 }
  0x1e   : > { %v762_v59 = vadd.s32 (%p552_p4), 64, %v9245_v53  ;;  %v761_v60 = vadd.s32 (%p552_p4), 56, %v9245_v53  ;;  %v9259_v62 = vadd.s32 (%p552_p4), 48, %v9245_v53  ;;  %v9262_v63 = vadd.s32 (%p552_p4), 40, %v9245_v53 }
  0x1f   : > { %vm780_vm2 = vcmp.eq.s32.totalorder (%p552_p4), %v765_v55, %v9248_v56  ;;  %v9256_v61 = vadd.s32 (%p552_p4), 1, %v9248_v56  ;;  %vm779_vm3 = vcmp.eq.s32.totalorder (%p552_p4), %v764_v57, %v9248_v56  ;;  %vm778_vm5 = vcmp.eq.s32.totalorder (%p552_p4), %v763_v58, %v9248_v56 }
  0x20   : >> { %606 = vperm.xlu2 %8376, %v9138_v5   ;;  %vm777_vm7 = vcmp.eq.s32.totalorder (%p552_p4), %v762_v59, %v9248_v56  ;;  %vm776_vm8 = vcmp.eq.s32.totalorder (%p552_p4), %v761_v60, %v9248_v56  ;;  %vm775_vm9 = vcmp.eq.s32.totalorder (%p552_p4), %v9259_v62, %v9248_v56  ;;  %vm774_vm10 = vcmp.eq.s32.totalorder (%p552_p4), %v9262_v63, %v9248_v56 }
  0x21   : > { %vm817_vm4 = vcmp.eq.s32.totalorder (%p552_p4), %v765_v55, %v9256_v61  ;;  %vm816_vm6 = vcmp.eq.s32.totalorder (%p552_p4), %v764_v57, %v9256_v61  ;;  %vm811_vm11 = vcmp.eq.s32.totalorder (%p552_p4), %v9262_v63, %v9256_v61  ;;  %vm815_vm12 = vcmp.eq.s32.totalorder (%p552_p4), %v763_v58, %v9256_v61 }
  0x22   : >> { %8362 = vrot.lane.b32.xlu0 %v8361_v18, %s9005_s26  ;;  %vm814_vm13 = vcmp.eq.s32.totalorder (%p552_p4), %v762_v59, %v9256_v61  ;;  %vm9311_vm14 = vcmp.eq.s32.totalorder (%p552_p4), %v9245_v53, %v9248_v56 }
  0x23   : >> { %8372 = vrot.lane.b32.xlu1 %v8371_v19, %s9005_s26 }
  0x2a   : >> { %611 = vperm.xlu0 %8377, %v9143_v6   ;;  %v756_v6 = vadd.s32 (%p552_p4), 16, %v9245_v53 }
  0x2b   : >> { %616 = vperm.xlu1 %8378, %v9148_v7   ;;  %v9306_v7 = vadd.s32 (%p552_p4), 32, %v9245_v53 }
  0x2c   : > { %vm9322_vm15 = vcmp.eq.s32.totalorder (%p552_p4), %v756_v6, %v9248_v56 }
  0x72   : >> { %v602_v33 = vpop.permute.xlu2 %601 }
  0x7a   : >> { %v607_v36 = vpop.permute.xlu2 %606 }
  0x8c   : >> { %v8358_v20 = vpop.permute.xlu0 %8357 }
  0x8d   : >> { %v8359_v21 = vunpack.i.l.bf16 %v8358_v20  ;;  %v8368_v22 = vpop.permute.xlu1 %8367  ;;  %v8360_v23 = vunpack.i.h.bf16 %v8358_v20 }
  0x8e   : >> { %v8369_v29 = vunpack.i.l.bf16 %v8368_v22  ;;  %v8370_v30 = vunpack.i.h.bf16 %v8368_v22 }
  0x8f   : >> { %619 = vmatpush.msra.mxu0 %v8359_v21  ;;  %8045 = vmatpush.msra.mxu1 %v8359_v21 }
  0x90   : >> { %8046 = vmatpush.msra.mxu2 %v8359_v21  ;;  %8047 = vmatpush.msra.mxu3 %v8359_v21  ;;  %v9399_v21 = vadd.s32 (%p552_p4), 24, %v9245_v53 }
  0x91   : >> { %620 = vmatpush.msra.mxu0 %v8360_v23  ;;  %8048 = vmatpush.msra.mxu1 %v8360_v23 }
  0x92   : >> { %8049 = vmatpush.msra.mxu2 %v8360_v23  ;;  %8050 = vmatpush.msra.mxu3 %v8360_v23 }
  0x94   : >> { %v8363_v24 = vpop.permute.xlu0 %8362 }
  0x95   : >> { %v8364_v25 = vunpack.i.l.bf16 %v8363_v24  ;;  %v8365_v27 = vunpack.i.h.bf16 %v8363_v24  ;;  %v8373_v28 = vpop.permute.xlu1 %8372 }
  0x96   : >> { %v8374_v31 = vunpack.i.l.bf16 %v8373_v28  ;;  %v8375_v32 = vunpack.i.h.bf16 %v8373_v28 }
  0x97   : >> { %621 = vmatpush.msra.mxu0 %v8364_v25  ;;  %8051 = vmatpush.msra.mxu1 %v8364_v25 }
  0x98   : >> { %8052 = vmatpush.msra.mxu2 %v8364_v25  ;;  %8053 = vmatpush.msra.mxu3 %v8364_v25 }
  0x99   : >> { %622 = vmatpush.msra.mxu0 %v8365_v27  ;;  %8054 = vmatpush.msra.mxu1 %v8365_v27 }
  0x9a   : >> { %8055 = vmatpush.msra.mxu2 %v8365_v27  ;;  %8056 = vmatpush.msra.mxu3 %v8365_v27 }
  0x9b   : >> { %623 = vmatpush.msra.mxu0 %v8369_v29  ;;  %8057 = vmatpush.msra.mxu1 %v8369_v29 }
  0x9c   : >> { %8058 = vmatpush.msra.mxu2 %v8369_v29  ;;  %8059 = vmatpush.msra.mxu3 %v8369_v29  ;;  %v612_v39 = vpop.permute.xlu0 %611 }
  0x9d   : >> { %624 = vmatpush.msra.mxu0 %v8370_v30  ;;  %8060 = vmatpush.msra.mxu1 %v8370_v30  ;;  %v617_v40 = vpop.permute.xlu1 %616 }
  0x9e   : >> { %8061 = vmatpush.msra.mxu2 %v8370_v30  ;;  %8062 = vmatpush.msra.mxu3 %v8370_v30 }
  0x9f   : >> { %625 = vmatpush.msra.mxu0 %v8374_v31  ;;  %8063 = vmatpush.msra.mxu1 %v8374_v31 }
  0xa0   : >> { %8064 = vmatpush.msra.mxu2 %v8374_v31  ;;  %8065 = vmatpush.msra.mxu3 %v8374_v31 }
  0xa1   : >> { %626 = vmatpush.msra.mxu0 %v8375_v32  ;;  %8066 = vmatpush.msra.mxu1 %v8375_v32 }
  0xa2   : >> { %8067 = vmatpush.msra.mxu2 %v8375_v32  ;;  %8068 = vmatpush.msra.mxu3 %v8375_v32 }
  0xa3   : >> { %627 = vmatpush.msra.mxu0 %v9175_v9  ;;  %8069 = vmatpush.msra.mxu1 %v9175_v9 }
  0xa4   : >> { %8070 = vmatpush.msra.mxu2 %v9175_v9  ;;  %8071 = vmatpush.msra.mxu3 %v9175_v9  ;;  %v13854_v9 = vmov (%p552_p4), 0 }
  0xa5   : >> { %628 = vmatpush.msra.mxu0 %v9173_v8  ;;  %8072 = vmatpush.msra.mxu1 %v9173_v8  ;;  %v13855_v9 = vsel (%p552_p4), %vm9311_vm14, 4294967295, %v13854_v9 }
  0xa6   : >> { %8073 = vmatpush.msra.mxu2 %v9173_v8  ;;  %8074 = vmatpush.msra.mxu3 %v9173_v8  ;;  %v755_v8 = vadd.s32 (%p552_p4), 8, %v9245_v53  ;;  %13856 = vst [vmem:[#allocation18_spill] sm:$0xff] (%p552_p4), %v13855_v9 }
  0xa7   : >> { %629 = vmatpush.msra.mxu0 %v9187_v15  ;;  %8075 = vmatpush.msra.mxu1 %v9187_v15 }
  0xa8   : >> { %8076 = vmatpush.msra.mxu2 %v9187_v15  ;;  %8077 = vmatpush.msra.mxu3 %v9187_v15 }
  0xa9   : >> { %630 = vmatpush.msra.mxu0 %v9185_v14  ;;  %8078 = vmatpush.msra.mxu1 %v9185_v14 }
  0xaa   : >> { %8079 = vmatpush.msra.mxu2 %v9185_v14  ;;  %8080 = vmatpush.msra.mxu3 %v9185_v14 }
  0xab   : >> { %631 = vmatpush.msra.mxu0 %v9181_v12  ;;  %8081 = vmatpush.msra.mxu1 %v9181_v12 }
  0xac   : >> { %8082 = vmatpush.msra.mxu2 %v9181_v12  ;;  %8083 = vmatpush.msra.mxu3 %v9181_v12 }
  0xad   : >> { %632 = vmatpush.msra.mxu0 %v9179_v11  ;;  %8084 = vmatpush.msra.mxu1 %v9179_v11 }
  0xae   : >> { %8085 = vmatpush.msra.mxu2 %v9179_v11  ;;  %8086 = vmatpush.msra.mxu3 %v9179_v11 }
  0xaf   : >> { %633 = vmatpush.msra.mxu0 %v9191_v17  ;;  %8087 = vmatpush.msra.mxu1 %v9191_v17 }
  0xb0   : >> { %8088 = vmatpush.msra.mxu2 %v9191_v17  ;;  %8089 = vmatpush.msra.mxu3 %v9191_v17 }
  0xb1   : >> { %634 = vmatpush.msra.mxu0 %v9189_v16  ;;  %8090 = vmatpush.msra.mxu1 %v9189_v16 }
  0xb2   : >> { %8091 = vmatpush.msra.mxu2 %v9189_v16  ;;  %8092 = vmatpush.msra.mxu3 %v9189_v16 }
  0xb3   : >> { %635 = vmatmul.f32.vlgmr.msra.gmra.mxu0 %v9113_v0  ;;  %638 = vmatmul.f32.vlgmr.msra.gmra.mxu1 %v9118_v1  ;;  %v9007_v0 = vmov (%p552_p4), 0.0  }
  0xb4   : >> { %641 = vmatmul.f32.vlgmr.msra.gmra.mxu2 %v9123_v2  ;;  %644 = vmatmul.f32.vlgmr.msra.gmra.mxu3 %v9128_v3  ;;  %v7495_v1 = vsel (%p552_p4), %vm780_vm2, 1.0, %v9007_v0  ;;  %v7507_v2 = vsel (%p552_p4), %vm817_vm4, 1.0, %v9007_v0  ;;  %v13769_v3 = vmov (%p552_p4), 1.0   ;;  %v9290_v4 = vsel (%p552_p4), %vm774_vm10, 1.0, %v9007_v0 }
  0xb5   : > { %8093 = vmatpush.msk.msra.mxu2 (%p552_p4), %vm1125_vm1, %v7495_v1  ;;  %7508 = vmatpush.msk.msra.mxu0 (%p552_p4), %vm1125_vm1, %v7495_v1  ;;  %v9295_v5 = vsel (%p552_p4), %vm811_vm11, 1.0, %v9007_v0  ;;  %vm9327_vm2 = vcmp.eq.s32.totalorder (%p552_p4), %v756_v6, %v9256_v61  ;;  %v9333_v12 = vsel (%p552_p4), %vm9311_vm14, 1.0, %v9007_v0  ;;  %v9349_v14 = vsel (%p552_p4), %vm9322_vm15, 1.0, %v9007_v0 }
  0xb6   : > { %8105 = vmatpush.msk.msra.mxu3 (%p552_p4), %vm1125_vm1, %v7507_v2  ;;  %7614 = vmatpush.msk.msra.mxu1 (%p552_p4), %vm1125_vm1, %v7507_v2  ;;  %13861 = vst [vmem:[#allocation19_spill] sm:$0xff] (%p552_p4), %v9333_v12  ;;  %v9353_v15 = vsel (%p552_p4), %vm9327_vm2, 1.0, %v9007_v0  ;;  %vm9356_vm4 = vcmp.eq.s32.totalorder (%p552_p4), %v755_v8, %v9248_v56 }
  0xb7   : > { %8094 = vmatpush.msk.msra.mxu2 (%p552_p4), %vm779_vm3, %v13769_v3  ;;  %7509 = vmatpush.msk.msra.mxu0 (%p552_p4), %vm779_vm3, %v13769_v3  ;;  %vm9337_vm3 = vcmp.eq.s32.totalorder (%p552_p4), %v9245_v53, %v9256_v61  ;;  %v9374_v18 = vsel (%p552_p4), %vm9356_vm4, 1.0, %v9007_v0 }
  0xb8   : > { %8106 = vmatpush.msk.msra.mxu3 (%p552_p4), %vm816_vm6, %v13769_v3  ;;  %7615 = vmatpush.msk.msra.mxu1 (%p552_p4), %vm816_vm6, %v13769_v3  ;;  %v13863_v13 = vsel (%p552_p4), %vm9337_vm3, 4294967295, %v13862_v13  ;;  %vm813_vm6 = vcmp.eq.s32.totalorder (%p552_p4), %v761_v60, %v9256_v61  ;;  %13869 = vst [vmem:[#allocation21_spill] sm:$0xff] (%p552_p4), %v9374_v18  ;;  %v9382_v20 = vsel (%p552_p4), %vm9337_vm3, 1.0, %v9007_v0 }
  0xb9   : > { %8095 = vmatpush.msk.msra.mxu2 (%p552_p4), %vm778_vm5, %v13769_v3  ;;  %7510 = vmatpush.msk.msra.mxu0 (%p552_p4), %vm778_vm5, %v13769_v3  ;;  %13864 = vst [vmem:[#allocation20_spill] sm:$0xff] (%p552_p4), %v13863_v13  ;;  %vm9361_vm5 = vcmp.eq.s32.totalorder (%p552_p4), %v755_v8, %v9256_v61 }
  0xba   : > { %8107 = vmatpush.msk.msra.mxu3 (%p552_p4), %vm815_vm12, %v13769_v3  ;;  %7616 = vmatpush.msk.msra.mxu1 (%p552_p4), %vm815_vm12, %v13769_v3  ;;  %v9378_v19 = vsel (%p552_p4), %vm9361_vm5, 1.0, %v9007_v0  ;;  %13871 = vst [vmem:[#allocation23_spill] sm:$0xff] (%p552_p4), %v9382_v20  ;;  %vm773_vm12 = vcmp.eq.s32.totalorder (%p552_p4), %v9306_v7, %v9248_v56 }
  0xbb   : > { %8096 = vmatpush.msk.msra.mxu2 (%p552_p4), %vm777_vm7, %v13769_v3  ;;  %7511 = vmatpush.msk.msra.mxu0 (%p552_p4), %vm777_vm7, %v13769_v3  ;;  %13870 = vst [vmem:[#allocation22_spill] sm:$0xff] (%p552_p4), %v9378_v19  ;;  %vm812_vm7 = vcmp.eq.s32.totalorder (%p552_p4), %v9259_v62, %v9256_v61 }
  0xbc   : > { %8108 = vmatpush.msk.msra.mxu3 (%p552_p4), %vm814_vm13, %v13769_v3  ;;  %7617 = vmatpush.msk.msra.mxu1 (%p552_p4), %vm814_vm13, %v13769_v3  ;;  %vm772_vm13 = vcmp.eq.s32.totalorder (%p552_p4), %v9399_v21, %v9248_v56 }
  0xbd   : > { %8097 = vmatpush.msk.msra.mxu2 (%p552_p4), %vm776_vm8, %v13769_v3  ;;  %7512 = vmatpush.msk.msra.mxu0 (%p552_p4), %vm776_vm8, %v13769_v3  ;;  %vm810_vm8 = vcmp.eq.s32.totalorder (%p552_p4), %v9306_v7, %v9256_v61 }
  0xbe   : > { %8109 = vmatpush.msk.msra.mxu3 (%p552_p4), %vm813_vm6, %v13769_v3  ;;  %7618 = vmatpush.msk.msra.mxu1 (%p552_p4), %vm813_vm6, %v13769_v3 }
  0xbf   : > { %8098 = vmatpush.msk.msra.mxu2 (%p552_p4), %vm775_vm9, %v13769_v3  ;;  %7513 = vmatpush.msk.msra.mxu0 (%p552_p4), %vm775_vm9, %v13769_v3  ;;  %vm809_vm9 = vcmp.eq.s32.totalorder (%p552_p4), %v9399_v21, %v9256_v61 }
  0xc0   : > { %8110 = vmatpush.msk.msra.mxu3 (%p552_p4), %vm812_vm7, %v13769_v3  ;;  %7619 = vmatpush.msk.msra.mxu1 (%p552_p4), %vm812_vm7, %v13769_v3 }
  0xc1   : > { %8099 = vmatpush.msk.msra.mxu2 (%p552_p4), %vm774_vm10, %v13769_v3  ;;  %7514 = vmatpush.msk.msra.mxu0 (%p552_p4), %vm774_vm10, %v13769_v3  ;;  %vm1428_vm10 = vcmask (%p552_p4), 384000  }
  0xc2   : > { %8111 = vmatpush.msk.msra.mxu3 (%p552_p4), %vm811_vm11, %v13769_v3  ;;  %7620 = vmatpush.msk.msra.mxu1 (%p552_p4), %vm811_vm11, %v13769_v3 }
  0xc3   : > { %8100 = vmatpush.msk.msra.mxu2 (%p552_p4), %vm773_vm12, %v13769_v3  ;;  %7515 = vmatpush.msk.msra.mxu0 (%p552_p4), %vm773_vm12, %v13769_v3 }
  0xc4   : > { %8112 = vmatpush.msk.msra.mxu3 (%p552_p4), %vm810_vm8, %v13769_v3  ;;  %7621 = vmatpush.msk.msra.mxu1 (%p552_p4), %vm810_vm8, %v13769_v3 }
  0xc5   : > { %8101 = vmatpush.msk.msra.mxu2 (%p552_p4), %vm772_vm13, %v13769_v3  ;;  %7516 = vmatpush.msk.msra.mxu0 (%p552_p4), %vm772_vm13, %v13769_v3 }
  0xc6   : > { %8113 = vmatpush.msk.msra.mxu3 (%p552_p4), %vm809_vm9, %v13769_v3  ;;  %7622 = vmatpush.msk.msra.mxu1 (%p552_p4), %vm809_vm9, %v13769_v3 }
  0xc7   : > { %8102 = vmatpush.msk.msra.mxu2 (%p552_p4), %vm9322_vm15, %v13769_v3  ;;  %7517 = vmatpush.msk.msra.mxu0 (%p552_p4), %vm9322_vm15, %v13769_v3 }
  0xc8   : > { %8114 = vmatpush.msk.msra.mxu3 (%p552_p4), %vm9327_vm2, %v13769_v3  ;;  %7623 = vmatpush.msk.msra.mxu1 (%p552_p4), %vm9327_vm2, %v13769_v3 }
  0xc9   : > { %8103 = vmatpush.msk.msra.mxu2 (%p552_p4), %vm9356_vm4, %v13769_v3  ;;  %7518 = vmatpush.msk.msra.mxu0 (%p552_p4), %vm9356_vm4, %v13769_v3 }
  0xca   : > { %8115 = vmatpush.msk.msra.mxu3 (%p552_p4), %vm9361_vm5, %v13769_v3  ;;  %7624 = vmatpush.msk.msra.mxu1 (%p552_p4), %vm9361_vm5, %v13769_v3 }
  0xcb   : > { %8104 = vmatpush.msk.msra.mxu2 (%p552_p4), %vm9311_vm14, %v13769_v3  ;;  %7519 = vmatpush.msk.msra.mxu0 (%p552_p4), %vm9311_vm14, %v13769_v3 }
  0xcc   : > { %8116 = vmatpush.msk.msra.mxu3 (%p552_p4), %vm9337_vm3, %v13769_v3  ;;  %7625 = vmatpush.msk.msra.mxu1 (%p552_p4), %vm9337_vm3, %v13769_v3 }
 0x130   : >> { %v636_v34 = vpop.f32.mrf.mxu0  ;;  %v639_v35 = vpop.f32.mrf.mxu1 }
 0x131   : >> { %v637_v37 = vadd.f32 %v636_v34, %v602_v33  ;;  %v640_v38 = vadd.f32 %v639_v35, %v607_v36 }
 0x133   : >> { %v648_v43 = vmax.f32 %v637_v37, 0.0  ;;  %v649_v44 = vmax.f32 %v640_v38, 0.0 }
 0x135   : >> { %v652_v49 = vmax.f32 %v648_v43, %v649_v44 }
 0x137   : >> { %v642_v41 = vpop.f32.mrf.mxu2  ;;  %v645_v42 = vpop.f32.mrf.mxu3 }
 0x138   : >> { %v643_v45 = vadd.f32 %v642_v41, %v612_v39  ;;  %v646_v46 = vadd.f32 %v645_v42, %v617_v40 }
 0x13a   : >> { %v650_v47 = vmax.f32 %v643_v45, 0.0  ;;  %v651_v48 = vmax.f32 %v646_v46, 0.0 }
 0x13c   : >> { %v653_v50 = vmax.f32 %v650_v47, %v651_v48  ;;  %554 = sbr.rel (!%p552_p4) target bundleno = 21 (0x15), region = 166 }
 0x13e   : >> { %v654_v51 = vmax.f32 %v652_v49, %v653_v50 }
 0x140   : >> { %658 = vst.msk [vmem:[%s656_s29] sm:$0xff] %vm657_vm0, %v654_v51 }
 0x147   : > { %v706_v22 = vld [vmem:[#allocation2 + $0x178] sm:$0xff]  ;;  %v659_v23 = vld [vmem:[#allocation2] sm:$0xff]  ;;  %v660_v25 = vld [vmem:[#allocation2 + $0x8] sm:$0xff] }
 0x148   : > { %7567 = vmatmul.msk.f32.vlgmr.msra.gmra.mxu2 %vm657_vm0, %v706_v22  ;;  %7673 = vmatmul.msk.f32.vlgmr.msra.gmra.mxu3 %vm657_vm0, %v706_v22  ;;  %v707_v24 = vld [vmem:[#allocation2 + $0x180] sm:$0xff]  ;;  %v708_v26 = vld [vmem:[#allocation2 + $0x188] sm:$0xff]  ;;  %v661_v27 = vld [vmem:[#allocation2 + $0x10] sm:$0xff] }
 0x149   : > { %7520 = vmatmul.msk.f32.vlgmr.msra.gmra.mxu0 %vm657_vm0, %v659_v23  ;;  %7626 = vmatmul.msk.f32.vlgmr.msra.gmra.mxu1 %vm657_vm0, %v659_v23  ;;  %v709_v28 = vld [vmem:[#allocation2 + $0x190] sm:$0xff]  ;;  %v662_v29 = vld [vmem:[#allocation2 + $0x18] sm:$0xff]  ;;  %v663_v31 = vld [vmem:[#allocation2 + $0x20] sm:$0xff] }
 0x14a   : > { %v710_v30 = vld [vmem:[#allocation2 + $0x198] sm:$0xff]  ;;  %v711_v32 = vld [vmem:[#allocation2 + $0x1a0] sm:$0xff]  ;;  %v664_v33 = vld [vmem:[#allocation2 + $0x28] sm:$0xff] }
 0x14b   : > { %v712_v34 = vld [vmem:[#allocation2 + $0x1a8] sm:$0xff]  ;;  %v665_v35 = vld [vmem:[#allocation2 + $0x30] sm:$0xff]  ;;  %v666_v37 = vld [vmem:[#allocation2 + $0x38] sm:$0xff] }
 0x14c   : > { %v713_v36 = vld [vmem:[#allocation2 + $0x1b0] sm:$0xff]  ;;  %v714_v38 = vld [vmem:[#allocation2 + $0x1b8] sm:$0xff]  ;;  %v667_v39 = vld [vmem:[#allocation2 + $0x40] sm:$0xff] }
 0x14d   : > { %v715_v40 = vld [vmem:[#allocation2 + $0x1c0] sm:$0xff]  ;;  %v668_v41 = vld [vmem:[#allocation2 + $0x48] sm:$0xff]  ;;  %v669_v43 = vld [vmem:[#allocation2 + $0x50] sm:$0xff] }
 0x14e   : > { %v716_v42 = vld [vmem:[#allocation2 + $0x1c8] sm:$0xff]  ;;  %v717_v44 = vld [vmem:[#allocation2 + $0x1d0] sm:$0xff]  ;;  %v670_v45 = vld [vmem:[#allocation2 + $0x58] sm:$0xff] }
 0x14f   : > { %v718_v46 = vld [vmem:[#allocation2 + $0x1d8] sm:$0xff]  ;;  %v671_v47 = vld [vmem:[#allocation2 + $0x60] sm:$0xff]  ;;  %v672_v49 = vld [vmem:[#allocation2 + $0x68] sm:$0xff] }
 0x150   : > { %7568 = vmatmul.msk.f32.gmra.mxu2 %vm657_vm0, %v707_v24  ;;  %7674 = vmatmul.msk.f32.gmra.mxu3 %vm657_vm0, %v707_v24  ;;  %v719_v48 = vld [vmem:[#allocation2 + $0x1e0] sm:$0xff]  ;;  %v720_v50 = vld [vmem:[#allocation2 + $0x1e8] sm:$0xff]  ;;  %v673_v51 = vld [vmem:[#allocation2 + $0x70] sm:$0xff] }
 0x151   : > { %7521 = vmatmul.msk.f32.gmra.mxu0 %vm657_vm0, %v660_v25  ;;  %7627 = vmatmul.msk.f32.gmra.mxu1 %vm657_vm0, %v660_v25  ;;  %v721_v52 = vld [vmem:[#allocation2 + $0x1f0] sm:$0xff]  ;;  %v674_v53 = vld [vmem:[#allocation2 + $0x78] sm:$0xff]  ;;  %v675_v58 = vld [vmem:[#allocation2 + $0x80] sm:$0xff] }
 0x152   : > { %v722_v54 = vld [vmem:[#allocation2 + $0x1f8] sm:$0xff]  ;;  %v723_v62 = vld [vmem:[#allocation2 + $0x200] sm:$0xff]  ;;  %v676_v1 = vld [vmem:[#allocation2 + $0x88] sm:$0xff] }
 0x153   : > { %v724_v8 = vld [vmem:[#allocation2 + $0x208] sm:$0xff]  ;;  %v677_v24 = vld [vmem:[#allocation2 + $0x90] sm:$0xff] }
 0x158   : > { %7569 = vmatmul.msk.f32.gmra.mxu2 %vm657_vm0, %v708_v26  ;;  %7675 = vmatmul.msk.f32.gmra.mxu3 %vm657_vm0, %v708_v26 }
 0x159   : > { %7522 = vmatmul.msk.f32.gmra.mxu0 %vm657_vm0, %v661_v27  ;;  %7628 = vmatmul.msk.f32.gmra.mxu1 %vm657_vm0, %v661_v27  ;;  %v725_v27 = vld [vmem:[#allocation2 + $0x210] sm:$0xff] }
 0x160   : > { %7570 = vmatmul.msk.f32.gmra.mxu2 %vm657_vm0, %v709_v28  ;;  %7676 = vmatmul.msk.f32.gmra.mxu3 %vm657_vm0, %v709_v28 }
 0x161   : > { %7523 = vmatmul.msk.f32.gmra.mxu0 %vm657_vm0, %v662_v29  ;;  %7629 = vmatmul.msk.f32.gmra.mxu1 %vm657_vm0, %v662_v29 }
 0x168   : > { %7571 = vmatmul.msk.f32.gmra.mxu2 %vm657_vm0, %v710_v30  ;;  %7677 = vmatmul.msk.f32.gmra.mxu3 %vm657_vm0, %v710_v30  ;;  %v678_v30 = vld [vmem:[#allocation2 + $0x98] sm:$0xff] }
 0x169   : > { %7524 = vmatmul.msk.f32.gmra.mxu0 %vm657_vm0, %v663_v31  ;;  %7630 = vmatmul.msk.f32.gmra.mxu1 %vm657_vm0, %v663_v31 }
 0x170   : > { %7572 = vmatmul.msk.f32.gmra.mxu2 %vm657_vm0, %v711_v32  ;;  %7678 = vmatmul.msk.f32.gmra.mxu3 %vm657_vm0, %v711_v32 }
 0x171   : > { %7525 = vmatmul.msk.f32.gmra.mxu0 %vm657_vm0, %v664_v33  ;;  %7631 = vmatmul.msk.f32.gmra.mxu1 %vm657_vm0, %v664_v33  ;;  %v726_v33 = vld [vmem:[#allocation2 + $0x218] sm:$0xff] }
 0x178   : > { %7573 = vmatmul.msk.f32.gmra.mxu2 %vm657_vm0, %v712_v34  ;;  %7679 = vmatmul.msk.f32.gmra.mxu3 %vm657_vm0, %v712_v34 }
 0x179   : > { %7526 = vmatmul.msk.f32.gmra.mxu0 %vm657_vm0, %v665_v35  ;;  %7632 = vmatmul.msk.f32.gmra.mxu1 %vm657_vm0, %v665_v35 }
 0x180   : > { %7574 = vmatmul.msk.f32.gmra.mxu2 %vm657_vm0, %v713_v36  ;;  %7680 = vmatmul.msk.f32.gmra.mxu3 %vm657_vm0, %v713_v36  ;;  %v679_v36 = vld [vmem:[#allocation2 + $0xa0] sm:$0xff] }
 0x181   : > { %7527 = vmatmul.msk.f32.gmra.mxu0 %vm657_vm0, %v666_v37  ;;  %7633 = vmatmul.msk.f32.gmra.mxu1 %vm657_vm0, %v666_v37 }
 0x188   : > { %7575 = vmatmul.msk.f32.gmra.mxu2 %vm657_vm0, %v714_v38  ;;  %7681 = vmatmul.msk.f32.gmra.mxu3 %vm657_vm0, %v714_v38 }
 0x189   : > { %7528 = vmatmul.msk.f32.gmra.mxu0 %vm657_vm0, %v667_v39  ;;  %7634 = vmatmul.msk.f32.gmra.mxu1 %vm657_vm0, %v667_v39  ;;  %v727_v39 = vld [vmem:[#allocation2 + $0x220] sm:$0xff] }
 0x190   : > { %7576 = vmatmul.msk.f32.gmra.mxu2 %vm657_vm0, %v715_v40  ;;  %7682 = vmatmul.msk.f32.gmra.mxu3 %vm657_vm0, %v715_v40 }
 0x191   : > { %7529 = vmatmul.msk.f32.gmra.mxu0 %vm657_vm0, %v668_v41  ;;  %7635 = vmatmul.msk.f32.gmra.mxu1 %vm657_vm0, %v668_v41 }
 0x198   : > { %7577 = vmatmul.msk.f32.gmra.mxu2 %vm657_vm0, %v716_v42  ;;  %7683 = vmatmul.msk.f32.gmra.mxu3 %vm657_vm0, %v716_v42  ;;  %v680_v42 = vld [vmem:[#allocation2 + $0xa8] sm:$0xff] }
 0x199   : > { %7530 = vmatmul.msk.f32.gmra.mxu0 %vm657_vm0, %v669_v43  ;;  %7636 = vmatmul.msk.f32.gmra.mxu1 %vm657_vm0, %v669_v43 }
 0x1a0   : > { %7578 = vmatmul.msk.f32.gmra.mxu2 %vm657_vm0, %v717_v44  ;;  %7684 = vmatmul.msk.f32.gmra.mxu3 %vm657_vm0, %v717_v44 }
 0x1a1   : > { %7531 = vmatmul.msk.f32.gmra.mxu0 %vm657_vm0, %v670_v45  ;;  %7637 = vmatmul.msk.f32.gmra.mxu1 %vm657_vm0, %v670_v45  ;;  %v728_v45 = vld [vmem:[#allocation2 + $0x228] sm:$0xff] }
 0x1a8   : > { %7579 = vmatmul.msk.f32.gmra.mxu2 %vm657_vm0, %v718_v46  ;;  %7685 = vmatmul.msk.f32.gmra.mxu3 %vm657_vm0, %v718_v46 }
 0x1a9   : > { %7532 = vmatmul.msk.f32.gmra.mxu0 %vm657_vm0, %v671_v47  ;;  %7638 = vmatmul.msk.f32.gmra.mxu1 %vm657_vm0, %v671_v47 }
 0x1b0   : > { %7580 = vmatmul.msk.f32.gmra.mxu2 %vm657_vm0, %v719_v48  ;;  %7686 = vmatmul.msk.f32.gmra.mxu3 %vm657_vm0, %v719_v48  ;;  %v681_v48 = vld [vmem:[#allocation2 + $0xb0] sm:$0xff] }
 0x1b1   : > { %7533 = vmatmul.msk.f32.gmra.mxu0 %vm657_vm0, %v672_v49  ;;  %7639 = vmatmul.msk.f32.gmra.mxu1 %vm657_vm0, %v672_v49 }
 0x1b8   : > { %7581 = vmatmul.msk.f32.gmra.mxu2 %vm657_vm0, %v720_v50  ;;  %7687 = vmatmul.msk.f32.gmra.mxu3 %vm657_vm0, %v720_v50 }
 0x1b9   : > { %7534 = vmatmul.msk.f32.gmra.mxu0 %vm657_vm0, %v673_v51  ;;  %7640 = vmatmul.msk.f32.gmra.mxu1 %vm657_vm0, %v673_v51  ;;  %v729_v51 = vld [vmem:[#allocation2 + $0x230] sm:$0xff] }
 0x1c0   : > { %7582 = vmatmul.msk.f32.gmra.mxu2 %vm657_vm0, %v721_v52  ;;  %7688 = vmatmul.msk.f32.gmra.mxu3 %vm657_vm0, %v721_v52 }
 0x1c1   : > { %7535 = vmatmul.msk.f32.gmra.mxu0 %vm657_vm0, %v674_v53  ;;  %7641 = vmatmul.msk.f32.gmra.mxu1 %vm657_vm0, %v674_v53 }
 0x1c6   : > { %v1146_v55 = vpop.f32.mrf.mxu0  ;;  %v1543_v57 = vpop.f32.mrf.mxu1 }
 0x1c7   : > { %1429 = vst.msk [vmem:[#allocation8] sm:$0xff] %vm1428_vm10, %v1146_v55 }
 0x1c8   : > { %7583 = vmatmul.msk.f32.gmra.mxu2 %vm657_vm0, %v722_v54  ;;  %7689 = vmatmul.msk.f32.gmra.mxu3 %vm657_vm0, %v722_v54  ;;  %1825 = vst.msk [vmem:[#allocation9] sm:$0xff] %vm1428_vm10, %v1543_v57  ;;  %v682_v54 = vld [vmem:[#allocation2 + $0xb8] sm:$0xff] }
 0x1c9   : > { %7536 = vmatmul.msk.f32.gmra.mxu0 %vm657_vm0, %v675_v58  ;;  %7642 = vmatmul.msk.f32.gmra.mxu1 %vm657_vm0, %v675_v58  ;;  %v730_v58 = vld [vmem:[#allocation2 + $0x238] sm:$0xff] }
 0x1cb   : > { %v1287_v59 = vpop.f32.mrf.mxu2  ;;  %v1684_v60 = vpop.f32.mrf.mxu3 }
 0x1cc   : > { %1476 = vst.msk [vmem:[#allocation8 + $0x178] sm:$0xff] %vm1428_vm10, %v1287_v59 }
 0x1cd   : > { %1872 = vst.msk [vmem:[#allocation9 + $0x178] sm:$0xff] %vm1428_vm10, %v1684_v60 }
 0x1ce   : > { %v1149_v63 = vpop.f32.mrf.mxu0  ;;  %v1546_v0 = vpop.f32.mrf.mxu1 }
 0x1cf   : > { %1430 = vst.msk [vmem:[#allocation8 + $0x8] sm:$0xff] %vm1428_vm10, %v1149_v63 }
 0x1d0   : > { %7584 = vmatmul.msk.f32.gmra.mxu2 %vm657_vm0, %v723_v62  ;;  %7690 = vmatmul.msk.f32.gmra.mxu3 %vm657_vm0, %v723_v62  ;;  %1826 = vst.msk [vmem:[#allocation9 + $0x8] sm:$0xff] %vm1428_vm10, %v1546_v0  ;;  %v683_v62 = vld [vmem:[#allocation2 + $0xc0] sm:$0xff] }
 0x1d1   : > { %7537 = vmatmul.msk.f32.gmra.mxu0 %vm657_vm0, %v676_v1  ;;  %7643 = vmatmul.msk.f32.gmra.mxu1 %vm657_vm0, %v676_v1  ;;  %v731_v1 = vld [vmem:[#allocation2 + $0x240] sm:$0xff] }
 0x1d3   : > { %v1290_v2 = vpop.f32.mrf.mxu2  ;;  %v1687_v6 = vpop.f32.mrf.mxu3 }
 0x1d4   : > { %1477 = vst.msk [vmem:[#allocation8 + $0x180] sm:$0xff] %vm1428_vm10, %v1290_v2 }
 0x1d5   : > { %1873 = vst.msk [vmem:[#allocation9 + $0x180] sm:$0xff] %vm1428_vm10, %v1687_v6 }
 0x1d6   : > { %v1152_v22 = vpop.f32.mrf.mxu0  ;;  %v1549_v23 = vpop.f32.mrf.mxu1 }
 0x1d7   : > { %1431 = vst.msk [vmem:[#allocation8 + $0x10] sm:$0xff] %vm1428_vm10, %v1152_v22 }
 0x1d8   : > { %7585 = vmatmul.msk.f32.gmra.mxu2 %vm657_vm0, %v724_v8  ;;  %7691 = vmatmul.msk.f32.gmra.mxu3 %vm657_vm0, %v724_v8  ;;  %1827 = vst.msk [vmem:[#allocation9 + $0x10] sm:$0xff] %vm1428_vm10, %v1549_v23  ;;  %v684_v8 = vld [vmem:[#allocation2 + $0xc8] sm:$0xff] }
 0x1d9   : > { %7538 = vmatmul.msk.f32.gmra.mxu0 %vm657_vm0, %v677_v24  ;;  %7644 = vmatmul.msk.f32.gmra.mxu1 %vm657_vm0, %v677_v24  ;;  %v732_v24 = vld [vmem:[#allocation2 + $0x248] sm:$0xff] }
 0x1db   : > { %v1293_v25 = vpop.f32.mrf.mxu2  ;;  %v1690_v26 = vpop.f32.mrf.mxu3 }
 0x1dc   : > { %1478 = vst.msk [vmem:[#allocation8 + $0x188] sm:$0xff] %vm1428_vm10, %v1293_v25 }
 0x1dd   : > { %1874 = vst.msk [vmem:[#allocation9 + $0x188] sm:$0xff] %vm1428_vm10, %v1690_v26 }
 0x1de   : > { %v1155_v28 = vpop.f32.mrf.mxu0  ;;  %v1552_v29 = vpop.f32.mrf.mxu1 }
 0x1df   : > { %1432 = vst.msk [vmem:[#allocation8 + $0x18] sm:$0xff] %vm1428_vm10, %v1155_v28 }
 0x1e0   : > { %7586 = vmatmul.msk.f32.gmra.mxu2 %vm657_vm0, %v725_v27  ;;  %7692 = vmatmul.msk.f32.gmra.mxu3 %vm657_vm0, %v725_v27  ;;  %1828 = vst.msk [vmem:[#allocation9 + $0x18] sm:$0xff] %vm1428_vm10, %v1552_v29  ;;  %v685_v27 = vld [vmem:[#allocation2 + $0xd0] sm:$0xff] }
 0x1e1   : > { %7539 = vmatmul.msk.f32.gmra.mxu0 %vm657_vm0, %v678_v30  ;;  %7645 = vmatmul.msk.f32.gmra.mxu1 %vm657_vm0, %v678_v30  ;;  %v733_v30 = vld [vmem:[#allocation2 + $0x250] sm:$0xff] }
 0x1e3   : > { %v1296_v31 = vpop.f32.mrf.mxu2  ;;  %v1693_v32 = vpop.f32.mrf.mxu3 }
 0x1e4   : > { %1479 = vst.msk [vmem:[#allocation8 + $0x190] sm:$0xff] %vm1428_vm10, %v1296_v31 }
 0x1e5   : > { %1875 = vst.msk [vmem:[#allocation9 + $0x190] sm:$0xff] %vm1428_vm10, %v1693_v32 }
 0x1e6   : > { %v1158_v34 = vpop.f32.mrf.mxu0  ;;  %v1555_v35 = vpop.f32.mrf.mxu1 }
 0x1e7   : > { %1433 = vst.msk [vmem:[#allocation8 + $0x20] sm:$0xff] %vm1428_vm10, %v1158_v34 }
 0x1e8   : > { %7587 = vmatmul.msk.f32.gmra.mxu2 %vm657_vm0, %v726_v33  ;;  %7693 = vmatmul.msk.f32.gmra.mxu3 %vm657_vm0, %v726_v33  ;;  %1829 = vst.msk [vmem:[#allocation9 + $0x20] sm:$0xff] %vm1428_vm10, %v1555_v35  ;;  %v686_v33 = vld [vmem:[#allocation2 + $0xd8] sm:$0xff] }
 0x1e9   : > { %7540 = vmatmul.msk.f32.gmra.mxu0 %vm657_vm0, %v679_v36  ;;  %7646 = vmatmul.msk.f32.gmra.mxu1 %vm657_vm0, %v679_v36  ;;  %v734_v36 = vld [vmem:[#allocation2 + $0x258] sm:$0xff] }
 0x1eb   : > { %v1299_v37 = vpop.f32.mrf.mxu2  ;;  %v1696_v38 = vpop.f32.mrf.mxu3 }
 0x1ec   : > { %1480 = vst.msk [vmem:[#allocation8 + $0x198] sm:$0xff] %vm1428_vm10, %v1299_v37 }
 0x1ed   : > { %1876 = vst.msk [vmem:[#allocation9 + $0x198] sm:$0xff] %vm1428_vm10, %v1696_v38 }
 0x1ee   : > { %v1161_v40 = vpop.f32.mrf.mxu0  ;;  %v1558_v41 = vpop.f32.mrf.mxu1 }
 0x1ef   : > { %1434 = vst.msk [vmem:[#allocation8 + $0x28] sm:$0xff] %vm1428_vm10, %v1161_v40 }
 0x1f0   : > { %7588 = vmatmul.msk.f32.gmra.mxu2 %vm657_vm0, %v727_v39  ;;  %7694 = vmatmul.msk.f32.gmra.mxu3 %vm657_vm0, %v727_v39  ;;  %1830 = vst.msk [vmem:[#allocation9 + $0x28] sm:$0xff] %vm1428_vm10, %v1558_v41  ;;  %v687_v39 = vld [vmem:[#allocation2 + $0xe0] sm:$0xff] }
 0x1f1   : > { %7541 = vmatmul.msk.f32.gmra.mxu0 %vm657_vm0, %v680_v42  ;;  %7647 = vmatmul.msk.f32.gmra.mxu1 %vm657_vm0, %v680_v42  ;;  %v735_v42 = vld [vmem:[#allocation2 + $0x260] sm:$0xff] }
 0x1f3   : > { %v1302_v43 = vpop.f32.mrf.mxu2  ;;  %v1699_v44 = vpop.f32.mrf.mxu3 }
 0x1f4   : > { %1481 = vst.msk [vmem:[#allocation8 + $0x1a0] sm:$0xff] %vm1428_vm10, %v1302_v43 }
 0x1f5   : > { %1877 = vst.msk [vmem:[#allocation9 + $0x1a0] sm:$0xff] %vm1428_vm10, %v1699_v44 }
 0x1f6   : > { %v1164_v46 = vpop.f32.mrf.mxu0  ;;  %v1561_v47 = vpop.f32.mrf.mxu1 }
 0x1f7   : > { %1435 = vst.msk [vmem:[#allocation8 + $0x30] sm:$0xff] %vm1428_vm10, %v1164_v46 }
 0x1f8   : > { %7589 = vmatmul.msk.f32.gmra.mxu2 %vm657_vm0, %v728_v45  ;;  %7695 = vmatmul.msk.f32.gmra.mxu3 %vm657_vm0, %v728_v45  ;;  %1831 = vst.msk [vmem:[#allocation9 + $0x30] sm:$0xff] %vm1428_vm10, %v1561_v47  ;;  %v688_v45 = vld [vmem:[#allocation2 + $0xe8] sm:$0xff] }
 0x1f9   : > { %7542 = vmatmul.msk.f32.gmra.mxu0 %vm657_vm0, %v681_v48  ;;  %7648 = vmatmul.msk.f32.gmra.mxu1 %vm657_vm0, %v681_v48  ;;  %v736_v48 = vld [vmem:[#allocation2 + $0x268] sm:$0xff] }
 0x1fb   : > { %v1305_v49 = vpop.f32.mrf.mxu2  ;;  %v1702_v50 = vpop.f32.mrf.mxu3 }
 0x1fc   : > { %1482 = vst.msk [vmem:[#allocation8 + $0x1a8] sm:$0xff] %vm1428_vm10, %v1305_v49 }
 0x1fd   : > { %1878 = vst.msk [vmem:[#allocation9 + $0x1a8] sm:$0xff] %vm1428_vm10, %v1702_v50 }
 0x1fe   : > { %v1167_v52 = vpop.f32.mrf.mxu0  ;;  %v1564_v53 = vpop.f32.mrf.mxu1 }
 0x1ff   : > { %1436 = vst.msk [vmem:[#allocation8 + $0x38] sm:$0xff] %vm1428_vm10, %v1167_v52 }
 0x200   : > { %7590 = vmatmul.msk.f32.gmra.mxu2 %vm657_vm0, %v729_v51  ;;  %7696 = vmatmul.msk.f32.gmra.mxu3 %vm657_vm0, %v729_v51  ;;  %1832 = vst.msk [vmem:[#allocation9 + $0x38] sm:$0xff] %vm1428_vm10, %v1564_v53  ;;  %v689_v51 = vld [vmem:[#allocation2 + $0xf0] sm:$0xff] }
 0x201   : > { %7543 = vmatmul.msk.f32.gmra.mxu0 %vm657_vm0, %v682_v54  ;;  %7649 = vmatmul.msk.f32.gmra.mxu1 %vm657_vm0, %v682_v54  ;;  %v737_v54 = vld [vmem:[#allocation2 + $0x270] sm:$0xff] }
 0x203   : > { %v1308_v55 = vpop.f32.mrf.mxu2  ;;  %v1705_v57 = vpop.f32.mrf.mxu3 }
 0x204   : > { %1483 = vst.msk [vmem:[#allocation8 + $0x1b0] sm:$0xff] %vm1428_vm10, %v1308_v55 }
 0x205   : > { %1879 = vst.msk [vmem:[#allocation9 + $0x1b0] sm:$0xff] %vm1428_vm10, %v1705_v57 }
 0x206   : > { %v1170_v59 = vpop.f32.mrf.mxu0  ;;  %v1567_v60 = vpop.f32.mrf.mxu1 }
 0x207   : > { %1437 = vst.msk [vmem:[#allocation8 + $0x40] sm:$0xff] %vm1428_vm10, %v1170_v59 }
 0x208   : > { %7591 = vmatmul.msk.f32.gmra.mxu2 %vm657_vm0, %v730_v58  ;;  %7697 = vmatmul.msk.f32.gmra.mxu3 %vm657_vm0, %v730_v58  ;;  %1833 = vst.msk [vmem:[#allocation9 + $0x40] sm:$0xff] %vm1428_vm10, %v1567_v60  ;;  %v690_v58 = vld [vmem:[#allocation2 + $0xf8] sm:$0xff] }
 0x209   : > { %7544 = vmatmul.msk.f32.gmra.mxu0 %vm657_vm0, %v683_v62  ;;  %7650 = vmatmul.msk.f32.gmra.mxu1 %vm657_vm0, %v683_v62  ;;  %v738_v62 = vld [vmem:[#allocation2 + $0x278] sm:$0xff] }
 0x20b   : > { %v1311_v63 = vpop.f32.mrf.mxu2  ;;  %v1708_v0 = vpop.f32.mrf.mxu3 }
 0x20c   : > { %1484 = vst.msk [vmem:[#allocation8 + $0x1b8] sm:$0xff] %vm1428_vm10, %v1311_v63 }
 0x20d   : > { %1880 = vst.msk [vmem:[#allocation9 + $0x1b8] sm:$0xff] %vm1428_vm10, %v1708_v0 }
 0x20e   : > { %v1173_v2 = vpop.f32.mrf.mxu0  ;;  %v1570_v6 = vpop.f32.mrf.mxu1 }
 0x20f   : > { %1438 = vst.msk [vmem:[#allocation8 + $0x48] sm:$0xff] %vm1428_vm10, %v1173_v2 }
 0x210   : > { %7592 = vmatmul.msk.f32.gmra.mxu2 %vm657_vm0, %v731_v1  ;;  %7698 = vmatmul.msk.f32.gmra.mxu3 %vm657_vm0, %v731_v1  ;;  %1834 = vst.msk [vmem:[#allocation9 + $0x48] sm:$0xff] %vm1428_vm10, %v1570_v6  ;;  %v691_v1 = vld [vmem:[#allocation2 + $0x100] sm:$0xff] }
 0x211   : > { %7545 = vmatmul.msk.f32.gmra.mxu0 %vm657_vm0, %v684_v8  ;;  %7651 = vmatmul.msk.f32.gmra.mxu1 %vm657_vm0, %v684_v8  ;;  %v739_v8 = vld [vmem:[#allocation2 + $0x280] sm:$0xff] }
 0x213   : > { %v1314_v22 = vpop.f32.mrf.mxu2  ;;  %v1711_v23 = vpop.f32.mrf.mxu3 }
 0x214   : > { %1485 = vst.msk [vmem:[#allocation8 + $0x1c0] sm:$0xff] %vm1428_vm10, %v1314_v22 }
 0x215   : > { %1881 = vst.msk [vmem:[#allocation9 + $0x1c0] sm:$0xff] %vm1428_vm10, %v1711_v23 }
 0x216   : > { %v1176_v25 = vpop.f32.mrf.mxu0  ;;  %v1573_v26 = vpop.f32.mrf.mxu1 }
 0x217   : > { %1439 = vst.msk [vmem:[#allocation8 + $0x50] sm:$0xff] %vm1428_vm10, %v1176_v25 }
 0x218   : > { %7593 = vmatmul.msk.f32.gmra.mxu2 %vm657_vm0, %v732_v24  ;;  %7699 = vmatmul.msk.f32.gmra.mxu3 %vm657_vm0, %v732_v24  ;;  %1835 = vst.msk [vmem:[#allocation9 + $0x50] sm:$0xff] %vm1428_vm10, %v1573_v26  ;;  %v692_v24 = vld [vmem:[#allocation2 + $0x108] sm:$0xff] }
 0x219   : > { %7546 = vmatmul.msk.f32.gmra.mxu0 %vm657_vm0, %v685_v27  ;;  %7652 = vmatmul.msk.f32.gmra.mxu1 %vm657_vm0, %v685_v27  ;;  %v740_v27 = vld [vmem:[#allocation2 + $0x288] sm:$0xff] }
 0x21b   : > { %v1317_v28 = vpop.f32.mrf.mxu2  ;;  %v1714_v29 = vpop.f32.mrf.mxu3 }
 0x21c   : > { %1486 = vst.msk [vmem:[#allocation8 + $0x1c8] sm:$0xff] %vm1428_vm10, %v1317_v28 }
 0x21d   : > { %1882 = vst.msk [vmem:[#allocation9 + $0x1c8] sm:$0xff] %vm1428_vm10, %v1714_v29 }
 0x21e   : > { %v1179_v31 = vpop.f32.mrf.mxu0  ;;  %v1576_v32 = vpop.f32.mrf.mxu1 }
 0x21f   : > { %1440 = vst.msk [vmem:[#allocation8 + $0x58] sm:$0xff] %vm1428_vm10, %v1179_v31 }
 0x220   : > { %7594 = vmatmul.msk.f32.gmra.mxu2 %vm657_vm0, %v733_v30  ;;  %7700 = vmatmul.msk.f32.gmra.mxu3 %vm657_vm0, %v733_v30  ;;  %1836 = vst.msk [vmem:[#allocation9 + $0x58] sm:$0xff] %vm1428_vm10, %v1576_v32  ;;  %v693_v30 = vld [vmem:[#allocation2 + $0x110] sm:$0xff] }
 0x221   : > { %7547 = vmatmul.msk.f32.gmra.mxu0 %vm657_vm0, %v686_v33  ;;  %7653 = vmatmul.msk.f32.gmra.mxu1 %vm657_vm0, %v686_v33  ;;  %v741_v33 = vld [vmem:[#allocation2 + $0x290] sm:$0xff] }
 0x223   : > { %v1320_v34 = vpop.f32.mrf.mxu2  ;;  %v1717_v35 = vpop.f32.mrf.mxu3 }
 0x224   : > { %1487 = vst.msk [vmem:[#allocation8 + $0x1d0] sm:$0xff] %vm1428_vm10, %v1320_v34 }
 0x225   : > { %1883 = vst.msk [vmem:[#allocation9 + $0x1d0] sm:$0xff] %vm1428_vm10, %v1717_v35 }
 0x226   : > { %v1182_v37 = vpop.f32.mrf.mxu0  ;;  %v1579_v38 = vpop.f32.mrf.mxu1 }
 0x227   : > { %1441 = vst.msk [vmem:[#allocation8 + $0x60] sm:$0xff] %vm1428_vm10, %v1182_v37 }
 0x228   : > { %7595 = vmatmul.msk.f32.gmra.mxu2 %vm657_vm0, %v734_v36  ;;  %7701 = vmatmul.msk.f32.gmra.mxu3 %vm657_vm0, %v734_v36  ;;  %1837 = vst.msk [vmem:[#allocation9 + $0x60] sm:$0xff] %vm1428_vm10, %v1579_v38  ;;  %v694_v36 = vld [vmem:[#allocation2 + $0x118] sm:$0xff] }
 0x229   : > { %7548 = vmatmul.msk.f32.gmra.mxu0 %vm657_vm0, %v687_v39  ;;  %7654 = vmatmul.msk.f32.gmra.mxu1 %vm657_vm0, %v687_v39  ;;  %v742_v39 = vld [vmem:[#allocation2 + $0x298] sm:$0xff] }
 0x22b   : > { %v1323_v40 = vpop.f32.mrf.mxu2  ;;  %v1720_v41 = vpop.f32.mrf.mxu3 }
 0x22c   : > { %1488 = vst.msk [vmem:[#allocation8 + $0x1d8] sm:$0xff] %vm1428_vm10, %v1323_v40 }
 0x22d   : > { %1884 = vst.msk [vmem:[#allocation9 + $0x1d8] sm:$0xff] %vm1428_vm10, %v1720_v41 }
 0x22e   : > { %v1185_v43 = vpop.f32.mrf.mxu0  ;;  %v1582_v44 = vpop.f32.mrf.mxu1 }
 0x22f   : > { %1442 = vst.msk [vmem:[#allocation8 + $0x68] sm:$0xff] %vm1428_vm10, %v1185_v43 }
 0x230   : > { %7596 = vmatmul.msk.f32.gmra.mxu2 %vm657_vm0, %v735_v42  ;;  %7702 = vmatmul.msk.f32.gmra.mxu3 %vm657_vm0, %v735_v42  ;;  %1838 = vst.msk [vmem:[#allocation9 + $0x68] sm:$0xff] %vm1428_vm10, %v1582_v44  ;;  %v695_v42 = vld [vmem:[#allocation2 + $0x120] sm:$0xff] }
 0x231   : > { %7549 = vmatmul.msk.f32.gmra.mxu0 %vm657_vm0, %v688_v45  ;;  %7655 = vmatmul.msk.f32.gmra.mxu1 %vm657_vm0, %v688_v45  ;;  %v743_v45 = vld [vmem:[#allocation2 + $0x2a0] sm:$0xff] }
 0x233   : > { %v1326_v46 = vpop.f32.mrf.mxu2  ;;  %v1723_v47 = vpop.f32.mrf.mxu3 }
 0x234   : > { %1489 = vst.msk [vmem:[#allocation8 + $0x1e0] sm:$0xff] %vm1428_vm10, %v1326_v46 }
 0x235   : > { %1885 = vst.msk [vmem:[#allocation9 + $0x1e0] sm:$0xff] %vm1428_vm10, %v1723_v47 }
 0x236   : > { %v1188_v49 = vpop.f32.mrf.mxu0  ;;  %v1585_v50 = vpop.f32.mrf.mxu1 }
 0x237   : > { %1443 = vst.msk [vmem:[#allocation8 + $0x70] sm:$0xff] %vm1428_vm10, %v1188_v49 }
 0x238   : > { %7597 = vmatmul.msk.f32.gmra.mxu2 %vm657_vm0, %v736_v48  ;;  %7703 = vmatmul.msk.f32.gmra.mxu3 %vm657_vm0, %v736_v48  ;;  %1839 = vst.msk [vmem:[#allocation9 + $0x70] sm:$0xff] %vm1428_vm10, %v1585_v50  ;;  %v696_v48 = vld [vmem:[#allocation2 + $0x128] sm:$0xff] }
 0x239   : > { %7550 = vmatmul.msk.f32.gmra.mxu0 %vm657_vm0, %v689_v51  ;;  %7656 = vmatmul.msk.f32.gmra.mxu1 %vm657_vm0, %v689_v51  ;;  %v744_v51 = vld [vmem:[#allocation2 + $0x2a8] sm:$0xff] }
 0x23b   : > { %v1329_v52 = vpop.f32.mrf.mxu2  ;;  %v1726_v53 = vpop.f32.mrf.mxu3 }
 0x23c   : > { %1490 = vst.msk [vmem:[#allocation8 + $0x1e8] sm:$0xff] %vm1428_vm10, %v1329_v52 }
 0x23d   : > { %1886 = vst.msk [vmem:[#allocation9 + $0x1e8] sm:$0xff] %vm1428_vm10, %v1726_v53 }
 0x23e   : > { %v1191_v55 = vpop.f32.mrf.mxu0  ;;  %v1588_v57 = vpop.f32.mrf.mxu1 }
 0x23f   : > { %1444 = vst.msk [vmem:[#allocation8 + $0x78] sm:$0xff] %vm1428_vm10, %v1191_v55 }
 0x240   : > { %7598 = vmatmul.msk.f32.gmra.mxu2 %vm657_vm0, %v737_v54  ;;  %7704 = vmatmul.msk.f32.gmra.mxu3 %vm657_vm0, %v737_v54  ;;  %1840 = vst.msk [vmem:[#allocation9 + $0x78] sm:$0xff] %vm1428_vm10, %v1588_v57  ;;  %v697_v54 = vld [vmem:[#allocation2 + $0x130] sm:$0xff] }
 0x241   : > { %7551 = vmatmul.msk.f32.gmra.mxu0 %vm657_vm0, %v690_v58  ;;  %7657 = vmatmul.msk.f32.gmra.mxu1 %vm657_vm0, %v690_v58  ;;  %v745_v58 = vld [vmem:[#allocation2 + $0x2b0] sm:$0xff] }
 0x243   : > { %v1332_v59 = vpop.f32.mrf.mxu2  ;;  %v1729_v60 = vpop.f32.mrf.mxu3 }
 0x244   : > { %1491 = vst.msk [vmem:[#allocation8 + $0x1f0] sm:$0xff] %vm1428_vm10, %v1332_v59 }
 0x245   : > { %1887 = vst.msk [vmem:[#allocation9 + $0x1f0] sm:$0xff] %vm1428_vm10, %v1729_v60 }
 0x246   : > { %v1194_v63 = vpop.f32.mrf.mxu0  ;;  %v1591_v0 = vpop.f32.mrf.mxu1 }
 0x247   : > { %1445 = vst.msk [vmem:[#allocation8 + $0x80] sm:$0xff] %vm1428_vm10, %v1194_v63 }
 0x248   : > { %7599 = vmatmul.msk.f32.gmra.mxu2 %vm657_vm0, %v738_v62  ;;  %7705 = vmatmul.msk.f32.gmra.mxu3 %vm657_vm0, %v738_v62  ;;  %1841 = vst.msk [vmem:[#allocation9 + $0x80] sm:$0xff] %vm1428_vm10, %v1591_v0  ;;  %v698_v62 = vld [vmem:[#allocation2 + $0x138] sm:$0xff] }
 0x249   : > { %7552 = vmatmul.msk.f32.gmra.mxu0 %vm657_vm0, %v691_v1  ;;  %7658 = vmatmul.msk.f32.gmra.mxu1 %vm657_vm0, %v691_v1  ;;  %v746_v1 = vld [vmem:[#allocation2 + $0x2b8] sm:$0xff] }
 0x24b   : > { %v1335_v2 = vpop.f32.mrf.mxu2  ;;  %v1732_v6 = vpop.f32.mrf.mxu3 }
 0x24c   : > { %1492 = vst.msk [vmem:[#allocation8 + $0x1f8] sm:$0xff] %vm1428_vm10, %v1335_v2 }
 0x24d   : > { %1888 = vst.msk [vmem:[#allocation9 + $0x1f8] sm:$0xff] %vm1428_vm10, %v1732_v6 }
 0x24e   : > { %v1197_v22 = vpop.f32.mrf.mxu0  ;;  %v1594_v23 = vpop.f32.mrf.mxu1 }
 0x24f   : > { %1446 = vst.msk [vmem:[#allocation8 + $0x88] sm:$0xff] %vm1428_vm10, %v1197_v22 }
 0x250   : > { %7600 = vmatmul.msk.f32.gmra.mxu2 %vm657_vm0, %v739_v8  ;;  %7706 = vmatmul.msk.f32.gmra.mxu3 %vm657_vm0, %v739_v8  ;;  %1842 = vst.msk [vmem:[#allocation9 + $0x88] sm:$0xff] %vm1428_vm10, %v1594_v23  ;;  %v699_v8 = vld [vmem:[#allocation2 + $0x140] sm:$0xff] }
 0x251   : > { %7553 = vmatmul.msk.f32.gmra.mxu0 %vm657_vm0, %v692_v24  ;;  %7659 = vmatmul.msk.f32.gmra.mxu1 %vm657_vm0, %v692_v24  ;;  %v747_v24 = vld [vmem:[#allocation2 + $0x2c0] sm:$0xff] }
 0x253   : > { %v1338_v25 = vpop.f32.mrf.mxu2  ;;  %v1735_v26 = vpop.f32.mrf.mxu3 }
 0x254   : > { %1493 = vst.msk [vmem:[#allocation8 + $0x200] sm:$0xff] %vm1428_vm10, %v1338_v25 }
 0x255   : > { %1889 = vst.msk [vmem:[#allocation9 + $0x200] sm:$0xff] %vm1428_vm10, %v1735_v26 }
 0x256   : > { %v1200_v28 = vpop.f32.mrf.mxu0  ;;  %v1597_v29 = vpop.f32.mrf.mxu1 }
 0x257   : > { %1447 = vst.msk [vmem:[#allocation8 + $0x90] sm:$0xff] %vm1428_vm10, %v1200_v28 }
 0x258   : > { %7601 = vmatmul.msk.f32.gmra.mxu2 %vm657_vm0, %v740_v27  ;;  %7707 = vmatmul.msk.f32.gmra.mxu3 %vm657_vm0, %v740_v27  ;;  %1843 = vst.msk [vmem:[#allocation9 + $0x90] sm:$0xff] %vm1428_vm10, %v1597_v29  ;;  %v700_v27 = vld [vmem:[#allocation2 + $0x148] sm:$0xff] }
 0x259   : > { %7554 = vmatmul.msk.f32.gmra.mxu0 %vm657_vm0, %v693_v30  ;;  %7660 = vmatmul.msk.f32.gmra.mxu1 %vm657_vm0, %v693_v30  ;;  %v748_v30 = vld [vmem:[#allocation2 + $0x2c8] sm:$0xff] }
 0x25b   : > { %v1341_v31 = vpop.f32.mrf.mxu2  ;;  %v1738_v32 = vpop.f32.mrf.mxu3 }
 0x25c   : > { %1494 = vst.msk [vmem:[#allocation8 + $0x208] sm:$0xff] %vm1428_vm10, %v1341_v31 }
 0x25d   : > { %1890 = vst.msk [vmem:[#allocation9 + $0x208] sm:$0xff] %vm1428_vm10, %v1738_v32 }
 0x25e   : > { %v1203_v34 = vpop.f32.mrf.mxu0  ;;  %v1600_v35 = vpop.f32.mrf.mxu1 }
 0x25f   : > { %1448 = vst.msk [vmem:[#allocation8 + $0x98] sm:$0xff] %vm1428_vm10, %v1203_v34 }
 0x260   : > { %7602 = vmatmul.msk.f32.gmra.mxu2 %vm657_vm0, %v741_v33  ;;  %7708 = vmatmul.msk.f32.gmra.mxu3 %vm657_vm0, %v741_v33  ;;  %1844 = vst.msk [vmem:[#allocation9 + $0x98] sm:$0xff] %vm1428_vm10, %v1600_v35  ;;  %v701_v33 = vld [vmem:[#allocation2 + $0x150] sm:$0xff] }
 0x261   : > { %7555 = vmatmul.msk.f32.gmra.mxu0 %vm657_vm0, %v694_v36  ;;  %7661 = vmatmul.msk.f32.gmra.mxu1 %vm657_vm0, %v694_v36  ;;  %v749_v36 = vld [vmem:[#allocation2 + $0x2d0] sm:$0xff] }
 0x263   : > { %v1344_v37 = vpop.f32.mrf.mxu2  ;;  %v1741_v38 = vpop.f32.mrf.mxu3 }
 0x264   : > { %1495 = vst.msk [vmem:[#allocation8 + $0x210] sm:$0xff] %vm1428_vm10, %v1344_v37 }
 0x265   : > { %1891 = vst.msk [vmem:[#allocation9 + $0x210] sm:$0xff] %vm1428_vm10, %v1741_v38 }
 0x266   : > { %v1206_v40 = vpop.f32.mrf.mxu0  ;;  %v1603_v41 = vpop.f32.mrf.mxu1 }
 0x267   : > { %1449 = vst.msk [vmem:[#allocation8 + $0xa0] sm:$0xff] %vm1428_vm10, %v1206_v40 }
 0x268   : > { %7603 = vmatmul.msk.f32.gmra.mxu2 %vm657_vm0, %v742_v39  ;;  %7709 = vmatmul.msk.f32.gmra.mxu3 %vm657_vm0, %v742_v39  ;;  %1845 = vst.msk [vmem:[#allocation9 + $0xa0] sm:$0xff] %vm1428_vm10, %v1603_v41  ;;  %v702_v39 = vld [vmem:[#allocation2 + $0x158] sm:$0xff] }
 0x269   : > { %7556 = vmatmul.msk.f32.gmra.mxu0 %vm657_vm0, %v695_v42  ;;  %7662 = vmatmul.msk.f32.gmra.mxu1 %vm657_vm0, %v695_v42  ;;  %v750_v42 = vld [vmem:[#allocation2 + $0x2d8] sm:$0xff] }
 0x26b   : > { %v1347_v43 = vpop.f32.mrf.mxu2  ;;  %v1744_v44 = vpop.f32.mrf.mxu3 }
 0x26c   : > { %1496 = vst.msk [vmem:[#allocation8 + $0x218] sm:$0xff] %vm1428_vm10, %v1347_v43 }
 0x26d   : > { %1892 = vst.msk [vmem:[#allocation9 + $0x218] sm:$0xff] %vm1428_vm10, %v1744_v44 }
 0x26e   : > { %v1209_v46 = vpop.f32.mrf.mxu0  ;;  %v1606_v47 = vpop.f32.mrf.mxu1 }
 0x26f   : > { %1450 = vst.msk [vmem:[#allocation8 + $0xa8] sm:$0xff] %vm1428_vm10, %v1209_v46 }
 0x270   : > { %7604 = vmatmul.msk.f32.gmra.mxu2 %vm657_vm0, %v743_v45  ;;  %7710 = vmatmul.msk.f32.gmra.mxu3 %vm657_vm0, %v743_v45  ;;  %1846 = vst.msk [vmem:[#allocation9 + $0xa8] sm:$0xff] %vm1428_vm10, %v1606_v47  ;;  %v703_v45 = vld [vmem:[#allocation2 + $0x160] sm:$0xff] }
 0x271   : > { %7557 = vmatmul.msk.f32.gmra.mxu0 %vm657_vm0, %v696_v48  ;;  %7663 = vmatmul.msk.f32.gmra.mxu1 %vm657_vm0, %v696_v48  ;;  %v751_v48 = vld [vmem:[#allocation2 + $0x2e0] sm:$0xff] }
 0x273   : > { %v1350_v49 = vpop.f32.mrf.mxu2  ;;  %v1747_v50 = vpop.f32.mrf.mxu3 }
 0x274   : > { %1497 = vst.msk [vmem:[#allocation8 + $0x220] sm:$0xff] %vm1428_vm10, %v1350_v49 }
 0x275   : > { %1893 = vst.msk [vmem:[#allocation9 + $0x220] sm:$0xff] %vm1428_vm10, %v1747_v50 }
 0x276   : > { %v1212_v52 = vpop.f32.mrf.mxu0  ;;  %v1609_v53 = vpop.f32.mrf.mxu1 }
 0x277   : > { %1451 = vst.msk [vmem:[#allocation8 + $0xb0] sm:$0xff] %vm1428_vm10, %v1212_v52 }
 0x278   : > { %7605 = vmatmul.msk.f32.gmra.mxu2 %vm657_vm0, %v744_v51  ;;  %7711 = vmatmul.msk.f32.gmra.mxu3 %vm657_vm0, %v744_v51  ;;  %1847 = vst.msk [vmem:[#allocation9 + $0xb0] sm:$0xff] %vm1428_vm10, %v1609_v53  ;;  %v704_v51 = vld [vmem:[#allocation2 + $0x168] sm:$0xff] }
 0x279   : > { %7558 = vmatmul.msk.f32.gmra.mxu0 %vm657_vm0, %v697_v54  ;;  %7664 = vmatmul.msk.f32.gmra.mxu1 %vm657_vm0, %v697_v54  ;;  %v752_v54 = vld [vmem:[#allocation2 + $0x2e8] sm:$0xff] }
 0x27b   : > { %v1353_v55 = vpop.f32.mrf.mxu2  ;;  %v1750_v57 = vpop.f32.mrf.mxu3 }
 0x27c   : > { %1498 = vst.msk [vmem:[#allocation8 + $0x228] sm:$0xff] %vm1428_vm10, %v1353_v55 }
 0x27d   : > { %1894 = vst.msk [vmem:[#allocation9 + $0x228] sm:$0xff] %vm1428_vm10, %v1750_v57 }
 0x27e   : > { %v1215_v59 = vpop.f32.mrf.mxu0  ;;  %v1612_v60 = vpop.f32.mrf.mxu1 }
 0x27f   : > { %1452 = vst.msk [vmem:[#allocation8 + $0xb8] sm:$0xff] %vm1428_vm10, %v1215_v59 }
 0x280   : > { %7606 = vmatmul.msk.f32.gmra.mxu2 %vm657_vm0, %v745_v58  ;;  %7712 = vmatmul.msk.f32.gmra.mxu3 %vm657_vm0, %v745_v58  ;;  %1848 = vst.msk [vmem:[#allocation9 + $0xb8] sm:$0xff] %vm1428_vm10, %v1612_v60  ;;  %v705_v58 = vld [vmem:[#allocation2 + $0x170] sm:$0xff] }
 0x281   : > { %7559 = vmatmul.msk.f32.gmra.mxu0 %vm657_vm0, %v698_v62  ;;  %7665 = vmatmul.msk.f32.gmra.mxu1 %vm657_vm0, %v698_v62 }
 0x283   : > { %v1356_v63 = vpop.f32.mrf.mxu2  ;;  %v1753_v0 = vpop.f32.mrf.mxu3 }
 0x284   : > { %1499 = vst.msk [vmem:[#allocation8 + $0x230] sm:$0xff] %vm1428_vm10, %v1356_v63 }
 0x285   : > { %1895 = vst.msk [vmem:[#allocation9 + $0x230] sm:$0xff] %vm1428_vm10, %v1753_v0 }
 0x286   : > { %v1218_v2 = vpop.f32.mrf.mxu0  ;;  %v1615_v6 = vpop.f32.mrf.mxu1 }
 0x287   : > { %1453 = vst.msk [vmem:[#allocation8 + $0xc0] sm:$0xff] %vm1428_vm10, %v1218_v2 }
 0x288   : > { %7607 = vmatmul.msk.f32.gmra.mxu2 %vm657_vm0, %v746_v1  ;;  %7713 = vmatmul.msk.f32.gmra.mxu3 %vm657_vm0, %v746_v1  ;;  %1849 = vst.msk [vmem:[#allocation9 + $0xc0] sm:$0xff] %vm1428_vm10, %v1615_v6 }
 0x289   : > { %7560 = vmatmul.msk.f32.gmra.mxu0 %vm657_vm0, %v699_v8  ;;  %7666 = vmatmul.msk.f32.gmra.mxu1 %vm657_vm0, %v699_v8 }
 0x28b   : > { %v1359_v22 = vpop.f32.mrf.mxu2  ;;  %v1756_v23 = vpop.f32.mrf.mxu3 }
 0x28c   : > { %1500 = vst.msk [vmem:[#allocation8 + $0x238] sm:$0xff] %vm1428_vm10, %v1359_v22 }
 0x28d   : > { %1896 = vst.msk [vmem:[#allocation9 + $0x238] sm:$0xff] %vm1428_vm10, %v1756_v23 }
 0x28e   : > { %v1221_v25 = vpop.f32.mrf.mxu0  ;;  %v1618_v26 = vpop.f32.mrf.mxu1 }
 0x28f   : > { %1454 = vst.msk [vmem:[#allocation8 + $0xc8] sm:$0xff] %vm1428_vm10, %v1221_v25 }
 0x290   : > { %7608 = vmatmul.msk.f32.gmra.mxu2 %vm657_vm0, %v747_v24  ;;  %7714 = vmatmul.msk.f32.gmra.mxu3 %vm657_vm0, %v747_v24  ;;  %1850 = vst.msk [vmem:[#allocation9 + $0xc8] sm:$0xff] %vm1428_vm10, %v1618_v26 }
 0x291   : > { %7561 = vmatmul.msk.f32.gmra.mxu0 %vm657_vm0, %v700_v27  ;;  %7667 = vmatmul.msk.f32.gmra.mxu1 %vm657_vm0, %v700_v27 }
 0x293   : > { %v1362_v28 = vpop.f32.mrf.mxu2  ;;  %v1759_v29 = vpop.f32.mrf.mxu3 }
 0x294   : > { %1501 = vst.msk [vmem:[#allocation8 + $0x240] sm:$0xff] %vm1428_vm10, %v1362_v28 }
 0x295   : > { %1897 = vst.msk [vmem:[#allocation9 + $0x240] sm:$0xff] %vm1428_vm10, %v1759_v29 }
 0x296   : > { %v1224_v31 = vpop.f32.mrf.mxu0  ;;  %v1621_v32 = vpop.f32.mrf.mxu1 }
 0x297   : > { %1455 = vst.msk [vmem:[#allocation8 + $0xd0] sm:$0xff] %vm1428_vm10, %v1224_v31 }
 0x298   : > { %7609 = vmatmul.msk.f32.gmra.mxu2 %vm657_vm0, %v748_v30  ;;  %7715 = vmatmul.msk.f32.gmra.mxu3 %vm657_vm0, %v748_v30  ;;  %1851 = vst.msk [vmem:[#allocation9 + $0xd0] sm:$0xff] %vm1428_vm10, %v1621_v32 }
 0x299   : > { %7562 = vmatmul.msk.f32.gmra.mxu0 %vm657_vm0, %v701_v33  ;;  %7668 = vmatmul.msk.f32.gmra.mxu1 %vm657_vm0, %v701_v33 }
 0x29b   : > { %v1365_v34 = vpop.f32.mrf.mxu2  ;;  %v1762_v35 = vpop.f32.mrf.mxu3 }
 0x29c   : > { %1502 = vst.msk [vmem:[#allocation8 + $0x248] sm:$0xff] %vm1428_vm10, %v1365_v34 }
 0x29d   : > { %1898 = vst.msk [vmem:[#allocation9 + $0x248] sm:$0xff] %vm1428_vm10, %v1762_v35 }
 0x29e   : > { %v1227_v37 = vpop.f32.mrf.mxu0  ;;  %v1624_v38 = vpop.f32.mrf.mxu1 }
 0x29f   : > { %1456 = vst.msk [vmem:[#allocation8 + $0xd8] sm:$0xff] %vm1428_vm10, %v1227_v37 }
 0x2a0   : > { %7610 = vmatmul.msk.f32.gmra.mxu2 %vm657_vm0, %v749_v36  ;;  %7716 = vmatmul.msk.f32.gmra.mxu3 %vm657_vm0, %v749_v36  ;;  %1852 = vst.msk [vmem:[#allocation9 + $0xd8] sm:$0xff] %vm1428_vm10, %v1624_v38 }
 0x2a1   : > { %7563 = vmatmul.msk.f32.gmra.mxu0 %vm657_vm0, %v702_v39  ;;  %7669 = vmatmul.msk.f32.gmra.mxu1 %vm657_vm0, %v702_v39 }
 0x2a3   : > { %v1368_v40 = vpop.f32.mrf.mxu2  ;;  %v1765_v41 = vpop.f32.mrf.mxu3 }
 0x2a4   : > { %1503 = vst.msk [vmem:[#allocation8 + $0x250] sm:$0xff] %vm1428_vm10, %v1368_v40 }
 0x2a5   : > { %1899 = vst.msk [vmem:[#allocation9 + $0x250] sm:$0xff] %vm1428_vm10, %v1765_v41 }
 0x2a6   : > { %v1230_v43 = vpop.f32.mrf.mxu0  ;;  %v1627_v44 = vpop.f32.mrf.mxu1 }
 0x2a7   : > { %1457 = vst.msk [vmem:[#allocation8 + $0xe0] sm:$0xff] %vm1428_vm10, %v1230_v43 }
 0x2a8   : > { %7611 = vmatmul.msk.f32.gmra.mxu2 %vm657_vm0, %v750_v42  ;;  %7717 = vmatmul.msk.f32.gmra.mxu3 %vm657_vm0, %v750_v42  ;;  %1853 = vst.msk [vmem:[#allocation9 + $0xe0] sm:$0xff] %vm1428_vm10, %v1627_v44 }
 0x2a9   : > { %7564 = vmatmul.msk.f32.gmra.mxu0 %vm657_vm0, %v703_v45  ;;  %7670 = vmatmul.msk.f32.gmra.mxu1 %vm657_vm0, %v703_v45 }
 0x2ab   : > { %v1371_v46 = vpop.f32.mrf.mxu2  ;;  %v1768_v47 = vpop.f32.mrf.mxu3 }
 0x2ac   : > { %1504 = vst.msk [vmem:[#allocation8 + $0x258] sm:$0xff] %vm1428_vm10, %v1371_v46 }
 0x2ad   : > { %1900 = vst.msk [vmem:[#allocation9 + $0x258] sm:$0xff] %vm1428_vm10, %v1768_v47 }
 0x2ae   : > { %v1233_v49 = vpop.f32.mrf.mxu0  ;;  %v1630_v50 = vpop.f32.mrf.mxu1 }
 0x2af   : > { %1458 = vst.msk [vmem:[#allocation8 + $0xe8] sm:$0xff] %vm1428_vm10, %v1233_v49 }
 0x2b0   : > { %7612 = vmatmul.msk.f32.gmra.mxu2 %vm657_vm0, %v751_v48  ;;  %7718 = vmatmul.msk.f32.gmra.mxu3 %vm657_vm0, %v751_v48  ;;  %1854 = vst.msk [vmem:[#allocation9 + $0xe8] sm:$0xff] %vm1428_vm10, %v1630_v50 }
 0x2b1   : > { %7565 = vmatmul.msk.f32.gmra.mxu0 %vm657_vm0, %v704_v51  ;;  %7671 = vmatmul.msk.f32.gmra.mxu1 %vm657_vm0, %v704_v51 }
 0x2b3   : > { %v1374_v52 = vpop.f32.mrf.mxu2  ;;  %v1771_v53 = vpop.f32.mrf.mxu3 }
 0x2b4   : > { %1505 = vst.msk [vmem:[#allocation8 + $0x260] sm:$0xff] %vm1428_vm10, %v1374_v52 }
 0x2b5   : > { %1901 = vst.msk [vmem:[#allocation9 + $0x260] sm:$0xff] %vm1428_vm10, %v1771_v53 }
 0x2b6   : > { %v1236_v55 = vpop.f32.mrf.mxu0  ;;  %v1633_v57 = vpop.f32.mrf.mxu1 }
 0x2b7   : > { %1459 = vst.msk [vmem:[#allocation8 + $0xf0] sm:$0xff] %vm1428_vm10, %v1236_v55 }
 0x2b8   : > { %7613 = vmatmul.msk.f32.gmra.mxu2 %vm657_vm0, %v752_v54  ;;  %7719 = vmatmul.msk.f32.gmra.mxu3 %vm657_vm0, %v752_v54  ;;  %1855 = vst.msk [vmem:[#allocation9 + $0xf0] sm:$0xff] %vm1428_vm10, %v1633_v57 }
 0x2b9   : > { %7566 = vmatmul.msk.f32.gmra.mxu0 %vm657_vm0, %v705_v58  ;;  %7672 = vmatmul.msk.f32.gmra.mxu1 %vm657_vm0, %v705_v58 }
 0x2bb   : > { %v1377_v59 = vpop.f32.mrf.mxu2  ;;  %v1774_v60 = vpop.f32.mrf.mxu3 }
 0x2bc   : > { %1506 = vst.msk [vmem:[#allocation8 + $0x268] sm:$0xff] %vm1428_vm10, %v1377_v59 }
 0x2bd   : > { %1902 = vst.msk [vmem:[#allocation9 + $0x268] sm:$0xff] %vm1428_vm10, %v1774_v60 }
 0x2be   : > { %v1239_v62 = vpop.f32.mrf.mxu0  ;;  %v1636_v63 = vpop.f32.mrf.mxu1 }
 0x2bf   : > { %1460 = vst.msk [vmem:[#allocation8 + $0xf8] sm:$0xff] %vm1428_vm10, %v1239_v62 }
 0x2c0   : > { %1856 = vst.msk [vmem:[#allocation9 + $0xf8] sm:$0xff] %vm1428_vm10, %v1636_v63 }
 0x2c3   : > { %v1380_v0 = vpop.f32.mrf.mxu2  ;;  %v1777_v1 = vpop.f32.mrf.mxu3 }
 0x2c4   : > { %1507 = vst.msk [vmem:[#allocation8 + $0x270] sm:$0xff] %vm1428_vm10, %v1380_v0 }
 0x2c5   : > { %1903 = vst.msk [vmem:[#allocation9 + $0x270] sm:$0xff] %vm1428_vm10, %v1777_v1  ;;  %v9868_v1 = vld [vmem:[%s13756_s4] sm:$0xff] }
 0x2c6   : > { %v1242_v2 = vpop.f32.mrf.mxu0  ;;  %v1639_v6 = vpop.f32.mrf.mxu1 }
 0x2c7   : > { %1461 = vst.msk [vmem:[#allocation8 + $0x100] sm:$0xff] %vm1428_vm10, %v1242_v2  ;;  %v9873_v2 = vld [vmem:[%s13756_s4 + $0x8] sm:$0xff] }
 0x2c8   : > { %1857 = vst.msk [vmem:[#allocation9 + $0x100] sm:$0xff] %vm1428_vm10, %v1639_v6  ;;  %v9878_v6 = vld [vmem:[%s13756_s4 + $0x10] sm:$0xff] }
 0x2cb   : > { %v1383_v8 = vpop.f32.mrf.mxu2  ;;  %v1780_v22 = vpop.f32.mrf.mxu3 }
 0x2cc   : > { %1508 = vst.msk [vmem:[#allocation8 + $0x278] sm:$0xff] %vm1428_vm10, %v1383_v8  ;;  %v9883_v8 = vld [vmem:[%s13756_s4 + $0x18] sm:$0xff] }
 0x2cd   : > { %1904 = vst.msk [vmem:[#allocation9 + $0x278] sm:$0xff] %vm1428_vm10, %v1780_v22  ;;  %v9888_v22 = vld [vmem:[%s13757_s5] sm:$0xff] }
 0x2ce   : > { %v1245_v23 = vpop.f32.mrf.mxu0  ;;  %v1642_v24 = vpop.f32.mrf.mxu1 }
 0x2cf   : > { %1462 = vst.msk [vmem:[#allocation8 + $0x108] sm:$0xff] %vm1428_vm10, %v1245_v23  ;;  %v9893_v23 = vld [vmem:[%s13757_s5 + $0x8] sm:$0xff] }
 0x2d0   : > { %1858 = vst.msk [vmem:[#allocation9 + $0x108] sm:$0xff] %vm1428_vm10, %v1642_v24 }
 0x2d3   : > { %v1386_v25 = vpop.f32.mrf.mxu2  ;;  %v1783_v26 = vpop.f32.mrf.mxu3 }
 0x2d4   : > { %1509 = vst.msk [vmem:[#allocation8 + $0x280] sm:$0xff] %vm1428_vm10, %v1386_v25 }
 0x2d5   : > { %1905 = vst.msk [vmem:[#allocation9 + $0x280] sm:$0xff] %vm1428_vm10, %v1783_v26  ;;  %v9898_v26 = vld [vmem:[%s13757_s5 + $0x10] sm:$0xff] }
 0x2d6   : > { %v1248_v27 = vpop.f32.mrf.mxu0  ;;  %v1645_v28 = vpop.f32.mrf.mxu1 }
 0x2d7   : > { %1463 = vst.msk [vmem:[#allocation8 + $0x110] sm:$0xff] %vm1428_vm10, %v1248_v27  ;;  %v9903_v27 = vld [vmem:[%s13757_s5 + $0x18] sm:$0xff] }
 0x2d8   : > { %1859 = vst.msk [vmem:[#allocation9 + $0x110] sm:$0xff] %vm1428_vm10, %v1645_v28 }
 0x2db   : > { %v1389_v29 = vpop.f32.mrf.mxu2  ;;  %v1786_v30 = vpop.f32.mrf.mxu3 }
 0x2dc   : > { %1510 = vst.msk [vmem:[#allocation8 + $0x288] sm:$0xff] %vm1428_vm10, %v1389_v29 }
 0x2dd   : > { %1906 = vst.msk [vmem:[#allocation9 + $0x288] sm:$0xff] %vm1428_vm10, %v1786_v30 }
 0x2de   : > { %v1251_v31 = vpop.f32.mrf.mxu0  ;;  %v1648_v32 = vpop.f32.mrf.mxu1 }
 0x2df   : > { %1464 = vst.msk [vmem:[#allocation8 + $0x118] sm:$0xff] %vm1428_vm10, %v1251_v31 }
 0x2e0   : > { %1860 = vst.msk [vmem:[#allocation9 + $0x118] sm:$0xff] %vm1428_vm10, %v1648_v32 }
 0x2e3   : > { %v1392_v33 = vpop.f32.mrf.mxu2  ;;  %v1789_v34 = vpop.f32.mrf.mxu3 }
 0x2e4   : > { %1511 = vst.msk [vmem:[#allocation8 + $0x290] sm:$0xff] %vm1428_vm10, %v1392_v33 }
 0x2e5   : > { %1907 = vst.msk [vmem:[#allocation9 + $0x290] sm:$0xff] %vm1428_vm10, %v1789_v34 }
 0x2e6   : > { %v1254_v35 = vpop.f32.mrf.mxu0  ;;  %v1651_v36 = vpop.f32.mrf.mxu1 }
 0x2e7   : > { %1465 = vst.msk [vmem:[#allocation8 + $0x120] sm:$0xff] %vm1428_vm10, %v1254_v35 }
 0x2e8   : > { %1861 = vst.msk [vmem:[#allocation9 + $0x120] sm:$0xff] %vm1428_vm10, %v1651_v36 }
 0x2eb   : > { %v1395_v37 = vpop.f32.mrf.mxu2  ;;  %v1792_v38 = vpop.f32.mrf.mxu3 }
 0x2ec   : > { %1512 = vst.msk [vmem:[#allocation8 + $0x298] sm:$0xff] %vm1428_vm10, %v1395_v37 }
 0x2ed   : > { %1908 = vst.msk [vmem:[#allocation9 + $0x298] sm:$0xff] %vm1428_vm10, %v1792_v38 }
 0x2ee   : > { %v1257_v39 = vpop.f32.mrf.mxu0  ;;  %v1654_v40 = vpop.f32.mrf.mxu1 }
 0x2ef   : > { %1466 = vst.msk [vmem:[#allocation8 + $0x128] sm:$0xff] %vm1428_vm10, %v1257_v39 }
 0x2f0   : > { %1862 = vst.msk [vmem:[#allocation9 + $0x128] sm:$0xff] %vm1428_vm10, %v1654_v40 }
 0x2f3   : > { %v1398_v41 = vpop.f32.mrf.mxu2  ;;  %v1795_v42 = vpop.f32.mrf.mxu3 }
 0x2f4   : > { %1513 = vst.msk [vmem:[#allocation8 + $0x2a0] sm:$0xff] %vm1428_vm10, %v1398_v41 }
 0x2f5   : > { %1909 = vst.msk [vmem:[#allocation9 + $0x2a0] sm:$0xff] %vm1428_vm10, %v1795_v42 }
 0x2f6   : > { %v1260_v43 = vpop.f32.mrf.mxu0  ;;  %v1657_v44 = vpop.f32.mrf.mxu1 }
 0x2f7   : > { %1467 = vst.msk [vmem:[#allocation8 + $0x130] sm:$0xff] %vm1428_vm10, %v1260_v43 }
 0x2f8   : > { %1863 = vst.msk [vmem:[#allocation9 + $0x130] sm:$0xff] %vm1428_vm10, %v1657_v44 }
 0x2fb   : > { %v1401_v45 = vpop.f32.mrf.mxu2  ;;  %v1798_v46 = vpop.f32.mrf.mxu3 }
 0x2fc   : > { %1514 = vst.msk [vmem:[#allocation8 + $0x2a8] sm:$0xff] %vm1428_vm10, %v1401_v45 }
 0x2fd   : > { %1910 = vst.msk [vmem:[#allocation9 + $0x2a8] sm:$0xff] %vm1428_vm10, %v1798_v46 }
 0x2fe   : > { %v1263_v47 = vpop.f32.mrf.mxu0  ;;  %v1660_v48 = vpop.f32.mrf.mxu1 }
 0x2ff   : > { %1468 = vst.msk [vmem:[#allocation8 + $0x138] sm:$0xff] %vm1428_vm10, %v1263_v47 }
 0x300   : > { %1864 = vst.msk [vmem:[#allocation9 + $0x138] sm:$0xff] %vm1428_vm10, %v1660_v48 }
 0x303   : > { %v1404_v49 = vpop.f32.mrf.mxu2  ;;  %v1801_v50 = vpop.f32.mrf.mxu3 }
 0x304   : > { %1515 = vst.msk [vmem:[#allocation8 + $0x2b0] sm:$0xff] %vm1428_vm10, %v1404_v49 }
 0x305   : > { %1911 = vst.msk [vmem:[#allocation9 + $0x2b0] sm:$0xff] %vm1428_vm10, %v1801_v50 }
 0x306   : > { %v1266_v51 = vpop.f32.mrf.mxu0  ;;  %v1663_v52 = vpop.f32.mrf.mxu1 }
 0x307   : > { %1469 = vst.msk [vmem:[#allocation8 + $0x140] sm:$0xff] %vm1428_vm10, %v1266_v51 }
 0x308   : > { %1865 = vst.msk [vmem:[#allocation9 + $0x140] sm:$0xff] %vm1428_vm10, %v1663_v52 }
 0x30b   : > { %v1407_v53 = vpop.f32.mrf.mxu2  ;;  %v1804_v54 = vpop.f32.mrf.mxu3 }
 0x30c   : > { %1516 = vst.msk [vmem:[#allocation8 + $0x2b8] sm:$0xff] %vm1428_vm10, %v1407_v53 }
 0x30d   : > { %1912 = vst.msk [vmem:[#allocation9 + $0x2b8] sm:$0xff] %vm1428_vm10, %v1804_v54 }
 0x30e   : > { %v1269_v55 = vpop.f32.mrf.mxu0  ;;  %v1666_v57 = vpop.f32.mrf.mxu1 }
 0x30f   : > { %1470 = vst.msk [vmem:[#allocation8 + $0x148] sm:$0xff] %vm1428_vm10, %v1269_v55 }
 0x310   : > { %1866 = vst.msk [vmem:[#allocation9 + $0x148] sm:$0xff] %vm1428_vm10, %v1666_v57 }
 0x313   : > { %v1410_v58 = vpop.f32.mrf.mxu2  ;;  %v1807_v59 = vpop.f32.mrf.mxu3 }
 0x314   : > { %1517 = vst.msk [vmem:[#allocation8 + $0x2c0] sm:$0xff] %vm1428_vm10, %v1410_v58 }
 0x315   : > { %1913 = vst.msk [vmem:[#allocation9 + $0x2c0] sm:$0xff] %vm1428_vm10, %v1807_v59 }
 0x316   : > { %v1272_v60 = vpop.f32.mrf.mxu0  ;;  %v1669_v62 = vpop.f32.mrf.mxu1 }
 0x317   : > { %1471 = vst.msk [vmem:[#allocation8 + $0x150] sm:$0xff] %vm1428_vm10, %v1272_v60 }
 0x318   : > { %1867 = vst.msk [vmem:[#allocation9 + $0x150] sm:$0xff] %vm1428_vm10, %v1669_v62 }
 0x31b   : > { %v1413_v63 = vpop.f32.mrf.mxu2  ;;  %v1810_v0 = vpop.f32.mrf.mxu3 }
 0x31c   : > { %1518 = vst.msk [vmem:[#allocation8 + $0x2c8] sm:$0xff] %vm1428_vm10, %v1413_v63 }
 0x31d   : > { %1914 = vst.msk [vmem:[#allocation9 + $0x2c8] sm:$0xff] %vm1428_vm10, %v1810_v0 }
 0x31e   : > { %v1275_v24 = vpop.f32.mrf.mxu0  ;;  %v1672_v25 = vpop.f32.mrf.mxu1 }
 0x31f   : > { %1472 = vst.msk [vmem:[#allocation8 + $0x158] sm:$0xff] %vm1428_vm10, %v1275_v24 }
 0x320   : > { %1868 = vst.msk [vmem:[#allocation9 + $0x158] sm:$0xff] %vm1428_vm10, %v1672_v25 }
 0x323   : > { %v1416_v28 = vpop.f32.mrf.mxu2  ;;  %v1813_v29 = vpop.f32.mrf.mxu3 }
 0x324   : > { %1519 = vst.msk [vmem:[#allocation8 + $0x2d0] sm:$0xff] %vm1428_vm10, %v1416_v28 }
 0x325   : > { %1915 = vst.msk [vmem:[#allocation9 + $0x2d0] sm:$0xff] %vm1428_vm10, %v1813_v29 }
 0x326   : > { %v1278_v30 = vpop.f32.mrf.mxu0  ;;  %v1675_v31 = vpop.f32.mrf.mxu1 }
 0x327   : > { %1473 = vst.msk [vmem:[#allocation8 + $0x160] sm:$0xff] %vm1428_vm10, %v1278_v30 }
 0x328   : > { %1869 = vst.msk [vmem:[#allocation9 + $0x160] sm:$0xff] %vm1428_vm10, %v1675_v31 }
 0x32b   : > { %v1419_v32 = vpop.f32.mrf.mxu2  ;;  %v1816_v33 = vpop.f32.mrf.mxu3 }
 0x32c   : > { %1520 = vst.msk [vmem:[#allocation8 + $0x2d8] sm:$0xff] %vm1428_vm10, %v1419_v32 }
 0x32d   : > { %1916 = vst.msk [vmem:[#allocation9 + $0x2d8] sm:$0xff] %vm1428_vm10, %v1816_v33 }
 0x32e   : > { %v1281_v34 = vpop.f32.mrf.mxu0  ;;  %v1678_v35 = vpop.f32.mrf.mxu1 }
 0x32f   : > { %1474 = vst.msk [vmem:[#allocation8 + $0x168] sm:$0xff] %vm1428_vm10, %v1281_v34 }
 0x330   : > { %1870 = vst.msk [vmem:[#allocation9 + $0x168] sm:$0xff] %vm1428_vm10, %v1678_v35 }
 0x333   : > { %v1422_v36 = vpop.f32.mrf.mxu2  ;;  %v1819_v37 = vpop.f32.mrf.mxu3 }
 0x334   : > { %1521 = vst.msk [vmem:[#allocation8 + $0x2e0] sm:$0xff] %vm1428_vm10, %v1422_v36 }
 0x335   : > { %1917 = vst.msk [vmem:[#allocation9 + $0x2e0] sm:$0xff] %vm1428_vm10, %v1819_v37 }
 0x336   : > { %v1284_v38 = vpop.f32.mrf.mxu0  ;;  %v1681_v39 = vpop.f32.mrf.mxu1 }
 0x337   : > { %1475 = vst.msk [vmem:[#allocation8 + $0x170] sm:$0xff] %vm1428_vm10, %v1284_v38 }
 0x338   : > { %1871 = vst.msk [vmem:[#allocation9 + $0x170] sm:$0xff] %vm1428_vm10, %v1681_v39 }
 0x33b   : > { %v1425_v40 = vpop.f32.mrf.mxu2  ;;  %v1822_v41 = vpop.f32.mrf.mxu3 }
 0x33c   : > { %1522 = vst.msk [vmem:[#allocation8 + $0x2e8] sm:$0xff] %vm1428_vm10, %v1425_v40 }
 0x33d   : > { %1918 = vst.msk [vmem:[#allocation9 + $0x2e8] sm:$0xff] %vm1428_vm10, %v1822_v41 }
 0x33e LB: >> { %s7720_s18 = sshll.u32 %s8995_s17, 4  ;;  %s9009_s23 = smov 127   ;;  %v9010_v62 = vmov 0   ;;  %vm2034_vm0 = vcmask 375808   ;;  %s8995_s17 = sphi %s9921_s17, %s1932_s17  }
 0x33f   : >> { %s1939_s19 = scalar_lea.vmem [#allocation9], %s7720_s18  ;;  %s1934_s20 = scalar_lea.vmem [#allocation8], %s7720_s18  ;;  %8401 = vset.pattern.permute.xlu1 %v9010_v62  ;;  %8400 = vset.pattern.permute.xlu0 %v9010_v62 }
 0x340   : >> { %8399 = vset.pattern.permute.xlu2 %v9010_v62  ;;  %s7721_s24 = sshll.u32 %s8995_s17, 3  ;;  %s1932_s17 = sadd.s32 1, %s8995_s17  }
 0x341   : >> { %1978 = vperm.xlu2 %8399, %v9888_v22   ;;  %s2033_s22 = scalar_lea.vmem [#allocation3], %s7721_s24  ;;  %p1929_p5 = scmp.ge.s32.totalorder %s1932_s17, 46  }
 0x342   : > { %vm2379_vm11 = vcmask (%p1929_p5), 187392   ;;  %s10339_s29 = smov (%p1929_p5), 0  }
 0x343   : >> { %v9933_v45 = vld [vmem:[%s1934_s20 + $0x10] sm:$0xff]  ;;  %v9935_v46 = vld [vmem:[%s1934_s20 + $0x18] sm:$0xff]  ;;  %v9943_v50 = vld [vmem:[%s1934_s20] sm:$0xff] }
 0x344   : >> { %v9927_v42 = vld [vmem:[%s1939_s19 + $0x10] sm:$0xff]  ;;  %v9929_v43 = vld [vmem:[%s1939_s19 + $0x18] sm:$0xff]  ;;  %v8389_v47 = vpack.i.bf16 %v9933_v45, %v9935_v46  ;;  %v9939_v48 = vld [vmem:[%s1939_s19] sm:$0xff] }
 0x345   : >> { %v8379_v44 = vpack.i.bf16 %v9927_v42, %v9929_v43  ;;  %v9941_v49 = vld [vmem:[%s1939_s19 + $0x8] sm:$0xff] }
 0x346   : >> { %8390 = vrot.lane.b32.xlu1 %v8389_v47, %s9009_s23  ;;  %v9945_v51 = vld [vmem:[%s1934_s20 + $0x8] sm:$0xff]  ;;  %v8384_v52 = vpack.i.bf16 %v9939_v48, %v9941_v49 }
 0x347   : >> { %8380 = vrot.lane.b32.xlu0 %v8379_v44, %s9009_s23  ;;  %v8394_v53 = vpack.i.bf16 %v9943_v50, %v9945_v51 }
 0x349   : >> { %1983 = vperm.xlu2 %8399, %v9893_v23  }
 0x34e   : >> { %8395 = vrot.lane.b32.xlu1 %v8394_v53, %s9009_s23 }
 0x34f   : >> { %8385 = vrot.lane.b32.xlu0 %v8384_v52, %s9009_s23 }
 0x356   : >> { %1993 = vperm.xlu1 %8401, %v9903_v27  }
 0x357   : >> { %1988 = vperm.xlu0 %8400, %v9898_v26  }
 0x39b   : >> { %v1979_v30 = vpop.permute.xlu2 %1978 }
 0x3a3   : >> { %v1984_v33 = vpop.permute.xlu2 %1983 }
 0x3b8   : >> { %v8391_v57 = vpop.permute.xlu1 %8390 }
 0x3b9   : >> { %v8381_v54 = vpop.permute.xlu0 %8380  ;;  %v8392_v24 = vunpack.i.l.bf16 %v8391_v57  ;;  %v8393_v25 = vunpack.i.h.bf16 %v8391_v57 }
 0x3ba   : >> { %v8382_v55 = vunpack.i.l.bf16 %v8381_v54  ;;  %v8383_v58 = vunpack.i.h.bf16 %v8381_v54 }
 0x3bc   : >> { %1996 = vmatpush.msra.mxu0 %v8382_v55  ;;  %8117 = vmatpush.msra.mxu1 %v8382_v55 }
 0x3bd   : >> { %8118 = vmatpush.msra.mxu2 %v8382_v55  ;;  %8119 = vmatpush.msra.mxu3 %v8382_v55 }
 0x3be   : >> { %1997 = vmatpush.msra.mxu0 %v8383_v58  ;;  %8120 = vmatpush.msra.mxu1 %v8383_v58 }
 0x3bf   : >> { %8121 = vmatpush.msra.mxu2 %v8383_v58  ;;  %8122 = vmatpush.msra.mxu3 %v8383_v58 }
 0x3c0   : >> { %v8396_v0 = vpop.permute.xlu1 %8395 }
 0x3c1   : >> { %v8386_v59 = vpop.permute.xlu0 %8385  ;;  %v8397_v28 = vunpack.i.l.bf16 %v8396_v0  ;;  %v8398_v29 = vunpack.i.h.bf16 %v8396_v0 }
 0x3c2   : >> { %v8387_v60 = vunpack.i.l.bf16 %v8386_v59  ;;  %v8388_v63 = vunpack.i.h.bf16 %v8386_v59 }
 0x3c4   : >> { %1998 = vmatpush.msra.mxu0 %v8387_v60  ;;  %8123 = vmatpush.msra.mxu1 %v8387_v60 }
 0x3c5   : >> { %8124 = vmatpush.msra.mxu2 %v8387_v60  ;;  %8125 = vmatpush.msra.mxu3 %v8387_v60 }
 0x3c6   : >> { %1999 = vmatpush.msra.mxu0 %v8388_v63  ;;  %8126 = vmatpush.msra.mxu1 %v8388_v63 }
 0x3c7   : >> { %8127 = vmatpush.msra.mxu2 %v8388_v63  ;;  %8128 = vmatpush.msra.mxu3 %v8388_v63 }
 0x3c8   : >> { %2000 = vmatpush.msra.mxu0 %v8392_v24  ;;  %8129 = vmatpush.msra.mxu1 %v8392_v24  ;;  %v1994_v37 = vpop.permute.xlu1 %1993 }
 0x3c9   : >> { %8130 = vmatpush.msra.mxu2 %v8392_v24  ;;  %8131 = vmatpush.msra.mxu3 %v8392_v24  ;;  %v1989_v36 = vpop.permute.xlu0 %1988 }
 0x3ca   : >> { %2001 = vmatpush.msra.mxu0 %v8393_v25  ;;  %8132 = vmatpush.msra.mxu1 %v8393_v25 }
 0x3cb   : >> { %8133 = vmatpush.msra.mxu2 %v8393_v25  ;;  %8134 = vmatpush.msra.mxu3 %v8393_v25 }
 0x3cc   : >> { %2002 = vmatpush.msra.mxu0 %v8397_v28  ;;  %8135 = vmatpush.msra.mxu1 %v8397_v28 }
 0x3cd   : >> { %8136 = vmatpush.msra.mxu2 %v8397_v28  ;;  %8137 = vmatpush.msra.mxu3 %v8397_v28 }
 0x3ce   : >> { %2003 = vmatpush.msra.mxu0 %v8398_v29  ;;  %8138 = vmatpush.msra.mxu1 %v8398_v29 }
 0x3cf   : >> { %8139 = vmatpush.msra.mxu2 %v8398_v29  ;;  %8140 = vmatpush.msra.mxu3 %v8398_v29 }
 0x3d0   : >> { %2004 = vmatpush.msra.mxu0 %v9929_v43  ;;  %8141 = vmatpush.msra.mxu1 %v9929_v43 }
 0x3d1   : >> { %8142 = vmatpush.msra.mxu2 %v9929_v43  ;;  %8143 = vmatpush.msra.mxu3 %v9929_v43 }
 0x3d2   : >> { %2005 = vmatpush.msra.mxu0 %v9927_v42  ;;  %8144 = vmatpush.msra.mxu1 %v9927_v42 }
 0x3d3   : >> { %8145 = vmatpush.msra.mxu2 %v9927_v42  ;;  %8146 = vmatpush.msra.mxu3 %v9927_v42 }
 0x3d4   : >> { %2006 = vmatpush.msra.mxu0 %v9941_v49  ;;  %8147 = vmatpush.msra.mxu1 %v9941_v49 }
 0x3d5   : >> { %8148 = vmatpush.msra.mxu2 %v9941_v49  ;;  %8149 = vmatpush.msra.mxu3 %v9941_v49 }
 0x3d6   : >> { %2007 = vmatpush.msra.mxu0 %v9939_v48  ;;  %8150 = vmatpush.msra.mxu1 %v9939_v48 }
 0x3d7   : >> { %8151 = vmatpush.msra.mxu2 %v9939_v48  ;;  %8152 = vmatpush.msra.mxu3 %v9939_v48 }
 0x3d8   : >> { %2008 = vmatpush.msra.mxu0 %v9935_v46  ;;  %8153 = vmatpush.msra.mxu1 %v9935_v46 }
 0x3d9   : >> { %8154 = vmatpush.msra.mxu2 %v9935_v46  ;;  %8155 = vmatpush.msra.mxu3 %v9935_v46 }
 0x3da   : >> { %2009 = vmatpush.msra.mxu0 %v9933_v45  ;;  %8156 = vmatpush.msra.mxu1 %v9933_v45 }
 0x3db   : >> { %8157 = vmatpush.msra.mxu2 %v9933_v45  ;;  %8158 = vmatpush.msra.mxu3 %v9933_v45 }
 0x3dc   : >> { %2010 = vmatpush.msra.mxu0 %v9945_v51  ;;  %8159 = vmatpush.msra.mxu1 %v9945_v51 }
 0x3dd   : >> { %8160 = vmatpush.msra.mxu2 %v9945_v51  ;;  %8161 = vmatpush.msra.mxu3 %v9945_v51 }
 0x3de   : >> { %2011 = vmatpush.msra.mxu0 %v9943_v50  ;;  %8162 = vmatpush.msra.mxu1 %v9943_v50 }
 0x3df   : >> { %8163 = vmatpush.msra.mxu2 %v9943_v50  ;;  %8164 = vmatpush.msra.mxu3 %v9943_v50 }
 0x3e0   : >> { %2012 = vmatmul.f32.vlgmr.msra.gmra.mxu0 %v9868_v1  ;;  %2015 = vmatmul.f32.vlgmr.msra.gmra.mxu1 %v9873_v2 }
 0x3e1   : >> { %2018 = vmatmul.f32.vlgmr.msra.gmra.mxu2 %v9878_v6  ;;  %2021 = vmatmul.f32.vlgmr.msra.gmra.mxu3 %v9883_v8 }
 0x3e2   : > { %8165 = vmatpush.msk.msra.mxu2 (%p1929_p5), %vm1125_vm1, %v9290_v4  ;;  %8171 = vmatpush.msk.msra.mxu3 (%p1929_p5), %vm1125_vm1, %v9295_v5 }
 0x3e3   : > { %7722 = vmatpush.msk.msra.mxu0 (%p1929_p5), %vm1125_vm1, %v9290_v4  ;;  %7774 = vmatpush.msk.msra.mxu1 (%p1929_p5), %vm1125_vm1, %v9295_v5 }
 0x3e4   : > { %8166 = vmatpush.msk.msra.mxu2 (%p1929_p5), %vm773_vm12, %v13769_v3  ;;  %8172 = vmatpush.msk.msra.mxu3 (%p1929_p5), %vm810_vm8, %v13769_v3 }
 0x3e5   : > { %7723 = vmatpush.msk.msra.mxu0 (%p1929_p5), %vm773_vm12, %v13769_v3  ;;  %7775 = vmatpush.msk.msra.mxu1 (%p1929_p5), %vm810_vm8, %v13769_v3 }
 0x3e6   : > { %8167 = vmatpush.msk.msra.mxu2 (%p1929_p5), %vm772_vm13, %v13769_v3  ;;  %8173 = vmatpush.msk.msra.mxu3 (%p1929_p5), %vm809_vm9, %v13769_v3 }
 0x3e7   : > { %7724 = vmatpush.msk.msra.mxu0 (%p1929_p5), %vm772_vm13, %v13769_v3  ;;  %7776 = vmatpush.msk.msra.mxu1 (%p1929_p5), %vm809_vm9, %v13769_v3 }
 0x3e8   : > { %8168 = vmatpush.msk.msra.mxu2 (%p1929_p5), %vm9322_vm15, %v13769_v3  ;;  %8174 = vmatpush.msk.msra.mxu3 (%p1929_p5), %vm9327_vm2, %v13769_v3 }
 0x3e9   : > { %7725 = vmatpush.msk.msra.mxu0 (%p1929_p5), %vm9322_vm15, %v13769_v3  ;;  %7777 = vmatpush.msk.msra.mxu1 (%p1929_p5), %vm9327_vm2, %v13769_v3 }
 0x3ea   : > { %8169 = vmatpush.msk.msra.mxu2 (%p1929_p5), %vm9356_vm4, %v13769_v3  ;;  %8175 = vmatpush.msk.msra.mxu3 (%p1929_p5), %vm9361_vm5, %v13769_v3 }
 0x3eb   : > { %7726 = vmatpush.msk.msra.mxu0 (%p1929_p5), %vm9356_vm4, %v13769_v3  ;;  %7778 = vmatpush.msk.msra.mxu1 (%p1929_p5), %vm9361_vm5, %v13769_v3 }
 0x3ec   : > { %8170 = vmatpush.msk.msra.mxu2 (%p1929_p5), %vm9311_vm14, %v13769_v3  ;;  %8176 = vmatpush.msk.msra.mxu3 (%p1929_p5), %vm9337_vm3, %v13769_v3 }
 0x3ed   : > { %7727 = vmatpush.msk.msra.mxu0 (%p1929_p5), %vm9311_vm14, %v13769_v3  ;;  %7779 = vmatpush.msk.msra.mxu1 (%p1929_p5), %vm9337_vm3, %v13769_v3 }
 0x45d   : >> { %v2013_v31 = vpop.f32.mrf.mxu0  ;;  %v2016_v32 = vpop.f32.mrf.mxu1 }
 0x45e   : >> { %v2014_v34 = vadd.f32 %v2013_v31, %v1979_v30  ;;  %v2017_v35 = vadd.f32 %v2016_v32, %v1984_v33 }
 0x460   : >> { %v2025_v40 = vmax.f32 %v2014_v34, 0.0  ;;  %v2026_v41 = vmax.f32 %v2017_v35, 0.0 }
 0x462   : >> { %v2029_v46 = vmax.f32 %v2025_v40, %v2026_v41 }
 0x464   : >> { %v2019_v38 = vpop.f32.mrf.mxu2  ;;  %v2022_v39 = vpop.f32.mrf.mxu3 }
 0x465   : >> { %v2020_v42 = vadd.f32 %v2019_v38, %v1989_v36  ;;  %v2023_v43 = vadd.f32 %v2022_v39, %v1994_v37 }
 0x467   : >> { %v2027_v44 = vmax.f32 %v2020_v42, 0.0  ;;  %v2028_v45 = vmax.f32 %v2023_v43, 0.0 }
 0x469   : >> { %v2030_v47 = vmax.f32 %v2027_v44, %v2028_v45  ;;  %1931 = sbr.rel (!%p1929_p5) target bundleno = 830 (0x33e), region = 177 }
 0x46b   : >> { %v2031_v48 = vmax.f32 %v2029_v46, %v2030_v47 }
 0x46d   : >> { %2035 = vst.msk [vmem:[%s2033_s22] sm:$0xff] %vm2034_vm0, %v2031_v48 }
 0x474   : > { %v2059_v56 = vld [vmem:[#allocation3 + $0xb8] sm:$0xff]  ;;  %v2036_v61 = vld [vmem:[#allocation3] sm:$0xff]  ;;  %v2037_v5 = vld [vmem:[#allocation3 + $0x8] sm:$0xff] }
 0x475   : > { %7751 = vmatmul.msk.f32.vlgmr.msra.gmra.mxu2 %vm2034_vm0, %v2059_v56  ;;  %7803 = vmatmul.msk.f32.vlgmr.msra.gmra.mxu3 %vm2034_vm0, %v2059_v56  ;;  %v2060_v4 = vld [vmem:[#allocation3 + $0xc0] sm:$0xff]  ;;  %v2061_v7 = vld [vmem:[#allocation3 + $0xc8] sm:$0xff]  ;;  %v2038_v10 = vld [vmem:[#allocation3 + $0x10] sm:$0xff] }
 0x476   : > { %7728 = vmatmul.msk.f32.vlgmr.msra.gmra.mxu0 %vm2034_vm0, %v2036_v61  ;;  %7780 = vmatmul.msk.f32.vlgmr.msra.gmra.mxu1 %vm2034_vm0, %v2036_v61  ;;  %v2062_v11 = vld [vmem:[#allocation3 + $0xd0] sm:$0xff]  ;;  %v2039_v21 = vld [vmem:[#allocation3 + $0x18] sm:$0xff]  ;;  %v2040_v2 = vld [vmem:[#allocation3 + $0x20] sm:$0xff] }
 0x477   : > { %v2063_v1 = vld [vmem:[#allocation3 + $0xd8] sm:$0xff]  ;;  %v2064_v6 = vld [vmem:[#allocation3 + $0xe0] sm:$0xff]  ;;  %v2041_v8 = vld [vmem:[#allocation3 + $0x28] sm:$0xff] }
 0x478   : > { %v2065_v22 = vld [vmem:[#allocation3 + $0xe8] sm:$0xff]  ;;  %v2042_v23 = vld [vmem:[#allocation3 + $0x30] sm:$0xff]  ;;  %v2043_v27 = vld [vmem:[#allocation3 + $0x38] sm:$0xff] }
 0x479   : > { %v2066_v26 = vld [vmem:[#allocation3 + $0xf0] sm:$0xff]  ;;  %v2067_v49 = vld [vmem:[#allocation3 + $0xf8] sm:$0xff]  ;;  %v2044_v50 = vld [vmem:[#allocation3 + $0x40] sm:$0xff] }
 0x47a   : > { %v2068_v51 = vld [vmem:[#allocation3 + $0x100] sm:$0xff]  ;;  %v2045_v52 = vld [vmem:[#allocation3 + $0x48] sm:$0xff]  ;;  %v2046_v54 = vld [vmem:[#allocation3 + $0x50] sm:$0xff] }
 0x47b   : > { %v2069_v53 = vld [vmem:[#allocation3 + $0x108] sm:$0xff]  ;;  %v2070_v55 = vld [vmem:[#allocation3 + $0x110] sm:$0xff]  ;;  %v2047_v57 = vld [vmem:[#allocation3 + $0x58] sm:$0xff] }
 0x47c   : > { %v2071_v58 = vld [vmem:[#allocation3 + $0x118] sm:$0xff]  ;;  %v2048_v59 = vld [vmem:[#allocation3 + $0x60] sm:$0xff]  ;;  %v2049_v62 = vld [vmem:[#allocation3 + $0x68] sm:$0xff] }
 0x47d   : > { %7752 = vmatmul.msk.f32.gmra.mxu2 %vm2034_vm0, %v2060_v4  ;;  %7804 = vmatmul.msk.f32.gmra.mxu3 %vm2034_vm0, %v2060_v4  ;;  %v2072_v60 = vld [vmem:[#allocation3 + $0x120] sm:$0xff]  ;;  %v2073_v63 = vld [vmem:[#allocation3 + $0x128] sm:$0xff]  ;;  %v2050_v0 = vld [vmem:[#allocation3 + $0x70] sm:$0xff] }
 0x47e   : > { %7729 = vmatmul.msk.f32.gmra.mxu0 %vm2034_vm0, %v2037_v5  ;;  %7781 = vmatmul.msk.f32.gmra.mxu1 %vm2034_vm0, %v2037_v5  ;;  %v2074_v24 = vld [vmem:[#allocation3 + $0x130] sm:$0xff]  ;;  %v2051_v25 = vld [vmem:[#allocation3 + $0x78] sm:$0xff]  ;;  %v2052_v31 = vld [vmem:[#allocation3 + $0x80] sm:$0xff] }
 0x47f   : > { %v2075_v28 = vld [vmem:[#allocation3 + $0x138] sm:$0xff]  ;;  %v2076_v34 = vld [vmem:[#allocation3 + $0x140] sm:$0xff]  ;;  %v2053_v37 = vld [vmem:[#allocation3 + $0x88] sm:$0xff] }
 0x480   : > { %v2077_v40 = vld [vmem:[#allocation3 + $0x148] sm:$0xff]  ;;  %v2054_v43 = vld [vmem:[#allocation3 + $0x90] sm:$0xff]  ;;  %v2055_v56 = vld [vmem:[#allocation3 + $0x98] sm:$0xff] }
 0x481   : > { %v2078_v46 = vld [vmem:[#allocation3 + $0x150] sm:$0xff]  ;;  %v2079_v5 = vld [vmem:[#allocation3 + $0x158] sm:$0xff] }
 0x485   : > { %7753 = vmatmul.msk.f32.gmra.mxu2 %vm2034_vm0, %v2061_v7  ;;  %7805 = vmatmul.msk.f32.gmra.mxu3 %vm2034_vm0, %v2061_v7 }
 0x486   : > { %7730 = vmatmul.msk.f32.gmra.mxu0 %vm2034_vm0, %v2038_v10  ;;  %7782 = vmatmul.msk.f32.gmra.mxu1 %vm2034_vm0, %v2038_v10 }
 0x48d   : > { %7754 = vmatmul.msk.f32.gmra.mxu2 %vm2034_vm0, %v2062_v11  ;;  %7806 = vmatmul.msk.f32.gmra.mxu3 %vm2034_vm0, %v2062_v11  ;;  %v2056_v11 = vld [vmem:[#allocation3 + $0xa0] sm:$0xff] }
 0x48e   : > { %7731 = vmatmul.msk.f32.gmra.mxu0 %vm2034_vm0, %v2039_v21  ;;  %7783 = vmatmul.msk.f32.gmra.mxu1 %vm2034_vm0, %v2039_v21 }
 0x495   : > { %7755 = vmatmul.msk.f32.gmra.mxu2 %vm2034_vm0, %v2063_v1  ;;  %7807 = vmatmul.msk.f32.gmra.mxu3 %vm2034_vm0, %v2063_v1 }
 0x496   : > { %7732 = vmatmul.msk.f32.gmra.mxu0 %vm2034_vm0, %v2040_v2  ;;  %7784 = vmatmul.msk.f32.gmra.mxu1 %vm2034_vm0, %v2040_v2  ;;  %v2080_v2 = vld [vmem:[#allocation3 + $0x160] sm:$0xff] }
 0x49d   : > { %7756 = vmatmul.msk.f32.gmra.mxu2 %vm2034_vm0, %v2064_v6  ;;  %7808 = vmatmul.msk.f32.gmra.mxu3 %vm2034_vm0, %v2064_v6 }
 0x49e   : > { %7733 = vmatmul.msk.f32.gmra.mxu0 %vm2034_vm0, %v2041_v8  ;;  %7785 = vmatmul.msk.f32.gmra.mxu1 %vm2034_vm0, %v2041_v8 }
 0x4a5   : > { %7757 = vmatmul.msk.f32.gmra.mxu2 %vm2034_vm0, %v2065_v22  ;;  %7809 = vmatmul.msk.f32.gmra.mxu3 %vm2034_vm0, %v2065_v22  ;;  %v2057_v22 = vld [vmem:[#allocation3 + $0xa8] sm:$0xff] }
 0x4a6   : > { %7734 = vmatmul.msk.f32.gmra.mxu0 %vm2034_vm0, %v2042_v23  ;;  %7786 = vmatmul.msk.f32.gmra.mxu1 %vm2034_vm0, %v2042_v23 }
 0x4ad   : > { %7758 = vmatmul.msk.f32.gmra.mxu2 %vm2034_vm0, %v2066_v26  ;;  %7810 = vmatmul.msk.f32.gmra.mxu3 %vm2034_vm0, %v2066_v26 }
 0x4ae   : > { %7735 = vmatmul.msk.f32.gmra.mxu0 %vm2034_vm0, %v2043_v27  ;;  %7787 = vmatmul.msk.f32.gmra.mxu1 %vm2034_vm0, %v2043_v27  ;;  %v2081_v27 = vld [vmem:[#allocation3 + $0x168] sm:$0xff] }
 0x4b5   : > { %7759 = vmatmul.msk.f32.gmra.mxu2 %vm2034_vm0, %v2067_v49  ;;  %7811 = vmatmul.msk.f32.gmra.mxu3 %vm2034_vm0, %v2067_v49 }
 0x4b6   : > { %7736 = vmatmul.msk.f32.gmra.mxu0 %vm2034_vm0, %v2044_v50  ;;  %7788 = vmatmul.msk.f32.gmra.mxu1 %vm2034_vm0, %v2044_v50 }
 0x4bd   : > { %7760 = vmatmul.msk.f32.gmra.mxu2 %vm2034_vm0, %v2068_v51  ;;  %7812 = vmatmul.msk.f32.gmra.mxu3 %vm2034_vm0, %v2068_v51  ;;  %v2058_v51 = vld [vmem:[#allocation3 + $0xb0] sm:$0xff] }
 0x4be   : > { %7737 = vmatmul.msk.f32.gmra.mxu0 %vm2034_vm0, %v2045_v52  ;;  %7789 = vmatmul.msk.f32.gmra.mxu1 %vm2034_vm0, %v2045_v52 }
 0x4c5   : > { %7761 = vmatmul.msk.f32.gmra.mxu2 %vm2034_vm0, %v2069_v53  ;;  %7813 = vmatmul.msk.f32.gmra.mxu3 %vm2034_vm0, %v2069_v53 }
 0x4c6   : > { %7738 = vmatmul.msk.f32.gmra.mxu0 %vm2034_vm0, %v2046_v54  ;;  %7790 = vmatmul.msk.f32.gmra.mxu1 %vm2034_vm0, %v2046_v54 }
 0x4cd   : > { %7762 = vmatmul.msk.f32.gmra.mxu2 %vm2034_vm0, %v2070_v55  ;;  %7814 = vmatmul.msk.f32.gmra.mxu3 %vm2034_vm0, %v2070_v55 }
 0x4ce   : > { %7739 = vmatmul.msk.f32.gmra.mxu0 %vm2034_vm0, %v2047_v57  ;;  %7791 = vmatmul.msk.f32.gmra.mxu1 %vm2034_vm0, %v2047_v57 }
 0x4d5   : > { %7763 = vmatmul.msk.f32.gmra.mxu2 %vm2034_vm0, %v2071_v58  ;;  %7815 = vmatmul.msk.f32.gmra.mxu3 %vm2034_vm0, %v2071_v58 }
 0x4d6   : > { %7740 = vmatmul.msk.f32.gmra.mxu0 %vm2034_vm0, %v2048_v59  ;;  %7792 = vmatmul.msk.f32.gmra.mxu1 %vm2034_vm0, %v2048_v59 }
 0x4dd   : > { %7764 = vmatmul.msk.f32.gmra.mxu2 %vm2034_vm0, %v2072_v60  ;;  %7816 = vmatmul.msk.f32.gmra.mxu3 %vm2034_vm0, %v2072_v60 }
 0x4de   : > { %7741 = vmatmul.msk.f32.gmra.mxu0 %vm2034_vm0, %v2049_v62  ;;  %7793 = vmatmul.msk.f32.gmra.mxu1 %vm2034_vm0, %v2049_v62 }
 0x4e5   : > { %7765 = vmatmul.msk.f32.gmra.mxu2 %vm2034_vm0, %v2073_v63  ;;  %7817 = vmatmul.msk.f32.gmra.mxu3 %vm2034_vm0, %v2073_v63 }
 0x4e6   : > { %7742 = vmatmul.msk.f32.gmra.mxu0 %vm2034_vm0, %v2050_v0  ;;  %7794 = vmatmul.msk.f32.gmra.mxu1 %vm2034_vm0, %v2050_v0 }
 0x4ed   : > { %7766 = vmatmul.msk.f32.gmra.mxu2 %vm2034_vm0, %v2074_v24  ;;  %7818 = vmatmul.msk.f32.gmra.mxu3 %vm2034_vm0, %v2074_v24 }
 0x4ee   : > { %7743 = vmatmul.msk.f32.gmra.mxu0 %vm2034_vm0, %v2051_v25  ;;  %7795 = vmatmul.msk.f32.gmra.mxu1 %vm2034_vm0, %v2051_v25 }
 0x4f3   : > { %v2241_v29 = vpop.f32.mrf.mxu0  ;;  %v2446_v30 = vpop.f32.mrf.mxu1 }
 0x4f4   : > { %2380 = vst.msk [vmem:[#allocation10] sm:$0xff] %vm2379_vm11, %v2241_v29 }
 0x4f5   : > { %7767 = vmatmul.msk.f32.gmra.mxu2 %vm2034_vm0, %v2075_v28  ;;  %7819 = vmatmul.msk.f32.gmra.mxu3 %vm2034_vm0, %v2075_v28  ;;  %2584 = vst.msk [vmem:[#allocation11] sm:$0xff] %vm2379_vm11, %v2446_v30 }
 0x4f6   : > { %7744 = vmatmul.msk.f32.gmra.mxu0 %vm2034_vm0, %v2052_v31  ;;  %7796 = vmatmul.msk.f32.gmra.mxu1 %vm2034_vm0, %v2052_v31 }
 0x4f8   : > { %v2310_v32 = vpop.f32.mrf.mxu2  ;;  %v2515_v33 = vpop.f32.mrf.mxu3 }
 0x4f9   : > { %2403 = vst.msk [vmem:[#allocation10 + $0xb8] sm:$0xff] %vm2379_vm11, %v2310_v32 }
 0x4fa   : > { %2607 = vst.msk [vmem:[#allocation11 + $0xb8] sm:$0xff] %vm2379_vm11, %v2515_v33 }
 0x4fb   : > { %v2244_v35 = vpop.f32.mrf.mxu0  ;;  %v2449_v36 = vpop.f32.mrf.mxu1 }
 0x4fc   : > { %2381 = vst.msk [vmem:[#allocation10 + $0x8] sm:$0xff] %vm2379_vm11, %v2244_v35 }
 0x4fd   : > { %7768 = vmatmul.msk.f32.gmra.mxu2 %vm2034_vm0, %v2076_v34  ;;  %7820 = vmatmul.msk.f32.gmra.mxu3 %vm2034_vm0, %v2076_v34  ;;  %2585 = vst.msk [vmem:[#allocation11 + $0x8] sm:$0xff] %vm2379_vm11, %v2449_v36 }
 0x4fe   : > { %7745 = vmatmul.msk.f32.gmra.mxu0 %vm2034_vm0, %v2053_v37  ;;  %7797 = vmatmul.msk.f32.gmra.mxu1 %vm2034_vm0, %v2053_v37 }
 0x500   : > { %v2313_v38 = vpop.f32.mrf.mxu2  ;;  %v2518_v39 = vpop.f32.mrf.mxu3 }
 0x501   : > { %2404 = vst.msk [vmem:[#allocation10 + $0xc0] sm:$0xff] %vm2379_vm11, %v2313_v38 }
 0x502   : > { %2608 = vst.msk [vmem:[#allocation11 + $0xc0] sm:$0xff] %vm2379_vm11, %v2518_v39 }
 0x503   : > { %v2247_v41 = vpop.f32.mrf.mxu0  ;;  %v2452_v42 = vpop.f32.mrf.mxu1 }
 0x504   : > { %2382 = vst.msk [vmem:[#allocation10 + $0x10] sm:$0xff] %vm2379_vm11, %v2247_v41 }
 0x505   : > { %7769 = vmatmul.msk.f32.gmra.mxu2 %vm2034_vm0, %v2077_v40  ;;  %7821 = vmatmul.msk.f32.gmra.mxu3 %vm2034_vm0, %v2077_v40  ;;  %2586 = vst.msk [vmem:[#allocation11 + $0x10] sm:$0xff] %vm2379_vm11, %v2452_v42 }
 0x506   : > { %7746 = vmatmul.msk.f32.gmra.mxu0 %vm2034_vm0, %v2054_v43  ;;  %7798 = vmatmul.msk.f32.gmra.mxu1 %vm2034_vm0, %v2054_v43 }
 0x508   : > { %v2316_v44 = vpop.f32.mrf.mxu2  ;;  %v2521_v45 = vpop.f32.mrf.mxu3 }
 0x509   : > { %2405 = vst.msk [vmem:[#allocation10 + $0xc8] sm:$0xff] %vm2379_vm11, %v2316_v44 }
 0x50a   : > { %2609 = vst.msk [vmem:[#allocation11 + $0xc8] sm:$0xff] %vm2379_vm11, %v2521_v45 }
 0x50b   : > { %v2250_v47 = vpop.f32.mrf.mxu0  ;;  %v2455_v48 = vpop.f32.mrf.mxu1 }
 0x50c   : > { %2383 = vst.msk [vmem:[#allocation10 + $0x18] sm:$0xff] %vm2379_vm11, %v2250_v47 }
 0x50d   : > { %7770 = vmatmul.msk.f32.gmra.mxu2 %vm2034_vm0, %v2078_v46  ;;  %7822 = vmatmul.msk.f32.gmra.mxu3 %vm2034_vm0, %v2078_v46  ;;  %2587 = vst.msk [vmem:[#allocation11 + $0x18] sm:$0xff] %vm2379_vm11, %v2455_v48 }
 0x50e   : > { %7747 = vmatmul.msk.f32.gmra.mxu0 %vm2034_vm0, %v2055_v56  ;;  %7799 = vmatmul.msk.f32.gmra.mxu1 %vm2034_vm0, %v2055_v56 }
 0x510   : > { %v2319_v61 = vpop.f32.mrf.mxu2  ;;  %v2524_v4 = vpop.f32.mrf.mxu3 }
 0x511   : > { %2406 = vst.msk [vmem:[#allocation10 + $0xd0] sm:$0xff] %vm2379_vm11, %v2319_v61 }
 0x512   : > { %2610 = vst.msk [vmem:[#allocation11 + $0xd0] sm:$0xff] %vm2379_vm11, %v2524_v4 }
 0x513   : > { %v2253_v7 = vpop.f32.mrf.mxu0  ;;  %v2458_v10 = vpop.f32.mrf.mxu1 }
 0x514   : > { %2384 = vst.msk [vmem:[#allocation10 + $0x20] sm:$0xff] %vm2379_vm11, %v2253_v7 }
 0x515   : > { %7771 = vmatmul.msk.f32.gmra.mxu2 %vm2034_vm0, %v2079_v5  ;;  %7823 = vmatmul.msk.f32.gmra.mxu3 %vm2034_vm0, %v2079_v5  ;;  %2588 = vst.msk [vmem:[#allocation11 + $0x20] sm:$0xff] %vm2379_vm11, %v2458_v10 }
 0x516   : > { %7748 = vmatmul.msk.f32.gmra.mxu0 %vm2034_vm0, %v2056_v11  ;;  %7800 = vmatmul.msk.f32.gmra.mxu1 %vm2034_vm0, %v2056_v11 }
 0x518   : > { %v2322_v21 = vpop.f32.mrf.mxu2  ;;  %v2527_v1 = vpop.f32.mrf.mxu3 }
 0x519   : > { %2407 = vst.msk [vmem:[#allocation10 + $0xd8] sm:$0xff] %vm2379_vm11, %v2322_v21 }
 0x51a   : > { %2611 = vst.msk [vmem:[#allocation11 + $0xd8] sm:$0xff] %vm2379_vm11, %v2527_v1 }
 0x51b   : > { %v2256_v6 = vpop.f32.mrf.mxu0  ;;  %v2461_v8 = vpop.f32.mrf.mxu1 }
 0x51c   : > { %2385 = vst.msk [vmem:[#allocation10 + $0x28] sm:$0xff] %vm2379_vm11, %v2256_v6 }
 0x51d   : > { %7772 = vmatmul.msk.f32.gmra.mxu2 %vm2034_vm0, %v2080_v2  ;;  %7824 = vmatmul.msk.f32.gmra.mxu3 %vm2034_vm0, %v2080_v2  ;;  %2589 = vst.msk [vmem:[#allocation11 + $0x28] sm:$0xff] %vm2379_vm11, %v2461_v8 }
 0x51e   : > { %7749 = vmatmul.msk.f32.gmra.mxu0 %vm2034_vm0, %v2057_v22  ;;  %7801 = vmatmul.msk.f32.gmra.mxu1 %vm2034_vm0, %v2057_v22 }
 0x520   : > { %v2325_v23 = vpop.f32.mrf.mxu2  ;;  %v2530_v26 = vpop.f32.mrf.mxu3 }
 0x521   : > { %2408 = vst.msk [vmem:[#allocation10 + $0xe0] sm:$0xff] %vm2379_vm11, %v2325_v23 }
 0x522   : > { %2612 = vst.msk [vmem:[#allocation11 + $0xe0] sm:$0xff] %vm2379_vm11, %v2530_v26 }
 0x523   : > { %v2259_v49 = vpop.f32.mrf.mxu0  ;;  %v2464_v50 = vpop.f32.mrf.mxu1 }
 0x524   : > { %2386 = vst.msk [vmem:[#allocation10 + $0x30] sm:$0xff] %vm2379_vm11, %v2259_v49  ;;  %v10246_v49 = vld [vmem:[%s13758_s6] sm:$0xff] }
 0x525   : > { %7773 = vmatmul.msk.f32.gmra.mxu2 %vm2034_vm0, %v2081_v27  ;;  %7825 = vmatmul.msk.f32.gmra.mxu3 %vm2034_vm0, %v2081_v27  ;;  %2590 = vst.msk [vmem:[#allocation11 + $0x30] sm:$0xff] %vm2379_vm11, %v2464_v50  ;;  %v10251_v50 = vld [vmem:[%s13758_s6 + $0x8] sm:$0xff] }
 0x526   : > { %7750 = vmatmul.msk.f32.gmra.mxu0 %vm2034_vm0, %v2058_v51  ;;  %7802 = vmatmul.msk.f32.gmra.mxu1 %vm2034_vm0, %v2058_v51  ;;  %v10256_v51 = vld [vmem:[%s13758_s6 + $0x10] sm:$0xff] }
 0x528   : > { %v2328_v52 = vpop.f32.mrf.mxu2  ;;  %v2533_v53 = vpop.f32.mrf.mxu3 }
 0x529   : > { %2409 = vst.msk [vmem:[#allocation10 + $0xe8] sm:$0xff] %vm2379_vm11, %v2328_v52  ;;  %v10261_v52 = vld [vmem:[%s13758_s6 + $0x18] sm:$0xff] }
 0x52a   : > { %2613 = vst.msk [vmem:[#allocation11 + $0xe8] sm:$0xff] %vm2379_vm11, %v2533_v53  ;;  %v10266_v53 = vld [vmem:[%s13758_s6 + $0x20] sm:$0xff] }
 0x52b   : > { %v2262_v54 = vpop.f32.mrf.mxu0  ;;  %v2467_v55 = vpop.f32.mrf.mxu1 }
 0x52c   : > { %2387 = vst.msk [vmem:[#allocation10 + $0x38] sm:$0xff] %vm2379_vm11, %v2262_v54  ;;  %v10271_v54 = vld [vmem:[%s13758_s6 + $0x28] sm:$0xff] }
 0x52d   : > { %2591 = vst.msk [vmem:[#allocation11 + $0x38] sm:$0xff] %vm2379_vm11, %v2467_v55 }
 0x530   : > { %v2331_v57 = vpop.f32.mrf.mxu2  ;;  %v2536_v58 = vpop.f32.mrf.mxu3 }
 0x531   : > { %2410 = vst.msk [vmem:[#allocation10 + $0xf0] sm:$0xff] %vm2379_vm11, %v2331_v57 }
 0x532   : > { %2614 = vst.msk [vmem:[#allocation11 + $0xf0] sm:$0xff] %vm2379_vm11, %v2536_v58  ;;  %v10276_v58 = vld [vmem:[%s13758_s6 + $0x30] sm:$0xff] }
 0x533   : > { %v2265_v59 = vpop.f32.mrf.mxu0  ;;  %v2470_v60 = vpop.f32.mrf.mxu1 }
 0x534   : > { %2388 = vst.msk [vmem:[#allocation10 + $0x40] sm:$0xff] %vm2379_vm11, %v2265_v59  ;;  %v10281_v59 = vld [vmem:[%s13758_s6 + $0x38] sm:$0xff] }
 0x535   : > { %2592 = vst.msk [vmem:[#allocation11 + $0x40] sm:$0xff] %vm2379_vm11, %v2470_v60  ;;  %v10286_v60 = vld [vmem:[%s13759_s7] sm:$0xff] }
 0x538   : > { %v2334_v62 = vpop.f32.mrf.mxu2  ;;  %v2539_v63 = vpop.f32.mrf.mxu3 }
 0x539   : > { %2411 = vst.msk [vmem:[#allocation10 + $0xf8] sm:$0xff] %vm2379_vm11, %v2334_v62  ;;  %v10292_v62 = vld [vmem:[%s13759_s7 + $0x8] sm:$0xff] }
 0x53a   : > { %2615 = vst.msk [vmem:[#allocation11 + $0xf8] sm:$0xff] %vm2379_vm11, %v2539_v63  ;;  %v10297_v63 = vld [vmem:[%s13759_s7 + $0x10] sm:$0xff] }
 0x53b   : > { %v2268_v0 = vpop.f32.mrf.mxu0  ;;  %v2473_v24 = vpop.f32.mrf.mxu1 }
 0x53c   : > { %2389 = vst.msk [vmem:[#allocation10 + $0x48] sm:$0xff] %vm2379_vm11, %v2268_v0  ;;  %v10302_v0 = vld [vmem:[%s13759_s7 + $0x18] sm:$0xff] }
 0x53d   : > { %2593 = vst.msk [vmem:[#allocation11 + $0x48] sm:$0xff] %vm2379_vm11, %v2473_v24  ;;  %v10308_v24 = vld [vmem:[%s13759_s7 + $0x20] sm:$0xff] }
 0x540   : > { %v2337_v25 = vpop.f32.mrf.mxu2  ;;  %v2542_v28 = vpop.f32.mrf.mxu3 }
 0x541   : > { %2412 = vst.msk [vmem:[#allocation10 + $0x100] sm:$0xff] %vm2379_vm11, %v2337_v25  ;;  %v10313_v25 = vld [vmem:[%s13759_s7 + $0x28] sm:$0xff] }
 0x542   : > { %2616 = vst.msk [vmem:[#allocation11 + $0x100] sm:$0xff] %vm2379_vm11, %v2542_v28  ;;  %v10318_v28 = vld [vmem:[%s13759_s7 + $0x30] sm:$0xff] }
 0x543   : > { %v2271_v29 = vpop.f32.mrf.mxu0  ;;  %v2476_v30 = vpop.f32.mrf.mxu1 }
 0x544   : > { %2390 = vst.msk [vmem:[#allocation10 + $0x50] sm:$0xff] %vm2379_vm11, %v2271_v29  ;;  %v10323_v29 = vld [vmem:[%s13759_s7 + $0x38] sm:$0xff] }
 0x545   : > { %2594 = vst.msk [vmem:[#allocation11 + $0x50] sm:$0xff] %vm2379_vm11, %v2476_v30 }
 0x548   : > { %v2340_v31 = vpop.f32.mrf.mxu2  ;;  %v2545_v32 = vpop.f32.mrf.mxu3 }
 0x549   : > { %2413 = vst.msk [vmem:[#allocation10 + $0x108] sm:$0xff] %vm2379_vm11, %v2340_v31 }
 0x54a   : > { %2617 = vst.msk [vmem:[#allocation11 + $0x108] sm:$0xff] %vm2379_vm11, %v2545_v32 }
 0x54b   : > { %v2274_v33 = vpop.f32.mrf.mxu0  ;;  %v2479_v34 = vpop.f32.mrf.mxu1 }
 0x54c   : > { %2391 = vst.msk [vmem:[#allocation10 + $0x58] sm:$0xff] %vm2379_vm11, %v2274_v33 }
 0x54d   : > { %2595 = vst.msk [vmem:[#allocation11 + $0x58] sm:$0xff] %vm2379_vm11, %v2479_v34 }
 0x550   : > { %v2343_v35 = vpop.f32.mrf.mxu2  ;;  %v2548_v36 = vpop.f32.mrf.mxu3 }
 0x551   : > { %2414 = vst.msk [vmem:[#allocation10 + $0x110] sm:$0xff] %vm2379_vm11, %v2343_v35 }
 0x552   : > { %2618 = vst.msk [vmem:[#allocation11 + $0x110] sm:$0xff] %vm2379_vm11, %v2548_v36 }
 0x553   : > { %v2277_v37 = vpop.f32.mrf.mxu0  ;;  %v2482_v38 = vpop.f32.mrf.mxu1 }
 0x554   : > { %2392 = vst.msk [vmem:[#allocation10 + $0x60] sm:$0xff] %vm2379_vm11, %v2277_v37 }
 0x555   : > { %2596 = vst.msk [vmem:[#allocation11 + $0x60] sm:$0xff] %vm2379_vm11, %v2482_v38 }
 0x558   : > { %v2346_v39 = vpop.f32.mrf.mxu2  ;;  %v2551_v40 = vpop.f32.mrf.mxu3 }
 0x559   : > { %2415 = vst.msk [vmem:[#allocation10 + $0x118] sm:$0xff] %vm2379_vm11, %v2346_v39 }
 0x55a   : > { %2619 = vst.msk [vmem:[#allocation11 + $0x118] sm:$0xff] %vm2379_vm11, %v2551_v40 }
 0x55b   : > { %v2280_v41 = vpop.f32.mrf.mxu0  ;;  %v2485_v42 = vpop.f32.mrf.mxu1 }
 0x55c   : > { %2393 = vst.msk [vmem:[#allocation10 + $0x68] sm:$0xff] %vm2379_vm11, %v2280_v41 }
 0x55d   : > { %2597 = vst.msk [vmem:[#allocation11 + $0x68] sm:$0xff] %vm2379_vm11, %v2485_v42 }
 0x560   : > { %v2349_v43 = vpop.f32.mrf.mxu2  ;;  %v2554_v44 = vpop.f32.mrf.mxu3 }
 0x561   : > { %2416 = vst.msk [vmem:[#allocation10 + $0x120] sm:$0xff] %vm2379_vm11, %v2349_v43 }
 0x562   : > { %2620 = vst.msk [vmem:[#allocation11 + $0x120] sm:$0xff] %vm2379_vm11, %v2554_v44 }
 0x563   : > { %v2283_v45 = vpop.f32.mrf.mxu0  ;;  %v2488_v46 = vpop.f32.mrf.mxu1 }
 0x564   : > { %2394 = vst.msk [vmem:[#allocation10 + $0x70] sm:$0xff] %vm2379_vm11, %v2283_v45 }
 0x565   : > { %2598 = vst.msk [vmem:[#allocation11 + $0x70] sm:$0xff] %vm2379_vm11, %v2488_v46 }
 0x568   : > { %v2352_v47 = vpop.f32.mrf.mxu2  ;;  %v2557_v48 = vpop.f32.mrf.mxu3 }
 0x569   : > { %2417 = vst.msk [vmem:[#allocation10 + $0x128] sm:$0xff] %vm2379_vm11, %v2352_v47 }
 0x56a   : > { %2621 = vst.msk [vmem:[#allocation11 + $0x128] sm:$0xff] %vm2379_vm11, %v2557_v48 }
 0x56b   : > { %v2286_v56 = vpop.f32.mrf.mxu0  ;;  %v2491_v61 = vpop.f32.mrf.mxu1 }
 0x56c   : > { %2395 = vst.msk [vmem:[#allocation10 + $0x78] sm:$0xff] %vm2379_vm11, %v2286_v56 }
 0x56d   : > { %2599 = vst.msk [vmem:[#allocation11 + $0x78] sm:$0xff] %vm2379_vm11, %v2491_v61 }
 0x570   : > { %v2355_v4 = vpop.f32.mrf.mxu2  ;;  %v2560_v5 = vpop.f32.mrf.mxu3 }
 0x571   : > { %2418 = vst.msk [vmem:[#allocation10 + $0x130] sm:$0xff] %vm2379_vm11, %v2355_v4 }
 0x572   : > { %2622 = vst.msk [vmem:[#allocation11 + $0x130] sm:$0xff] %vm2379_vm11, %v2560_v5 }
 0x573   : > { %v2289_v7 = vpop.f32.mrf.mxu0  ;;  %v2494_v10 = vpop.f32.mrf.mxu1 }
 0x574   : > { %2396 = vst.msk [vmem:[#allocation10 + $0x80] sm:$0xff] %vm2379_vm11, %v2289_v7 }
 0x575   : > { %2600 = vst.msk [vmem:[#allocation11 + $0x80] sm:$0xff] %vm2379_vm11, %v2494_v10 }
 0x578   : > { %v2358_v11 = vpop.f32.mrf.mxu2  ;;  %v2563_v21 = vpop.f32.mrf.mxu3 }
 0x579   : > { %2419 = vst.msk [vmem:[#allocation10 + $0x138] sm:$0xff] %vm2379_vm11, %v2358_v11 }
 0x57a   : > { %2623 = vst.msk [vmem:[#allocation11 + $0x138] sm:$0xff] %vm2379_vm11, %v2563_v21 }
 0x57b   : > { %v2292_v1 = vpop.f32.mrf.mxu0  ;;  %v2497_v2 = vpop.f32.mrf.mxu1 }
 0x57c   : > { %2397 = vst.msk [vmem:[#allocation10 + $0x88] sm:$0xff] %vm2379_vm11, %v2292_v1 }
 0x57d   : > { %2601 = vst.msk [vmem:[#allocation11 + $0x88] sm:$0xff] %vm2379_vm11, %v2497_v2 }
 0x580   : > { %v2361_v6 = vpop.f32.mrf.mxu2  ;;  %v2566_v8 = vpop.f32.mrf.mxu3 }
 0x581   : > { %2420 = vst.msk [vmem:[#allocation10 + $0x140] sm:$0xff] %vm2379_vm11, %v2361_v6 }
 0x582   : > { %2624 = vst.msk [vmem:[#allocation11 + $0x140] sm:$0xff] %vm2379_vm11, %v2566_v8 }
 0x583   : > { %v2295_v22 = vpop.f32.mrf.mxu0  ;;  %v2500_v23 = vpop.f32.mrf.mxu1 }
 0x584   : > { %2398 = vst.msk [vmem:[#allocation10 + $0x90] sm:$0xff] %vm2379_vm11, %v2295_v22 }
 0x585   : > { %2602 = vst.msk [vmem:[#allocation11 + $0x90] sm:$0xff] %vm2379_vm11, %v2500_v23 }
 0x588   : > { %v2364_v26 = vpop.f32.mrf.mxu2  ;;  %v2569_v27 = vpop.f32.mrf.mxu3 }
 0x589   : > { %2421 = vst.msk [vmem:[#allocation10 + $0x148] sm:$0xff] %vm2379_vm11, %v2364_v26 }
 0x58a   : > { %2625 = vst.msk [vmem:[#allocation11 + $0x148] sm:$0xff] %vm2379_vm11, %v2569_v27 }
 0x58b   : > { %v2298_v55 = vpop.f32.mrf.mxu0  ;;  %v2503_v57 = vpop.f32.mrf.mxu1 }
 0x58c   : > { %2399 = vst.msk [vmem:[#allocation10 + $0x98] sm:$0xff] %vm2379_vm11, %v2298_v55 }
 0x58d   : > { %2603 = vst.msk [vmem:[#allocation11 + $0x98] sm:$0xff] %vm2379_vm11, %v2503_v57 }
 0x590   : > { %v2367_v30 = vpop.f32.mrf.mxu2  ;;  %v2572_v31 = vpop.f32.mrf.mxu3 }
 0x591   : > { %2422 = vst.msk [vmem:[#allocation10 + $0x150] sm:$0xff] %vm2379_vm11, %v2367_v30 }
 0x592   : > { %2626 = vst.msk [vmem:[#allocation11 + $0x150] sm:$0xff] %vm2379_vm11, %v2572_v31 }
 0x593   : > { %v2301_v32 = vpop.f32.mrf.mxu0  ;;  %v2506_v33 = vpop.f32.mrf.mxu1 }
 0x594   : > { %2400 = vst.msk [vmem:[#allocation10 + $0xa0] sm:$0xff] %vm2379_vm11, %v2301_v32 }
 0x595   : > { %2604 = vst.msk [vmem:[#allocation11 + $0xa0] sm:$0xff] %vm2379_vm11, %v2506_v33 }
 0x598   : > { %v2370_v34 = vpop.f32.mrf.mxu2  ;;  %v2575_v35 = vpop.f32.mrf.mxu3 }
 0x599   : > { %2423 = vst.msk [vmem:[#allocation10 + $0x158] sm:$0xff] %vm2379_vm11, %v2370_v34 }
 0x59a   : > { %2627 = vst.msk [vmem:[#allocation11 + $0x158] sm:$0xff] %vm2379_vm11, %v2575_v35 }
 0x59b   : > { %v2304_v36 = vpop.f32.mrf.mxu0  ;;  %v2509_v37 = vpop.f32.mrf.mxu1 }
 0x59c   : > { %2401 = vst.msk [vmem:[#allocation10 + $0xa8] sm:$0xff] %vm2379_vm11, %v2304_v36 }
 0x59d   : > { %2605 = vst.msk [vmem:[#allocation11 + $0xa8] sm:$0xff] %vm2379_vm11, %v2509_v37 }
 0x5a0   : > { %v2373_v38 = vpop.f32.mrf.mxu2  ;;  %v2578_v39 = vpop.f32.mrf.mxu3 }
 0x5a1   : > { %2424 = vst.msk [vmem:[#allocation10 + $0x160] sm:$0xff] %vm2379_vm11, %v2373_v38 }
 0x5a2   : > { %2628 = vst.msk [vmem:[#allocation11 + $0x160] sm:$0xff] %vm2379_vm11, %v2578_v39 }
 0x5a3   : > { %v2307_v40 = vpop.f32.mrf.mxu0  ;;  %v2512_v41 = vpop.f32.mrf.mxu1 }
 0x5a4   : > { %2402 = vst.msk [vmem:[#allocation10 + $0xb0] sm:$0xff] %vm2379_vm11, %v2307_v40 }
 0x5a5   : > { %2606 = vst.msk [vmem:[#allocation11 + $0xb0] sm:$0xff] %vm2379_vm11, %v2512_v41 }
 0x5a8   : > { %v2376_v42 = vpop.f32.mrf.mxu2  ;;  %v2581_v43 = vpop.f32.mrf.mxu3 }
 0x5a9   : > { %2425 = vst.msk [vmem:[#allocation10 + $0x168] sm:$0xff] %vm2379_vm11, %v2376_v42 }
 0x5aa   : > { %2629 = vst.msk [vmem:[#allocation11 + $0x168] sm:$0xff] %vm2379_vm11, %v2581_v43 }
 0x5ab LB: >> { %s10345_s2 = sshll.u32 %s8999_s29, 4  ;;  %s9011_s18 = smov 127   ;;  %v9012_v8 = vmov 0   ;;  %vm2791_vm15 = vcmask 179200   ;;  %s8999_s29 = sphi %s10339_s29, %s2651_s29  }
 0x5ac   : >> { %s2658_s0 = scalar_lea.vmem [#allocation11], %s10345_s2  ;;  %s2653_s17 = scalar_lea.vmem [#allocation10], %s10345_s2  ;;  %8422 = vset.pattern.permute.xlu2 %v9012_v8  ;;  %8424 = vset.pattern.permute.xlu1 %v9012_v8 }
 0x5ad   : >> { %2697 = vperm.xlu2 %8422, %v10286_v60   ;;  %8423 = vset.pattern.permute.xlu0 %v9012_v8  ;;  %s2790_s19 = scalar_lea.vmem [#allocation4], %s10345_s2  ;;  %s2651_s29 = sadd.s32 1, %s8999_s29  }
 0x5ae   : >> { %p2648_p6 = scmp.ge.s32.totalorder %s2651_s29, 22  }
 0x5b0   : >> { %v10355_v47 = vld [vmem:[%s2653_s17 + $0x10] sm:$0xff]  ;;  %v10357_v48 = vld [vmem:[%s2653_s17 + $0x18] sm:$0xff]  ;;  %v10365_v5 = vld [vmem:[%s2653_s17] sm:$0xff] }
 0x5b1   : >> { %v10348_v44 = vld [vmem:[%s2658_s0 + $0x10] sm:$0xff]  ;;  %v10350_v45 = vld [vmem:[%s2658_s0 + $0x18] sm:$0xff]  ;;  %v8412_v56 = vpack.i.bf16 %v10355_v47, %v10357_v48  ;;  %v10361_v61 = vld [vmem:[%s2658_s0] sm:$0xff] }
 0x5b2   : >> { %v8402_v46 = vpack.i.bf16 %v10348_v44, %v10350_v45  ;;  %v10363_v4 = vld [vmem:[%s2658_s0 + $0x8] sm:$0xff] }
 0x5b3   : >> { %8413 = vrot.lane.b32.xlu1 %v8412_v56, %s9011_s18  ;;  %v10367_v7 = vld [vmem:[%s2653_s17 + $0x8] sm:$0xff]  ;;  %v8407_v10 = vpack.i.bf16 %v10361_v61, %v10363_v4 }
 0x5b4   : >> { %8403 = vrot.lane.b32.xlu0 %v8402_v46, %s9011_s18  ;;  %v8417_v11 = vpack.i.bf16 %v10365_v5, %v10367_v7 }
 0x5b5   : >> { %2702 = vperm.xlu2 %8422, %v10292_v62  }
 0x5bb   : >> { %8418 = vrot.lane.b32.xlu1 %v8417_v11, %s9011_s18 }
 0x5bc   : >> { %8408 = vrot.lane.b32.xlu0 %v8407_v10, %s9011_s18  ;;  %s10875_s18 = smov (%p2648_p6), 0  }
 0x5bd   : >> { %2717 = vperm.xlu2 %8422, %v10308_v24  }
 0x5c3   : >> { %2712 = vperm.xlu1 %8424, %v10302_v0  }
 0x5c4   : >> { %2707 = vperm.xlu0 %8423, %v10297_v63  }
 0x5c5   : >> { %2727 = vperm.xlu2 %8422, %v10318_v28  }
 0x5cb   : >> { %2722 = vperm.xlu1 %8424, %v10313_v25  }
 0x5cc   : >> { %2732 = vperm.xlu0 %8423, %v10323_v29  }
 0x607   : >> { %v2698_v32 = vpop.permute.xlu2 %2697 }
 0x60f   : >> { %v2703_v33 = vpop.permute.xlu2 %2702 }
 0x617   : >> { %v2718_v34 = vpop.permute.xlu2 %2717 }
 0x61f   : >> { %v2728_v41 = vpop.permute.xlu2 %2727 }
 0x625   : >> { %v8414_v2 = vpop.permute.xlu1 %8413 }
 0x626   : >> { %v8404_v21 = vpop.permute.xlu0 %8403  ;;  %v8415_v55 = vunpack.i.l.bf16 %v8414_v2  ;;  %v8416_v57 = vunpack.i.h.bf16 %v8414_v2 }
 0x627   : >> { %v8405_v1 = vunpack.i.l.bf16 %v8404_v21  ;;  %v8406_v6 = vunpack.i.h.bf16 %v8404_v21 }
 0x629   : >> { %2735 = vmatpush.msra.mxu0 %v8405_v1  ;;  %8177 = vmatpush.msra.mxu1 %v8405_v1 }
 0x62a   : >> { %8178 = vmatpush.msra.mxu2 %v8405_v1  ;;  %8179 = vmatpush.msra.mxu3 %v8405_v1 }
 0x62b   : >> { %2736 = vmatpush.msra.mxu0 %v8406_v6  ;;  %8180 = vmatpush.msra.mxu1 %v8406_v6 }
 0x62c   : >> { %8181 = vmatpush.msra.mxu2 %v8406_v6  ;;  %8182 = vmatpush.msra.mxu3 %v8406_v6 }
 0x62d   : >> { %v8419_v27 = vpop.permute.xlu1 %8418 }
 0x62e   : >> { %v8409_v22 = vpop.permute.xlu0 %8408  ;;  %v8420_v30 = vunpack.i.l.bf16 %v8419_v27  ;;  %v8421_v31 = vunpack.i.h.bf16 %v8419_v27 }
 0x62f   : >> { %v8410_v23 = vunpack.i.l.bf16 %v8409_v22  ;;  %v8411_v26 = vunpack.i.h.bf16 %v8409_v22 }
 0x631   : >> { %2737 = vmatpush.msra.mxu0 %v8410_v23  ;;  %8183 = vmatpush.msra.mxu1 %v8410_v23 }
 0x632   : >> { %8184 = vmatpush.msra.mxu2 %v8410_v23  ;;  %8185 = vmatpush.msra.mxu3 %v8410_v23 }
 0x633   : >> { %2738 = vmatpush.msra.mxu0 %v8411_v26  ;;  %8186 = vmatpush.msra.mxu1 %v8411_v26 }
 0x634   : >> { %8187 = vmatpush.msra.mxu2 %v8411_v26  ;;  %8188 = vmatpush.msra.mxu3 %v8411_v26 }
 0x635   : >> { %2739 = vmatpush.msra.mxu0 %v8415_v55  ;;  %8189 = vmatpush.msra.mxu1 %v8415_v55  ;;  %v2713_v38 = vpop.permute.xlu1 %2712 }
 0x636   : >> { %8190 = vmatpush.msra.mxu2 %v8415_v55  ;;  %8191 = vmatpush.msra.mxu3 %v8415_v55  ;;  %v2708_v37 = vpop.permute.xlu0 %2707 }
 0x637   : >> { %2740 = vmatpush.msra.mxu0 %v8416_v57  ;;  %8192 = vmatpush.msra.mxu1 %v8416_v57 }
 0x638   : >> { %8193 = vmatpush.msra.mxu2 %v8416_v57  ;;  %8194 = vmatpush.msra.mxu3 %v8416_v57 }
 0x639   : >> { %2741 = vmatpush.msra.mxu0 %v8420_v30  ;;  %8195 = vmatpush.msra.mxu1 %v8420_v30 }
 0x63a   : >> { %8196 = vmatpush.msra.mxu2 %v8420_v30  ;;  %8197 = vmatpush.msra.mxu3 %v8420_v30 }
 0x63b   : >> { %2742 = vmatpush.msra.mxu0 %v8421_v31  ;;  %8198 = vmatpush.msra.mxu1 %v8421_v31 }
 0x63c   : >> { %8199 = vmatpush.msra.mxu2 %v8421_v31  ;;  %8200 = vmatpush.msra.mxu3 %v8421_v31 }
 0x63d   : >> { %2743 = vmatpush.msra.mxu0 %v10350_v45  ;;  %8201 = vmatpush.msra.mxu1 %v10350_v45  ;;  %v2723_v1 = vpop.permute.xlu1 %2722 }
 0x63e   : >> { %8202 = vmatpush.msra.mxu2 %v10350_v45  ;;  %8203 = vmatpush.msra.mxu3 %v10350_v45  ;;  %v2733_v21 = vpop.permute.xlu0 %2732 }
 0x63f   : >> { %2744 = vmatpush.msra.mxu0 %v10348_v44  ;;  %8204 = vmatpush.msra.mxu1 %v10348_v44 }
 0x640   : >> { %8205 = vmatpush.msra.mxu2 %v10348_v44  ;;  %8206 = vmatpush.msra.mxu3 %v10348_v44 }
 0x641   : >> { %2745 = vmatpush.msra.mxu0 %v10363_v4  ;;  %8207 = vmatpush.msra.mxu1 %v10363_v4 }
 0x642   : >> { %8208 = vmatpush.msra.mxu2 %v10363_v4  ;;  %8209 = vmatpush.msra.mxu3 %v10363_v4 }
 0x643   : >> { %2746 = vmatpush.msra.mxu0 %v10361_v61  ;;  %8210 = vmatpush.msra.mxu1 %v10361_v61 }
 0x644   : >> { %8211 = vmatpush.msra.mxu2 %v10361_v61  ;;  %8212 = vmatpush.msra.mxu3 %v10361_v61 }
 0x645   : >> { %2747 = vmatpush.msra.mxu0 %v10357_v48  ;;  %8213 = vmatpush.msra.mxu1 %v10357_v48 }
 0x646   : >> { %8214 = vmatpush.msra.mxu2 %v10357_v48  ;;  %8215 = vmatpush.msra.mxu3 %v10357_v48 }
 0x647   : >> { %2748 = vmatpush.msra.mxu0 %v10355_v47  ;;  %8216 = vmatpush.msra.mxu1 %v10355_v47 }
 0x648   : >> { %8217 = vmatpush.msra.mxu2 %v10355_v47  ;;  %8218 = vmatpush.msra.mxu3 %v10355_v47 }
 0x649   : >> { %2749 = vmatpush.msra.mxu0 %v10367_v7  ;;  %8219 = vmatpush.msra.mxu1 %v10367_v7 }
 0x64a   : >> { %8220 = vmatpush.msra.mxu2 %v10367_v7  ;;  %8221 = vmatpush.msra.mxu3 %v10367_v7 }
 0x64b   : >> { %2750 = vmatpush.msra.mxu0 %v10365_v5  ;;  %8222 = vmatpush.msra.mxu1 %v10365_v5 }
 0x64c   : >> { %8223 = vmatpush.msra.mxu2 %v10365_v5  ;;  %8224 = vmatpush.msra.mxu3 %v10365_v5 }
 0x64d   : >> { %2751 = vmatmul.f32.vlgmr.msra.gmra.mxu0 %v10246_v49  ;;  %2757 = vmatmul.f32.vlgmr.msra.gmra.mxu1 %v10256_v51 }
 0x64e   : >> { %2763 = vmatmul.f32.vlgmr.msra.gmra.mxu2 %v10266_v53  ;;  %2769 = vmatmul.f32.vlgmr.msra.gmra.mxu3 %v10276_v58 }
 0x64f   : > { %8225 = vmatpush.msk.msra.mxu2 (%p2648_p6), %vm1125_vm1, %v9349_v14  ;;  %8228 = vmatpush.msk.msra.mxu3 (%p2648_p6), %vm1125_vm1, %v9353_v15 }
 0x650   : > { %7827 = vmatpush.msk.msra.mxu0 (%p2648_p6), %vm1125_vm1, %v9349_v14  ;;  %7874 = vmatpush.msk.msra.mxu1 (%p2648_p6), %vm1125_vm1, %v9353_v15  ;;  %vm3123_vm1 = vcmask (%p2648_p6), 89088  }
 0x651   : > { %8226 = vmatpush.msk.msra.mxu2 (%p2648_p6), %vm9356_vm4, %v13769_v3  ;;  %8229 = vmatpush.msk.msra.mxu3 (%p2648_p6), %vm9361_vm5, %v13769_v3 }
 0x652   : > { %7828 = vmatpush.msk.msra.mxu0 (%p2648_p6), %vm9356_vm4, %v13769_v3  ;;  %7875 = vmatpush.msk.msra.mxu1 (%p2648_p6), %vm9361_vm5, %v13769_v3 }
 0x653   : > { %8227 = vmatpush.msk.msra.mxu2 (%p2648_p6), %vm9311_vm14, %v13769_v3  ;;  %8230 = vmatpush.msk.msra.mxu3 (%p2648_p6), %vm9337_vm3, %v13769_v3 }
 0x654   : > { %7829 = vmatpush.msk.msra.mxu0 (%p2648_p6), %vm9311_vm14, %v13769_v3  ;;  %7876 = vmatpush.msk.msra.mxu1 (%p2648_p6), %vm9337_vm3, %v13769_v3 }
 0x655   : >> { %2754 = vmatmul.f32.gmra.mxu0 %v10251_v50  ;;  %2760 = vmatmul.f32.gmra.mxu1 %v10261_v52 }
 0x656   : >> { %2766 = vmatmul.f32.gmra.mxu2 %v10271_v54  ;;  %2772 = vmatmul.f32.gmra.mxu3 %v10281_v59 }
 0x6ca   : >> { %v2752_v35 = vpop.f32.mrf.mxu0  ;;  %v2758_v36 = vpop.f32.mrf.mxu1 }
 0x6cb   : >> { %v2753_v39 = vadd.f32 %v2752_v35, %v2698_v32  ;;  %v2759_v40 = vadd.f32 %v2758_v36, %v2708_v37 }
 0x6cd   : >> { %v2776_v44 = vmax.f32 %v2753_v39, 0.0  ;;  %v2778_v45 = vmax.f32 %v2759_v40, 0.0 }
 0x6cf   : >> { %v2784_v5 = vmax.f32 %v2776_v44, %v2778_v45 }
 0x6d1   : >> { %v2764_v42 = vpop.f32.mrf.mxu2  ;;  %v2770_v43 = vpop.f32.mrf.mxu3 }
 0x6d2   : >> { %v2765_v46 = vadd.f32 %v2764_v42, %v2718_v34  ;;  %v2771_v47 = vadd.f32 %v2770_v43, %v2728_v41  ;;  %v2755_v48 = vpop.f32.mrf.mxu0  ;;  %v2761_v56 = vpop.f32.mrf.mxu1 }
 0x6d3   : >> { %v2756_v10 = vadd.f32 %v2755_v48, %v2703_v33  ;;  %v2762_v11 = vadd.f32 %v2761_v56, %v2713_v38 }
 0x6d4   : >> { %v2780_v61 = vmax.f32 %v2765_v46, 0.0  ;;  %v2782_v4 = vmax.f32 %v2771_v47, 0.0 }
 0x6d5   : >> { %v2777_v22 = vmax.f32 %v2756_v10, 0.0  ;;  %v2779_v23 = vmax.f32 %v2762_v11, 0.0 }
 0x6d6   : >> { %v2786_v7 = vmax.f32 %v2780_v61, %v2782_v4 }
 0x6d7   : >> { %v2785_v30 = vmax.f32 %v2777_v22, %v2779_v23 }
 0x6d8   : >> { %v2788_v2 = vmax.f32 %v2784_v5, %v2786_v7 }
 0x6d9   : >> { %v2767_v6 = vpop.f32.mrf.mxu2  ;;  %v2773_v8 = vpop.f32.mrf.mxu3 }
 0x6da   : >> { %2792 = vst.msk [vmem:[%s2790_s19] sm:$0xff] %vm2791_vm15, %v2788_v2  ;;  %v2768_v26 = vadd.f32 %v2767_v6, %v2723_v1  ;;  %v2774_v27 = vadd.f32 %v2773_v8, %v2733_v21 }
 0x6dc   : >> { %v2781_v55 = vmax.f32 %v2768_v26, 0.0  ;;  %v2783_v57 = vmax.f32 %v2774_v27, 0.0 }
 0x6de   : >> { %v2787_v31 = vmax.f32 %v2781_v55, %v2783_v57  ;;  %2650 = sbr.rel (!%p2648_p6) target bundleno = 1451 (0x5ab), region = 188 }
 0x6e0   : >> { %v2789_v32 = vmax.f32 %v2785_v30, %v2787_v31 }
 0x6e2   : >> { %2793 = vst.msk [vmem:[%s2790_s19 + $0x8] sm:$0xff] %vm2791_vm15, %v2789_v32 }
 0x6e9   : > { %v2816_v49 = vld [vmem:[#allocation4 + $0xb0] sm:$0xff]  ;;  %v2794_v14 = vld [vmem:[#allocation4] sm:$0xff]  ;;  %v2817_v15 = vld [vmem:[#allocation4 + $0xb8] sm:$0xff] }
 0x6ea   : > { %7852 = vmatmul.msk.f32.vlgmr.msra.gmra.mxu2 %vm2791_vm15, %v2816_v49  ;;  %7899 = vmatmul.msk.f32.vlgmr.msra.gmra.mxu3 %vm2791_vm15, %v2816_v49  ;;  %v2795_v16 = vld [vmem:[#allocation4 + $0x8] sm:$0xff]  ;;  %v2818_v17 = vld [vmem:[#allocation4 + $0xc0] sm:$0xff]  ;;  %v2796_v50 = vld [vmem:[#allocation4 + $0x10] sm:$0xff] }
 0x6eb   : > { %7830 = vmatmul.msk.f32.vlgmr.msra.gmra.mxu0 %vm2791_vm15, %v2794_v14  ;;  %7877 = vmatmul.msk.f32.vlgmr.msra.gmra.mxu1 %vm2791_vm15, %v2794_v14  ;;  %v2819_v51 = vld [vmem:[#allocation4 + $0xc8] sm:$0xff]  ;;  %v2797_v52 = vld [vmem:[#allocation4 + $0x18] sm:$0xff]  ;;  %v2820_v53 = vld [vmem:[#allocation4 + $0xd0] sm:$0xff] }
 0x6ec   : > { %v2798_v54 = vld [vmem:[#allocation4 + $0x20] sm:$0xff]  ;;  %v2821_v58 = vld [vmem:[#allocation4 + $0xd8] sm:$0xff]  ;;  %v2799_v59 = vld [vmem:[#allocation4 + $0x28] sm:$0xff] }
 0x6ed   : > { %v2822_v60 = vld [vmem:[#allocation4 + $0xe0] sm:$0xff]  ;;  %v2800_v62 = vld [vmem:[#allocation4 + $0x30] sm:$0xff]  ;;  %v2823_v63 = vld [vmem:[#allocation4 + $0xe8] sm:$0xff] }
 0x6ee   : > { %v2801_v0 = vld [vmem:[#allocation4 + $0x38] sm:$0xff]  ;;  %v2824_v24 = vld [vmem:[#allocation4 + $0xf0] sm:$0xff]  ;;  %v2802_v25 = vld [vmem:[#allocation4 + $0x40] sm:$0xff] }
 0x6ef   : > { %v2825_v28 = vld [vmem:[#allocation4 + $0xf8] sm:$0xff]  ;;  %v2803_v29 = vld [vmem:[#allocation4 + $0x48] sm:$0xff]  ;;  %v2826_v33 = vld [vmem:[#allocation4 + $0x100] sm:$0xff] }
 0x6f0   : > { %v2804_v34 = vld [vmem:[#allocation4 + $0x50] sm:$0xff]  ;;  %v2827_v35 = vld [vmem:[#allocation4 + $0x108] sm:$0xff]  ;;  %v2805_v36 = vld [vmem:[#allocation4 + $0x58] sm:$0xff] }
 0x6f1   : > { %v2828_v37 = vld [vmem:[#allocation4 + $0x110] sm:$0xff]  ;;  %v2806_v38 = vld [vmem:[#allocation4 + $0x60] sm:$0xff]  ;;  %v2829_v39 = vld [vmem:[#allocation4 + $0x118] sm:$0xff] }
 0x6f2   : > { %7853 = vmatmul.msk.f32.gmra.mxu2 %vm2791_vm15, %v2817_v15  ;;  %7900 = vmatmul.msk.f32.gmra.mxu3 %vm2791_vm15, %v2817_v15  ;;  %v2807_v40 = vld [vmem:[#allocation4 + $0x68] sm:$0xff]  ;;  %v2830_v41 = vld [vmem:[#allocation4 + $0x120] sm:$0xff]  ;;  %v2808_v42 = vld [vmem:[#allocation4 + $0x70] sm:$0xff] }
 0x6f3   : > { %7831 = vmatmul.msk.f32.gmra.mxu0 %vm2791_vm15, %v2795_v16  ;;  %7878 = vmatmul.msk.f32.gmra.mxu1 %vm2791_vm15, %v2795_v16  ;;  %v2831_v43 = vld [vmem:[#allocation4 + $0x128] sm:$0xff]  ;;  %v2809_v44 = vld [vmem:[#allocation4 + $0x78] sm:$0xff]  ;;  %v2832_v45 = vld [vmem:[#allocation4 + $0x130] sm:$0xff] }
 0x6f4   : > { %v2810_v48 = vld [vmem:[#allocation4 + $0x80] sm:$0xff]  ;;  %v2833_v4 = vld [vmem:[#allocation4 + $0x138] sm:$0xff]  ;;  %v2811_v10 = vld [vmem:[#allocation4 + $0x88] sm:$0xff] }
 0x6f5   : > { %v2834_v1 = vld [vmem:[#allocation4 + $0x140] sm:$0xff]  ;;  %v2812_v8 = vld [vmem:[#allocation4 + $0x90] sm:$0xff]  ;;  %v2835_v26 = vld [vmem:[#allocation4 + $0x148] sm:$0xff] }
 0x6f6   : > { %v2813_v57 = vld [vmem:[#allocation4 + $0x98] sm:$0xff]  ;;  %v2836_v32 = vld [vmem:[#allocation4 + $0x150] sm:$0xff]  ;;  %v2814_v15 = vld [vmem:[#allocation4 + $0xa0] sm:$0xff] }
 0x6fa   : > { %7854 = vmatmul.msk.f32.gmra.mxu2 %vm2791_vm15, %v2818_v17  ;;  %7901 = vmatmul.msk.f32.gmra.mxu3 %vm2791_vm15, %v2818_v17 }
 0x6fb   : > { %7832 = vmatmul.msk.f32.gmra.mxu0 %vm2791_vm15, %v2796_v50  ;;  %7879 = vmatmul.msk.f32.gmra.mxu1 %vm2791_vm15, %v2796_v50  ;;  %v2837_v50 = vld [vmem:[#allocation4 + $0x158] sm:$0xff] }
 0x702   : > { %7855 = vmatmul.msk.f32.gmra.mxu2 %vm2791_vm15, %v2819_v51  ;;  %7902 = vmatmul.msk.f32.gmra.mxu3 %vm2791_vm15, %v2819_v51 }
 0x703   : > { %7833 = vmatmul.msk.f32.gmra.mxu0 %vm2791_vm15, %v2797_v52  ;;  %7880 = vmatmul.msk.f32.gmra.mxu1 %vm2791_vm15, %v2797_v52 }
 0x70a   : > { %7856 = vmatmul.msk.f32.gmra.mxu2 %vm2791_vm15, %v2820_v53  ;;  %7903 = vmatmul.msk.f32.gmra.mxu3 %vm2791_vm15, %v2820_v53  ;;  %v2815_v53 = vld [vmem:[#allocation4 + $0xa8] sm:$0xff] }
 0x70b   : > { %7834 = vmatmul.msk.f32.gmra.mxu0 %vm2791_vm15, %v2798_v54  ;;  %7881 = vmatmul.msk.f32.gmra.mxu1 %vm2791_vm15, %v2798_v54 }
 0x712   : > { %7857 = vmatmul.msk.f32.gmra.mxu2 %vm2791_vm15, %v2821_v58  ;;  %7904 = vmatmul.msk.f32.gmra.mxu3 %vm2791_vm15, %v2821_v58 }
 0x713   : > { %7835 = vmatmul.msk.f32.gmra.mxu0 %vm2791_vm15, %v2799_v59  ;;  %7882 = vmatmul.msk.f32.gmra.mxu1 %vm2791_vm15, %v2799_v59 }
 0x71a   : > { %7858 = vmatmul.msk.f32.gmra.mxu2 %vm2791_vm15, %v2822_v60  ;;  %7905 = vmatmul.msk.f32.gmra.mxu3 %vm2791_vm15, %v2822_v60 }
 0x71b   : > { %7836 = vmatmul.msk.f32.gmra.mxu0 %vm2791_vm15, %v2800_v62  ;;  %7883 = vmatmul.msk.f32.gmra.mxu1 %vm2791_vm15, %v2800_v62 }
 0x722   : > { %7859 = vmatmul.msk.f32.gmra.mxu2 %vm2791_vm15, %v2823_v63  ;;  %7906 = vmatmul.msk.f32.gmra.mxu3 %vm2791_vm15, %v2823_v63 }
 0x723   : > { %7837 = vmatmul.msk.f32.gmra.mxu0 %vm2791_vm15, %v2801_v0  ;;  %7884 = vmatmul.msk.f32.gmra.mxu1 %vm2791_vm15, %v2801_v0 }
 0x72a   : > { %7860 = vmatmul.msk.f32.gmra.mxu2 %vm2791_vm15, %v2824_v24  ;;  %7907 = vmatmul.msk.f32.gmra.mxu3 %vm2791_vm15, %v2824_v24 }
 0x72b   : > { %7838 = vmatmul.msk.f32.gmra.mxu0 %vm2791_vm15, %v2802_v25  ;;  %7885 = vmatmul.msk.f32.gmra.mxu1 %vm2791_vm15, %v2802_v25 }
 0x732   : > { %7861 = vmatmul.msk.f32.gmra.mxu2 %vm2791_vm15, %v2825_v28  ;;  %7908 = vmatmul.msk.f32.gmra.mxu3 %vm2791_vm15, %v2825_v28 }
 0x733   : > { %7839 = vmatmul.msk.f32.gmra.mxu0 %vm2791_vm15, %v2803_v29  ;;  %7886 = vmatmul.msk.f32.gmra.mxu1 %vm2791_vm15, %v2803_v29 }
 0x73a   : > { %7862 = vmatmul.msk.f32.gmra.mxu2 %vm2791_vm15, %v2826_v33  ;;  %7909 = vmatmul.msk.f32.gmra.mxu3 %vm2791_vm15, %v2826_v33 }
 0x73b   : > { %7840 = vmatmul.msk.f32.gmra.mxu0 %vm2791_vm15, %v2804_v34  ;;  %7887 = vmatmul.msk.f32.gmra.mxu1 %vm2791_vm15, %v2804_v34 }
 0x742   : > { %7863 = vmatmul.msk.f32.gmra.mxu2 %vm2791_vm15, %v2827_v35  ;;  %7910 = vmatmul.msk.f32.gmra.mxu3 %vm2791_vm15, %v2827_v35 }
 0x743   : > { %7841 = vmatmul.msk.f32.gmra.mxu0 %vm2791_vm15, %v2805_v36  ;;  %7888 = vmatmul.msk.f32.gmra.mxu1 %vm2791_vm15, %v2805_v36 }
 0x74a   : > { %7864 = vmatmul.msk.f32.gmra.mxu2 %vm2791_vm15, %v2828_v37  ;;  %7911 = vmatmul.msk.f32.gmra.mxu3 %vm2791_vm15, %v2828_v37 }
 0x74b   : > { %7842 = vmatmul.msk.f32.gmra.mxu0 %vm2791_vm15, %v2806_v38  ;;  %7889 = vmatmul.msk.f32.gmra.mxu1 %vm2791_vm15, %v2806_v38 }
 0x752   : > { %7865 = vmatmul.msk.f32.gmra.mxu2 %vm2791_vm15, %v2829_v39  ;;  %7912 = vmatmul.msk.f32.gmra.mxu3 %vm2791_vm15, %v2829_v39 }
 0x753   : > { %7843 = vmatmul.msk.f32.gmra.mxu0 %vm2791_vm15, %v2807_v40  ;;  %7890 = vmatmul.msk.f32.gmra.mxu1 %vm2791_vm15, %v2807_v40 }
 0x75a   : > { %7866 = vmatmul.msk.f32.gmra.mxu2 %vm2791_vm15, %v2830_v41  ;;  %7913 = vmatmul.msk.f32.gmra.mxu3 %vm2791_vm15, %v2830_v41 }
 0x75b   : > { %7844 = vmatmul.msk.f32.gmra.mxu0 %vm2791_vm15, %v2808_v42  ;;  %7891 = vmatmul.msk.f32.gmra.mxu1 %vm2791_vm15, %v2808_v42 }
 0x762   : > { %7867 = vmatmul.msk.f32.gmra.mxu2 %vm2791_vm15, %v2831_v43  ;;  %7914 = vmatmul.msk.f32.gmra.mxu3 %vm2791_vm15, %v2831_v43 }
 0x763   : > { %7845 = vmatmul.msk.f32.gmra.mxu0 %vm2791_vm15, %v2809_v44  ;;  %7892 = vmatmul.msk.f32.gmra.mxu1 %vm2791_vm15, %v2809_v44 }
 0x768   : > { %v2991_v46 = vpop.f32.mrf.mxu0  ;;  %v3188_v47 = vpop.f32.mrf.mxu1 }
 0x769   : > { %3124 = vst.msk [vmem:[#allocation12] sm:$0xff] %vm3123_vm1, %v2991_v46 }
 0x76a   : > { %7868 = vmatmul.msk.f32.gmra.mxu2 %vm2791_vm15, %v2832_v45  ;;  %7915 = vmatmul.msk.f32.gmra.mxu3 %vm2791_vm15, %v2832_v45  ;;  %3320 = vst.msk [vmem:[#allocation13] sm:$0xff] %vm3123_vm1, %v3188_v47 }
 0x76b   : > { %7846 = vmatmul.msk.f32.gmra.mxu0 %vm2791_vm15, %v2810_v48  ;;  %7893 = vmatmul.msk.f32.gmra.mxu1 %vm2791_vm15, %v2810_v48 }
 0x76d   : > { %v3057_v56 = vpop.f32.mrf.mxu2  ;;  %v3254_v61 = vpop.f32.mrf.mxu3 }
 0x76e   : > { %3146 = vst.msk [vmem:[#allocation12 + $0xb0] sm:$0xff] %vm3123_vm1, %v3057_v56 }
 0x76f   : > { %3342 = vst.msk [vmem:[#allocation13 + $0xb0] sm:$0xff] %vm3123_vm1, %v3254_v61 }
 0x770   : > { %v2994_v5 = vpop.f32.mrf.mxu0  ;;  %v3191_v7 = vpop.f32.mrf.mxu1 }
 0x771   : > { %3125 = vst.msk [vmem:[#allocation12 + $0x8] sm:$0xff] %vm3123_vm1, %v2994_v5 }
 0x772   : > { %7869 = vmatmul.msk.f32.gmra.mxu2 %vm2791_vm15, %v2833_v4  ;;  %7916 = vmatmul.msk.f32.gmra.mxu3 %vm2791_vm15, %v2833_v4  ;;  %3321 = vst.msk [vmem:[#allocation13 + $0x8] sm:$0xff] %vm3123_vm1, %v3191_v7 }
 0x773   : > { %7847 = vmatmul.msk.f32.gmra.mxu0 %vm2791_vm15, %v2811_v10  ;;  %7894 = vmatmul.msk.f32.gmra.mxu1 %vm2791_vm15, %v2811_v10 }
 0x775   : > { %v3060_v11 = vpop.f32.mrf.mxu2  ;;  %v3257_v21 = vpop.f32.mrf.mxu3 }
 0x776   : > { %3147 = vst.msk [vmem:[#allocation12 + $0xb8] sm:$0xff] %vm3123_vm1, %v3060_v11 }
 0x777   : > { %3343 = vst.msk [vmem:[#allocation13 + $0xb8] sm:$0xff] %vm3123_vm1, %v3257_v21 }
 0x778   : > { %v2997_v2 = vpop.f32.mrf.mxu0  ;;  %v3194_v6 = vpop.f32.mrf.mxu1 }
 0x779   : > { %3126 = vst.msk [vmem:[#allocation12 + $0x10] sm:$0xff] %vm3123_vm1, %v2997_v2 }
 0x77a   : > { %7870 = vmatmul.msk.f32.gmra.mxu2 %vm2791_vm15, %v2834_v1  ;;  %7917 = vmatmul.msk.f32.gmra.mxu3 %vm2791_vm15, %v2834_v1  ;;  %3322 = vst.msk [vmem:[#allocation13 + $0x10] sm:$0xff] %vm3123_vm1, %v3194_v6 }
 0x77b   : > { %7848 = vmatmul.msk.f32.gmra.mxu0 %vm2791_vm15, %v2812_v8  ;;  %7895 = vmatmul.msk.f32.gmra.mxu1 %vm2791_vm15, %v2812_v8 }
 0x77d   : > { %v3063_v22 = vpop.f32.mrf.mxu2  ;;  %v3260_v23 = vpop.f32.mrf.mxu3 }
 0x77e   : > { %3148 = vst.msk [vmem:[#allocation12 + $0xc0] sm:$0xff] %vm3123_vm1, %v3063_v22 }
 0x77f   : > { %3344 = vst.msk [vmem:[#allocation13 + $0xc0] sm:$0xff] %vm3123_vm1, %v3260_v23 }
 0x780   : > { %v3000_v27 = vpop.f32.mrf.mxu0  ;;  %v3197_v55 = vpop.f32.mrf.mxu1 }
 0x781   : > { %3127 = vst.msk [vmem:[#allocation12 + $0x18] sm:$0xff] %vm3123_vm1, %v3000_v27 }
 0x782   : > { %7871 = vmatmul.msk.f32.gmra.mxu2 %vm2791_vm15, %v2835_v26  ;;  %7918 = vmatmul.msk.f32.gmra.mxu3 %vm2791_vm15, %v2835_v26  ;;  %3323 = vst.msk [vmem:[#allocation13 + $0x18] sm:$0xff] %vm3123_vm1, %v3197_v55 }
 0x783   : > { %7849 = vmatmul.msk.f32.gmra.mxu0 %vm2791_vm15, %v2813_v57  ;;  %7896 = vmatmul.msk.f32.gmra.mxu1 %vm2791_vm15, %v2813_v57 }
 0x785   : > { %v3066_v30 = vpop.f32.mrf.mxu2  ;;  %v3263_v31 = vpop.f32.mrf.mxu3 }
 0x786   : > { %3149 = vst.msk [vmem:[#allocation12 + $0xc8] sm:$0xff] %vm3123_vm1, %v3066_v30 }
 0x787   : > { %3345 = vst.msk [vmem:[#allocation13 + $0xc8] sm:$0xff] %vm3123_vm1, %v3263_v31 }
 0x788   : > { %v3003_v49 = vpop.f32.mrf.mxu0  ;;  %v3200_v14 = vpop.f32.mrf.mxu1 }
 0x789   : > { %3128 = vst.msk [vmem:[#allocation12 + $0x20] sm:$0xff] %vm3123_vm1, %v3003_v49 }
 0x78a   : > { %7872 = vmatmul.msk.f32.gmra.mxu2 %vm2791_vm15, %v2836_v32  ;;  %7919 = vmatmul.msk.f32.gmra.mxu3 %vm2791_vm15, %v2836_v32  ;;  %3324 = vst.msk [vmem:[#allocation13 + $0x20] sm:$0xff] %vm3123_vm1, %v3200_v14 }
 0x78b   : > { %7850 = vmatmul.msk.f32.gmra.mxu0 %vm2791_vm15, %v2814_v15  ;;  %7897 = vmatmul.msk.f32.gmra.mxu1 %vm2791_vm15, %v2814_v15  ;;  %v10622_v15 = vld [vmem:[%s13760_s8] sm:$0xff] }
 0x78c   : > { %13872 = vst [vmem:[#allocation24_spill] sm:$0xff] %v10622_v15 }
 0x78d   : > { %v3069_v16 = vpop.f32.mrf.mxu2  ;;  %v3266_v17 = vpop.f32.mrf.mxu3 }
 0x78e   : > { %3150 = vst.msk [vmem:[#allocation12 + $0xd0] sm:$0xff] %vm3123_vm1, %v3069_v16  ;;  %v10627_v16 = vld [vmem:[%s13760_s8 + $0x8] sm:$0xff] }
 0x78f   : > { %3346 = vst.msk [vmem:[#allocation13 + $0xd0] sm:$0xff] %vm3123_vm1, %v3266_v17  ;;  %v10632_v17 = vld [vmem:[%s13760_s8 + $0x10] sm:$0xff] }
 0x790   : > { %v3006_v51 = vpop.f32.mrf.mxu0  ;;  %v3203_v52 = vpop.f32.mrf.mxu1  ;;  %13873 = vst [vmem:[#allocation25_spill] sm:$0xff] %v10627_v16 }
 0x791   : > { %3129 = vst.msk [vmem:[#allocation12 + $0x28] sm:$0xff] %vm3123_vm1, %v3006_v51  ;;  %v10642_v51 = vld [vmem:[%s13760_s8 + $0x20] sm:$0xff] }
 0x792   : > { %7873 = vmatmul.msk.f32.gmra.mxu2 %vm2791_vm15, %v2837_v50  ;;  %7920 = vmatmul.msk.f32.gmra.mxu3 %vm2791_vm15, %v2837_v50  ;;  %3325 = vst.msk [vmem:[#allocation13 + $0x28] sm:$0xff] %vm3123_vm1, %v3203_v52  ;;  %v10637_v50 = vld [vmem:[%s13760_s8 + $0x18] sm:$0xff]  ;;  %v10647_v52 = vld [vmem:[%s13760_s8 + $0x28] sm:$0xff] }
 0x793   : > { %7851 = vmatmul.msk.f32.gmra.mxu0 %vm2791_vm15, %v2815_v53  ;;  %7898 = vmatmul.msk.f32.gmra.mxu1 %vm2791_vm15, %v2815_v53  ;;  %13874 = vst [vmem:[#allocation26_spill] sm:$0xff] %v10632_v17 }
 0x795   : > { %v3072_v54 = vpop.f32.mrf.mxu2  ;;  %v3269_v58 = vpop.f32.mrf.mxu3 }
 0x796   : > { %3151 = vst.msk [vmem:[#allocation12 + $0xd8] sm:$0xff] %vm3123_vm1, %v3072_v54 }
 0x797   : > { %3347 = vst.msk [vmem:[#allocation13 + $0xd8] sm:$0xff] %vm3123_vm1, %v3269_v58  ;;  %v10652_v58 = vld [vmem:[%s13760_s8 + $0x30] sm:$0xff] }
 0x798   : > { %v3009_v59 = vpop.f32.mrf.mxu0  ;;  %v3206_v60 = vpop.f32.mrf.mxu1 }
 0x799   : > { %3130 = vst.msk [vmem:[#allocation12 + $0x30] sm:$0xff] %vm3123_vm1, %v3009_v59  ;;  %v10657_v59 = vld [vmem:[%s13760_s8 + $0x38] sm:$0xff] }
 0x79a   : > { %3326 = vst.msk [vmem:[#allocation13 + $0x30] sm:$0xff] %vm3123_vm1, %v3206_v60  ;;  %v10662_v60 = vld [vmem:[%s13760_s8 + $0x40] sm:$0xff] }
 0x79d   : > { %v3075_v62 = vpop.f32.mrf.mxu2  ;;  %v3272_v63 = vpop.f32.mrf.mxu3 }
 0x79e   : > { %3152 = vst.msk [vmem:[#allocation12 + $0xe0] sm:$0xff] %vm3123_vm1, %v3075_v62  ;;  %v10668_v62 = vld [vmem:[%s13760_s8 + $0x48] sm:$0xff] }
 0x79f   : > { %3348 = vst.msk [vmem:[#allocation13 + $0xe0] sm:$0xff] %vm3123_vm1, %v3272_v63  ;;  %v10673_v63 = vld [vmem:[%s13760_s8 + $0x50] sm:$0xff] }
 0x7a0   : > { %v3012_v0 = vpop.f32.mrf.mxu0  ;;  %v3209_v24 = vpop.f32.mrf.mxu1 }
 0x7a1   : > { %3131 = vst.msk [vmem:[#allocation12 + $0x38] sm:$0xff] %vm3123_vm1, %v3012_v0  ;;  %v10678_v0 = vld [vmem:[%s13760_s8 + $0x58] sm:$0xff] }
 0x7a2   : > { %3327 = vst.msk [vmem:[#allocation13 + $0x38] sm:$0xff] %vm3123_vm1, %v3209_v24  ;;  %v10684_v24 = vld [vmem:[%s13760_s8 + $0x60] sm:$0xff] }
 0x7a3   : > { %13875 = vst [vmem:[#allocation27_spill] sm:$0xff] %v10678_v0 }
 0x7a4   : > { %13876 = vst [vmem:[#allocation28_spill] sm:$0xff] %v10684_v24 }
 0x7a5   : > { %v3078_v25 = vpop.f32.mrf.mxu2  ;;  %v3275_v28 = vpop.f32.mrf.mxu3 }
 0x7a6   : > { %3153 = vst.msk [vmem:[#allocation12 + $0xe8] sm:$0xff] %vm3123_vm1, %v3078_v25  ;;  %v10689_v25 = vld [vmem:[%s13760_s8 + $0x68] sm:$0xff] }
 0x7a7   : > { %3349 = vst.msk [vmem:[#allocation13 + $0xe8] sm:$0xff] %vm3123_vm1, %v3275_v28  ;;  %v10694_v28 = vld [vmem:[%s13760_s8 + $0x70] sm:$0xff] }
 0x7a8   : > { %v3015_v29 = vpop.f32.mrf.mxu0  ;;  %v3212_v33 = vpop.f32.mrf.mxu1  ;;  %13877 = vst [vmem:[#allocation29_spill] sm:$0xff] %v10689_v25 }
 0x7a9   : > { %3132 = vst.msk [vmem:[#allocation12 + $0x40] sm:$0xff] %vm3123_vm1, %v3015_v29  ;;  %v10699_v29 = vld [vmem:[%s13760_s8 + $0x78] sm:$0xff] }
 0x7aa   : > { %3328 = vst.msk [vmem:[#allocation13 + $0x40] sm:$0xff] %vm3123_vm1, %v3212_v33  ;;  %v10704_v33 = vld [vmem:[%s13760_s8 + $0x80] sm:$0xff] }
 0x7ab   : > { %13878 = vst [vmem:[#allocation30_spill] sm:$0xff] %v10694_v28 }
 0x7ac   : > { %13879 = vst [vmem:[#allocation31_spill] sm:$0xff] %v10699_v29 }
 0x7ad   : > { %v3081_v34 = vpop.f32.mrf.mxu2  ;;  %v3278_v35 = vpop.f32.mrf.mxu3  ;;  %13880 = vst [vmem:[#allocation32_spill] sm:$0xff] %v10704_v33 }
 0x7ae   : > { %3154 = vst.msk [vmem:[#allocation12 + $0xf0] sm:$0xff] %vm3123_vm1, %v3081_v34  ;;  %v10709_v34 = vld [vmem:[%s13760_s8 + $0x88] sm:$0xff] }
 0x7af   : > { %3350 = vst.msk [vmem:[#allocation13 + $0xf0] sm:$0xff] %vm3123_vm1, %v3278_v35 }
 0x7b0   : > { %v3018_v36 = vpop.f32.mrf.mxu0  ;;  %v3215_v37 = vpop.f32.mrf.mxu1  ;;  %13881 = vst [vmem:[#allocation33_spill] sm:$0xff] %v10709_v34 }
 0x7b1   : > { %3133 = vst.msk [vmem:[#allocation12 + $0x48] sm:$0xff] %vm3123_vm1, %v3018_v36 }
 0x7b2   : > { %3329 = vst.msk [vmem:[#allocation13 + $0x48] sm:$0xff] %vm3123_vm1, %v3215_v37  ;;  %v10714_v37 = vld [vmem:[%s13760_s8 + $0x90] sm:$0xff] }
 0x7b3   : > { %13882 = vst [vmem:[#allocation34_spill] sm:$0xff] %v10714_v37 }
 0x7b5   : > { %v3084_v38 = vpop.f32.mrf.mxu2  ;;  %v3281_v39 = vpop.f32.mrf.mxu3 }
 0x7b6   : > { %3155 = vst.msk [vmem:[#allocation12 + $0xf8] sm:$0xff] %vm3123_vm1, %v3084_v38  ;;  %v10719_v38 = vld [vmem:[%s13760_s8 + $0x98] sm:$0xff] }
 0x7b7   : > { %3351 = vst.msk [vmem:[#allocation13 + $0xf8] sm:$0xff] %vm3123_vm1, %v3281_v39  ;;  %v10724_v39 = vld [vmem:[%s13760_s8 + $0xa0] sm:$0xff] }
 0x7b8   : > { %v3021_v40 = vpop.f32.mrf.mxu0  ;;  %v3218_v41 = vpop.f32.mrf.mxu1  ;;  %13883 = vst [vmem:[#allocation35_spill] sm:$0xff] %v10719_v38 }
 0x7b9   : > { %3134 = vst.msk [vmem:[#allocation12 + $0x50] sm:$0xff] %vm3123_vm1, %v3021_v40  ;;  %v10730_v40 = vld [vmem:[%s13760_s8 + $0xa8] sm:$0xff] }
 0x7ba   : > { %3330 = vst.msk [vmem:[#allocation13 + $0x50] sm:$0xff] %vm3123_vm1, %v3218_v41  ;;  %v10735_v41 = vld [vmem:[%s13760_s8 + $0xb0] sm:$0xff] }
 0x7bb   : > { %13884 = vst [vmem:[#allocation36_spill] sm:$0xff] %v10724_v39 }
 0x7bc   : > { %13885 = vst [vmem:[#allocation37_spill] sm:$0xff] %v10730_v40 }
 0x7bd   : > { %v3087_v42 = vpop.f32.mrf.mxu2  ;;  %v3284_v43 = vpop.f32.mrf.mxu3  ;;  %13886 = vst [vmem:[#allocation38_spill] sm:$0xff] %v10735_v41 }
 0x7be   : > { %3156 = vst.msk [vmem:[#allocation12 + $0x100] sm:$0xff] %vm3123_vm1, %v3087_v42  ;;  %v10740_v42 = vld [vmem:[%s13760_s8 + $0xb8] sm:$0xff] }
 0x7bf   : > { %3352 = vst.msk [vmem:[#allocation13 + $0x100] sm:$0xff] %vm3123_vm1, %v3284_v43  ;;  %v10746_v43 = vld [vmem:[%s13760_s8 + $0xc0] sm:$0xff] }
 0x7c0   : > { %v3024_v44 = vpop.f32.mrf.mxu0  ;;  %v3221_v45 = vpop.f32.mrf.mxu1  ;;  %13887 = vst [vmem:[#allocation39_spill] sm:$0xff] %v10740_v42 }
 0x7c1   : > { %3135 = vst.msk [vmem:[#allocation12 + $0x58] sm:$0xff] %vm3123_vm1, %v3024_v44  ;;  %v10751_v44 = vld [vmem:[%s13760_s8 + $0xc8] sm:$0xff] }
 0x7c2   : > { %3331 = vst.msk [vmem:[#allocation13 + $0x58] sm:$0xff] %vm3123_vm1, %v3221_v45  ;;  %v10756_v45 = vld [vmem:[%s13760_s8 + $0xd0] sm:$0xff] }
 0x7c3   : > { %13888 = vst [vmem:[#allocation40_spill] sm:$0xff] %v10746_v43 }
 0x7c4   : > { %13889 = vst [vmem:[#allocation41_spill] sm:$0xff] %v10751_v44 }
 0x7c5   : > { %v3090_v46 = vpop.f32.mrf.mxu2  ;;  %v3287_v47 = vpop.f32.mrf.mxu3 }
 0x7c6   : > { %3157 = vst.msk [vmem:[#allocation12 + $0x108] sm:$0xff] %vm3123_vm1, %v3090_v46  ;;  %v10761_v46 = vld [vmem:[%s13760_s8 + $0xd8] sm:$0xff] }
 0x7c7   : > { %3353 = vst.msk [vmem:[#allocation13 + $0x108] sm:$0xff] %vm3123_vm1, %v3287_v47  ;;  %v10766_v47 = vld [vmem:[%s13760_s8 + $0xe0] sm:$0xff] }
 0x7c8   : > { %v3027_v48 = vpop.f32.mrf.mxu0  ;;  %v3224_v56 = vpop.f32.mrf.mxu1 }
 0x7c9   : > { %3136 = vst.msk [vmem:[#allocation12 + $0x60] sm:$0xff] %vm3123_vm1, %v3027_v48  ;;  %v10771_v48 = vld [vmem:[%s13760_s8 + $0xe8] sm:$0xff] }
 0x7ca   : > { %3332 = vst.msk [vmem:[#allocation13 + $0x60] sm:$0xff] %vm3123_vm1, %v3224_v56 }
 0x7cd   : > { %v3093_v61 = vpop.f32.mrf.mxu2  ;;  %v3290_v4 = vpop.f32.mrf.mxu3 }
 0x7ce   : > { %3158 = vst.msk [vmem:[#allocation12 + $0x110] sm:$0xff] %vm3123_vm1, %v3093_v61 }
 0x7cf   : > { %3354 = vst.msk [vmem:[#allocation13 + $0x110] sm:$0xff] %vm3123_vm1, %v3290_v4  ;;  %v10776_v4 = vld [vmem:[%s13760_s8 + $0xf0] sm:$0xff] }
 0x7d0   : > { %v3030_v5 = vpop.f32.mrf.mxu0  ;;  %v3227_v7 = vpop.f32.mrf.mxu1  ;;  %13890 = vst [vmem:[#allocation42_spill] sm:$0xff] %v10776_v4 }
 0x7d1   : > { %3137 = vst.msk [vmem:[#allocation12 + $0x68] sm:$0xff] %vm3123_vm1, %v3030_v5  ;;  %v10781_v5 = vld [vmem:[%s13760_s8 + $0xf8] sm:$0xff] }
 0x7d2   : > { %3333 = vst.msk [vmem:[#allocation13 + $0x68] sm:$0xff] %vm3123_vm1, %v3227_v7  ;;  %v10786_v7 = vld [vmem:[%s13761_s9] sm:$0xff] }
 0x7d3   : > { %13891 = vst [vmem:[#allocation43_spill] sm:$0xff] %v10781_v5 }
 0x7d4   : > { %13892 = vst [vmem:[#allocation44_spill] sm:$0xff] %v10786_v7 }
 0x7d5   : > { %v3096_v10 = vpop.f32.mrf.mxu2  ;;  %v3293_v11 = vpop.f32.mrf.mxu3 }
 0x7d6   : > { %3159 = vst.msk [vmem:[#allocation12 + $0x118] sm:$0xff] %vm3123_vm1, %v3096_v10  ;;  %v10792_v10 = vld [vmem:[%s13761_s9 + $0x8] sm:$0xff] }
 0x7d7   : > { %3355 = vst.msk [vmem:[#allocation13 + $0x118] sm:$0xff] %vm3123_vm1, %v3293_v11  ;;  %v10797_v11 = vld [vmem:[%s13761_s9 + $0x10] sm:$0xff] }
 0x7d8   : > { %v3033_v21 = vpop.f32.mrf.mxu0  ;;  %v3230_v1 = vpop.f32.mrf.mxu1  ;;  %13893 = vst [vmem:[#allocation45_spill] sm:$0xff] %v10792_v10 }
 0x7d9   : > { %3138 = vst.msk [vmem:[#allocation12 + $0x70] sm:$0xff] %vm3123_vm1, %v3033_v21  ;;  %v10802_v21 = vld [vmem:[%s13761_s9 + $0x18] sm:$0xff] }
 0x7da   : > { %3334 = vst.msk [vmem:[#allocation13 + $0x70] sm:$0xff] %vm3123_vm1, %v3230_v1  ;;  %v10808_v1 = vld [vmem:[%s13761_s9 + $0x20] sm:$0xff] }
 0x7db   : > { %13894 = vst [vmem:[#allocation46_spill] sm:$0xff] %v10797_v11 }
 0x7dc   : > { %13895 = vst [vmem:[#allocation47_spill] sm:$0xff] %v10802_v21 }
 0x7dd   : > { %v3099_v2 = vpop.f32.mrf.mxu2  ;;  %v3296_v6 = vpop.f32.mrf.mxu3  ;;  %13896 = vst [vmem:[#allocation48_spill] sm:$0xff] %v10808_v1 }
 0x7de   : > { %3160 = vst.msk [vmem:[#allocation12 + $0x120] sm:$0xff] %vm3123_vm1, %v3099_v2  ;;  %v10813_v2 = vld [vmem:[%s13761_s9 + $0x28] sm:$0xff] }
 0x7df   : > { %3356 = vst.msk [vmem:[#allocation13 + $0x120] sm:$0xff] %vm3123_vm1, %v3296_v6  ;;  %v10818_v6 = vld [vmem:[%s13761_s9 + $0x30] sm:$0xff] }
 0x7e0   : > { %v3036_v8 = vpop.f32.mrf.mxu0  ;;  %v3233_v22 = vpop.f32.mrf.mxu1  ;;  %13897 = vst [vmem:[#allocation49_spill] sm:$0xff] %v10813_v2 }
 0x7e1   : > { %3139 = vst.msk [vmem:[#allocation12 + $0x78] sm:$0xff] %vm3123_vm1, %v3036_v8  ;;  %v10823_v8 = vld [vmem:[%s13761_s9 + $0x38] sm:$0xff] }
 0x7e2   : > { %3335 = vst.msk [vmem:[#allocation13 + $0x78] sm:$0xff] %vm3123_vm1, %v3233_v22  ;;  %v10828_v22 = vld [vmem:[%s13761_s9 + $0x40] sm:$0xff] }
 0x7e3   : > { %13898 = vst [vmem:[#allocation50_spill] sm:$0xff] %v10818_v6 }
 0x7e4   : > { %13899 = vst [vmem:[#allocation51_spill] sm:$0xff] %v10823_v8 }
 0x7e5   : > { %v3102_v23 = vpop.f32.mrf.mxu2  ;;  %v3299_v26 = vpop.f32.mrf.mxu3  ;;  %13900 = vst [vmem:[#allocation52_spill] sm:$0xff] %v10828_v22 }
 0x7e6   : > { %3161 = vst.msk [vmem:[#allocation12 + $0x128] sm:$0xff] %vm3123_vm1, %v3102_v23  ;;  %v10833_v23 = vld [vmem:[%s13761_s9 + $0x48] sm:$0xff] }
 0x7e7   : > { %3357 = vst.msk [vmem:[#allocation13 + $0x128] sm:$0xff] %vm3123_vm1, %v3299_v26 }
 0x7e8   : > { %v3039_v27 = vpop.f32.mrf.mxu0  ;;  %v3236_v55 = vpop.f32.mrf.mxu1  ;;  %13901 = vst [vmem:[#allocation53_spill] sm:$0xff] %v10833_v23 }
 0x7e9   : > { %3140 = vst.msk [vmem:[#allocation12 + $0x80] sm:$0xff] %vm3123_vm1, %v3039_v27 }
 0x7ea   : > { %3336 = vst.msk [vmem:[#allocation13 + $0x80] sm:$0xff] %vm3123_vm1, %v3236_v55  ;;  %v10838_v55 = vld [vmem:[%s13761_s9 + $0x50] sm:$0xff] }
 0x7ed   : > { %v3105_v57 = vpop.f32.mrf.mxu2  ;;  %v3302_v30 = vpop.f32.mrf.mxu3 }
 0x7ee   : > { %3162 = vst.msk [vmem:[#allocation12 + $0x130] sm:$0xff] %vm3123_vm1, %v3105_v57  ;;  %v10843_v57 = vld [vmem:[%s13761_s9 + $0x58] sm:$0xff] }
 0x7ef   : > { %3358 = vst.msk [vmem:[#allocation13 + $0x130] sm:$0xff] %vm3123_vm1, %v3302_v30  ;;  %v10848_v30 = vld [vmem:[%s13761_s9 + $0x60] sm:$0xff] }
 0x7f0   : > { %v3042_v31 = vpop.f32.mrf.mxu0  ;;  %v3239_v32 = vpop.f32.mrf.mxu1  ;;  %13902 = vst [vmem:[#allocation54_spill] sm:$0xff] %v10848_v30 }
 0x7f1   : > { %3141 = vst.msk [vmem:[#allocation12 + $0x88] sm:$0xff] %vm3123_vm1, %v3042_v31  ;;  %v10854_v31 = vld [vmem:[%s13761_s9 + $0x68] sm:$0xff] }
 0x7f2   : > { %3337 = vst.msk [vmem:[#allocation13 + $0x88] sm:$0xff] %vm3123_vm1, %v3239_v32  ;;  %v10859_v32 = vld [vmem:[%s13761_s9 + $0x70] sm:$0xff] }
 0x7f3   : > { %13903 = vst [vmem:[#allocation55_spill] sm:$0xff] %v10854_v31 }
 0x7f4   : > { %13904 = vst [vmem:[#allocation56_spill] sm:$0xff] %v10859_v32 }
 0x7f5   : > { %v3108_v49 = vpop.f32.mrf.mxu2  ;;  %v3305_v14 = vpop.f32.mrf.mxu3 }
 0x7f6   : > { %3163 = vst.msk [vmem:[#allocation12 + $0x138] sm:$0xff] %vm3123_vm1, %v3108_v49  ;;  %v10864_v49 = vld [vmem:[%s13761_s9 + $0x78] sm:$0xff] }
 0x7f7   : > { %3359 = vst.msk [vmem:[#allocation13 + $0x138] sm:$0xff] %vm3123_vm1, %v3305_v14 }
 0x7f8   : > { %v3045_v53 = vpop.f32.mrf.mxu0  ;;  %v3242_v54 = vpop.f32.mrf.mxu1 }
 0x7f9   : > { %3142 = vst.msk [vmem:[#allocation12 + $0x90] sm:$0xff] %vm3123_vm1, %v3045_v53 }
 0x7fa   : > { %3338 = vst.msk [vmem:[#allocation13 + $0x90] sm:$0xff] %vm3123_vm1, %v3242_v54 }
 0x7fd   : > { %v3111_v35 = vpop.f32.mrf.mxu2  ;;  %v3308_v36 = vpop.f32.mrf.mxu3 }
 0x7fe   : > { %3164 = vst.msk [vmem:[#allocation12 + $0x140] sm:$0xff] %vm3123_vm1, %v3111_v35 }
 0x7ff   : > { %3360 = vst.msk [vmem:[#allocation13 + $0x140] sm:$0xff] %vm3123_vm1, %v3308_v36 }
 0x800   : > { %v3048_v56 = vpop.f32.mrf.mxu0  ;;  %v3245_v61 = vpop.f32.mrf.mxu1 }
 0x801   : > { %3143 = vst.msk [vmem:[#allocation12 + $0x98] sm:$0xff] %vm3123_vm1, %v3048_v56 }
 0x802   : > { %3339 = vst.msk [vmem:[#allocation13 + $0x98] sm:$0xff] %vm3123_vm1, %v3245_v61 }
 0x805   : > { %v3114_v26 = vpop.f32.mrf.mxu2  ;;  %v3311_v27 = vpop.f32.mrf.mxu3 }
 0x806   : > { %3165 = vst.msk [vmem:[#allocation12 + $0x148] sm:$0xff] %vm3123_vm1, %v3114_v26 }
 0x807   : > { %3361 = vst.msk [vmem:[#allocation13 + $0x148] sm:$0xff] %vm3123_vm1, %v3311_v27 }
 0x808   : > { %v3051_v14 = vpop.f32.mrf.mxu0  ;;  %v3248_v53 = vpop.f32.mrf.mxu1 }
 0x809   : > { %3144 = vst.msk [vmem:[#allocation12 + $0xa0] sm:$0xff] %vm3123_vm1, %v3051_v14 }
 0x80a   : > { %3340 = vst.msk [vmem:[#allocation13 + $0xa0] sm:$0xff] %vm3123_vm1, %v3248_v53 }
 0x80d   : > { %v3117_v54 = vpop.f32.mrf.mxu2  ;;  %v3314_v35 = vpop.f32.mrf.mxu3 }
 0x80e   : > { %3166 = vst.msk [vmem:[#allocation12 + $0x150] sm:$0xff] %vm3123_vm1, %v3117_v54 }
 0x80f   : > { %3362 = vst.msk [vmem:[#allocation13 + $0x150] sm:$0xff] %vm3123_vm1, %v3314_v35 }
 0x810   : > { %v3054_v36 = vpop.f32.mrf.mxu0  ;;  %v3251_v56 = vpop.f32.mrf.mxu1 }
 0x811   : > { %3145 = vst.msk [vmem:[#allocation12 + $0xa8] sm:$0xff] %vm3123_vm1, %v3054_v36 }
 0x812   : > { %3341 = vst.msk [vmem:[#allocation13 + $0xa8] sm:$0xff] %vm3123_vm1, %v3251_v56 }
 0x815   : > { %v3120_v61 = vpop.f32.mrf.mxu2  ;;  %v3317_v26 = vpop.f32.mrf.mxu3 }
 0x816   : > { %3167 = vst.msk [vmem:[#allocation12 + $0x158] sm:$0xff] %vm3123_vm1, %v3120_v61 }
 0x817   : > { %3363 = vst.msk [vmem:[#allocation13 + $0x158] sm:$0xff] %vm3123_vm1, %v3317_v26 }
 0x818 LB: >> { %s10881_s19 = sshll.u32 %s9003_s18, 5  ;;  %s9013_s23 = smov 127   ;;  %v13905_v33 = vld [vmem:[#allocation32_spill] sm:$0xff]  ;;  %v13907_v37 = vld [vmem:[#allocation34_spill] sm:$0xff]  ;;  %v13915_v10 = vld [vmem:[#allocation45_spill] sm:$0xff]  ;;  %vm3740_vm2 = vcmask 80896   ;;  %s9003_s18 = sphi %s10875_s18, %s3417_s18  }
 0x819   : >> { %s3428_s20 = scalar_lea.vmem [#allocation13], %s10881_s19  ;;  %s3419_s24 = scalar_lea.vmem [#allocation12], %s10881_s19  ;;  %v13906_v15 = vld [vmem:[#allocation24_spill] sm:$0xff]  ;;  %v13908_v17 = vld [vmem:[#allocation26_spill] sm:$0xff]  ;;  %v13920_v21 = vld [vmem:[#allocation47_spill] sm:$0xff] }
 0x81a   : >> { %v13909_v39 = vld [vmem:[#allocation36_spill] sm:$0xff]  ;;  %v13910_v41 = vld [vmem:[#allocation38_spill] sm:$0xff]  ;;  %v13921_v23 = vld [vmem:[#allocation53_spill] sm:$0xff]  ;;  %s10954_s22 = scalar_lea.vmem [#allocation5], %s10881_s19  ;;  %s3417_s18 = sadd.s32 1, %s9003_s18  }
 0x81b   : >> { %v13911_v43 = vld [vmem:[#allocation40_spill] sm:$0xff]  ;;  %v13913_v4 = vld [vmem:[#allocation42_spill] sm:$0xff]  ;;  %v13922_v8 = vld [vmem:[#allocation51_spill] sm:$0xff]  ;;  %p3414_p7 = scmp.ge.s32.totalorder %s3417_s18, 10  }
 0x81c   : >> { %v13912_v24 = vld [vmem:[#allocation28_spill] sm:$0xff]  ;;  %v13914_v28 = vld [vmem:[#allocation30_spill] sm:$0xff]  ;;  %v13923_v2 = vld [vmem:[#allocation49_spill] sm:$0xff]  ;;  %vm3906_vm4 = vcmask (%p3414_p7), 1041408   ;;  %s9015_s25 = smov (%p3414_p7), 127   ;;  %vm6310_vm5 = vcmask (%p3414_p7), 1043456  }
 0x81d   : >> { %v3426_v26 = vld [vmem:[%s3419_s24 + $0x30] sm:$0xff]  ;;  %v3427_v3 = vld [vmem:[%s3419_s24 + $0x38] sm:$0xff]  ;;  %v3425_v19 = vld [vmem:[%s3419_s24 + $0x28] sm:$0xff]  ;;  %vm6379_vm6 = vcmask (%p3414_p7), 15360   ;;  %vm7308_vm7 = vcmask (%p3414_p7), 7168   ;;  %vm7329_vm12 = vcmask (%p3414_p7), 523264  }
 0x81e   : >> { %v3435_v27 = vld [vmem:[%s3428_s20 + $0x30] sm:$0xff]  ;;  %v3436_v14 = vld [vmem:[%s3428_s20 + $0x38] sm:$0xff]  ;;  %v3433_v56 = vld [vmem:[%s3428_s20 + $0x20] sm:$0xff]  ;;  %v8445_v13 = vpack.i.bf16 %v3426_v26, %v3427_v3  ;;  %vm7360_vm8 = vcmask (%p3414_p7), 6144  }
 0x81f   : >> { %v8425_v53 = vpack.i.bf16 %v3435_v27, %v3436_v14  ;;  %v3431_v54 = vld [vmem:[%s3428_s20 + $0x10] sm:$0xff]  ;;  %v3432_v35 = vld [vmem:[%s3428_s20 + $0x18] sm:$0xff]  ;;  %8231 = vmatpush.msra.mxu2 %v3436_v14  ;;  %3581 = vmatpush.msra.mxu0 %v3436_v14  ;;  %v3434_v61 = vld [vmem:[%s3428_s20 + $0x28] sm:$0xff] }
 0x820   : >> { %v8435_v36 = vpack.i.bf16 %v3431_v54, %v3432_v35  ;;  %v3429_v12 = vld [vmem:[%s3428_s20] sm:$0xff]  ;;  %v3430_v20 = vld [vmem:[%s3428_s20 + $0x8] sm:$0xff]  ;;  %v8430_v9 = vpack.i.bf16 %v3433_v56, %v3434_v61  ;;  %8446 = vrot.lane.b32.xlu2 %v8445_v13, %s9013_s23  ;;  %v3423_v18 = vld [vmem:[%s3419_s24 + $0x18] sm:$0xff] }
 0x821   : >> { %8426 = vrot.lane.b32.xlu0 %v8425_v53, %s9013_s23  ;;  %8232 = vmatpush.msra.mxu2 %v3435_v27  ;;  %v8440_v14 = vpack.i.bf16 %v3429_v12, %v3430_v20  ;;  %v3424_v53 = vld [vmem:[%s3419_s24 + $0x20] sm:$0xff]  ;;  %v13917_v7 = vld [vmem:[#allocation44_spill] sm:$0xff]  ;;  %v13926_v16 = vld [vmem:[#allocation25_spill] sm:$0xff] }
 0x822   : >> { %8436 = vrot.lane.b32.xlu1 %v8435_v36, %s9013_s23  ;;  %3582 = vmatpush.msra.mxu0 %v3435_v27  ;;  %v8450_v36 = vpack.i.bf16 %v3424_v53, %v3425_v19  ;;  %v3422_v27 = vld [vmem:[%s3419_s24 + $0x10] sm:$0xff]  ;;  %v3420_v5 = vld [vmem:[%s3419_s24] sm:$0xff]  ;;  %v13927_v34 = vld [vmem:[#allocation33_spill] sm:$0xff] }
 0x823   : >> { %8233 = vmatpush.msra.mxu2 %v3434_v61  ;;  %v8455_v13 = vpack.i.bf16 %v3422_v27, %v3423_v18  ;;  %v13916_v11 = vld [vmem:[#allocation46_spill] sm:$0xff]  ;;  %v13919_v1 = vld [vmem:[#allocation48_spill] sm:$0xff]  ;;  %v13928_v31 = vld [vmem:[#allocation55_spill] sm:$0xff] }
 0x824   : >> { %3583 = vmatpush.msra.mxu0 %v3434_v61  ;;  %v3421_v61 = vld [vmem:[%s3419_s24 + $0x8] sm:$0xff]  ;;  %v13918_v6 = vld [vmem:[#allocation50_spill] sm:$0xff]  ;;  %v13925_v22 = vld [vmem:[#allocation52_spill] sm:$0xff] }
 0x825   : >> { %8234 = vmatpush.msra.mxu2 %v3433_v56  ;;  %v13924_v30 = vld [vmem:[#allocation54_spill] sm:$0xff]  ;;  %v13929_v38 = vld [vmem:[#allocation35_spill] sm:$0xff]  ;;  %v13930_v32 = vld [vmem:[#allocation56_spill] sm:$0xff] }
 0x826   : >> { %3584 = vmatpush.msra.mxu0 %v3433_v56  ;;  %v8460_v56 = vpack.i.bf16 %v3420_v5, %v3421_v61  ;;  %v13931_v40 = vld [vmem:[#allocation37_spill] sm:$0xff]  ;;  %v13932_v42 = vld [vmem:[#allocation39_spill] sm:$0xff] }
 0x827   : >> { %8235 = vmatpush.msra.mxu2 %v3432_v35  ;;  %v13933_v44 = vld [vmem:[#allocation41_spill] sm:$0xff]  ;;  %v13934_v0 = vld [vmem:[#allocation27_spill] sm:$0xff] }
 0x828   : >> { %3585 = vmatpush.msra.mxu0 %v3432_v35  ;;  %8451 = vrot.lane.b32.xlu2 %v8450_v36, %s9013_s23  ;;  %v13935_v25 = vld [vmem:[#allocation29_spill] sm:$0xff]  ;;  %v13936_v29 = vld [vmem:[#allocation31_spill] sm:$0xff] }
 0x829   : >> { %8431 = vrot.lane.b32.xlu0 %v8430_v9, %s9013_s23  ;;  %8236 = vmatpush.msra.mxu2 %v3431_v54 }
 0x82a   : >> { %8441 = vrot.lane.b32.xlu1 %v8440_v14, %s9013_s23  ;;  %3586 = vmatpush.msra.mxu0 %v3431_v54 }
 0x82b   : >> { %8237 = vmatpush.msra.mxu2 %v3430_v20 }
 0x82c   : >> { %3587 = vmatpush.msra.mxu0 %v3430_v20 }
 0x82d   : >> { %8238 = vmatpush.msra.mxu2 %v3429_v12 }
 0x82e   : >> { %3588 = vmatpush.msra.mxu0 %v3429_v12 }
 0x82f   : >> { %8239 = vmatpush.msra.mxu2 %v3427_v3 }
 0x830   : >> { %3589 = vmatpush.msra.mxu0 %v3427_v3 }
 0x831   : >> { %8456 = vrot.lane.b32.xlu0 %v8455_v13, %s9013_s23  ;;  %8240 = vmatpush.msra.mxu2 %v3426_v26 }
 0x832   : >> { %8461 = vrot.lane.b32.xlu1 %v8460_v56, %s9013_s23  ;;  %3590 = vmatpush.msra.mxu0 %v3426_v26 }
 0x833   : >> { %8241 = vmatpush.msra.mxu2 %v3425_v19 }
 0x834   : >> { %3591 = vmatpush.msra.mxu0 %v3425_v19  ;;  %v9014_v19 = vmov 0  }
 0x835   : >> { %8242 = vmatpush.msra.mxu2 %v3424_v53  ;;  %8467 = vset.pattern.permute.xlu1 %v9014_v19 }
 0x836   : >> { %3592 = vmatpush.msra.mxu0 %v3424_v53  ;;  %8466 = vset.pattern.permute.xlu0 %v9014_v19 }
 0x837   : >> { %8243 = vmatpush.msra.mxu2 %v3423_v18  ;;  %8465 = vset.pattern.permute.xlu2 %v9014_v19 }
 0x838   : >> { %3593 = vmatpush.msra.mxu0 %v3423_v18  ;;  %3503 = vperm.xlu2 %8465, %v13917_v7  }
 0x839   : >> { %8244 = vmatpush.msra.mxu2 %v3422_v27  ;;  %3508 = vperm.xlu0 %8466, %v13915_v10  }
 0x83a   : >> { %3594 = vmatpush.msra.mxu0 %v3422_v27  ;;  %3513 = vperm.xlu1 %8467, %v13916_v11  }
 0x83b   : >> { %8245 = vmatpush.msra.mxu2 %v3421_v61 }
 0x83c   : >> { %3595 = vmatpush.msra.mxu0 %v3421_v61 }
 0x83d   : >> { %8246 = vmatpush.msra.mxu2 %v3420_v5 }
 0x83e   : >> { %3621 = vmatmul.f32.vlgmr.msra.gmra.mxu2 %v13905_v33  ;;  %3596 = vmatpush.msra.mxu0 %v3420_v5 }
 0x83f   : >> { %3597 = vmatmul.f32.vlgmr.msra.gmra.mxu0 %v13906_v15 }
 0x840   : >> { %3518 = vperm.xlu2 %8465, %v13920_v21  }
 0x841   : >> { %3533 = vperm.xlu0 %8466, %v13918_v6  }
 0x842   : >> { %3523 = vperm.xlu1 %8467, %v13919_v1  }
 0x846   : >> { %3624 = vmatmul.f32.gmra.mxu2 %v13907_v37 }
 0x847   : >> { %3600 = vmatmul.f32.gmra.mxu0 %v13908_v17 }
 0x848   : >> { %3528 = vperm.xlu2 %8465, %v13923_v2  }
 0x849   : >> { %3548 = vperm.xlu0 %8466, %v13921_v23  }
 0x84a   : >> { %3538 = vperm.xlu1 %8467, %v13922_v8  }
 0x84e   : >> { %3627 = vmatmul.f32.gmra.mxu2 %v13909_v39 }
 0x84f   : >> { %3603 = vmatmul.f32.gmra.mxu0 %v10642_v51 }
 0x850   : >> { %3543 = vperm.xlu2 %8465, %v13925_v22  }
 0x851   : >> { %3563 = vperm.xlu0 %8466, %v13924_v30  }
 0x852   : >> { %3553 = vperm.xlu1 %8467, %v10838_v55  }
 0x856   : >> { %3630 = vmatmul.f32.gmra.mxu2 %v13910_v41 }
 0x857   : >> { %3606 = vmatmul.f32.gmra.mxu0 %v10652_v58 }
 0x858   : >> { %3558 = vperm.xlu2 %8465, %v10843_v57  }
 0x859   : >> { %3578 = vperm.xlu0 %8466, %v10864_v49  }
 0x85a   : >> { %3568 = vperm.xlu1 %8467, %v13928_v31  }
 0x85e   : >> { %3633 = vmatmul.f32.gmra.mxu2 %v13911_v43 }
 0x85f   : >> { %3609 = vmatmul.f32.gmra.mxu0 %v10662_v60 }
 0x860   : >> { %3573 = vperm.xlu2 %8465, %v13930_v32  }
 0x866   : >> { %3636 = vmatmul.f32.gmra.mxu2 %v10756_v45 }
 0x867   : >> { %3612 = vmatmul.f32.gmra.mxu0 %v10673_v63 }
 0x86e   : >> { %3639 = vmatmul.f32.gmra.mxu2 %v10766_v47 }
 0x86f   : >> { %3615 = vmatmul.f32.gmra.mxu0 %v13912_v24 }
 0x876   : >> { %3642 = vmatmul.f32.gmra.mxu2 %v13913_v4 }
 0x877   : >> { %3618 = vmatmul.f32.gmra.mxu0 %v13914_v28 }
 0x87a   : >> { %v8447_v54 = vpop.permute.xlu2 %8446 }
 0x87b   : >> { %v8448_v13 = vunpack.i.l.bf16 %v8447_v54  ;;  %v8449_v56 = vunpack.i.h.bf16 %v8447_v54 }
 0x882   : >> { %v8452_v61 = vpop.permute.xlu2 %8451 }
 0x893   : >> { %v8427_v3 = vpop.permute.xlu0 %8426 }
 0x894   : >> { %v8428_v9 = vunpack.i.l.bf16 %v8427_v3  ;;  %v8437_v12 = vpop.permute.xlu1 %8436  ;;  %v8429_v18 = vunpack.i.h.bf16 %v8427_v3  ;;  %v8453_v3 = vunpack.i.l.bf16 %v8452_v61 }
 0x895   : >> { %v8438_v14 = vunpack.i.l.bf16 %v8437_v12  ;;  %v8439_v53 = vunpack.i.h.bf16 %v8437_v12  ;;  %v8454_v12 = vunpack.i.h.bf16 %v8452_v61 }
 0x896   : >> { %3646 = vmatpush.msra.mxu1 %v8428_v9  ;;  %8247 = vmatpush.msra.mxu3 %v8428_v9 }
 0x898   : >> { %3647 = vmatpush.msra.mxu1 %v8429_v18  ;;  %8248 = vmatpush.msra.mxu3 %v8429_v18 }
 0x89b   : >> { %v8432_v20 = vpop.permute.xlu0 %8431 }
 0x89c   : >> { %v8433_v5 = vunpack.i.l.bf16 %v8432_v20  ;;  %v8434_v35 = vunpack.i.h.bf16 %v8432_v20  ;;  %v8442_v26 = vpop.permute.xlu1 %8441 }
 0x89d   : >> { %v8443_v36 = vunpack.i.l.bf16 %v8442_v26  ;;  %v8444_v27 = vunpack.i.h.bf16 %v8442_v26 }
 0x89e   : >> { %3648 = vmatpush.msra.mxu1 %v8433_v5  ;;  %8249 = vmatpush.msra.mxu3 %v8433_v5 }
 0x8a0   : >> { %3649 = vmatpush.msra.mxu1 %v8434_v35  ;;  %8250 = vmatpush.msra.mxu3 %v8434_v35  ;;  %v13937_v35 = vld [vmem:[#allocation43_spill] sm:$0xff] }
 0x8a2   : >> { %3650 = vmatpush.msra.mxu1 %v8438_v14  ;;  %8251 = vmatpush.msra.mxu3 %v8438_v14 }
 0x8a3   : >> { %v8457_v9 = vpop.permute.xlu0 %8456 }
 0x8a4   : >> { %3651 = vmatpush.msra.mxu1 %v8439_v53  ;;  %8252 = vmatpush.msra.mxu3 %v8439_v53  ;;  %v8458_v18 = vunpack.i.l.bf16 %v8457_v9  ;;  %v8462_v19 = vpop.permute.xlu1 %8461  ;;  %v8459_v20 = vunpack.i.h.bf16 %v8457_v9 }
 0x8a5   : >> { %v8463_v5 = vunpack.i.l.bf16 %v8462_v19  ;;  %v8464_v54 = vunpack.i.h.bf16 %v8462_v19 }
 0x8a6   : >> { %3652 = vmatpush.msra.mxu1 %v8443_v36  ;;  %8253 = vmatpush.msra.mxu3 %v8443_v36 }
 0x8a8   : >> { %3653 = vmatpush.msra.mxu1 %v8444_v27  ;;  %8254 = vmatpush.msra.mxu3 %v8444_v27  ;;  %v3504_v27 = vpop.permute.xlu2 %3503 }
 0x8aa   : >> { %3654 = vmatpush.msra.mxu1 %v8448_v13  ;;  %8255 = vmatpush.msra.mxu3 %v8448_v13 }
 0x8ac   : >> { %3655 = vmatpush.msra.mxu1 %v8449_v56  ;;  %8256 = vmatpush.msra.mxu3 %v8449_v56  ;;  %v3514_v13 = vpop.permute.xlu1 %3513 }
 0x8ae   : >> { %3656 = vmatpush.msra.mxu1 %v8453_v3  ;;  %8257 = vmatpush.msra.mxu3 %v8453_v3  ;;  %v3509_v3 = vpop.permute.xlu0 %3508 }
 0x8b0   : >> { %3657 = vmatpush.msra.mxu1 %v8454_v12  ;;  %8258 = vmatpush.msra.mxu3 %v8454_v12  ;;  %v10941_v19 = vpop.permute.xlu2 %3518 }
 0x8b2   : >> { %3658 = vmatpush.msra.mxu1 %v8458_v18  ;;  %8259 = vmatpush.msra.mxu3 %v8458_v18 }
 0x8b4   : >> { %3659 = vmatpush.msra.mxu1 %v8459_v20  ;;  %8260 = vmatpush.msra.mxu3 %v8459_v20  ;;  %v3524_v20 = vpop.permute.xlu1 %3523 }
 0x8b6   : >> { %3660 = vmatpush.msra.mxu1 %v8463_v5  ;;  %8261 = vmatpush.msra.mxu3 %v8463_v5 }
 0x8b8   : >> { %3661 = vmatpush.msra.mxu1 %v8464_v54  ;;  %8262 = vmatpush.msra.mxu3 %v8464_v54  ;;  %v3529_v2 = vpop.permute.xlu2 %3528 }
 0x8b9   : >> { %3662 = vmatmul.f32.vlgmr.msra.gmra.mxu1 %v13926_v16  ;;  %3686 = vmatmul.f32.vlgmr.msra.gmra.mxu3 %v13927_v34 }
 0x8bc   : >> { %v3598_v26 = vpop.f32.mrf.mxu0  ;;  %v10947_v4 = vpop.permute.xlu1 %3538 }
 0x8bd   : >> { %v3599_v22 = vadd.f32 %v3598_v26, %v3504_v27 }
 0x8c0   : >> { %v3544_v15 = vpop.permute.xlu2 %3543 }
 0x8c1   : >> { %3665 = vmatmul.f32.gmra.mxu1 %v10637_v50  ;;  %3689 = vmatmul.f32.gmra.mxu3 %v13929_v38  ;;  %v3622_v14 = vpop.f32.mrf.mxu2 }
 0x8c2   : >> { %v3623_v23 = vadd.f32 %v3622_v14, %v3544_v15 }
 0x8c4   : >> { %v3601_v53 = vpop.f32.mrf.mxu0  ;;  %v3554_v17 = vpop.permute.xlu1 %3553 }
 0x8c5   : >> { %v3602_v39 = vadd.f32 %v3601_v53, %v3509_v3 }
 0x8c9   : >> { %3668 = vmatmul.f32.gmra.mxu1 %v10647_v52  ;;  %3692 = vmatmul.f32.gmra.mxu3 %v13931_v40  ;;  %v3625_v36 = vpop.f32.mrf.mxu2  ;;  %v3559_v40 = vpop.permute.xlu2 %3558 }
 0x8cc   : >> { %v3604_v56 = vpop.f32.mrf.mxu0 }
 0x8d1   : >> { %3671 = vmatmul.f32.gmra.mxu1 %v10657_v59  ;;  %3695 = vmatmul.f32.gmra.mxu3 %v13932_v42  ;;  %v3628_v12 = vpop.f32.mrf.mxu2 }
 0x8d4   : >> { %v10943_v5 = vpop.f32.mrf.mxu0 }
 0x8d9   : >> { %3674 = vmatmul.f32.gmra.mxu1 %v10668_v62  ;;  %3698 = vmatmul.f32.gmra.mxu3 %v13933_v44  ;;  %v10945_v1 = vpop.f32.mrf.mxu2 }
 0x8dc   : >> { %v3610_v7 = vpop.f32.mrf.mxu0 }
 0x8dd   : >> { %v3611_v24 = vadd.f32 %v3610_v7, %v3524_v20  ;;  %v3569_v7 = vpop.permute.xlu1 %3568 }
 0x8e1   : >> { %3677 = vmatmul.f32.gmra.mxu1 %v13934_v0  ;;  %3701 = vmatmul.f32.gmra.mxu3 %v10761_v46  ;;  %v3534_v0 = vpop.permute.xlu0 %3533  ;;  %v3634_v11 = vpop.f32.mrf.mxu2 }
 0x8e9   : >> { %3680 = vmatmul.f32.gmra.mxu1 %v13935_v25  ;;  %3704 = vmatmul.f32.gmra.mxu3 %v10771_v48  ;;  %v3549_v10 = vpop.permute.xlu0 %3548  ;;  %v3613_v25 = vpop.f32.mrf.mxu0 }
 0x8ea   : >> { %v3637_v33 = vpop.f32.mrf.mxu2  ;;  %v3626_v41 = vadd.f32 %v3625_v36, %v3549_v10  ;;  %v3614_v26 = vadd.f32 %v3613_v25, %v3529_v2  ;;  %v3605_v25 = vadd.f32 %v3604_v56, %v3514_v13 }
 0x8f1   : >> { %3683 = vmatmul.f32.gmra.mxu1 %v13936_v29  ;;  %3707 = vmatmul.f32.gmra.mxu3 %v13937_v35  ;;  %v3564_v29 = vpop.permute.xlu0 %3563 }
 0x8f2   : >> { %v3635_v32 = vadd.f32 %v3634_v11, %v3564_v29  ;;  %v3640_v2 = vpop.f32.mrf.mxu2 }
 0x936   : >> { %v3663_v61 = vpop.f32.mrf.mxu1 }
 0x937   : >> { %v3664_v30 = vadd.f32 %v3663_v61, %v3599_v22  ;;  %v3616_v22 = vpop.f32.mrf.mxu0 }
 0x939   : >> { %v3711_v43 = vmax.f32 %v3664_v30, 0.0 }
 0x93c   : >> { %v3687_v9 = vpop.f32.mrf.mxu3 }
 0x93d   : >> { %v3688_v31 = vadd.f32 %v3687_v9, %v3623_v23  ;;  %v3638_v23 = vadd.f32 %v3637_v33, %v3569_v7 }
 0x93e   : >> { %v3666_v18 = vpop.f32.mrf.mxu1 }
 0x93f   : >> { %v3719_v44 = vmax.f32 %v3688_v31, 0.0  ;;  %v3667_v29 = vadd.f32 %v3666_v18, %v3602_v39  ;;  %v3619_v3 = vpop.f32.mrf.mxu0 }
 0x944   : >> { %v3690_v54 = vpop.f32.mrf.mxu3 }
 0x945   : >> { %v3691_v11 = vadd.f32 %v3690_v54, %v3626_v41  ;;  %v3574_v41 = vpop.permute.xlu2 %3573  ;;  %v3608_v54 = vadd.f32 %v10943_v5, %v10941_v19 }
 0x946   : >> { %v3669_v35 = vpop.f32.mrf.mxu1  ;;  %v3641_v36 = vadd.f32 %v3640_v2, %v3574_v41 }
 0x947   : >> { %v3670_v53 = vadd.f32 %v3669_v35, %v3605_v25  ;;  %v3579_v35 = vpop.permute.xlu0 %3578 }
 0x94c   : >> { %v3693_v6 = vpop.f32.mrf.mxu3 }
 0x94e   : >> { %v10949_v8 = vpop.f32.mrf.mxu1 }
 0x954   : >> { %v10951_v16 = vpop.f32.mrf.mxu3 }
 0x956   : >> { %v3675_v21 = vpop.f32.mrf.mxu1 }
 0x957   : >> { %v3676_v28 = vadd.f32 %v3675_v21, %v3611_v24 }
 0x959   : >> { %v3715_v37 = vmax.f32 %v3676_v28, 0.0 }
 0x95b   : >> { %v3727_v14 = vmax.f32 %v3711_v43, %v3715_v37  ;;  %v3720_v43 = vmax.f32 %v3691_v11, 0.0 }
 0x95c   : >> { %v3699_v34 = vpop.f32.mrf.mxu3 }
 0x95d   : >> { %v3700_v38 = vadd.f32 %v3699_v34, %v3635_v32 }
 0x95e   : >> { %v3678_v42 = vpop.f32.mrf.mxu1 }
 0x95f   : >> { %v3723_v15 = vmax.f32 %v3700_v38, 0.0  ;;  %v3679_v21 = vadd.f32 %v3678_v42, %v3614_v26  ;;  %v3629_v38 = vadd.f32 %v3628_v12, %v3554_v17  ;;  %v3712_v42 = vmax.f32 %v3667_v29, 0.0  ;;  %v3643_v26 = vpop.f32.mrf.mxu2 }
 0x960   : >> { %v3713_v12 = vmax.f32 %v3670_v53, 0.0 }
 0x961   : >> { %v3731_v24 = vmax.f32 %v3719_v44, %v3723_v15  ;;  %v3716_v10 = vmax.f32 %v3679_v21, 0.0  ;;  %v3617_v44 = vadd.f32 %v3616_v22, %v3534_v0  ;;  %v3694_v27 = vadd.f32 %v3693_v6, %v3629_v38 }
 0x962   : >> { %v3620_v0 = vadd.f32 %v3619_v3, %v10947_v4  ;;  %v3632_v6 = vadd.f32 %v10945_v1, %v3559_v40  ;;  %v3644_v21 = vadd.f32 %v3643_v26, %v3579_v35 }
 0x963   : >> { %v3735_v28 = vmax.f32 %v3727_v14, %v3731_v24  ;;  %v3728_v33 = vmax.f32 %v3712_v42, %v3716_v10  ;;  %v3721_v18 = vmax.f32 %v3694_v27, 0.0  ;;  %v3673_v24 = vadd.f32 %v10949_v8, %v3608_v54  ;;  %v13939_v8 = vld [vmem:[#allocation22_spill] sm:$0xff] (%p3414_p7) }
 0x964   : >> { %v3702_v34 = vpop.f32.mrf.mxu3  ;;  %v3697_v22 = vadd.f32 %v10951_v16, %v3632_v6  ;;  %v13938_v16 = vld [vmem:[#allocation21_spill] sm:$0xff] (%p3414_p7)  ;;  %7964 = vmatpush.msk.msra.mxu1 (%p3414_p7), %vm3906_vm4, %v13939_v8 }
 0x965   : >> { %3741 = vst.msk [vmem:[%s10954_s22] sm:$0xff] %vm3740_vm2, %v3735_v28  ;;  %v3703_v30 = vadd.f32 %v3702_v34, %v3638_v23  ;;  %v3714_v19 = vmax.f32 %v3673_v24, 0.0  ;;  %7922 = vmatpush.msk.msra.mxu0 (%p3414_p7), %vm3906_vm4, %v13938_v16 }
 0x966   : >> { %v3681_v37 = vpop.f32.mrf.mxu1  ;;  %v3722_v5 = vmax.f32 %v3697_v22, 0.0 }
 0x967   : >> { %v3724_v39 = vmax.f32 %v3703_v30, 0.0  ;;  %v3682_v32 = vadd.f32 %v3681_v37, %v3617_v44  ;;  %v13940_v30 = vmov (%p3414_p7), 1.0  }
 0x968   : > { %7923 = vmatpush.msk.msra.mxu0 (%p3414_p7), %vm9311_vm14, %v13940_v30  ;;  %7965 = vmatpush.msk.msra.mxu1 (%p3414_p7), %vm9337_vm3, %v13940_v30  ;;  %vm4047_vm14 = vcmask (%p3414_p7), 39936   ;;  %vm4876_vm3 = vcmask (%p3414_p7), 31744  }
 0x969   : >> { %v3732_v31 = vmax.f32 %v3720_v43, %v3724_v39  ;;  %v3717_v17 = vmax.f32 %v3682_v32, 0.0 }
 0x96b   : >> { %v3736_v61 = vmax.f32 %v3728_v33, %v3732_v31  ;;  %v3729_v15 = vmax.f32 %v3713_v12, %v3717_v17 }
 0x96c   : >> { %v3705_v9 = vpop.f32.mrf.mxu3 }
 0x96d   : >> { %3742 = vst.msk [vmem:[%s10954_s22 + $0x8] sm:$0xff] %vm3740_vm2, %v3736_v61  ;;  %v3706_v13 = vadd.f32 %v3705_v9, %v3641_v36 }
 0x96e   : >> { %v3684_v56 = vpop.f32.mrf.mxu1 }
 0x96f   : >> { %v3725_v20 = vmax.f32 %v3706_v13, 0.0  ;;  %v3685_v14 = vadd.f32 %v3684_v56, %v3620_v0 }
 0x971   : >> { %v3733_v7 = vmax.f32 %v3721_v18, %v3725_v20  ;;  %v3718_v4 = vmax.f32 %v3685_v14, 0.0 }
 0x973   : >> { %v3737_v29 = vmax.f32 %v3729_v15, %v3733_v7  ;;  %v3730_v34 = vmax.f32 %v3714_v19, %v3718_v4 }
 0x974   : >> { %v3708_v11 = vpop.f32.mrf.mxu3 }
 0x975   : >> { %3743 = vst.msk [vmem:[%s10954_s22 + $0x10] sm:$0xff] %vm3740_vm2, %v3737_v29  ;;  %v3709_v23 = vadd.f32 %v3708_v11, %v3644_v21 }
 0x977   : >> { %v3726_v28 = vmax.f32 %v3709_v23, 0.0 }
 0x979   : >> { %v3734_v40 = vmax.f32 %v3722_v5, %v3726_v28  ;;  %3416 = sbr.rel (!%p3414_p7) target bundleno = 2072 (0x818), region = 199 }
 0x97b   : >> { %v3738_v1 = vmax.f32 %v3730_v34, %v3734_v40 }
 0x97d   : >> { %3744 = vst.msk [vmem:[%s10954_s22 + $0x18] sm:$0xff] %vm3740_vm2, %v3738_v1 }
 0x984   : > { %v3745_v10 = vld [vmem:[#allocation5] sm:$0xff]  ;;  %v3746_v2 = vld [vmem:[#allocation5 + $0x8] sm:$0xff]  ;;  %v3747_v50 = vld [vmem:[#allocation5 + $0x10] sm:$0xff] }
 0x985   : > { %7924 = vmatmul.msk.f32.vlgmr.msra.gmra.mxu0 %vm3740_vm2, %v3745_v10  ;;  %7966 = vmatmul.msk.f32.vlgmr.msra.gmra.mxu1 %vm3740_vm2, %v3745_v10  ;;  %v3748_v51 = vld [vmem:[#allocation5 + $0x18] sm:$0xff]  ;;  %v3749_v52 = vld [vmem:[#allocation5 + $0x20] sm:$0xff]  ;;  %v3750_v58 = vld [vmem:[#allocation5 + $0x28] sm:$0xff] }
 0x986   : > { %v3751_v59 = vld [vmem:[#allocation5 + $0x30] sm:$0xff]  ;;  %v3752_v60 = vld [vmem:[#allocation5 + $0x38] sm:$0xff]  ;;  %v3753_v62 = vld [vmem:[#allocation5 + $0x40] sm:$0xff] }
 0x987   : > { %v3754_v63 = vld [vmem:[#allocation5 + $0x48] sm:$0xff]  ;;  %v3755_v45 = vld [vmem:[#allocation5 + $0x50] sm:$0xff]  ;;  %v3756_v46 = vld [vmem:[#allocation5 + $0x58] sm:$0xff] }
 0x988   : > { %v3757_v47 = vld [vmem:[#allocation5 + $0x60] sm:$0xff]  ;;  %v3758_v48 = vld [vmem:[#allocation5 + $0x68] sm:$0xff]  ;;  %v3759_v55 = vld [vmem:[#allocation5 + $0x70] sm:$0xff] }
 0x989   : > { %v3760_v57 = vld [vmem:[#allocation5 + $0x78] sm:$0xff]  ;;  %v3761_v42 = vld [vmem:[#allocation5 + $0x80] sm:$0xff]  ;;  %v3762_v39 = vld [vmem:[#allocation5 + $0x88] sm:$0xff] }
 0x98a   : > { %v3763_v31 = vld [vmem:[#allocation5 + $0x90] sm:$0xff]  ;;  %v3764_v36 = vld [vmem:[#allocation5 + $0x98] sm:$0xff]  ;;  %v3765_v3 = vld [vmem:[#allocation5 + $0xa0] sm:$0xff] }
 0x98b   : > { %v3766_v13 = vld [vmem:[#allocation5 + $0xa8] sm:$0xff]  ;;  %v3767_v18 = vld [vmem:[#allocation5 + $0xb0] sm:$0xff]  ;;  %v3768_v54 = vld [vmem:[#allocation5 + $0xb8] sm:$0xff] }
 0x98c   : > { %v3769_v6 = vld [vmem:[#allocation5 + $0xc0] sm:$0xff]  ;;  %v3770_v14 = vld [vmem:[#allocation5 + $0xc8] sm:$0xff]  ;;  %v3771_v22 = vld [vmem:[#allocation5 + $0xd0] sm:$0xff] }
 0x98d   : > { %7925 = vmatmul.msk.f32.gmra.mxu0 %vm3740_vm2, %v3746_v2  ;;  %7967 = vmatmul.msk.f32.gmra.mxu1 %vm3740_vm2, %v3746_v2  ;;  %v3772_v4 = vld [vmem:[#allocation5 + $0xd8] sm:$0xff]  ;;  %v3773_v5 = vld [vmem:[#allocation5 + $0xe0] sm:$0xff]  ;;  %v3774_v8 = vld [vmem:[#allocation5 + $0xe8] sm:$0xff] }
 0x995   : > { %7926 = vmatmul.msk.f32.gmra.mxu0 %vm3740_vm2, %v3747_v50  ;;  %7968 = vmatmul.msk.f32.gmra.mxu1 %vm3740_vm2, %v3747_v50 }
 0x99d   : > { %7927 = vmatmul.msk.f32.gmra.mxu0 %vm3740_vm2, %v3748_v51  ;;  %7969 = vmatmul.msk.f32.gmra.mxu1 %vm3740_vm2, %v3748_v51  ;;  %v3775_v51 = vld [vmem:[#allocation5 + $0xf0] sm:$0xff] }
 0x9a5   : > { %7928 = vmatmul.msk.f32.gmra.mxu0 %vm3740_vm2, %v3749_v52  ;;  %7970 = vmatmul.msk.f32.gmra.mxu1 %vm3740_vm2, %v3749_v52 }
 0x9ad   : > { %7929 = vmatmul.msk.f32.gmra.mxu0 %vm3740_vm2, %v3750_v58  ;;  %7971 = vmatmul.msk.f32.gmra.mxu1 %vm3740_vm2, %v3750_v58 }
 0x9b5   : > { %7930 = vmatmul.msk.f32.gmra.mxu0 %vm3740_vm2, %v3751_v59  ;;  %7972 = vmatmul.msk.f32.gmra.mxu1 %vm3740_vm2, %v3751_v59 }
 0x9bd   : > { %7931 = vmatmul.msk.f32.gmra.mxu0 %vm3740_vm2, %v3752_v60  ;;  %7973 = vmatmul.msk.f32.gmra.mxu1 %vm3740_vm2, %v3752_v60 }
 0x9c5   : > { %7932 = vmatmul.msk.f32.gmra.mxu0 %vm3740_vm2, %v3753_v62  ;;  %7974 = vmatmul.msk.f32.gmra.mxu1 %vm3740_vm2, %v3753_v62 }
 0x9cd   : > { %7933 = vmatmul.msk.f32.gmra.mxu0 %vm3740_vm2, %v3754_v63  ;;  %7975 = vmatmul.msk.f32.gmra.mxu1 %vm3740_vm2, %v3754_v63 }
 0x9d5   : > { %7934 = vmatmul.msk.f32.gmra.mxu0 %vm3740_vm2, %v3755_v45  ;;  %7976 = vmatmul.msk.f32.gmra.mxu1 %vm3740_vm2, %v3755_v45 }
 0x9dd   : > { %7935 = vmatmul.msk.f32.gmra.mxu0 %vm3740_vm2, %v3756_v46  ;;  %7977 = vmatmul.msk.f32.gmra.mxu1 %vm3740_vm2, %v3756_v46 }
 0x9e5   : > { %7936 = vmatmul.msk.f32.gmra.mxu0 %vm3740_vm2, %v3757_v47  ;;  %7978 = vmatmul.msk.f32.gmra.mxu1 %vm3740_vm2, %v3757_v47  ;;  %v3776_v47 = vld [vmem:[#allocation5 + $0xf8] sm:$0xff] }
 0x9ed   : > { %7937 = vmatmul.msk.f32.gmra.mxu0 %vm3740_vm2, %v3758_v48  ;;  %7979 = vmatmul.msk.f32.gmra.mxu1 %vm3740_vm2, %v3758_v48 }
 0x9f5   : > { %7938 = vmatmul.msk.f32.gmra.mxu0 %vm3740_vm2, %v3759_v55  ;;  %7980 = vmatmul.msk.f32.gmra.mxu1 %vm3740_vm2, %v3759_v55 }
 0x9fd   : > { %7939 = vmatmul.msk.f32.gmra.mxu0 %vm3740_vm2, %v3760_v57  ;;  %7981 = vmatmul.msk.f32.gmra.mxu1 %vm3740_vm2, %v3760_v57 }
 0xa02   : > { %v3927_v49 = vpop.f32.mrf.mxu0  ;;  %v4108_v37 = vpop.f32.mrf.mxu1 }
 0xa03   : > { %4048 = vst.msk [vmem:[#allocation14] sm:$0xff] %vm4047_vm14, %v3927_v49 }
 0xa04   : > { %4228 = vst.msk [vmem:[#allocation15] sm:$0xff] %vm4047_vm14, %v4108_v37 }
 0xa05   : > { %7940 = vmatmul.msk.f32.gmra.mxu0 %vm3740_vm2, %v3761_v42  ;;  %7982 = vmatmul.msk.f32.gmra.mxu1 %vm3740_vm2, %v3761_v42 }
 0xa0a   : > { %v3930_v43 = vpop.f32.mrf.mxu0  ;;  %v4111_v44 = vpop.f32.mrf.mxu1 }
 0xa0b   : > { %4049 = vst.msk [vmem:[#allocation14 + $0x8] sm:$0xff] %vm4047_vm14, %v3930_v43 }
 0xa0c   : > { %4229 = vst.msk [vmem:[#allocation15 + $0x8] sm:$0xff] %vm4047_vm14, %v4111_v44 }
 0xa0d   : > { %7941 = vmatmul.msk.f32.gmra.mxu0 %vm3740_vm2, %v3762_v39  ;;  %7983 = vmatmul.msk.f32.gmra.mxu1 %vm3740_vm2, %v3762_v39 }
 0xa12   : > { %v3933_v41 = vpop.f32.mrf.mxu0  ;;  %v4114_v33 = vpop.f32.mrf.mxu1 }
 0xa13   : > { %4050 = vst.msk [vmem:[#allocation14 + $0x10] sm:$0xff] %vm4047_vm14, %v3933_v41  ;;  %v3777_v41 = vld [vmem:[#allocation5 + $0x100] sm:$0xff] }
 0xa14   : > { %4230 = vst.msk [vmem:[#allocation15 + $0x10] sm:$0xff] %vm4047_vm14, %v4114_v33 }
 0xa15   : > { %7942 = vmatmul.msk.f32.gmra.mxu0 %vm3740_vm2, %v3763_v31  ;;  %7984 = vmatmul.msk.f32.gmra.mxu1 %vm3740_vm2, %v3763_v31 }
 0xa1a   : > { %v3936_v32 = vpop.f32.mrf.mxu0  ;;  %v4117_v53 = vpop.f32.mrf.mxu1 }
 0xa1b   : > { %4051 = vst.msk [vmem:[#allocation14 + $0x18] sm:$0xff] %vm4047_vm14, %v3936_v32  ;;  %v11122_v42 = vld [vmem:[#allocation15 + $0x10] sm:$0xff] }
 0xa1c   : > { %4231 = vst.msk [vmem:[#allocation15 + $0x18] sm:$0xff] %vm4047_vm14, %v4117_v53  ;;  %v11138_v53 = vld [vmem:[#allocation14] sm:$0xff] }
 0xa1d   : > { %7943 = vmatmul.msk.f32.gmra.mxu0 %vm3740_vm2, %v3764_v36  ;;  %7985 = vmatmul.msk.f32.gmra.mxu1 %vm3740_vm2, %v3764_v36 }
 0xa22   : > { %v3939_v27 = vpop.f32.mrf.mxu0  ;;  %v4120_v61 = vpop.f32.mrf.mxu1  ;;  %v11110_v48 = vld [vmem:[#allocation14 + $0x18] sm:$0xff] }
 0xa23   : > { %4052 = vst.msk [vmem:[#allocation14 + $0x20] sm:$0xff] %vm4047_vm14, %v3939_v27 }
 0xa24   : > { %4232 = vst.msk [vmem:[#allocation15 + $0x20] sm:$0xff] %vm4047_vm14, %v4120_v61  ;;  %v8538_v61 = vpack.i.bf16 %v11138_v53, %v11122_v42 }
 0xa25   : > { %7944 = vmatmul.msk.f32.gmra.mxu0 %vm3740_vm2, %v3765_v3  ;;  %7986 = vmatmul.msk.f32.gmra.mxu1 %vm3740_vm2, %v3765_v3 }
 0xa2a   : > { %v3942_v9 = vpop.f32.mrf.mxu0  ;;  %v4123_v17 = vpop.f32.mrf.mxu1 }
 0xa2b   : > { %4053 = vst.msk [vmem:[#allocation14 + $0x28] sm:$0xff] %vm4047_vm14, %v3942_v9 }
 0xa2c   : > { %4233 = vst.msk [vmem:[#allocation15 + $0x28] sm:$0xff] %vm4047_vm14, %v4123_v17 }
 0xa2d   : > { %7945 = vmatmul.msk.f32.gmra.mxu0 %vm3740_vm2, %v3766_v13  ;;  %7987 = vmatmul.msk.f32.gmra.mxu1 %vm3740_vm2, %v3766_v13 }
 0xa32   : > { %v3945_v56 = vpop.f32.mrf.mxu0  ;;  %v4126_v12 = vpop.f32.mrf.mxu1 }
 0xa33   : > { %4054 = vst.msk [vmem:[#allocation14 + $0x30] sm:$0xff] %vm4047_vm14, %v3945_v56  ;;  %v11107_v63 = vld [vmem:[#allocation15 + $0x28] sm:$0xff] }
 0xa34   : > { %4234 = vst.msk [vmem:[#allocation15 + $0x30] sm:$0xff] %vm4047_vm14, %v4126_v12  ;;  %v8523_v49 = vpack.i.bf16 %v11110_v48, %v11107_v63  ;;  %v3778_v56 = vld [vmem:[#allocation5 + $0x108] sm:$0xff] }
 0xa35   : > { %7946 = vmatmul.msk.f32.gmra.mxu0 %vm3740_vm2, %v3767_v18  ;;  %7988 = vmatmul.msk.f32.gmra.mxu1 %vm3740_vm2, %v3767_v18  ;;  %v4352_v18 = vld [vmem:[#allocation14 + $0x20] sm:$0xff] }
 0xa3a   : > { %v3948_v0 = vpop.f32.mrf.mxu0  ;;  %v4129_v20 = vpop.f32.mrf.mxu1  ;;  %v11092_v52 = vld [vmem:[#allocation14 + $0x30] sm:$0xff] }
 0xa3b   : > { %4055 = vst.msk [vmem:[#allocation14 + $0x38] sm:$0xff] %vm4047_vm14, %v3948_v0  ;;  %v4370_v12 = vld [vmem:[#allocation15 + $0x30] sm:$0xff] }
 0xa3c   : > { %4235 = vst.msk [vmem:[#allocation15 + $0x38] sm:$0xff] %vm4047_vm14, %v4129_v20  ;;  %v8518_v20 = vpack.i.bf16 %v4352_v18, %v4370_v12 }
 0xa3d   : > { %7947 = vmatmul.msk.f32.gmra.mxu0 %vm3740_vm2, %v3768_v54  ;;  %7989 = vmatmul.msk.f32.gmra.mxu1 %vm3740_vm2, %v3768_v54 }
 0xa42   : > { %v3951_v35 = vpop.f32.mrf.mxu0  ;;  %v4132_v26 = vpop.f32.mrf.mxu1  ;;  %v11140_v36 = vld [vmem:[#allocation14 + $0x38] sm:$0xff] }
 0xa43   : > { %4056 = vst.msk [vmem:[#allocation14 + $0x40] sm:$0xff] %vm4047_vm14, %v3951_v35 }
 0xa44   : > { %4236 = vst.msk [vmem:[#allocation15 + $0x40] sm:$0xff] %vm4047_vm14, %v4132_v26 }
 0xa45   : > { %7948 = vmatmul.msk.f32.gmra.mxu0 %vm3740_vm2, %v3769_v6  ;;  %7990 = vmatmul.msk.f32.gmra.mxu1 %vm3740_vm2, %v3769_v6 }
 0xa4a   : > { %v3954_v15 = vpop.f32.mrf.mxu0  ;;  %v4135_v7 = vpop.f32.mrf.mxu1  ;;  %v11188_v6 = vld [vmem:[#allocation14 + $0x40] sm:$0xff] }
 0xa4b   : > { %4057 = vst.msk [vmem:[#allocation14 + $0x48] sm:$0xff] %vm4047_vm14, %v3954_v15  ;;  %v11089_v38 = vld [vmem:[#allocation15 + $0x40] sm:$0xff]  ;;  %v4371_v15 = vld [vmem:[#allocation15 + $0x38] sm:$0xff] }
 0xa4c   : > { %4237 = vst.msk [vmem:[#allocation15 + $0x48] sm:$0xff] %vm4047_vm14, %v4135_v7  ;;  %v8508_v60 = vpack.i.bf16 %v11092_v52, %v11089_v38  ;;  %v3779_v7 = vld [vmem:[#allocation5 + $0x110] sm:$0xff] }
 0xa4d   : > { %7949 = vmatmul.msk.f32.gmra.mxu0 %vm3740_vm2, %v3770_v14  ;;  %7991 = vmatmul.msk.f32.gmra.mxu1 %vm3740_vm2, %v3770_v14  ;;  %v4367_v14 = vld [vmem:[#allocation15 + $0x18] sm:$0xff] }
 0xa52   : > { %v3957_v24 = vpop.f32.mrf.mxu0  ;;  %v4138_v21 = vpop.f32.mrf.mxu1  ;;  %v11062_v28 = vld [vmem:[#allocation14 + $0x48] sm:$0xff] }
 0xa53   : > { %4058 = vst.msk [vmem:[#allocation14 + $0x50] sm:$0xff] %vm4047_vm14, %v3957_v24  ;;  %v11126_v33 = vld [vmem:[#allocation15 + $0x48] sm:$0xff] }
 0xa54   : > { %4238 = vst.msk [vmem:[#allocation15 + $0x50] sm:$0xff] %vm4047_vm14, %v4138_v21  ;;  %v8503_v3 = vpack.i.bf16 %v11140_v36, %v11126_v33  ;;  %v4349_v24 = vld [vmem:[#allocation14 + $0x8] sm:$0xff] }
 0xa55   : > { %7950 = vmatmul.msk.f32.gmra.mxu0 %vm3740_vm2, %v3771_v22  ;;  %7992 = vmatmul.msk.f32.gmra.mxu1 %vm3740_vm2, %v3771_v22  ;;  %v8533_v21 = vpack.i.bf16 %v4349_v24, %v4367_v14 }
 0xa5a   : > { %v3960_v29 = vpop.f32.mrf.mxu0  ;;  %v4141_v11 = vpop.f32.mrf.mxu1  ;;  %v11076_v10 = vld [vmem:[#allocation14 + $0x50] sm:$0xff] }
 0xa5b   : > { %4059 = vst.msk [vmem:[#allocation14 + $0x58] sm:$0xff] %vm4047_vm14, %v3960_v29  ;;  %v11168_v0 = vld [vmem:[#allocation15 + $0x50] sm:$0xff] }
 0xa5c   : > { %4239 = vst.msk [vmem:[#allocation15 + $0x58] sm:$0xff] %vm4047_vm14, %v4141_v11  ;;  %v11200_v22 = vpack.i.bf16 %v11188_v6, %v11168_v0 }
 0xa5d   : > { %7951 = vmatmul.msk.f32.gmra.mxu0 %vm3740_vm2, %v3772_v4  ;;  %7993 = vmatmul.msk.f32.gmra.mxu1 %vm3740_vm2, %v3772_v4  ;;  %v4353_v4 = vld [vmem:[#allocation14 + $0x28] sm:$0xff] }
 0xa62   : > { %v3963_v23 = vpop.f32.mrf.mxu0  ;;  %v4144_v19 = vpop.f32.mrf.mxu1  ;;  %v11094_v58 = vld [vmem:[#allocation14 + $0x58] sm:$0xff] }
 0xa63   : > { %4060 = vst.msk [vmem:[#allocation14 + $0x60] sm:$0xff] %vm4047_vm14, %v3963_v23  ;;  %v11064_v34 = vld [vmem:[#allocation15 + $0x58] sm:$0xff]  ;;  %v4368_v23 = vld [vmem:[#allocation15 + $0x20] sm:$0xff] }
 0xa64   : > { %4240 = vst.msk [vmem:[#allocation15 + $0x60] sm:$0xff] %vm4047_vm14, %v4144_v19  ;;  %v11069_v40 = vpack.i.bf16 %v11062_v28, %v11064_v34  ;;  %v3780_v19 = vld [vmem:[#allocation5 + $0x118] sm:$0xff] }
 0xa65   : > { %7952 = vmatmul.msk.f32.gmra.mxu0 %vm3740_vm2, %v3773_v5  ;;  %7994 = vmatmul.msk.f32.gmra.mxu1 %vm3740_vm2, %v3773_v5 }
 0xa66   : > { %8469 = vrot.lane.b32.xlu2 %v11069_v40, %s9015_s25 }
 0xa6a   : > { %v3966_v1 = vpop.f32.mrf.mxu0  ;;  %v4147_v16 = vpop.f32.mrf.mxu1  ;;  %v4360_v55 = vld [vmem:[#allocation14 + $0x60] sm:$0xff] }
 0xa6b   : > { %4061 = vst.msk [vmem:[#allocation14 + $0x68] sm:$0xff] %vm4047_vm14, %v3966_v1  ;;  %v11078_v30 = vld [vmem:[#allocation15 + $0x60] sm:$0xff]  ;;  %v4350_v1 = vld [vmem:[#allocation14 + $0x10] sm:$0xff] }
 0xa6c   : > { %4241 = vst.msk [vmem:[#allocation15 + $0x68] sm:$0xff] %vm4047_vm14, %v4147_v16  ;;  %v11083_v25 = vpack.i.bf16 %v11076_v10, %v11078_v30  ;;  %v4365_v16 = vld [vmem:[#allocation15 + $0x8] sm:$0xff] }
 0xa6d   : > { %7953 = vmatmul.msk.f32.gmra.mxu0 %vm3740_vm2, %v3774_v8  ;;  %7995 = vmatmul.msk.f32.gmra.mxu1 %vm3740_vm2, %v3774_v8  ;;  %v4364_v8 = vld [vmem:[#allocation15] sm:$0xff] }
 0xa6e   : > { %8474 = vrot.lane.b32.xlu2 %v11083_v25, %s9015_s25 }
 0xa72   : > { %v3969_v2 = vpop.f32.mrf.mxu0  ;;  %v4150_v50 = vpop.f32.mrf.mxu1  ;;  %v11155_v9 = vld [vmem:[#allocation14 + $0x68] sm:$0xff] }
 0xa73   : > { %4062 = vst.msk [vmem:[#allocation14 + $0x70] sm:$0xff] %vm4047_vm14, %v3969_v2  ;;  %v4377_v59 = vld [vmem:[#allocation15 + $0x68] sm:$0xff] }
 0xa74   : > { %4242 = vst.msk [vmem:[#allocation15 + $0x70] sm:$0xff] %vm4047_vm14, %v4150_v50  ;;  %v11100_v62 = vpack.i.bf16 %v11094_v58, %v4377_v59 }
 0xa75   : > { %7954 = vmatmul.msk.f32.gmra.mxu0 %vm3740_vm2, %v3775_v51  ;;  %7996 = vmatmul.msk.f32.gmra.mxu1 %vm3740_vm2, %v3775_v51  ;;  %v8528_v51 = vpack.i.bf16 %v4350_v1, %v4368_v23 }
 0xa76   : > { %8509 = vrot.lane.b32.xlu2 %v8508_v60, %s9015_s25  ;;  %8479 = vrot.lane.b32.xlu1 %v11100_v62, %s9015_s25  ;;  %v4289_v60 = vld [vmem:[%s13762_s10 + $0xa8] sm:$0xff] }
 0xa7a   : > { %v3972_v45 = vpop.f32.mrf.mxu0  ;;  %v4153_v46 = vpop.f32.mrf.mxu1  ;;  %v11133_v32 = vld [vmem:[#allocation14 + $0x70] sm:$0xff] }
 0xa7b   : > { %4063 = vst.msk [vmem:[#allocation14 + $0x78] sm:$0xff] %vm4047_vm14, %v3972_v45  ;;  %v4378_v57 = vld [vmem:[#allocation15 + $0x70] sm:$0xff] }
 0xa7c   : > { %4243 = vst.msk [vmem:[#allocation15 + $0x78] sm:$0xff] %vm4047_vm14, %v4153_v46  ;;  %v11115_v37 = vpack.i.bf16 %v4360_v55, %v4378_v57 }
 0xa7d   : > { %7955 = vmatmul.msk.f32.gmra.mxu0 %vm3740_vm2, %v3776_v47  ;;  %7997 = vmatmul.msk.f32.gmra.mxu1 %vm3740_vm2, %v3776_v47 }
 0xa7e   : > { %8524 = vrot.lane.b32.xlu2 %v8523_v49, %s9015_s25  ;;  %8484 = vrot.lane.b32.xlu1 %v11115_v37, %s9015_s25  ;;  %v4292_v49 = vld [vmem:[%s13762_s10 + $0xc0] sm:$0xff] }
 0xa82   : > { %v3975_v43 = vpop.f32.mrf.mxu0  ;;  %v4156_v44 = vpop.f32.mrf.mxu1  ;;  %v11124_v39 = vld [vmem:[#allocation14 + $0x78] sm:$0xff] }
 0xa83   : > { %4064 = vst.msk [vmem:[#allocation14 + $0x80] sm:$0xff] %vm4047_vm14, %v3975_v43  ;;  %4588 = vmatpush.msrb.mxu1 %v11124_v39  ;;  %8263 = vmatpush.msra.mxu2 %v11124_v39  ;;  %v11131_v31 = vld [vmem:[#allocation15 + $0x78] sm:$0xff]  ;;  %v8488_v27 = vpack.i.bf16 %v11133_v32, %v11124_v39 }
 0xa84   : > { %4244 = vst.msk [vmem:[#allocation15 + $0x80] sm:$0xff] %vm4047_vm14, %v4156_v44  ;;  %4653 = vmatpush.msrb.mxu0 %v11131_v31  ;;  %8279 = vmatpush.msra.mxu3 %v11131_v31  ;;  %v11174_v54 = vpack.i.bf16 %v11155_v9, %v11131_v31 }
 0xa85   : > { %7956 = vmatmul.msk.f32.gmra.mxu0 %vm3740_vm2, %v3777_v41  ;;  %7998 = vmatmul.msk.f32.gmra.mxu1 %vm3740_vm2, %v3777_v41  ;;  %v3783_v41 = vld [vmem:[#allocation5 + $0x130] sm:$0xff] }
 0xa86   : > { %4654 = vmatpush.msrb.mxu0 %v4378_v57  ;;  %8280 = vmatpush.msra.mxu3 %v4378_v57 }
 0xa87   : > { %8539 = vrot.lane.b32.xlu2 %v8538_v61, %s9015_s25  ;;  %8504 = vrot.lane.b32.xlu1 %v8503_v3, %s9015_s25  ;;  %v4296_v61 = vld [vmem:[%s13762_s10 + $0xe0] sm:$0xff]  ;;  %v4297_v3 = vld [vmem:[%s13762_s10 + $0xe8] sm:$0xff] }
 0xa88   : > { %8489 = vrot.lane.b32.xlu0 %v8488_v27, %s9015_s25  ;;  %4589 = vmatpush.msrb.mxu1 %v11133_v32 }
 0xa89   : > { %8264 = vmatpush.msra.mxu2 %v11133_v32  ;;  %4655 = vmatpush.msrb.mxu0 %v4377_v59 }
 0xa8a   : > { %4590 = vmatpush.msrb.mxu1 %v11155_v9  ;;  %8281 = vmatpush.msra.mxu3 %v4377_v59  ;;  %v3978_v17 = vpop.f32.mrf.mxu0  ;;  %v4159_v13 = vpop.f32.mrf.mxu1  ;;  %v4288_v59 = vld [vmem:[%s13762_s10 + $0xa0] sm:$0xff] }
 0xa8b   : > { %8265 = vmatpush.msra.mxu2 %v11155_v9  ;;  %4656 = vmatpush.msrb.mxu0 %v11078_v30  ;;  %4065 = vst.msk [vmem:[#allocation14 + $0x88] sm:$0xff] %vm4047_vm14, %v3978_v17 }
 0xa8c   : > { %4591 = vmatpush.msrb.mxu1 %v4360_v55  ;;  %8282 = vmatpush.msra.mxu3 %v11078_v30  ;;  %4245 = vst.msk [vmem:[#allocation15 + $0x88] sm:$0xff] %vm4047_vm14, %v4159_v13 }
 0xa8d   : > { %8266 = vmatpush.msra.mxu2 %v4360_v55  ;;  %4657 = vmatpush.msrb.mxu0 %v11064_v34 }
 0xa8e   : > { %4592 = vmatpush.msrb.mxu1 %v11094_v58  ;;  %8283 = vmatpush.msra.mxu3 %v11064_v34  ;;  %v8513_v34 = vpack.i.bf16 %v4353_v4, %v4371_v15 }
 0xa8f   : > { %8267 = vmatpush.msra.mxu2 %v11094_v58  ;;  %7957 = vmatmul.msk.f32.gmra.mxu0 %vm3740_vm2, %v3778_v56 }
 0xa90   : > { %7999 = vmatmul.msk.f32.gmra.mxu1 %vm3740_vm2, %v3778_v56  ;;  %4658 = vmatpush.msrb.mxu0 %v11168_v0  ;;  %v3784_v56 = vld [vmem:[#allocation5 + $0x138] sm:$0xff] }
 0xa91   : > { %8284 = vmatpush.msra.mxu3 %v11168_v0  ;;  %8519 = vrot.lane.b32.xlu1 %v8518_v20, %s9015_s25 }
 0xa92   : > { %8494 = vrot.lane.b32.xlu0 %v11174_v54, %s9015_s25  ;;  %4593 = vmatpush.msrb.mxu1 %v11076_v10  ;;  %v3981_v35 = vpop.f32.mrf.mxu0  ;;  %v4162_v26 = vpop.f32.mrf.mxu1  ;;  %v11262_v43 = vld [vmem:[#allocation14 + $0x88] sm:$0xff] }
 0xa93   : > { %8268 = vmatpush.msra.mxu2 %v11076_v10  ;;  %4659 = vmatpush.msrb.mxu0 %v11126_v33  ;;  %4066 = vst.msk [vmem:[#allocation14 + $0x90] sm:$0xff] %vm4047_vm14, %v3981_v35  ;;  %v3781_v10 = vld [vmem:[#allocation5 + $0x120] sm:$0xff] }
 0xa94   : > { %4594 = vmatpush.msrb.mxu1 %v11062_v28  ;;  %8285 = vmatpush.msra.mxu3 %v11126_v33  ;;  %4246 = vst.msk [vmem:[#allocation15 + $0x90] sm:$0xff] %vm4047_vm14, %v4162_v26 }
 0xa95   : > { %8269 = vmatpush.msra.mxu2 %v11062_v28  ;;  %4660 = vmatpush.msrb.mxu0 %v11089_v38 }
 0xa96   : > { %4595 = vmatpush.msrb.mxu1 %v11188_v6  ;;  %8286 = vmatpush.msra.mxu3 %v11089_v38 }
 0xa97   : > { %8270 = vmatpush.msra.mxu2 %v11188_v6  ;;  %4661 = vmatpush.msrb.mxu0 %v4371_v15 }
 0xa98   : > { %4596 = vmatpush.msrb.mxu1 %v11140_v36  ;;  %8287 = vmatpush.msra.mxu3 %v4371_v15 }
 0xa99   : > { %8271 = vmatpush.msra.mxu2 %v11140_v36  ;;  %7958 = vmatmul.msk.f32.gmra.mxu0 %vm3740_vm2, %v3779_v7 }
 0xa9a   : > { %8000 = vmatmul.msk.f32.gmra.mxu1 %vm3740_vm2, %v3779_v7  ;;  %4662 = vmatpush.msrb.mxu0 %v4370_v12  ;;  %v3984_v29 = vpop.f32.mrf.mxu0  ;;  %v4165_v11 = vpop.f32.mrf.mxu1  ;;  %v11220_v30 = vld [vmem:[#allocation14 + $0x90] sm:$0xff] }
 0xa9b   : > { %8288 = vmatpush.msra.mxu3 %v4370_v12  ;;  %8534 = vrot.lane.b32.xlu1 %v8533_v21, %s9015_s25  ;;  %4067 = vst.msk [vmem:[#allocation14 + $0x98] sm:$0xff] %vm4047_vm14, %v3984_v29  ;;  %v4301_v29 = vld [vmem:[%s13762_s10 + $0x108] sm:$0xff] }
 0xa9c   : > { %8499 = vrot.lane.b32.xlu0 %v11200_v22, %s9015_s25  ;;  %4597 = vmatpush.msrb.mxu1 %v11092_v52  ;;  %4247 = vst.msk [vmem:[#allocation15 + $0x98] sm:$0xff] %vm4047_vm14, %v4165_v11  ;;  %v11321_v11 = vld [vmem:[#allocation14 + $0x80] sm:$0xff] }
 0xa9d   : > { %8272 = vmatpush.msra.mxu2 %v11092_v52  ;;  %4663 = vmatpush.msrb.mxu0 %v11107_v63 }
 0xa9e   : > { %4598 = vmatpush.msrb.mxu1 %v4353_v4  ;;  %8289 = vmatpush.msra.mxu3 %v11107_v63  ;;  %v3782_v63 = vld [vmem:[#allocation5 + $0x128] sm:$0xff] }
 0xa9f   : > { %8273 = vmatpush.msra.mxu2 %v4353_v4  ;;  %4664 = vmatpush.msrb.mxu0 %v4368_v23  ;;  %v11323_v4 = vld [vmem:[#allocation15 + $0x90] sm:$0xff] }
 0xaa0   : > { %4599 = vmatpush.msrb.mxu1 %v4352_v18  ;;  %8290 = vmatpush.msra.mxu3 %v4368_v23  ;;  %v11325_v23 = vld [vmem:[#allocation15 + $0x80] sm:$0xff] }
 0xaa1   : > { %8274 = vmatpush.msra.mxu2 %v4352_v18  ;;  %4665 = vmatpush.msrb.mxu0 %v4367_v14 }
 0xaa2   : > { %4600 = vmatpush.msrb.mxu1 %v11110_v48  ;;  %8291 = vmatpush.msra.mxu3 %v4367_v14  ;;  %v3987_v5 = vpop.f32.mrf.mxu0  ;;  %v4168_v28 = vpop.f32.mrf.mxu1  ;;  %v11243_v45 = vld [vmem:[#allocation14 + $0x98] sm:$0xff] }
 0xaa3   : > { %8275 = vmatpush.msra.mxu2 %v11110_v48  ;;  %7959 = vmatmul.msk.f32.gmra.mxu0 %vm3740_vm2, %v3780_v19  ;;  %4068 = vst.msk [vmem:[#allocation14 + $0xa0] sm:$0xff] %vm4047_vm14, %v3987_v5  ;;  %v8543_v48 = vpack.i.bf16 %v4364_v8, %v4365_v16  ;;  %v11264_v44 = vld [vmem:[#allocation15 + $0x98] sm:$0xff]  ;;  %v11331_v5 = vpack.i.bf16 %v11321_v11, %v11323_v4 }
 0xaa4   : > { %8001 = vmatmul.msk.f32.gmra.mxu1 %vm3740_vm2, %v3780_v19  ;;  %4666 = vmatpush.msrb.mxu0 %v11122_v42  ;;  %4248 = vst.msk [vmem:[#allocation15 + $0xa0] sm:$0xff] %vm4047_vm14, %v4168_v28  ;;  %v11327_v19 = vld [vmem:[#allocation15 + $0x88] sm:$0xff] }
 0xaa5   : > { %8292 = vmatpush.msra.mxu3 %v11122_v42  ;;  %8514 = vrot.lane.b32.xlu0 %v8513_v34, %s9015_s25  ;;  %v4293_v42 = vld [vmem:[%s13762_s10 + $0xc8] sm:$0xff] }
 0xaa6   : > { %4601 = vmatpush.msrb.mxu1 %v4350_v1  ;;  %8276 = vmatpush.msra.mxu2 %v4350_v1  ;;  %v8588_v1 = vpack.i.bf16 %v11133_v32, %v11325_v23 }
 0xaa7   : > { %4667 = vmatpush.msrb.mxu0 %v4365_v16  ;;  %8293 = vmatpush.msra.mxu3 %v4365_v16  ;;  %v4304_v16 = vld [vmem:[%s13762_s10 + $0x120] sm:$0xff] }
 0xaa8   : > { %4602 = vmatpush.msrb.mxu1 %v4349_v24  ;;  %8277 = vmatpush.msra.mxu2 %v4349_v24  ;;  %v4300_v24 = vld [vmem:[%s13762_s10 + $0x100] sm:$0xff] }
 0xaa9   : > { %4668 = vmatpush.msrb.mxu0 %v4364_v8  ;;  %8294 = vmatpush.msra.mxu3 %v4364_v8  ;;  %v8583_v8 = vpack.i.bf16 %v11124_v39, %v11327_v19 }
 0xaaa   : > { %4603 = vmatpush.msrb.mxu1 %v11138_v53  ;;  %8278 = vmatpush.msra.mxu2 %v11138_v53  ;;  %v3990_v2 = vpop.f32.mrf.mxu0  ;;  %v4171_v50 = vpop.f32.mrf.mxu1  ;;  %v11270_v53 = vpack.i.bf16 %v11262_v43, %v11264_v44  ;;  %v11284_v17 = vld [vmem:[#allocation14 + $0xa0] sm:$0xff] }
 0xaab   : > { %7960 = vmatmul.msk.f32.gmra.mxu0 %vm3740_vm2, %v3781_v10  ;;  %4069 = vst.msk [vmem:[#allocation14 + $0xa8] sm:$0xff] %vm4047_vm14, %v3990_v2  ;;  %v11226_v52 = vld [vmem:[#allocation15 + $0xa0] sm:$0xff]  ;;  %4619 = vmatmul.f32.vlgmr.msra.gmra.mxu2 %v4288_v59  ;;  %v4309_v59 = vld [vmem:[%s13762_s10 + $0x148] sm:$0xff] }
 0xaac   : > { %8002 = vmatmul.msk.f32.gmra.mxu1 %vm3740_vm2, %v3781_v10  ;;  %4249 = vst.msk [vmem:[#allocation15 + $0xa8] sm:$0xff] %vm4047_vm14, %v4171_v50  ;;  %v11232_v58 = vpack.i.bf16 %v11220_v30, %v11226_v52  ;;  %4684 = vmatmul.f32.vlgmr.msra.gmra.mxu3 %v4289_v60  ;;  %v4305_v10 = vld [vmem:[%s13762_s10 + $0x128] sm:$0xff] }
 0xaad   : > { %8529 = vrot.lane.b32.xlu0 %v8528_v51, %s9015_s25  ;;  %v4308_v51 = vld [vmem:[%s13762_s10 + $0x140] sm:$0xff] }
 0xaae   : > { %8554 = vrot.lane.b32.xlu2 %v11232_v58, %s9015_s25 }
 0xab2   : > { %v3993_v46 = vpop.f32.mrf.mxu0  ;;  %v4174_v47 = vpop.f32.mrf.mxu1  ;;  %v11294_v20 = vld [vmem:[#allocation14 + $0xa8] sm:$0xff] }
 0xab3   : > { %7961 = vmatmul.msk.f32.gmra.mxu0 %vm3740_vm2, %v3782_v63  ;;  %4070 = vst.msk [vmem:[#allocation14 + $0xb0] sm:$0xff] %vm4047_vm14, %v3993_v46  ;;  %v11247_v55 = vld [vmem:[#allocation15 + $0xa8] sm:$0xff]  ;;  %4622 = vmatmul.f32.gmra.mxu2 %v4292_v49  ;;  %v4312_v46 = vld [vmem:[%s13762_s10 + $0x160] sm:$0xff] }
 0xab4   : > { %8003 = vmatmul.msk.f32.gmra.mxu1 %vm3740_vm2, %v3782_v63  ;;  %4250 = vst.msk [vmem:[#allocation15 + $0xb0] sm:$0xff] %vm4047_vm14, %v4174_v47  ;;  %v11253_v57 = vpack.i.bf16 %v11243_v45, %v11247_v55  ;;  %4687 = vmatmul.f32.gmra.mxu3 %v4293_v42  ;;  %v8623_v47 = vpack.i.bf16 %v11089_v38, %v11126_v33  ;;  %v4317_v33 = vld [vmem:[%s13762_s10 + $0x188] sm:$0xff] }
 0xab5   : > { %8544 = vrot.lane.b32.xlu0 %v8543_v48, %s9015_s25 }
 0xab6   : > { %8559 = vrot.lane.b32.xlu1 %v11253_v57, %s9015_s25 }
 0xaba   : > { %v3996_v36 = vpop.f32.mrf.mxu0  ;;  %v4177_v27 = vpop.f32.mrf.mxu1  ;;  %v11288_v12 = vld [vmem:[#allocation14 + $0xb0] sm:$0xff] }
 0xabb   : > { %7962 = vmatmul.msk.f32.gmra.mxu0 %vm3740_vm2, %v3783_v41  ;;  %4071 = vst.msk [vmem:[#allocation14 + $0xb8] sm:$0xff] %vm4047_vm14, %v3996_v36  ;;  %v11286_v13 = vld [vmem:[#allocation15 + $0xb0] sm:$0xff]  ;;  %4625 = vmatmul.f32.gmra.mxu2 %v4296_v61  ;;  %v4320_v61 = vld [vmem:[%s13762_s10 + $0x1a0] sm:$0xff] }
 0xabc   : > { %8004 = vmatmul.msk.f32.gmra.mxu1 %vm3740_vm2, %v3783_v41  ;;  %4251 = vst.msk [vmem:[#allocation15 + $0xb8] sm:$0xff] %vm4047_vm14, %v4177_v27  ;;  %4690 = vmatmul.f32.gmra.mxu3 %v4297_v3  ;;  %v11292_v18 = vpack.i.bf16 %v11284_v17, %v11286_v13 }
 0xabd   : > { %8549 = vrot.lane.b32.xlu0 %v11270_v53, %s9015_s25 }
 0xac2   : > { %v3999_v35 = vpop.f32.mrf.mxu0  ;;  %v4180_v26 = vpop.f32.mrf.mxu1  ;;  %v11296_v15 = vld [vmem:[#allocation14 + $0xb8] sm:$0xff] }
 0xac3   : > { %7963 = vmatmul.msk.f32.gmra.mxu0 %vm3740_vm2, %v3784_v56  ;;  %4072 = vst.msk [vmem:[#allocation14 + $0xc0] sm:$0xff] %vm4047_vm14, %v3999_v35  ;;  %v11300_v7 = vld [vmem:[#allocation15 + $0xb8] sm:$0xff]  ;;  %v8568_v14 = vpack.i.bf16 %v11288_v12, %v11296_v15  ;;  %4628 = vmatmul.f32.gmra.mxu2 %v4300_v24  ;;  %v4321_v35 = vld [vmem:[%s13762_s10 + $0x1a8] sm:$0xff] }
 0xac4   : > { %8005 = vmatmul.msk.f32.gmra.mxu1 %vm3740_vm2, %v3784_v56  ;;  %4252 = vst.msk [vmem:[#allocation15 + $0xc0] sm:$0xff] %vm4047_vm14, %v4180_v26  ;;  %v11311_v21 = vpack.i.bf16 %v11294_v20, %v11300_v7  ;;  %4693 = vmatmul.f32.gmra.mxu3 %v4301_v29 }
 0xac5   : > { %8564 = vrot.lane.b32.xlu0 %v11292_v18, %s9015_s25  ;;  %8569 = vrot.lane.b32.xlu1 %v8568_v14, %s9015_s25 }
 0xac6   : > { %8579 = vrot.lane.b32.xlu2 %v11311_v21, %s9015_s25 }
 0xaca   : > { %v4002_v28 = vpop.f32.mrf.mxu0  ;;  %v4183_v34 = vpop.f32.mrf.mxu1 }
 0xacb   : > { %4073 = vst.msk [vmem:[#allocation14 + $0xc8] sm:$0xff] %vm4047_vm14, %v4002_v28  ;;  %4631 = vmatmul.f32.gmra.mxu2 %v4304_v16 }
 0xacc   : > { %4253 = vst.msk [vmem:[#allocation15 + $0xc8] sm:$0xff] %vm4047_vm14, %v4183_v34  ;;  %4696 = vmatmul.f32.gmra.mxu3 %v4305_v10  ;;  %v4324_v34 = vld [vmem:[%s13762_s10 + $0x1c0] sm:$0xff] }
 0xacd   : > { %8589 = vrot.lane.b32.xlu0 %v8588_v1, %s9015_s25  ;;  %8574 = vrot.lane.b32.xlu1 %v11331_v5, %s9015_s25 }
 0xace   : > { %8584 = vrot.lane.b32.xlu2 %v8583_v8, %s9015_s25 }
 0xad2   : > { %v4005_v2 = vpop.f32.mrf.mxu0  ;;  %v4186_v50 = vpop.f32.mrf.mxu1 }
 0xad3   : > { %4074 = vst.msk [vmem:[#allocation14 + $0xd0] sm:$0xff] %vm4047_vm14, %v4005_v2  ;;  %4634 = vmatmul.f32.gmra.mxu2 %v4308_v51 }
 0xad4   : > { %4254 = vst.msk [vmem:[#allocation15 + $0xd0] sm:$0xff] %vm4047_vm14, %v4186_v50  ;;  %4699 = vmatmul.f32.gmra.mxu3 %v4309_v59 }
 0xad5   : > { %8604 = vrot.lane.b32.xlu0 %v11100_v62, %s9015_s25  ;;  %8594 = vrot.lane.b32.xlu1 %v11174_v54, %s9015_s25  ;;  %v4313_v62 = vld [vmem:[%s13762_s10 + $0x168] sm:$0xff] }
 0xad6   : > { %8599 = vrot.lane.b32.xlu2 %v11115_v37, %s9015_s25 }
 0xada   : > { %v4008_v60 = vpop.f32.mrf.mxu0  ;;  %v4189_v63 = vpop.f32.mrf.mxu1  ;;  %v11395_v38 = vld [vmem:[#allocation14 + $0xd0] sm:$0xff] }
 0xadb   : > { %4075 = vst.msk [vmem:[#allocation14 + $0xd8] sm:$0xff] %vm4047_vm14, %v4008_v60  ;;  %4637 = vmatmul.f32.gmra.mxu2 %v4312_v46  ;;  %v4325_v60 = vld [vmem:[%s13762_s10 + $0x1c8] sm:$0xff]  ;;  %v11452_v46 = vld [vmem:[#allocation15 + $0xc0] sm:$0xff] }
 0xadc   : > { %4255 = vst.msk [vmem:[#allocation15 + $0xd8] sm:$0xff] %vm4047_vm14, %v4189_v63  ;;  %4702 = vmatmul.f32.gmra.mxu3 %v4313_v62  ;;  %v4328_v62 = vld [vmem:[%s13762_s10 + $0x1e0] sm:$0xff] }
 0xadd   : > { %8619 = vrot.lane.b32.xlu0 %v11200_v22, %s9015_s25  ;;  %8609 = vrot.lane.b32.xlu1 %v11083_v25, %s9015_s25  ;;  %v4316_v25 = vld [vmem:[%s13762_s10 + $0x180] sm:$0xff]  ;;  %v11387_v22 = vld [vmem:[#allocation14 + $0xc8] sm:$0xff] }
 0xade   : > { %8614 = vrot.lane.b32.xlu2 %v11069_v40, %s9015_s25  ;;  %v11384_v40 = vpop.permute.xlu2 %8469 }
 0xae2   : > { %v4011_v37 = vpop.f32.mrf.mxu0  ;;  %v4192_v54 = vpop.f32.mrf.mxu1  ;;  %v11417_v56 = vld [vmem:[#allocation14 + $0xd8] sm:$0xff] }
 0xae3   : > { %4076 = vst.msk [vmem:[#allocation14 + $0xe0] sm:$0xff] %vm4047_vm14, %v4011_v37  ;;  %v11389_v48 = vld [vmem:[#allocation15 + $0xd8] sm:$0xff]  ;;  %4640 = vmatmul.f32.gmra.mxu2 %v4316_v25 }
 0xae4   : > { %4256 = vst.msk [vmem:[#allocation15 + $0xe0] sm:$0xff] %vm4047_vm14, %v4192_v54  ;;  %v11393_v49 = vpack.i.bf16 %v11387_v22, %v11389_v48  ;;  %4705 = vmatmul.f32.gmra.mxu3 %v4317_v33  ;;  %v8668_v33 = vpack.i.bf16 %v11288_v12, %v11452_v46 }
 0xae5   : > { %8624 = vrot.lane.b32.xlu1 %v8623_v47, %s9015_s25 }
 0xae6   : > { %v11415_v3 = vpop.permute.xlu2 %8474 }
 0xae8   : > { %v8480_v28 = vpop.permute.xlu1 %8479 }
 0xaea   : > { %v4014_v42 = vpop.f32.mrf.mxu0  ;;  %v4195_v41 = vpop.f32.mrf.mxu1  ;;  %v11437_v16 = vld [vmem:[#allocation14 + $0xe0] sm:$0xff] }
 0xaeb   : > { %4077 = vst.msk [vmem:[#allocation14 + $0xe8] sm:$0xff] %vm4047_vm14, %v4014_v42  ;;  %v11401_v36 = vld [vmem:[#allocation15 + $0xe0] sm:$0xff]  ;;  %4643 = vmatmul.f32.gmra.mxu2 %v4320_v61 }
 0xaec   : > { %4257 = vst.msk [vmem:[#allocation15 + $0xe8] sm:$0xff] %vm4047_vm14, %v4195_v41  ;;  %v11406_v27 = vpack.i.bf16 %v11395_v38, %v11401_v36  ;;  %4708 = vmatmul.f32.gmra.mxu3 %v4321_v35 }
 0xaed   : > { %8629 = vrot.lane.b32.xlu1 %v11393_v49, %s9015_s25 }
 0xaee   : > { %8634 = vrot.lane.b32.xlu0 %v11406_v27, %s9015_s25  ;;  %v11435_v1 = vpop.permute.xlu2 %8509 }
 0xaf0   : > { %v8485_v54 = vpop.permute.xlu1 %8484 }
 0xaf2   : > { %v4017_v26 = vpop.f32.mrf.mxu0  ;;  %v4198_v14 = vpop.f32.mrf.mxu1  ;;  %v11459_v47 = vld [vmem:[#allocation14 + $0xe8] sm:$0xff] }
 0xaf3   : > { %4078 = vst.msk [vmem:[#allocation14 + $0xf0] sm:$0xff] %vm4047_vm14, %v4017_v26  ;;  %v11423_v24 = vld [vmem:[#allocation15 + $0xe8] sm:$0xff]  ;;  %4646 = vmatmul.f32.gmra.mxu2 %v4324_v34 }
 0xaf4   : > { %4258 = vst.msk [vmem:[#allocation15 + $0xf0] sm:$0xff] %vm4047_vm14, %v4198_v14  ;;  %v11428_v29 = vpack.i.bf16 %v11417_v56, %v11423_v24  ;;  %4711 = vmatmul.f32.gmra.mxu3 %v4325_v60  ;;  %v8486_v60 = vunpack.i.l.bf16 %v8485_v54 }
 0xaf6   : > { %8639 = vrot.lane.b32.xlu2 %v11428_v29, %s9015_s25  ;;  %v11470_v26 = vpop.permute.xlu2 %8524 }
 0xafa   : > { %v8490_v8 = vpop.permute.xlu0 %8489  ;;  %v4020_v10 = vpop.f32.mrf.mxu0  ;;  %v11457_v37 = vld [vmem:[#allocation14 + $0xf0] sm:$0xff] }
 0xafb   : > { %4079 = vst.msk [vmem:[#allocation14 + $0xf8] sm:$0xff] %vm4047_vm14, %v4020_v10  ;;  %v4201_v2 = vpop.f32.mrf.mxu1  ;;  %v8491_v50 = vunpack.i.l.bf16 %v8490_v8  ;;  %v11440_v51 = vld [vmem:[#allocation15 + $0xf0] sm:$0xff]  ;;  %v8492_v63 = vunpack.i.h.bf16 %v8490_v8  ;;  %4649 = vmatmul.f32.gmra.mxu2 %v4328_v62  ;;  %v4329_v8 = vld [vmem:[%s13762_s10 + $0x1e8] sm:$0xff]  ;;  %v8482_v62 = vunpack.i.h.bf16 %v8480_v28 }
 0xafc   : > { %4259 = vst.msk [vmem:[#allocation15 + $0xf8] sm:$0xff] %vm4047_vm14, %v4201_v2  ;;  %v11445_v59 = vpack.i.bf16 %v11437_v16, %v11440_v51  ;;  %4714 = vmatmul.f32.gmra.mxu3 %v4329_v8  ;;  %v8477_v8 = vunpack.i.h.bf16 %v11415_v3 }
 0xafd   : > { %4718 = vmatpush.msrb.mxu2 %v8491_v50  ;;  %v8487_v50 = vunpack.i.h.bf16 %v8485_v54  ;;  %v8476_v54 = vunpack.i.l.bf16 %v11415_v3 }
 0xafe   : > { %8644 = vrot.lane.b32.xlu1 %v11445_v59, %s9015_s25 }
 0xaff   : > { %4719 = vmatpush.msrb.mxu2 %v8492_v63  ;;  %v11484_v63 = vld [vmem:[#allocation15 + $0xc8] sm:$0xff] }
 0xb02   : > { %v4023_v25 = vpop.f32.mrf.mxu0  ;;  %v11463_v42 = vld [vmem:[#allocation14 + $0xf8] sm:$0xff] }
 0xb03   : > { %4080 = vst.msk [vmem:[#allocation14 + $0x100] sm:$0xff] %vm4047_vm14, %v4023_v25  ;;  %v4204_v41 = vpop.f32.mrf.mxu1  ;;  %v11466_v61 = vld [vmem:[#allocation15 + $0xf8] sm:$0xff]  ;;  %v8648_v35 = vpack.i.bf16 %v11457_v37, %v11463_v42  ;;  %v8481_v25 = vunpack.i.l.bf16 %v8480_v28 }
 0xb04   : > { %v8495_v14 = vpop.permute.xlu0 %8494  ;;  %4260 = vst.msk [vmem:[#allocation15 + $0x100] sm:$0xff] %vm4047_vm14, %v4204_v41  ;;  %v11475_v34 = vpack.i.bf16 %v11459_v47, %v11466_v61  ;;  %v11486_v41 = vld [vmem:[#allocation14 + $0xc0] sm:$0xff] }
 0xb05   : > { %v8497_v10 = vunpack.i.h.bf16 %v8495_v14  ;;  %v8496_v2 = vunpack.i.l.bf16 %v8495_v14  ;;  %8649 = vrot.lane.b32.xlu2 %v8648_v35, %s9015_s25  ;;  %v11488_v14 = vld [vmem:[#allocation15 + $0xd0] sm:$0xff]  ;;  %v8505_v35 = vpop.permute.xlu1 %8504 }
 0xb06   : > { %8669 = vrot.lane.b32.xlu1 %v8668_v33, %s9015_s25  ;;  %8659 = vrot.lane.b32.xlu0 %v11475_v34, %s9015_s25  ;;  %v8663_v33 = vpack.i.bf16 %v11296_v15, %v11484_v63 }
 0xb07   : > { %4720 = vmatpush.msrb.mxu2 %v8497_v10  ;;  %4783 = vmatpush.msrb.mxu3 %v8496_v2  ;;  %v11496_v2 = vpack.i.bf16 %v11486_v41, %v11488_v14 }
 0xb09   : > { %4721 = vmatpush.msrb.mxu2 %v8487_v50  ;;  %4784 = vmatpush.msrb.mxu3 %v8486_v60  ;;  %v8472_v50 = vunpack.i.h.bf16 %v11384_v40  ;;  %v8471_v60 = vunpack.i.l.bf16 %v11384_v40  ;;  %v11513_v40 = vld [vmem:[%s13762_s10 + $0x8] sm:$0xff] }
 0xb0a   : > { %4669 = vmatmul.f32.vlgmr.msrb.gmra.mxu0 %v11513_v40 }
 0xb0b   : > { %4722 = vmatpush.msrb.mxu2 %v8482_v62  ;;  %4785 = vmatpush.msrb.mxu3 %v8481_v25  ;;  %v4268_v62 = vld [vmem:[%s13762_s10] sm:$0xff]  ;;  %v11504_v25 = vpop.permute.xlu2 %8539 }
 0xb0c   : > { %v4026_v10 = vpop.f32.mrf.mxu0  ;;  %4604 = vmatmul.f32.vlgmr.msrb.gmra.mxu1 %v4268_v62 }
 0xb0d   : > { %4723 = vmatpush.msrb.mxu2 %v8477_v8  ;;  %4786 = vmatpush.msrb.mxu3 %v8476_v54  ;;  %4081 = vst.msk [vmem:[#allocation14 + $0x108] sm:$0xff] %vm4047_vm14, %v4026_v10  ;;  %v4207_v28 = vpop.f32.mrf.mxu1  ;;  %v8507_v10 = vunpack.i.h.bf16 %v8505_v35 }
 0xb0e   : > { %v8500_v3 = vpop.permute.xlu0 %8499  ;;  %4261 = vst.msk [vmem:[#allocation15 + $0x108] sm:$0xff] %vm4047_vm14, %v4207_v28  ;;  %8684 = vrot.lane.b32.xlu1 %v11253_v57, %s9015_s25  ;;  %8664 = vrot.lane.b32.xlu0 %v8663_v33, %s9015_s25  ;;  %v8506_v28 = vunpack.i.l.bf16 %v8505_v35  ;;  %v8512_v57 = vunpack.i.h.bf16 %v11435_v1  ;;  %v8511_v33 = vunpack.i.l.bf16 %v11435_v1 }
 0xb0f   : > { %4724 = vmatpush.msrb.mxu2 %v8472_v50  ;;  %4787 = vmatpush.msrb.mxu3 %v8471_v60  ;;  %v8502_v8 = vunpack.i.h.bf16 %v8500_v3  ;;  %v8501_v54 = vunpack.i.l.bf16 %v8500_v3  ;;  %v8520_v50 = vpop.permute.xlu1 %8519  ;;  %v11523_v60 = vld [vmem:[%s13762_s10 + $0x20] sm:$0xff] }
 0xb10   : > { %8654 = vrot.lane.b32.xlu2 %v11496_v2, %s9015_s25  ;;  %13943 = vst [vmem:[#allocation24_spill] sm:$0xff] %v11523_v60 }
 0xb11   : > { %4725 = vmatpush.msrb.mxu2 %v8502_v8  ;;  %4788 = vmatpush.msrb.mxu3 %v8501_v54 }
 0xb13   : > { %4726 = vmatpush.msrb.mxu2 %v8507_v10  ;;  %4789 = vmatpush.msrb.mxu3 %v8506_v28  ;;  %v11529_v35 = vpop.permute.xlu2 %8554  ;;  %v8521_v10 = vunpack.i.l.bf16 %v8520_v50  ;;  %v8527_v28 = vunpack.i.h.bf16 %v11470_v26 }
 0xb14   : > { %4607 = vmatmul.f32.gmra.mxu1 %v11523_v60  ;;  %v11745_v60 = vld [vmem:[%s13762_s10 + $0x98] sm:$0xff] }
 0xb15   : > { %4727 = vmatpush.msrb.mxu2 %v8512_v57  ;;  %4790 = vmatpush.msrb.mxu3 %v8511_v33  ;;  %v8526_v57 = vunpack.i.l.bf16 %v11470_v26  ;;  %v11559_v26 = vld [vmem:[%s13762_s10 + $0x48] sm:$0xff] }
 0xb16   : > { %v4029_v62 = vpop.f32.mrf.mxu0  ;;  %8699 = vrot.lane.b32.xlu1 %v11331_v5, %s9015_s25  ;;  %8679 = vrot.lane.b32.xlu0 %v11292_v18, %s9015_s25  ;;  %v11539_v5 = vld [vmem:[%s13762_s10 + $0x28] sm:$0xff]  ;;  %v8522_v18 = vunpack.i.h.bf16 %v8520_v50  ;;  %13946 = vst [vmem:[#allocation27_spill] sm:$0xff] %v11559_v26 }
 0xb17   : > { %v8515_v3 = vpop.permute.xlu0 %8514  ;;  %4082 = vst.msk [vmem:[#allocation14 + $0x110] sm:$0xff] %vm4047_vm14, %v4029_v62  ;;  %v4210_v1 = vpop.f32.mrf.mxu1  ;;  %4672 = vmatmul.f32.gmra.mxu0 %v11539_v5 }
 0xb18   : > { %4262 = vst.msk [vmem:[#allocation15 + $0x110] sm:$0xff] %vm4047_vm14, %v4210_v1  ;;  %v8517_v8 = vunpack.i.h.bf16 %v8515_v3  ;;  %v8516_v54 = vunpack.i.l.bf16 %v8515_v3  ;;  %8674 = vrot.lane.b32.xlu2 %v11311_v21, %s9015_s25  ;;  %v11547_v21 = vld [vmem:[%s13762_s10 + $0x40] sm:$0xff]  ;;  %v8535_v33 = vpop.permute.xlu1 %8534 }
 0xb19   : > { %13944 = vst [vmem:[#allocation25_spill] sm:$0xff] %v11539_v5 }
 0xb1a   : > { %4728 = vmatpush.msrb.mxu2 %v8517_v8  ;;  %4791 = vmatpush.msrb.mxu3 %v8516_v54  ;;  %13945 = vst [vmem:[#allocation26_spill] sm:$0xff] %v11547_v21 }
 0xb1c   : > { %4729 = vmatpush.msrb.mxu2 %v8522_v18  ;;  %4792 = vmatpush.msrb.mxu3 %v8521_v10  ;;  %v8537_v18 = vunpack.i.h.bf16 %v8535_v33  ;;  %v8542_v10 = vunpack.i.h.bf16 %v11504_v25 }
 0xb1d   : > { %4610 = vmatmul.f32.gmra.mxu1 %v11547_v21 }
 0xb1e   : > { %4730 = vmatpush.msrb.mxu2 %v8527_v28  ;;  %4793 = vmatpush.msrb.mxu3 %v8526_v57  ;;  %v8541_v28 = vunpack.i.l.bf16 %v11504_v25  ;;  %v11570_v57 = vld [vmem:[%s13762_s10 + $0x10] sm:$0xff] }
 0xb1f   : > { %v8530_v62 = vpop.permute.xlu0 %8529  ;;  %8694 = vrot.lane.b32.xlu0 %v11270_v53, %s9015_s25  ;;  %4675 = vmatmul.f32.gmra.mxu0 %v11559_v26  ;;  %v11634_v26 = vld [vmem:[%s13762_s10 + $0x88] sm:$0xff] }
 0xb20   : > { %v4032_v50 = vpop.f32.mrf.mxu0  ;;  %v8532_v3 = vunpack.i.h.bf16 %v8530_v62  ;;  %v8531_v1 = vunpack.i.l.bf16 %v8530_v62  ;;  %8689 = vrot.lane.b32.xlu2 %v11232_v58, %s9015_s25  ;;  %v11553_v8 = vpop.permute.xlu2 %8579  ;;  %v8536_v58 = vunpack.i.l.bf16 %v8535_v33  ;;  %v8703_v62 = vpack.i.bf16 %v11325_v23, %v11327_v19  ;;  %v11577_v33 = vld [vmem:[%s13762_s10 + $0x60] sm:$0xff]  ;;  %13954 = vst [vmem:[#allocation35_spill] sm:$0xff] %v11634_v26 }
 0xb21   : > { %4083 = vst.msk [vmem:[#allocation14 + $0x118] sm:$0xff] %vm4047_vm14, %v4032_v50  ;;  %v4213_v54 = vpop.f32.mrf.mxu1  ;;  %v8581_v53 = vunpack.i.l.bf16 %v11553_v8 }
 0xb22   : > { %4263 = vst.msk [vmem:[#allocation15 + $0x118] sm:$0xff] %vm4047_vm14, %v4213_v54  ;;  %4731 = vmatpush.msrb.mxu2 %v8532_v3  ;;  %4794 = vmatpush.msrb.mxu3 %v8531_v1  ;;  %v11585_v1 = vld [vmem:[%s13762_s10 + $0x68] sm:$0xff] }
 0xb23   : > { %5238 = vmatpush.msra.mxu1 %v8581_v53  ;;  %13947 = vst [vmem:[#allocation28_spill] sm:$0xff] %v11577_v33 }
 0xb24   : > { %4732 = vmatpush.msrb.mxu2 %v8537_v18  ;;  %4795 = vmatpush.msrb.mxu3 %v8536_v58  ;;  %13948 = vst [vmem:[#allocation29_spill] sm:$0xff] %v11585_v1  ;;  %v11594_v18 = vld [vmem:[%s13762_s10 + $0x18] sm:$0xff]  ;;  %v11596_v58 = vld [vmem:[#allocation14 + $0x108] sm:$0xff] }
 0xb25   : > { %4613 = vmatmul.f32.gmra.mxu1 %v11577_v33  ;;  %13949 = vst [vmem:[#allocation30_spill] sm:$0xff] %v11596_v58 }
 0xb26   : > { %4733 = vmatpush.msrb.mxu2 %v8542_v10  ;;  %4796 = vmatpush.msrb.mxu3 %v8541_v28  ;;  %v11605_v28 = vld [vmem:[%s13762_s10 + $0x30] sm:$0xff] }
 0xb27   : > { %v8545_v50 = vpop.permute.xlu0 %8544  ;;  %4734 = vmatmul.f32.vlgmr.msrb.gmra.mxu2 %v11570_v57  ;;  %4678 = vmatmul.f32.gmra.mxu0 %v11585_v1 }
 0xb28   : > { %5043 = vmatpush.msra.mxu2 %v11296_v15  ;;  %v4035_v25 = vpop.f32.mrf.mxu0  ;;  %v8546_v3 = vunpack.i.l.bf16 %v8545_v50  ;;  %8704 = vrot.lane.b32.xlu2 %v8703_v62, %s9015_s25  ;;  %v8547_v53 = vunpack.i.h.bf16 %v8545_v50  ;;  %v11608_v62 = vpop.permute.xlu1 %8559 }
 0xb29   : > { %4084 = vst.msk [vmem:[#allocation14 + $0x120] sm:$0xff] %vm4047_vm14, %v4035_v25  ;;  %v4216_v54 = vpop.f32.mrf.mxu1  ;;  %v11598_v10 = vld [vmem:[#allocation15 + $0x118] sm:$0xff]  ;;  %v11617_v25 = vld [vmem:[%s13762_s10 + $0x80] sm:$0xff]  ;;  %v8561_v5 = vunpack.i.l.bf16 %v11608_v62 }
 0xb2a   : > { %5044 = vmatpush.msra.mxu2 %v11288_v12  ;;  %4264 = vst.msk [vmem:[#allocation15 + $0x120] sm:$0xff] %vm4047_vm14, %v4216_v54  ;;  %4797 = vmatpush.msrb.mxu3 %v8546_v3  ;;  %v8708_v50 = vpack.i.bf16 %v11596_v58, %v11598_v10  ;;  %v11622_v54 = vld [vmem:[#allocation14 + $0x110] sm:$0xff] }
 0xb2b   : > { %13950 = vst [vmem:[#allocation31_spill] sm:$0xff] %v11598_v10 }
 0xb2c   : > { %5045 = vmatpush.msra.mxu2 %v11294_v20  ;;  %4798 = vmatpush.msrb.mxu3 %v8547_v53  ;;  %13951 = vst [vmem:[#allocation32_spill] sm:$0xff] %v11617_v25 }
 0xb2d   : > { %4799 = vmatmul.f32.vlgmr.msrb.gmra.mxu3 %v11594_v18  ;;  %13952 = vst [vmem:[#allocation33_spill] sm:$0xff] %v11622_v54  ;;  %4616 = vmatmul.f32.gmra.mxu1 %v11617_v25 }
 0xb2e   : > { %5046 = vmatpush.msra.mxu2 %v11284_v17  ;;  %5108 = vmatpush.msra.mxu3 %v11300_v7 }
 0xb2f   : > { %4737 = vmatmul.f32.gmra.mxu2 %v11605_v28  ;;  %v11620_v3 = vpop.permute.xlu0 %8549  ;;  %4681 = vmatmul.f32.gmra.mxu0 %v11634_v26 }
 0xb30   : > { %5109 = vmatpush.msra.mxu3 %v11286_v13  ;;  %5047 = vmatpush.msra.mxu2 %v11243_v45  ;;  %v4038_v53 = vpop.f32.mrf.mxu0 }
 0xb31   : > { %4085 = vst.msk [vmem:[#allocation14 + $0x128] sm:$0xff] %vm4047_vm14, %v4038_v53  ;;  %v4219_v1 = vpop.f32.mrf.mxu1  ;;  %8709 = vrot.lane.b32.xlu2 %v8708_v50, %s9015_s25  ;;  %v11628_v33 = vld [vmem:[#allocation15 + $0x120] sm:$0xff]  ;;  %v11642_v53 = vld [vmem:[%s13762_s10 + $0x38] sm:$0xff] }
 0xb32   : > { %13953 = vst [vmem:[#allocation34_spill] sm:$0xff] %v11628_v33  ;;  %5048 = vmatpush.msra.mxu2 %v11220_v30  ;;  %5110 = vmatpush.msra.mxu3 %v11247_v55  ;;  %v8713_v50 = vpack.i.bf16 %v11622_v54, %v11628_v33  ;;  %v11652_v30 = vld [vmem:[%s13762_s10 + $0x50] sm:$0xff] }
 0xb33   : > { %4265 = vst.msk [vmem:[#allocation15 + $0x128] sm:$0xff] %vm4047_vm14, %v4219_v1 }
 0xb34   : > { %5049 = vmatpush.msra.mxu2 %v11262_v43  ;;  %5111 = vmatpush.msra.mxu3 %v11226_v52 }
 0xb35   : > { %4802 = vmatmul.f32.gmra.mxu3 %v11642_v53  ;;  %8714 = vrot.lane.b32.xlu1 %v8713_v50, %s9015_s25  ;;  %v11670_v50 = vld [vmem:[#allocation14 + $0x118] sm:$0xff] }
 0xb36   : > { %5050 = vmatpush.msra.mxu2 %v11321_v11  ;;  %5112 = vmatpush.msra.mxu3 %v11264_v44  ;;  %v11668_v44 = vld [vmem:[%s13762_s10 + $0x58] sm:$0xff]  ;;  %13955 = vst [vmem:[#allocation36_spill] sm:$0xff] %v11670_v50 }
 0xb37   : > { %4740 = vmatmul.f32.gmra.mxu2 %v11652_v30  ;;  %v8565_v1 = vpop.permute.xlu0 %8564  ;;  %v8570_v26 = vpop.permute.xlu1 %8569 }
 0xb38   : > { %5113 = vmatpush.msra.mxu3 %v11323_v4  ;;  %v8566_v52 = vunpack.i.l.bf16 %v8565_v1  ;;  %5051 = vmatpush.msra.mxu2 %v11124_v39  ;;  %v4041_v25 = vpop.f32.mrf.mxu0  ;;  %v8571_v21 = vunpack.i.l.bf16 %v8570_v26  ;;  %v8572_v58 = vunpack.i.h.bf16 %v8570_v26  ;;  %v11682_v26 = vpop.f32.mrf.mxu2  ;;  %v8567_v33 = vunpack.i.h.bf16 %v8565_v1  ;;  %v8875_v1 = vld [vmem:[#allocation15 + $0x68] sm:$0xff] }
 0xb39   : > { %4086 = vst.msk [vmem:[#allocation14 + $0x130] sm:$0xff] %vm4047_vm14, %v4041_v25  ;;  %v4222_v10 = vpop.f32.mrf.mxu1  ;;  %v8871_v25 = vld [vmem:[#allocation14 + $0x60] sm:$0xff] }
 0xb3a   : > { %5052 = vmatpush.msra.mxu2 %v11133_v32  ;;  %5114 = vmatpush.msra.mxu3 %v11327_v19  ;;  %4266 = vst.msk [vmem:[#allocation15 + $0x130] sm:$0xff] %vm4047_vm14, %v4222_v10  ;;  %v11672_v39 = vld [vmem:[#allocation15 + $0x128] sm:$0xff]  ;;  %v11680_v32 = vld [vmem:[%s13762_s10 + $0x70] sm:$0xff]  ;;  %v8582_v10 = vunpack.i.h.bf16 %v11553_v8 }
 0xb3b   : > { %13956 = vst [vmem:[#allocation37_spill] sm:$0xff] %v11672_v39  ;;  %5173 = vmatpush.msra.mxu0 %v8571_v21  ;;  %5239 = vmatpush.msra.mxu1 %v8566_v52  ;;  %v8718_v21 = vpack.i.bf16 %v11670_v50, %v11672_v39  ;;  %v11690_v52 = vpop.permute.xlu2 %8584  ;;  %v8872_v8 = vld [vmem:[#allocation15 + $0x70] sm:$0xff] }
 0xb3c   : > { %5053 = vmatpush.msra.mxu2 %v11155_v9  ;;  %5115 = vmatpush.msra.mxu3 %v11325_v23  ;;  %13957 = vst [vmem:[#allocation38_spill] sm:$0xff] %v11682_v26  ;;  %v8556_v9 = vunpack.i.l.bf16 %v11529_v35  ;;  %v11693_v26 = vld [vmem:[#allocation14 + $0x120] sm:$0xff]  ;;  %v8874_v39 = vld [vmem:[#allocation14 + $0x50] sm:$0xff] }
 0xb3d   : > { %4805 = vmatmul.f32.gmra.mxu3 %v11668_v44  ;;  %5174 = vmatpush.msra.mxu0 %v8572_v58  ;;  %v8873_v58 = vld [vmem:[#allocation14 + $0x58] sm:$0xff] }
 0xb3e   : > { %5054 = vmatpush.msra.mxu2 %v8871_v25  ;;  %5116 = vmatpush.msra.mxu3 %v11131_v31 }
 0xb3f   : > { %4743 = vmatmul.f32.gmra.mxu2 %v11680_v32  ;;  %5240 = vmatpush.msra.mxu1 %v8561_v5  ;;  %v11703_v5 = vld [vmem:[%s13762_s10 + $0x78] sm:$0xff]  ;;  %v8590_v50 = vpop.permute.xlu0 %8589 }
 0xb40   : > { %5117 = vmatpush.msra.mxu3 %v8872_v8  ;;  %5055 = vmatpush.msra.mxu2 %v8873_v58  ;;  %v4044_v54 = vpop.f32.mrf.mxu0  ;;  %v11707_v8 = vpop.f32.mrf.mxu3  ;;  %v8877_v58 = vld [vmem:[#allocation15 + $0x60] sm:$0xff] }
 0xb41   : > { %4087 = vst.msk [vmem:[#allocation14 + $0x138] sm:$0xff] %vm4047_vm14, %v4044_v54  ;;  %v4225_v25 = vpop.f32.mrf.mxu1  ;;  %8719 = vrot.lane.b32.xlu0 %v8718_v21, %s9015_s25  ;;  %v11697_v31 = vld [vmem:[#allocation15 + $0x130] sm:$0xff]  ;;  %5175 = vmatpush.msra.mxu0 %v8582_v10  ;;  %v8551_v21 = vunpack.i.l.bf16 %v11620_v3  ;;  %v8575_v10 = vpop.permute.xlu1 %8574 }
 0xb42   : > { %13958 = vst [vmem:[#allocation39_spill] sm:$0xff] %v11697_v31  ;;  %5056 = vmatpush.msra.mxu2 %v8874_v39  ;;  %5118 = vmatpush.msra.mxu3 %v8875_v1  ;;  %v8723_v54 = vpack.i.bf16 %v11693_v26, %v11697_v31  ;;  %v8876_v39 = vld [vmem:[#allocation14 + $0x48] sm:$0xff]  ;;  %v11716_v1 = vld [vmem:[%s13762_s10 + $0x90] sm:$0xff] }
 0xb43   : > { %4267 = vst.msk [vmem:[#allocation15 + $0x138] sm:$0xff] %vm4047_vm14, %v4225_v25  ;;  %5241 = vmatpush.msra.mxu1 %v8556_v9  ;;  %5176 = vmatpush.msra.mxu0 %v8567_v33  ;;  %v8562_v25 = vunpack.i.h.bf16 %v11608_v62  ;;  %v8878_v9 = vld [vmem:[#allocation15 + $0x58] sm:$0xff]  ;;  %v8576_v33 = vunpack.i.l.bf16 %v8575_v10  ;;  %v11723_v62 = vld [vmem:[#allocation15 + $0x100] sm:$0xff] }
 0xb44   : > { %13959 = vst [vmem:[#allocation40_spill] sm:$0xff] %v11707_v8  ;;  %5057 = vmatpush.msra.mxu2 %v8876_v39  ;;  %5119 = vmatpush.msra.mxu3 %v8877_v58  ;;  %v11719_v8 = vpop.f32.mrf.mxu2  ;;  %v8557_v39 = vunpack.i.h.bf16 %v11529_v35  ;;  %v11729_v58 = vld [vmem:[#allocation14 + $0x130] sm:$0xff] }
 0xb45   : > { %4808 = vmatmul.f32.gmra.mxu3 %v11703_v5  ;;  %8724 = vrot.lane.b32.xlu2 %v8723_v54, %s9015_s25  ;;  %13960 = vst [vmem:[#allocation41_spill] sm:$0xff] %v11719_v8  ;;  %v11727_v54 = vld [vmem:[#allocation14 + $0x128] sm:$0xff] }
 0xb46   : > { %5058 = vmatpush.msra.mxu2 %v11188_v6  ;;  %5120 = vmatpush.msra.mxu3 %v8878_v9  ;;  %13961 = vst [vmem:[#allocation42_spill] sm:$0xff] %v11723_v62  ;;  %v11733_v9 = vpop.permute.xlu2 %8599  ;;  %v8879_v8 = vld [vmem:[#allocation15 + $0x48] sm:$0xff] }
 0xb47   : > { %5242 = vmatpush.msra.mxu1 %v8551_v21  ;;  %4746 = vmatmul.f32.gmra.mxu2 %v11716_v1  ;;  %v8586_v21 = vunpack.i.l.bf16 %v11690_v52 }
 0xb48   : > { %5498 = vmatpush.msrb.mxu2 %v11463_v42  ;;  %5121 = vmatpush.msra.mxu3 %v11168_v0  ;;  %v11731_v6 = vld [vmem:[#allocation14 + $0x138] sm:$0xff]  ;;  %v8748_v0 = vpack.i.bf16 %v11457_v37, %v11723_v62  ;;  %v8577_v62 = vunpack.i.h.bf16 %v8575_v10  ;;  %v8587_v10 = vunpack.i.h.bf16 %v11690_v52 }
 0xb49   : > { %5177 = vmatpush.msra.mxu0 %v8562_v25  ;;  %5243 = vmatpush.msra.mxu1 %v8576_v33  ;;  %v8728_v31 = vpack.i.bf16 %v11729_v58, %v11731_v6  ;;  %v8880_v33 = vld [vmem:[#allocation15 + $0x40] sm:$0xff]  ;;  %v11785_v52 = vld [vmem:[%s13762_s10 + $0xb8] sm:$0xff] }
 0xb4a   : > { %5499 = vmatpush.msrb.mxu2 %v11457_v37  ;;  %v11736_v35 = vld [vmem:[#allocation15 + $0x138] sm:$0xff]  ;;  %5122 = vmatpush.msra.mxu3 %v8879_v8  ;;  %v8552_v8 = vunpack.i.h.bf16 %v11620_v3  ;;  %v11752_v37 = vpop.f32.mrf.mxu3  ;;  %v11763_v3 = vld [vmem:[%s13762_s10 + $0xb0] sm:$0xff] }
 0xb4b   : > { %5178 = vmatpush.msra.mxu0 %v8557_v39  ;;  %v8738_v25 = vpack.i.bf16 %v11727_v54, %v11736_v35  ;;  %5244 = vmatpush.msra.mxu1 %v8586_v21  ;;  %v8591_v39 = vunpack.i.l.bf16 %v8590_v50  ;;  %v11773_v21 = vld [vmem:[#allocation14 + $0x100] sm:$0xff] }
 0xb4c   : > { %5500 = vmatpush.msrb.mxu2 %v11459_v47  ;;  %5123 = vmatpush.msra.mxu3 %v8880_v33  ;;  %v8595_v47 = vpop.permute.xlu1 %8594 }
 0xb4d   : > { %4811 = vmatmul.f32.gmra.mxu3 %v11745_v60  ;;  %8749 = vrot.lane.b32.xlu2 %v8748_v0, %s9015_s25  ;;  %v11775_v0 = vld [vmem:[#allocation15 + $0x110] sm:$0xff] }
 0xb4e   : > { %5501 = vmatpush.msrb.mxu2 %v11437_v16  ;;  %5563 = vmatpush.msrb.mxu3 %v11466_v61  ;;  %v8596_v16 = vunpack.i.l.bf16 %v8595_v47  ;;  %v11765_v61 = vpop.f32.mrf.mxu2 }
 0xb4f   : > { %8739 = vrot.lane.b32.xlu1 %v8738_v25, %s9015_s25  ;;  %8729 = vrot.lane.b32.xlu0 %v8728_v31, %s9015_s25  ;;  %v11771_v31 = vld [vmem:[#allocation15 + $0x108] sm:$0xff]  ;;  %v8615_v25 = vpop.permute.xlu2 %8614 }
 0xb50   : > { %5179 = vmatpush.msra.mxu0 %v8552_v8  ;;  %5245 = vmatpush.msra.mxu1 %v8591_v39  ;;  %v8592_v8 = vunpack.i.h.bf16 %v8590_v50 }
 0xb51   : > { %5502 = vmatpush.msrb.mxu2 %v11417_v56  ;;  %5564 = vmatpush.msrb.mxu3 %v11440_v51  ;;  %v8601_v56 = vunpack.i.l.bf16 %v11733_v9  ;;  %v8605_v51 = vpop.permute.xlu0 %8604 }
 0xb52   : > { %4749 = vmatmul.f32.gmra.mxu2 %v11763_v3  ;;  %5180 = vmatpush.msra.mxu0 %v8577_v62  ;;  %v11791_v50 = vpop.f32.mrf.mxu3  ;;  %v8597_v62 = vunpack.i.h.bf16 %v8595_v47  ;;  %v8607_v47 = vunpack.i.h.bf16 %v8605_v51 }
 0xb53   : > { %5503 = vmatpush.msrb.mxu2 %v11395_v38  ;;  %5565 = vmatpush.msrb.mxu3 %v11423_v24  ;;  %v8743_v38 = vpack.i.bf16 %v11463_v42, %v11771_v31  ;;  %v8733_v24 = vpack.i.bf16 %v11773_v21, %v11775_v0  ;;  %v11803_v42 = vld [vmem:[%s13762_s10 + $0xd0] sm:$0xff] }
 0xb54   : > { %5181 = vmatpush.msra.mxu0 %v8587_v10  ;;  %5246 = vmatpush.msra.mxu1 %v8596_v16  ;;  %v8617_v10 = vunpack.i.h.bf16 %v8615_v25 }
 0xb55   : > { %5504 = vmatpush.msrb.mxu2 %v11387_v22  ;;  %5566 = vmatpush.msrb.mxu3 %v11401_v36  ;;  %v8610_v22 = vpop.permute.xlu1 %8609  ;;  %v8606_v36 = vunpack.i.l.bf16 %v8605_v51  ;;  %v9016_v51 = vmov 0  }
 0xb56   : > { %5182 = vmatpush.msra.mxu0 %v8592_v8  ;;  %5247 = vmatpush.msra.mxu1 %v8601_v56  ;;  %v11806_v33 = vpop.f32.mrf.mxu2  ;;  %v8612_v39 = vunpack.i.h.bf16 %v8610_v22 }
 0xb57   : > { %5505 = vmatpush.msrb.mxu2 %v11486_v41  ;;  %5567 = vmatpush.msrb.mxu3 %v11389_v48  ;;  %v8602_v41 = vunpack.i.h.bf16 %v11733_v9  ;;  %v8611_v48 = vunpack.i.l.bf16 %v8610_v22  ;;  %v8616_v9 = vunpack.i.l.bf16 %v8615_v25 }
 0xb58   : > { %4814 = vmatmul.f32.gmra.mxu3 %v11785_v52  ;;  %8764 = vrot.lane.b32.xlu2 %v11428_v29, %s9015_s25  ;;  %v11810_v29 = vpop.permute.xlu2 %8639 }
 0xb59   : > { %8744 = vrot.lane.b32.xlu1 %v8743_v38, %s9015_s25  ;;  %8734 = vrot.lane.b32.xlu0 %v8733_v24, %s9015_s25  ;;  %v8620_v16 = vpop.permute.xlu0 %8619  ;;  %v8883_v38 = vld [vmem:[#allocation15 + $0x98] sm:$0xff]  ;;  %v11860_v24 = vld [vmem:[%s13762_s10 + $0x110] sm:$0xff] }
 0xb5a   : > { %5183 = vmatpush.msra.mxu0 %v8597_v62  ;;  %5248 = vmatpush.msra.mxu1 %v8606_v36  ;;  %v8621_v56 = vunpack.i.l.bf16 %v8620_v16 }
 0xb5b   : > { %5506 = vmatpush.msrb.mxu2 %v11296_v15  ;;  %5568 = vmatpush.msrb.mxu3 %v11488_v14  ;;  %v11820_v15 = vld [vmem:[%s13762_s10 + $0xd8] sm:$0xff]  ;;  %v11822_v14 = vpop.f32.mrf.mxu3 }
 0xb5c   : > { %4752 = vmatmul.f32.gmra.mxu2 %v11803_v42  ;;  %5184 = vmatpush.msra.mxu0 %v8602_v41 }
 0xb5d   : > { %5507 = vmatpush.msrb.mxu2 %v11288_v12  ;;  %5569 = vmatpush.msrb.mxu3 %v11484_v63  ;;  %v8625_v12 = vpop.permute.xlu1 %8624 }
 0xb5e   : > { %5185 = vmatpush.msra.mxu0 %v8607_v47  ;;  %5249 = vmatpush.msra.mxu1 %v8611_v48  ;;  %v11838_v25 = vpop.f32.mrf.mxu2  ;;  %v8627_v8 = vunpack.i.h.bf16 %v8625_v12  ;;  %v4341_v47 = vld [vmem:[%s13763_s11 + $0x48] sm:$0xff] }
 0xb5f   : > { %5508 = vmatpush.msrb.mxu2 %v11294_v20  ;;  %5570 = vmatpush.msrb.mxu3 %v11452_v46  ;;  %v8622_v20 = vunpack.i.h.bf16 %v8620_v16 }
 0xb60   : > { %5186 = vmatpush.msra.mxu0 %v8612_v39  ;;  %5250 = vmatpush.msra.mxu1 %v8616_v9  ;;  %v4344_v9 = vld [vmem:[%s13763_s11 + $0x60] sm:$0xff] }
 0xb61   : > { %5509 = vmatpush.msrb.mxu2 %v11284_v17  ;;  %5571 = vmatpush.msrb.mxu3 %v11300_v7  ;;  %v11836_v17 = vld [vmem:[%s13762_s10 + $0xf0] sm:$0xff]  ;;  %v8626_v7 = vunpack.i.l.bf16 %v8625_v12  ;;  %v11870_v36 = vpop.permute.xlu0 %8634 }
 0xb62   : > { %4817 = vmatmul.f32.gmra.mxu3 %v11820_v15  ;;  %8779 = vrot.lane.b32.xlu2 %v11496_v2, %s9015_s25  ;;  %v8650_v2 = vpop.permute.xlu2 %8649 }
 0xb63   : > { %8759 = vrot.lane.b32.xlu1 %v11445_v59, %s9015_s25  ;;  %8754 = vrot.lane.b32.xlu0 %v11475_v34, %s9015_s25  ;;  %v8881_v59 = vld [vmem:[#allocation14 + $0x90] sm:$0xff]  ;;  %v11847_v34 = vld [vmem:[%s13762_s10 + $0xf8] sm:$0xff]  ;;  %v8651_v22 = vunpack.i.l.bf16 %v8650_v2 }
 0xb64   : > { %5187 = vmatpush.msra.mxu0 %v8617_v10  ;;  %5251 = vmatpush.msra.mxu1 %v8621_v56 }
 0xb65   : > { %5510 = vmatpush.msrb.mxu2 %v11243_v45  ;;  %5572 = vmatpush.msrb.mxu3 %v11286_v13  ;;  %v8882_v45 = vld [vmem:[#allocation15 + $0xa0] sm:$0xff] }
 0xb66   : > { %4755 = vmatmul.f32.gmra.mxu2 %v11836_v17  ;;  %5188 = vmatpush.msra.mxu0 %v8622_v20  ;;  %v4336_v13 = vld [vmem:[%s13763_s11 + $0x20] sm:$0xff]  ;;  %v11872_v62 = vpop.f32.mrf.mxu2  ;;  %v8642_v20 = vunpack.i.h.bf16 %v11810_v29 }
 0xb67   : > { %5511 = vmatpush.msrb.mxu2 %v8881_v59  ;;  %5573 = vmatpush.msrb.mxu3 %v11247_v55  ;;  %v11854_v55 = vpop.f32.mrf.mxu3  ;;  %v8636_v59 = vunpack.i.l.bf16 %v11870_v36 }
 0xb68   : > { %5252 = vmatpush.msra.mxu1 %v8626_v7  ;;  %8789 = vset.pattern.permute.xlu2 %v9016_v51  ;;  %v11928_v7 = vld [vmem:[%s13762_s10 + $0x150] sm:$0xff] }
 0xb69   : > { %5512 = vmatpush.msrb.mxu2 %v11262_v43  ;;  %5574 = vmatpush.msrb.mxu3 %v8882_v45  ;;  %v11862_v43 = vpop.permute.xlu1 %8629  ;;  %v11940_v45 = vld [vmem:[%s13762_s10 + $0x158] sm:$0xff] }
 0xb6a   : > { %5253 = vmatpush.msra.mxu1 %v8627_v8  ;;  %4820 = vmatmul.f32.gmra.mxu3 %v11847_v34  ;;  %v11880_v41 = vpop.permute.xlu2 %8654 }
 0xb6b   : > { %5513 = vmatpush.msrb.mxu2 %v11321_v11  ;;  %5575 = vmatpush.msrb.mxu3 %v8883_v38  ;;  %v8652_v11 = vunpack.i.h.bf16 %v8650_v2  ;;  %v8641_v2 = vunpack.i.l.bf16 %v11810_v29  ;;  %v8631_v38 = vunpack.i.l.bf16 %v11862_v43 }
 0xb6c   : > { %4530 = vperm.xlu2 %8789, %v4336_v13   ;;  %8774 = vrot.lane.b32.xlu1 %v11393_v49, %s9015_s25  ;;  %v11878_v49 = vld [vmem:[%s13762_s10 + $0x118] sm:$0xff] }
 0xb6d   : > { %8769 = vrot.lane.b32.xlu0 %v11406_v27, %s9015_s25  ;;  %5576 = vmatpush.msrb.mxu3 %v11323_v4  ;;  %v4333_v4 = vld [vmem:[%s13763_s11 + $0x8] sm:$0xff]  ;;  %v8783_v27 = vpack.i.bf16 %v11452_v46, %v11484_v63 }
 0xb6e   : > { %4758 = vmatmul.f32.gmra.mxu2 %v11860_v24  ;;  %8788 = vset.pattern.permute.xlu1 %v9016_v51  ;;  %v11908_v63 = vpop.f32.mrf.mxu2 }
 0xb6f   : > { %5577 = vmatpush.msrb.mxu3 %v11327_v19  ;;  %8790 = vset.pattern.permute.xlu0 %v9016_v51  ;;  %v4332_v19 = vld [vmem:[%s13763_s11] sm:$0xff]  ;;  %13962 = vst [vmem:[#allocation43_spill] sm:$0xff] %v11908_v63  ;;  %v8632_v51 = vunpack.i.h.bf16 %v11862_v43 }
 0xb70   : > { %5628 = vmatpush.msrb.mxu0 %v8651_v22  ;;  %5254 = vmatmul.f32.vlgmr.msra.gmra.mxu1 %v11594_v18  ;;  %v11899_v18 = vpop.f32.mrf.mxu3  ;;  %v4338_v22 = vld [vmem:[%s13763_s11 + $0x30] sm:$0xff]  ;;  %v8897_v63 = vld [vmem:[#allocation14 + $0xc0] sm:$0xff] }
 0xb71   : > { %5578 = vmatpush.msrb.mxu3 %v11325_v23  ;;  %5189 = vmatmul.f32.vlgmr.msra.gmra.mxu0 %v11570_v57  ;;  %v11897_v23 = vld [vmem:[%s13762_s10 + $0x130] sm:$0xff]  ;;  %v8645_v48 = vpop.permute.xlu1 %8644  ;;  %v11906_v57 = vld [vmem:[%s13762_s10 + $0x138] sm:$0xff] }
 0xb72   : > { %4823 = vmatmul.f32.gmra.mxu3 %v11878_v49  ;;  %5629 = vmatpush.msrb.mxu0 %v8652_v11  ;;  %v8647_v39 = vunpack.i.h.bf16 %v8645_v48  ;;  %v11917_v16 = vpop.permute.xlu2 %8674  ;;  %v8646_v56 = vunpack.i.l.bf16 %v8645_v48  ;;  %v4337_v11 = vld [vmem:[%s13763_s11 + $0x28] sm:$0xff] }
 0xb74   : > { %4515 = vperm.xlu2 %8789, %v4333_v4   ;;  %4510 = vperm.xlu1 %8788, %v4332_v19   ;;  %v4345_v4 = vld [vmem:[%s13763_s11 + $0x68] sm:$0xff]  ;;  %v8656_v19 = vunpack.i.l.bf16 %v11880_v41 }
 0xb75   : > { %8784 = vrot.lane.b32.xlu0 %v8783_v27, %s9015_s25  ;;  %v11961_v27 = vld [vmem:[%s13762_s10 + $0x170] sm:$0xff] }
 0xb76   : > { %4761 = vmatmul.f32.gmra.mxu2 %v11897_v23  ;;  %v11955_v43 = vpop.f32.mrf.mxu2 }
 0xb78   : > { %v8660_v46 = vpop.permute.xlu0 %8659  ;;  %5257 = vmatmul.f32.gmra.mxu1 %v11642_v53  ;;  %v4340_v53 = vld [vmem:[%s13763_s11 + $0x40] sm:$0xff]  ;;  %v11934_v8 = vpop.f32.mrf.mxu3 }
 0xb79   : > { %v8662_v12 = vunpack.i.h.bf16 %v8660_v46  ;;  %v8661_v10 = vunpack.i.l.bf16 %v8660_v46  ;;  %5192 = vmatmul.f32.gmra.mxu0 %v11605_v28  ;;  %v8637_v28 = vunpack.i.h.bf16 %v11870_v36  ;;  %13963 = vst [vmem:[#allocation44_spill] sm:$0xff] %v11934_v8  ;;  %v8670_v29 = vpop.permute.xlu1 %8669  ;;  %v8657_v36 = vunpack.i.h.bf16 %v11880_v41  ;;  %v11969_v41 = vld [vmem:[%s13762_s10 + $0x178] sm:$0xff]  ;;  %v13982_v8 = vld [vmem:[#allocation28_spill] sm:$0xff] }
 0xb7a   : > { %4826 = vmatmul.f32.gmra.mxu3 %v11906_v57  ;;  %v11963_v48 = vpop.permute.xlu2 %8689 }
 0xb7b   : > { %5630 = vmatpush.msrb.mxu0 %v8662_v12  ;;  %5693 = vmatpush.msrb.mxu1 %v8661_v10  ;;  %v8671_v12 = vunpack.i.l.bf16 %v8670_v29  ;;  %v4335_v10 = vld [vmem:[%s13763_s11 + $0x18] sm:$0xff] }
 0xb7c   : > { %4555 = vperm.xlu2 %8789, %v4341_v47   ;;  %4570 = vperm.xlu1 %8788, %v4344_v9   ;;  %v8672_v47 = vunpack.i.h.bf16 %v8670_v29 }
 0xb7d   : > { %4550 = vperm.xlu0 %8790, %v4340_v53   ;;  %5631 = vmatpush.msrb.mxu0 %v8647_v39  ;;  %v4334_v53 = vld [vmem:[%s13763_s11 + $0x10] sm:$0xff] }
 0xb7e   : > { %4764 = vmatmul.f32.gmra.mxu2 %v11928_v7  ;;  %5694 = vmatpush.msrb.mxu1 %v8646_v56 }
 0xb7f   : > { %5632 = vmatpush.msrb.mxu0 %v8642_v20  ;;  %v8677_v20 = vunpack.i.h.bf16 %v11917_v16 }
 0xb80   : > { %5695 = vmatpush.msrb.mxu1 %v8641_v2  ;;  %v8665_v13 = vpop.permute.xlu0 %8664  ;;  %v11972_v39 = vpop.f32.mrf.mxu3  ;;  %v11988_v2 = vld [vmem:[%s13762_s10 + $0x190] sm:$0xff] }
 0xb81   : > { %5633 = vmatpush.msrb.mxu0 %v8637_v28  ;;  %5260 = vmatmul.f32.gmra.mxu1 %v11668_v44  ;;  %v8667_v44 = vunpack.i.h.bf16 %v8665_v13  ;;  %v8666_v46 = vunpack.i.l.bf16 %v8665_v13  ;;  %v8685_v56 = vpop.permute.xlu1 %8684  ;;  %v8676_v28 = vunpack.i.l.bf16 %v11917_v16 }
 0xb82   : > { %4829 = vmatmul.f32.gmra.mxu3 %v11940_v45  ;;  %5696 = vmatpush.msrb.mxu1 %v8636_v59  ;;  %v11991_v59 = vpop.f32.mrf.mxu2  ;;  %v8686_v16 = vunpack.i.l.bf16 %v8685_v56 }
 0xb83   : > { %5634 = vmatpush.msrb.mxu0 %v8632_v51  ;;  %v8705_v51 = vpop.permute.xlu2 %8704 }
 0xb84   : > { %4540 = vperm.xlu2 %8789, %v4338_v22   ;;  %4535 = vperm.xlu1 %8788, %v4337_v11   ;;  %v11997_v22 = vld [vmem:[%s13762_s10 + $0x198] sm:$0xff]  ;;  %v8692_v11 = vunpack.i.h.bf16 %v11963_v48 }
 0xb85   : > { %4575 = vperm.xlu0 %8790, %v4345_v4   ;;  %5697 = vmatpush.msrb.mxu1 %v8631_v38  ;;  %v8687_v38 = vunpack.i.h.bf16 %v8685_v56  ;;  %v4346_v4 = vld [vmem:[%s13763_s11 + $0x70] sm:$0xff] }
 0xb86   : > { %4767 = vmatmul.f32.gmra.mxu2 %v11961_v27  ;;  %5635 = vmatpush.msrb.mxu0 %v8657_v36  ;;  %v4347_v36 = vld [vmem:[%s13763_s11 + $0x78] sm:$0xff] }
 0xb87   : > { %5698 = vmatpush.msrb.mxu1 %v8656_v19  ;;  %5195 = vmatmul.f32.gmra.mxu0 %v11652_v30  ;;  %v4342_v30 = vld [vmem:[%s13763_s11 + $0x50] sm:$0xff] }
 0xb88   : > { %5636 = vmatpush.msrb.mxu0 %v8667_v44  ;;  %v8680_v9 = vpop.permute.xlu0 %8679  ;;  %v12012_v44 = vpop.f32.mrf.mxu3 }
 0xb89   : > { %5699 = vmatpush.msrb.mxu1 %v8666_v46  ;;  %v8682_v29 = vunpack.i.h.bf16 %v8680_v9  ;;  %v8681_v13 = vunpack.i.l.bf16 %v8680_v9  ;;  %v8691_v46 = vunpack.i.l.bf16 %v11963_v48  ;;  %v8700_v9 = vpop.permute.xlu1 %8699 }
 0xb8a   : > { %4832 = vmatmul.f32.gmra.mxu3 %v11969_v41  ;;  %5637 = vmatpush.msrb.mxu0 %v8672_v47  ;;  %v12018_v47 = vld [vmem:[%s13762_s10 + $0x1b0] sm:$0xff]  ;;  %v12023_v56 = vpop.f32.mrf.mxu2  ;;  %v8701_v48 = vunpack.i.l.bf16 %v8700_v9 }
 0xb8b   : > { %5700 = vmatpush.msrb.mxu1 %v8671_v12 }
 0xb8c   : > { %4525 = vperm.xlu2 %8789, %v4335_v10   ;;  %4520 = vperm.xlu1 %8788, %v4334_v53   ;;  %v12020_v10 = vpop.permute.xlu2 %8709  ;;  %v8702_v53 = vunpack.i.h.bf16 %v8700_v9 }
 0xb8d   : > { %4560 = vperm.xlu0 %8790, %v4342_v30   ;;  %5638 = vmatpush.msrb.mxu0 %v8677_v20  ;;  %v12028_v30 = vld [vmem:[%s13762_s10 + $0x1b8] sm:$0xff]  ;;  %v8706_v20 = vunpack.i.l.bf16 %v8705_v51 }
 0xb8e   : > { %4770 = vmatmul.f32.gmra.mxu2 %v11988_v2  ;;  %5701 = vmatpush.msrb.mxu1 %v8676_v28  ;;  %v4343_v28 = vld [vmem:[%s13763_s11 + $0x58] sm:$0xff] }
 0xb8f   : > { %5639 = vmatpush.msrb.mxu0 %v8682_v29  ;;  %5263 = vmatmul.f32.gmra.mxu1 %v11703_v5  ;;  %v4339_v5 = vld [vmem:[%s13763_s11 + $0x38] sm:$0xff]  ;;  %v8707_v29 = vunpack.i.h.bf16 %v8705_v51 }
 0xb90   : > { %5702 = vmatpush.msrb.mxu1 %v8681_v13  ;;  %5198 = vmatmul.f32.gmra.mxu0 %v11680_v32  ;;  %v12039_v13 = vld [vmem:[%s13762_s10 + $0x1d0] sm:$0xff] }
 0xb91   : > { %5640 = vmatpush.msrb.mxu0 %v8687_v38  ;;  %v8695_v19 = vpop.permute.xlu0 %8694  ;;  %v12041_v38 = vpop.f32.mrf.mxu3 }
 0xb92   : > { %4835 = vmatmul.f32.gmra.mxu3 %v11997_v22  ;;  %5703 = vmatpush.msrb.mxu1 %v8686_v16  ;;  %v8697_v32 = vunpack.i.h.bf16 %v8695_v19  ;;  %v8696_v12 = vunpack.i.l.bf16 %v8695_v19  ;;  %13964 = vst [vmem:[#allocation45_spill] sm:$0xff] %v12041_v38  ;;  %v12053_v16 = vpop.f32.mrf.mxu0 }
 0xb93   : > { %5641 = vmatpush.msrb.mxu0 %v8692_v11  ;;  %v12055_v11 = vpop.f32.mrf.mxu2 }
 0xb94   : > { %4585 = vperm.xlu2 %8789, %v4347_v36   ;;  %4580 = vperm.xlu1 %8788, %v4346_v4   ;;  %13965 = vst [vmem:[#allocation46_spill] sm:$0xff] %v12055_v11  ;;  %v12063_v36 = vld [vmem:[%s13762_s10 + $0x1f0] sm:$0xff]  ;;  %v8889_v11 = vld [vmem:[#allocation14 + $0xe0] sm:$0xff] }
 0xb95   : > { %4545 = vperm.xlu0 %8790, %v4339_v5   ;;  %5704 = vmatpush.msrb.mxu1 %v8691_v46  ;;  %13966 = vst [vmem:[#allocation47_spill] sm:$0xff] %v12063_v36  ;;  %v12073_v5 = vld [vmem:[%s13762_s10 + $0x1f8] sm:$0xff]  ;;  %v12087_v46 = vld [vmem:[%s13762_s10] sm:$0xff] }
 0xb96   : > { %4773 = vmatmul.f32.gmra.mxu2 %v12018_v47  ;;  %5642 = vmatpush.msrb.mxu0 %v8697_v32  ;;  %13968 = vst [vmem:[#allocation49_spill] sm:$0xff] %v12073_v5 }
 0xb97   : > { %5705 = vmatpush.msrb.mxu1 %v8696_v12  ;;  %13969 = vst [vmem:[#allocation50_spill] sm:$0xff] %v12087_v46 }
 0xb98   : > { %5643 = vmatpush.msrb.mxu0 %v8702_v53  ;;  %5266 = vmatmul.f32.gmra.mxu1 %v11745_v60  ;;  %v12043_v60 = vpop.f32.mrf.mxu1  ;;  %v13970_v53 = vld [vmem:[#allocation39_spill] sm:$0xff] }
 0xb99   : > { %5706 = vmatpush.msrb.mxu1 %v8701_v48  ;;  %5201 = vmatmul.f32.gmra.mxu0 %v11716_v1  ;;  %v12049_v1 = vld [vmem:[%s13762_s10 + $0x1d8] sm:$0xff]  ;;  %v12066_v4 = vpop.f32.mrf.mxu3 }
 0xb9a   : > { %4838 = vmatmul.f32.gmra.mxu3 %v12028_v30  ;;  %13967 = vst [vmem:[#allocation48_spill] sm:$0xff] %v12066_v4 }
 0xb9b   : > { %5707 = vmatpush.msrb.mxu1 %v8706_v20 }
 0xb9c   : > { %4565 = vperm.xlu1 %8788, %v4343_v28  }
 0xb9d   : > { %5708 = vmatpush.msrb.mxu1 %v8707_v29 }
 0xb9e   : > { %4776 = vmatmul.f32.gmra.mxu2 %v12039_v13 }
 0xb9f   : > { %v12051_v51 = vpop.permute.xlu2 %8724 }
 0xba0   : > { %5269 = vmatmul.f32.gmra.mxu1 %v11785_v52  ;;  %v12068_v19 = vpop.f32.mrf.mxu1 }
 0xba1   : > { %5204 = vmatmul.f32.gmra.mxu0 %v11763_v3  ;;  %v12078_v3 = vpop.f32.mrf.mxu0 }
 0xba2   : > { %4841 = vmatmul.f32.gmra.mxu3 %v12049_v1 }
 0xba6   : > { %4779 = vmatmul.f32.gmra.mxu2 %v12063_v36 }
 0xba7   : > { %v12075_v52 = vpop.permute.xlu2 %8749 }
 0xba8   : > { %5272 = vmatmul.f32.gmra.mxu1 %v11820_v15  ;;  %v12093_v15 = vpop.f32.mrf.mxu1 }
 0xba9   : > { %5207 = vmatmul.f32.gmra.mxu0 %v11803_v42 }
 0xbaa   : > { %4844 = vmatmul.f32.gmra.mxu3 %v12073_v5  ;;  %v12082_v32 = vpop.f32.mrf.mxu2 }
 0xbae   : > { %5059 = vmatmul.f32.vlgmr.msra.gmra.mxu2 %v12087_v46 }
 0xbaf   : > { %5953 = vmatpush.msra.mxu2 %v11731_v6  ;;  %v12105_v6 = vpop.f32.mrf.mxu0 }
 0xbb0   : > { %v12091_v9 = vpop.f32.mrf.mxu3  ;;  %5275 = vmatmul.f32.gmra.mxu1 %v11847_v34  ;;  %v13971_v34 = vld [vmem:[#allocation24_spill] sm:$0xff]  ;;  %v12124_v29 = vpop.f32.mrf.mxu1 }
 0xbb1   : > { %5954 = vmatpush.msra.mxu2 %v11729_v58  ;;  %5210 = vmatmul.f32.gmra.mxu0 %v11836_v17  ;;  %v13972_v58 = vld [vmem:[#allocation36_spill] sm:$0xff]  ;;  %v13973_v17 = vld [vmem:[#allocation37_spill] sm:$0xff] }
 0xbb2   : > { %5124 = vmatmul.f32.vlgmr.msra.gmra.mxu3 %v11513_v40  ;;  %v12099_v42 = vpop.permute.xlu2 %8764  ;;  %v12101_v12 = vpop.f32.mrf.mxu2 }
 0xbb3   : > { %5955 = vmatpush.msra.mxu2 %v11727_v54  ;;  %6018 = vmatpush.msra.mxu3 %v11736_v35  ;;  %v12112_v40 = vpop.permute.xlu1 %8714  ;;  %v12114_v48 = vpop.permute.xlu0 %8719  ;;  %v13974_v54 = vld [vmem:[#allocation33_spill] sm:$0xff]  ;;  %v13975_v35 = vld [vmem:[#allocation34_spill] sm:$0xff] }
 0xbb5   : > { %5956 = vmatpush.msra.mxu2 %v11693_v26  ;;  %6019 = vmatpush.msra.mxu3 %v13970_v53  ;;  %v13976_v26 = vld [vmem:[#allocation25_spill] sm:$0xff]  ;;  %v13977_v53 = vld [vmem:[#allocation30_spill] sm:$0xff] }
 0xbb6   : > { %5062 = vmatmul.f32.gmra.mxu2 %v13971_v34  ;;  %v13978_v34 = vld [vmem:[#allocation31_spill] sm:$0xff] }
 0xbb7   : > { %5957 = vmatpush.msra.mxu2 %v13972_v58  ;;  %6020 = vmatpush.msra.mxu3 %v13973_v17  ;;  %v13979_v17 = vld [vmem:[#allocation26_spill] sm:$0xff] }
 0xbb8   : > { %v12116_v20 = vpop.f32.mrf.mxu3  ;;  %5278 = vmatmul.f32.gmra.mxu1 %v11878_v49  ;;  %v12133_v49 = vpop.f32.mrf.mxu0 }
 0xbb9   : > { %5958 = vmatpush.msra.mxu2 %v13974_v54  ;;  %6021 = vmatpush.msra.mxu3 %v13975_v35  ;;  %v8885_v54 = vld [vmem:[#allocation14 + $0xf8] sm:$0xff] }
 0xbba   : > { %5127 = vmatmul.f32.gmra.mxu3 %v13976_v26  ;;  %v12122_v28 = vpop.f32.mrf.mxu2  ;;  %5213 = vmatmul.f32.gmra.mxu0 %v11860_v24  ;;  %v8886_v24 = vld [vmem:[#allocation14 + $0xf0] sm:$0xff]  ;;  %v13980_v26 = vld [vmem:[#allocation42_spill] sm:$0xff] }
 0xbbb   : > { %5959 = vmatpush.msra.mxu2 %v13977_v53  ;;  %6022 = vmatpush.msra.mxu3 %v13978_v34  ;;  %v13981_v34 = vld [vmem:[#allocation27_spill] sm:$0xff] }
 0xbbc   : > { %v12129_v58 = vpop.permute.xlu2 %8779 }
 0xbbd   : > { %5960 = vmatpush.msra.mxu2 %v11773_v21  ;;  %6023 = vmatpush.msra.mxu3 %v11775_v0 }
 0xbbe   : > { %5065 = vmatmul.f32.gmra.mxu2 %v13979_v17 }
 0xbbf   : > { %5961 = vmatpush.msra.mxu2 %v8885_v54  ;;  %6024 = vmatpush.msra.mxu3 %v11771_v31  ;;  %v8887_v31 = vld [vmem:[#allocation14 + $0xe8] sm:$0xff]  ;;  %v8888_v54 = vld [vmem:[#allocation15 + $0xf8] sm:$0xff] }
 0xbc0   : > { %v12137_v35 = vpop.f32.mrf.mxu3  ;;  %5281 = vmatmul.f32.gmra.mxu1 %v11906_v57  ;;  %v8726_v57 = vunpack.i.l.bf16 %v12051_v51 }
 0xbc1   : > { %5962 = vmatpush.msra.mxu2 %v8886_v24  ;;  %6025 = vmatpush.msra.mxu3 %v13980_v26  ;;  %v8740_v53 = vpop.permute.xlu1 %8739  ;;  %v8730_v21 = vpop.permute.xlu0 %8729 }
 0xbc2   : > { %5130 = vmatmul.f32.gmra.mxu3 %v13981_v34  ;;  %v8741_v0 = vunpack.i.l.bf16 %v8740_v53  ;;  %v8732_v46 = vunpack.i.h.bf16 %v8730_v21  ;;  %v8731_v4 = vunpack.i.l.bf16 %v8730_v21  ;;  %v12142_v17 = vpop.f32.mrf.mxu2  ;;  %5216 = vmatmul.f32.gmra.mxu0 %v11897_v23  ;;  %v8742_v24 = vunpack.i.h.bf16 %v8740_v53  ;;  %v4617_v26 = vpop.f32.mrf.mxu1  ;;  %v8890_v34 = vld [vmem:[#allocation15 + $0xf0] sm:$0xff]  ;;  %v8891_v23 = vld [vmem:[#allocation14 + $0xd8] sm:$0xff] }
 0xbc3   : > { %5963 = vmatpush.msra.mxu2 %v8887_v31  ;;  %6026 = vmatpush.msra.mxu3 %v8888_v54  ;;  %v8727_v21 = vunpack.i.h.bf16 %v12051_v51  ;;  %v8892_v31 = vld [vmem:[#allocation15 + $0xe8] sm:$0xff]  ;;  %v8893_v51 = vld [vmem:[#allocation14 + $0xd0] sm:$0xff] }
 0xbc4   : > { %6083 = vmatpush.msra.mxu0 %v8731_v4  ;;  %6148 = vmatpush.msra.mxu1 %v8741_v0  ;;  %v4682_v4 = vpop.f32.mrf.mxu0  ;;  %v8722_v0 = vunpack.i.h.bf16 %v12114_v48 }
 0xbc5   : > { %5964 = vmatpush.msra.mxu2 %v8889_v11  ;;  %6027 = vmatpush.msra.mxu3 %v8890_v34  ;;  %v8721_v11 = vunpack.i.l.bf16 %v12114_v48  ;;  %v13984_v34 = vld [vmem:[#allocation29_spill] sm:$0xff] }
 0xbc6   : > { %5068 = vmatmul.f32.gmra.mxu2 %v13982_v8  ;;  %v12148_v38 = vpop.permute.xlu2 %4530  ;;  %6084 = vmatpush.msra.mxu0 %v8732_v46  ;;  %v8894_v8 = vld [vmem:[#allocation15 + $0xe0] sm:$0xff]  ;;  %v8716_v46 = vunpack.i.l.bf16 %v12112_v40 }
 0xbc7   : > { %13983 = vst [vmem:[#allocation51_spill] sm:$0xff] %v12148_v38  ;;  %5965 = vmatpush.msra.mxu2 %v8891_v23  ;;  %6028 = vmatpush.msra.mxu3 %v8892_v31  ;;  %v4618_v53 = vadd.f32 %v4617_v26, %v12148_v38  ;;  %v8717_v26 = vunpack.i.h.bf16 %v12112_v40  ;;  %v8895_v31 = vld [vmem:[#allocation14 + $0xc8] sm:$0xff]  ;;  %v8896_v38 = vld [vmem:[#allocation15 + $0xd8] sm:$0xff] }
 0xbc8   : > { %6085 = vmatpush.msra.mxu0 %v8742_v24  ;;  %6149 = vmatpush.msra.mxu1 %v8726_v57  ;;  %v12153_v54 = vpop.f32.mrf.mxu3  ;;  %v8711_v24 = vunpack.i.l.bf16 %v12020_v10 }
 0xbc9   : > { %5966 = vmatpush.msra.mxu2 %v8893_v51  ;;  %6029 = vmatpush.msra.mxu3 %v8894_v8  ;;  %v4683_v23 = vadd.f32 %v4682_v4, %v4618_v53  ;;  %v8712_v8 = vunpack.i.h.bf16 %v12020_v10 }
 0xbca   : > { %5133 = vmatmul.f32.gmra.mxu3 %v13984_v34  ;;  %6086 = vmatpush.msra.mxu0 %v8727_v21  ;;  %v4747_v51 = vpop.f32.mrf.mxu2  ;;  %v8898_v34 = vld [vmem:[#allocation15 + $0xd0] sm:$0xff] }
 0xbcb   : > { %5967 = vmatpush.msra.mxu2 %v8895_v31  ;;  %6030 = vmatpush.msra.mxu3 %v8896_v38  ;;  %v8745_v48 = vpop.permute.xlu1 %8744  ;;  %v8735_v57 = vpop.permute.xlu0 %8734  ;;  %v13985_v21 = vld [vmem:[#allocation32_spill] sm:$0xff]  ;;  %v4748_v38 = vadd.f32 %v4747_v51, %v4683_v23  ;;  %v13987_v23 = vld [vmem:[#allocation35_spill] sm:$0xff] }
 0xbcc   : > { %6150 = vmatpush.msra.mxu1 %v8721_v11  ;;  %6087 = vmatpush.msra.mxu0 %v8722_v0  ;;  %v8736_v53 = vunpack.i.l.bf16 %v8735_v57  ;;  %v8737_v31 = vunpack.i.h.bf16 %v8735_v57  ;;  %v8899_v11 = vld [vmem:[#allocation15 + $0xc8] sm:$0xff]  ;;  %v8746_v0 = vunpack.i.l.bf16 %v8745_v48  ;;  %v8747_v10 = vunpack.i.h.bf16 %v8745_v48 }
 0xbcd   : > { %5968 = vmatpush.msra.mxu2 %v8897_v63  ;;  %6031 = vmatpush.msra.mxu3 %v8898_v34  ;;  %v8900_v34 = vld [vmem:[#allocation15 + $0xc0] sm:$0xff] }
 0xbce   : > { %5071 = vmatmul.f32.gmra.mxu2 %v13985_v21  ;;  %v12161_v40 = vpop.permute.xlu2 %4515  ;;  %6151 = vmatpush.msra.mxu1 %v8716_v46  ;;  %v8751_v46 = vunpack.i.l.bf16 %v12075_v52 }
 0xbcf   : > { %13986 = vst [vmem:[#allocation52_spill] sm:$0xff] %v12161_v40  ;;  %v4609_v4 = vadd.f32 %v12068_v19, %v12161_v40  ;;  %6032 = vmatpush.msra.mxu3 %v8899_v11  ;;  %6088 = vmatpush.msra.mxu0 %v8717_v26  ;;  %v8752_v26 = vunpack.i.h.bf16 %v12075_v52 }
 0xbd0   : > { %6152 = vmatpush.msra.mxu1 %v8711_v24  ;;  %5219 = vmatmul.f32.gmra.mxu0 %v11928_v7  ;;  %v4812_v21 = vpop.f32.mrf.mxu3  ;;  %v12180_v24 = vld [vmem:[%s13762_s10 + $0xa0] sm:$0xff] }
 0xbd1   : > { %v4674_v63 = vadd.f32 %v12078_v3, %v4609_v4  ;;  %6033 = vmatpush.msra.mxu3 %v8900_v34  ;;  %6089 = vmatpush.msra.mxu0 %v8712_v8  ;;  %v12169_v19 = vadd.f32 %v4812_v21, %v4748_v38  ;;  %13988 = vst [vmem:[#allocation53_spill] sm:$0xff] %v12180_v24  ;;  %v8767_v4 = vunpack.i.h.bf16 %v12099_v42  ;;  %v13989_v34 = vld [vmem:[#allocation41_spill] sm:$0xff] }
 0xbd2   : > { %5136 = vmatmul.f32.gmra.mxu3 %v13987_v23  ;;  %6153 = vmatpush.msra.mxu1 %v8736_v53 }
 0xbd3   : > { %v4739_v57 = vadd.f32 %v12101_v12, %v4674_v63  ;;  %6090 = vmatpush.msra.mxu0 %v8737_v31  ;;  %5284 = vmatmul.f32.gmra.mxu1 %v11940_v45  ;;  %v12193_v31 = vld [vmem:[%s13762_s10 + $0xa8] sm:$0xff] }
 0xbd4   : > { %6154 = vmatpush.msra.mxu1 %v8746_v0 }
 0xbd5   : > { %v8760_v7 = vpop.permute.xlu1 %8759  ;;  %v8755_v3 = vpop.permute.xlu0 %8754  ;;  %6091 = vmatpush.msra.mxu0 %v8747_v10  ;;  %v12175_v48 = vadd.f32 %v12116_v20, %v4739_v57  ;;  %v8766_v20 = vunpack.i.l.bf16 %v12099_v42  ;;  %v12202_v42 = vld [vmem:[%s13762_s10 + $0xc0] sm:$0xff] }
 0xbd6   : > { %5074 = vmatmul.f32.gmra.mxu2 %v12180_v24  ;;  %v12183_v52 = vpop.permute.xlu2 %4555  ;;  %v8761_v12 = vunpack.i.l.bf16 %v8760_v7  ;;  %v8757_v51 = vunpack.i.h.bf16 %v8755_v3  ;;  %v8756_v8 = vunpack.i.l.bf16 %v8755_v3  ;;  %v12185_v53 = vpop.f32.mrf.mxu2  ;;  %6155 = vmatpush.msra.mxu1 %v8751_v46  ;;  %v8762_v38 = vunpack.i.h.bf16 %v8760_v7 }
 0xbd7   : > { %6092 = vmatpush.msra.mxu0 %v8752_v26 }
 0xbd8   : > { %6156 = vmatpush.msra.mxu1 %v8756_v8  ;;  %5222 = vmatmul.f32.gmra.mxu0 %v11961_v27 }
 0xbd9   : > { %6093 = vmatpush.msra.mxu0 %v8757_v51  ;;  %v8781_v51 = vunpack.i.l.bf16 %v12129_v58 }
 0xbda   : > { %5139 = vmatmul.f32.gmra.mxu3 %v12193_v31  ;;  %6157 = vmatpush.msra.mxu1 %v8761_v12  ;;  %v12214_v12 = vld [vmem:[%s13762_s10 + $0xc8] sm:$0xff] }
 0xbdb   : > { %v12196_v11 = vpop.f32.mrf.mxu3  ;;  %6094 = vmatpush.msra.mxu0 %v8762_v38  ;;  %5287 = vmatmul.f32.gmra.mxu1 %v11969_v41  ;;  %v8782_v38 = vunpack.i.h.bf16 %v12129_v58 }
 0xbdc   : > { %6158 = vmatpush.msra.mxu1 %v8766_v20 }
 0xbdd   : > { %6095 = vmatpush.msra.mxu0 %v8767_v4 }
 0xbde   : > { %5077 = vmatmul.f32.gmra.mxu2 %v12202_v42  ;;  %v12205_v0 = vpop.permute.xlu2 %4540  ;;  %v8775_v63 = vpop.permute.xlu1 %8774 }
 0xbdf   : > { %v8770_v10 = vpop.permute.xlu0 %8769  ;;  %v4624_v21 = vadd.f32 %v13989_v34, %v12205_v0  ;;  %v4753_v46 = vpop.f32.mrf.mxu2  ;;  %v8777_v23 = vunpack.i.h.bf16 %v8775_v63  ;;  %v8776_v26 = vunpack.i.l.bf16 %v8775_v63 }
 0xbe0   : > { %v8772_v57 = vunpack.i.h.bf16 %v8770_v10  ;;  %v8771_v7 = vunpack.i.l.bf16 %v8770_v10  ;;  %5225 = vmatmul.f32.gmra.mxu0 %v11988_v2 }
 0xbe1   : > { %v4689_v3 = vadd.f32 %v11752_v37, %v4624_v21  ;;  %v12223_v37 = vld [vmem:[%s13762_s10 + $0xe0] sm:$0xff] }
 0xbe2   : > { %6159 = vmatpush.msra.mxu1 %v8771_v7  ;;  %6096 = vmatpush.msra.mxu0 %v8772_v57 }
 0xbe3   : > { %5142 = vmatmul.f32.gmra.mxu3 %v12214_v12  ;;  %5290 = vmatmul.f32.gmra.mxu1 %v11997_v22  ;;  %v4754_v8 = vadd.f32 %v4753_v46, %v4689_v3 }
 0xbe4   : > { %6160 = vmatpush.msra.mxu1 %v8776_v26  ;;  %6097 = vmatpush.msra.mxu0 %v8777_v23 }
 0xbe5   : > { %v4818_v20 = vpop.f32.mrf.mxu3 }
 0xbe6   : > { %6161 = vmatpush.msra.mxu1 %v8781_v51  ;;  %5080 = vmatmul.f32.gmra.mxu2 %v12223_v37  ;;  %v12226_v4 = vpop.permute.xlu2 %4525  ;;  %v12228_v63 = vpop.permute.xlu1 %4510  ;;  %v12230_v10 = vadd.f32 %v4818_v20, %v4754_v8  ;;  %v4852_v8 = vmax.f32 %v12169_v19, 0.0  ;;  %v12284_v19 = vld [vmem:[%s13762_s10 + $0x120] sm:$0xff] }
 0xbe7   : > { %13990 = vst [vmem:[#allocation54_spill] sm:$0xff] %v12226_v4  ;;  %v4615_v34 = vadd.f32 %v12124_v29, %v12226_v4  ;;  %v4606_v58 = vadd.f32 %v12043_v60, %v12228_v63  ;;  %v8785_v21 = vpop.permute.xlu0 %8784  ;;  %6098 = vmatpush.msra.mxu0 %v8782_v38  ;;  %v12246_v60 = vld [vmem:[%s13762_s10 + $0xe8] sm:$0xff] }
 0xbe8   : > { %v8786_v46 = vunpack.i.l.bf16 %v8785_v21  ;;  %5228 = vmatmul.f32.gmra.mxu0 %v12018_v47  ;;  %v8787_v7 = vunpack.i.h.bf16 %v8785_v21  ;;  %13994 = vst [vmem:[#allocation22_spill] sm:$0xff] %v12284_v19 }
 0xbe9   : > { %v4680_v23 = vadd.f32 %v12133_v49, %v4615_v34  ;;  %v4671_v26 = vadd.f32 %v12053_v16, %v4606_v58  ;;  %v12239_v57 = vpop.f32.mrf.mxu2  ;;  %v12275_v34 = vld [vmem:[%s13762_s10 + $0x108] sm:$0xff] }
 0xbea   : > { %6162 = vmatpush.msra.mxu1 %v8786_v46  ;;  %13993 = vst [vmem:[#allocation21_spill] sm:$0xff] %v12275_v34  ;;  %v13995_v46 = vld [vmem:[#allocation38_spill] sm:$0xff] }
 0xbeb   : > { %v4745_v3 = vadd.f32 %v12142_v17, %v4680_v23  ;;  %v4736_v29 = vadd.f32 %v12082_v32, %v4671_v26  ;;  %5145 = vmatmul.f32.gmra.mxu3 %v12246_v60  ;;  %5293 = vmatmul.f32.gmra.mxu1 %v12028_v30  ;;  %v12259_v32 = vld [vmem:[%s13762_s10 + $0x100] sm:$0xff] }
 0xbec   : > { %6163 = vmatpush.msra.mxu1 %v8787_v7  ;;  %v13996_v7 = vld [vmem:[#allocation40_spill] sm:$0xff] }
 0xbed   : > { %v12250_v49 = vpop.f32.mrf.mxu3  ;;  %v4801_v16 = vadd.f32 %v12091_v9, %v4736_v29  ;;  %v12254_v51 = vadd.f32 %v12153_v54, %v4745_v3 }
 0xbee   : > { %5083 = vmatmul.f32.gmra.mxu2 %v12259_v32  ;;  %v12262_v17 = vpop.permute.xlu1 %4570 }
 0xbef   : > { %13991 = vst [vmem:[#allocation55_spill] sm:$0xff] %v12262_v17  ;;  %v12265_v38 = vpop.permute.xlu0 %4550  ;;  %v4848_v20 = vmax.f32 %v4801_v16, 0.0 }
 0xbf0   : > { %13992 = vst [vmem:[#allocation56_spill] sm:$0xff] %v12265_v38  ;;  %5231 = vmatmul.f32.gmra.mxu0 %v12039_v13 }
 0xbf1   : > { %v12268_v9 = vpop.f32.mrf.mxu2  ;;  %v12270_v54 = vmax.f32 %v4848_v20, %v4852_v8  ;;  %v12301_v8 = vld [vmem:[%s13762_s10 + $0x128] sm:$0xff] }
 0xbf2   : > { %13997 = vst [vmem:[#allocation18_spill] sm:$0xff] %v12301_v8 }
 0xbf3   : > { %5148 = vmatmul.f32.gmra.mxu3 %v12275_v34  ;;  %5296 = vmatmul.f32.gmra.mxu1 %v12049_v1 }
 0xbf5   : > { %v12279_v58 = vpop.f32.mrf.mxu3 }
 0xbf6   : > { %5086 = vmatmul.f32.gmra.mxu2 %v12284_v19  ;;  %v12287_v21 = vpop.permute.xlu1 %4535 }
 0xbf7   : > { %v4621_v23 = vadd.f32 %v13995_v46, %v12287_v21  ;;  %v12291_v26 = vpop.permute.xlu0 %4575 }
 0xbf8   : > { %5234 = vmatmul.f32.gmra.mxu0 %v12063_v36 }
 0xbf9   : > { %v4686_v3 = vadd.f32 %v13996_v7, %v4621_v23  ;;  %v12295_v29 = vpop.f32.mrf.mxu2  ;;  %v12311_v23 = vld [vmem:[%s13762_s10 + $0x140] sm:$0xff] }
 0xbfa   : > { %13998 = vst [vmem:[#allocation20_spill] sm:$0xff] %v12311_v23 }
 0xbfb   : > { %v4751_v16 = vadd.f32 %v12185_v53, %v4686_v3  ;;  %5151 = vmatmul.f32.gmra.mxu3 %v12301_v8  ;;  %5299 = vmatmul.f32.gmra.mxu1 %v12073_v5  ;;  %v4849_v5 = vmax.f32 %v12175_v48, 0.0  ;;  %v12336_v48 = vld [vmem:[%s13762_s10 + $0x148] sm:$0xff] }
 0xbfc   : > { %14000 = vst [vmem:[#allocation24_spill] sm:$0xff] %v12336_v48 }
 0xbfd   : > { %v12305_v20 = vpop.f32.mrf.mxu3  ;;  %v4816_v46 = vadd.f32 %v12196_v11, %v4751_v16  ;;  %v12324_v11 = vld [vmem:[%s13762_s10 + $0x10] sm:$0xff] }
 0xbfe   : > { %5089 = vmatmul.f32.gmra.mxu2 %v12311_v23  ;;  %v12314_v53 = vpop.permute.xlu1 %4520 }
 0xbff   : > { %13999 = vst [vmem:[#allocation39_spill] sm:$0xff] %v12314_v53  ;;  %v4612_v7 = vadd.f32 %v12093_v15, %v12314_v53  ;;  %v12318_v3 = vpop.permute.xlu0 %4560  ;;  %v4853_v8 = vmax.f32 %v4816_v46, 0.0  ;;  %v12342_v46 = vld [vmem:[%s13762_s10 + $0x18] sm:$0xff] }
 0xc00   : > { %5644 = vmatmul.f32.vlgmr.msrb.gmra.mxu0 %v12324_v11  ;;  %14001 = vst [vmem:[#allocation36_spill] sm:$0xff] %v12342_v46 }
 0xc01   : > { %v4677_v16 = vadd.f32 %v12105_v6, %v4612_v7  ;;  %v12328_v23 = vpop.f32.mrf.mxu2  ;;  %v12330_v36 = vmax.f32 %v4849_v5, %v4853_v8  ;;  %v4854_v8 = vmax.f32 %v12230_v10, 0.0  ;;  %v4630_v10 = vadd.f32 %v11806_v33, %v12265_v38  ;;  %v12391_v33 = vld [vmem:[%s13762_s10 + $0x180] sm:$0xff] }
 0xc02   : > { %14005 = vst [vmem:[#allocation25_spill] sm:$0xff] %v12391_v33 }
 0xc03   : > { %v4742_v15 = vadd.f32 %v12122_v28, %v4677_v16  ;;  %5154 = vmatmul.f32.gmra.mxu3 %v12336_v48  ;;  %5709 = vmatmul.f32.vlgmr.msrb.gmra.mxu1 %v12342_v46  ;;  %v12351_v28 = vld [vmem:[%s13762_s10 + $0x160] sm:$0xff]  ;;  %v12362_v46 = vld [vmem:[%s13762_s10 + $0x30] sm:$0xff] }
 0xc04   : > { %14002 = vst [vmem:[#allocation37_spill] sm:$0xff] %v12351_v28 }
 0xc05   : > { %v12345_v6 = vpop.f32.mrf.mxu3  ;;  %v4807_v5 = vadd.f32 %v12137_v35, %v4742_v15 }
 0xc06   : > { %5092 = vmatmul.f32.gmra.mxu2 %v12351_v28 }
 0xc07   : > { %v12355_v7 = vpop.permute.xlu0 %4545  ;;  %v4850_v16 = vmax.f32 %v4807_v5, 0.0  ;;  %v12381_v5 = vld [vmem:[%s13762_s10 + $0x38] sm:$0xff] }
 0xc08   : > { %v4627_v48 = vadd.f32 %v11765_v61, %v12355_v7  ;;  %5647 = vmatmul.f32.gmra.mxu0 %v12362_v46  ;;  %v12375_v61 = vld [vmem:[%s13762_s10 + $0x168] sm:$0xff]  ;;  %14004 = vst [vmem:[#allocation34_spill] sm:$0xff] %v12381_v5 }
 0xc09   : > { %v12365_v35 = vpop.f32.mrf.mxu2  ;;  %v12367_v15 = vmax.f32 %v4850_v16, %v4854_v8  ;;  %14003 = vst [vmem:[#allocation33_spill] sm:$0xff] %v12375_v61 }
 0xc0a   : > { %v4692_v28 = vadd.f32 %v11791_v50, %v4627_v48  ;;  %v4695_v50 = vadd.f32 %v11822_v14, %v4630_v10  ;;  %v4642_v48 = vadd.f32 %v11955_v43, %v12262_v17  ;;  %v12408_v43 = vpop.permute.xlu1 %4580 }
 0xc0b   : > { %5157 = vmatmul.f32.gmra.mxu3 %v12375_v61  ;;  %5712 = vmatmul.f32.gmra.mxu1 %v12381_v5  ;;  %v4851_v5 = vmax.f32 %v12254_v51, 0.0  ;;  %14006 = vst [vmem:[#allocation30_spill] sm:$0xff] %v12408_v43  ;;  %v12419_v51 = vld [vmem:[%s13762_s10 + $0x58] sm:$0xff] }
 0xc0c   : > { %v4757_v8 = vadd.f32 %v12239_v57, %v4692_v28  ;;  %v12401_v57 = vld [vmem:[%s13762_s10 + $0x50] sm:$0xff]  ;;  %v4760_v28 = vadd.f32 %v12268_v9, %v4695_v50  ;;  %v4707_v10 = vadd.f32 %v11972_v39, %v4642_v48  ;;  %14008 = vst [vmem:[#allocation26_spill] sm:$0xff] %v12419_v51  ;;  %v4645_v50 = vadd.f32 %v11991_v59, %v12291_v26 }
 0xc0d   : > { %v12385_v16 = vpop.f32.mrf.mxu3 }
 0xc0e   : > { %5095 = vmatmul.f32.gmra.mxu2 %v12391_v33  ;;  %v4822_v38 = vadd.f32 %v12250_v49, %v4757_v8  ;;  %v12413_v49 = vld [vmem:[%s13762_s10 + $0x188] sm:$0xff]  ;;  %v4825_v39 = vadd.f32 %v12279_v58, %v4760_v28  ;;  %v4710_v59 = vadd.f32 %v12012_v44, %v4645_v50 }
 0xc0f   : > { %14007 = vst [vmem:[#allocation31_spill] sm:$0xff] %v12413_v49 }
 0xc10   : > { %v4855_v61 = vmax.f32 %v4822_v38, 0.0  ;;  %5650 = vmatmul.f32.gmra.mxu0 %v12401_v57  ;;  %v4633_v38 = vadd.f32 %v11838_v25, %v12183_v52  ;;  %v4856_v48 = vmax.f32 %v4825_v39, 0.0  ;;  %v12437_v25 = vld [vmem:[%s13762_s10 + $0x70] sm:$0xff]  ;;  %v12444_v39 = vpop.f32.mrf.mxu0 }
 0xc11   : > { %v4771_v14 = vpop.f32.mrf.mxu2 }
 0xc12   : > { %v12406_v33 = vmax.f32 %v4851_v5, %v4855_v61  ;;  %v4772_v9 = vadd.f32 %v4771_v14, %v4707_v10  ;;  %v12428_v5 = vld [vmem:[%s13762_s10 + $0x1a0] sm:$0xff]  ;;  %v4636_v10 = vadd.f32 %v11872_v62, %v12318_v3 }
 0xc13   : > { %5160 = vmatmul.f32.gmra.mxu3 %v12413_v49  ;;  %5715 = vmatmul.f32.gmra.mxu1 %v12419_v51  ;;  %v4698_v51 = vadd.f32 %v11854_v55, %v4633_v38  ;;  %v12446_v55 = vpop.f32.mrf.mxu1  ;;  %v12451_v38 = vld [vmem:[%s13762_s10 + $0x1a8] sm:$0xff] }
 0xc14   : > { %v4701_v50 = vadd.f32 %v11899_v18, %v4636_v10  ;;  %v12479_v18 = vld [vmem:[%s13762_s10 + $0x90] sm:$0xff] }
 0xc15   : > { %v4836_v61 = vpop.f32.mrf.mxu3  ;;  %v4763_v28 = vadd.f32 %v12295_v29, %v4698_v51  ;;  %v12457_v29 = vld [vmem:[%s13762_s10 + $0x78] sm:$0xff] }
 0xc16   : > { %5098 = vmatmul.f32.gmra.mxu2 %v12428_v5  ;;  %v4837_v8 = vadd.f32 %v4836_v61, %v4772_v9  ;;  %v12462_v61 = vpop.permute.xlu1 %4565 }
 0xc17   : > { %v4828_v62 = vadd.f32 %v12305_v20, %v4763_v28  ;;  %14009 = vst [vmem:[#allocation42_spill] sm:$0xff] %v12462_v61  ;;  %v4648_v20 = vadd.f32 %v12023_v56, %v12408_v43 }
 0xc18   : > { %v4860_v58 = vmax.f32 %v4837_v8, 0.0  ;;  %5653 = vmatmul.f32.gmra.mxu0 %v12437_v25 }
 0xc19   : > { %v4774_v14 = vpop.f32.mrf.mxu2 }
 0xc1a   : > { %v4868_v9 = vmax.f32 %v4856_v48, %v4860_v58  ;;  %v4775_v51 = vadd.f32 %v4774_v14, %v4710_v59  ;;  %v12469_v48 = vld [vmem:[%s13762_s10 + $0x1c0] sm:$0xff]  ;;  %v14011_v14 = vld [vmem:[#allocation43_spill] sm:$0xff]  ;;  %v4766_v59 = vadd.f32 %v12328_v23, %v4701_v50  ;;  %v12499_v23 = vld [vmem:[%s13762_s10 + $0x98] sm:$0xff] }
 0xc1b   : > { %5163 = vmatmul.f32.gmra.mxu3 %v12451_v38  ;;  %5718 = vmatmul.f32.gmra.mxu1 %v12457_v29  ;;  %14010 = vst [vmem:[#allocation27_spill] sm:$0xff] %v12469_v48  ;;  %v4639_v28 = vadd.f32 %v14011_v14, %v12462_v61  ;;  %v12486_v56 = vpop.f32.mrf.mxu1  ;;  %v12509_v61 = vld [vmem:[%s13762_s10 + $0x1e0] sm:$0xff] }
 0xc1c   : > { %v4872_v44 = vmax.f32 %v12270_v54, %v4868_v9  ;;  %v4857_v54 = vmax.f32 %v4828_v62, 0.0  ;;  %v12488_v62 = vpop.permute.xlu2 %4585  ;;  %14015 = vst [vmem:[#allocation32_spill] sm:$0xff] %v12499_v23  ;;  %v4831_v50 = vadd.f32 %v12345_v6, %v4766_v59 }
 0xc1d   : > { %v4839_v8 = vpop.f32.mrf.mxu3  ;;  %14013 = vst [vmem:[#allocation28_spill] sm:$0xff] %v12488_v62 }
 0xc1e   : > { %4877 = vst.msk [vmem:[#allocation6] sm:$0xff] %vm4876_vm3, %v4872_v44  ;;  %5101 = vmatmul.f32.gmra.mxu2 %v12469_v48  ;;  %v4840_v58 = vadd.f32 %v4839_v8, %v4775_v51  ;;  %v14012_v51 = vld [vmem:[#allocation45_spill] sm:$0xff]  ;;  %v12484_v48 = vpop.f32.mrf.mxu0  ;;  %v4858_v6 = vmax.f32 %v4831_v50, 0.0 }
 0xc1f   : > { %v4713_v8 = vadd.f32 %v14012_v51, %v4648_v20  ;;  %v14016_v20 = vld [vmem:[#allocation44_spill] sm:$0xff] }
 0xc20   : > { %v4861_v9 = vmax.f32 %v4840_v58, 0.0  ;;  %5656 = vmatmul.f32.gmra.mxu0 %v12479_v18  ;;  %v12493_v58 = vld [vmem:[%s13762_s10 + $0x1c8] sm:$0xff] }
 0xc21   : > { %v4777_v10 = vpop.f32.mrf.mxu2  ;;  %14014 = vst [vmem:[#allocation29_spill] sm:$0xff] %v12493_v58 }
 0xc22   : > { %v4869_v44 = vmax.f32 %v4857_v54, %v4861_v9  ;;  %v4704_v54 = vadd.f32 %v14016_v20, %v4639_v28  ;;  %v4778_v9 = vadd.f32 %v4777_v10, %v4713_v8  ;;  %v14018_v8 = vld [vmem:[#allocation48_spill] sm:$0xff] }
 0xc23   : > { %5166 = vmatmul.f32.gmra.mxu3 %v12493_v58  ;;  %5721 = vmatmul.f32.gmra.mxu1 %v12499_v23  ;;  %v14017_v23 = vld [vmem:[#allocation46_spill] sm:$0xff] }
 0xc24   : > { %v4873_v14 = vmax.f32 %v12330_v36, %v4869_v44  ;;  %v4651_v43 = vadd.f32 %v14017_v23, %v12488_v62  ;;  %v4769_v28 = vadd.f32 %v12365_v35, %v4704_v54  ;;  %v12518_v36 = vld [vmem:[%s13762_s10 + $0xb0] sm:$0xff]  ;;  %v12529_v35 = vld [vmem:[%s13762_s10 + $0x1e8] sm:$0xff] }
 0xc25   : > { %v4842_v51 = vpop.f32.mrf.mxu3  ;;  %14019 = vst [vmem:[#allocation35_spill] sm:$0xff] %v12529_v35 }
 0xc26   : > { %4878 = vst.msk [vmem:[#allocation6 + $0x8] sm:$0xff] %vm4876_vm3, %v4873_v14  ;;  %5104 = vmatmul.f32.gmra.mxu2 %v12509_v61  ;;  %v4843_v58 = vadd.f32 %v4842_v51, %v4778_v9  ;;  %v4716_v20 = vadd.f32 %v14018_v8, %v4651_v43  ;;  %v12522_v14 = vpop.f32.mrf.mxu0  ;;  %v12524_v9 = vpop.f32.mrf.mxu1  ;;  %v4834_v43 = vadd.f32 %v12385_v16, %v4769_v28  ;;  %v14021_v51 = vld [vmem:[#allocation50_spill] sm:$0xff] }
 0xc28   : > { %v4862_v59 = vmax.f32 %v4843_v58, 0.0  ;;  %5659 = vmatmul.f32.gmra.mxu0 %v12518_v36  ;;  %v12535_v58 = vld [vmem:[%s13762_s10 + $0xb8] sm:$0xff] }
 0xc29   : > { %v4780_v10 = vpop.f32.mrf.mxu2  ;;  %14020 = vst [vmem:[#allocation41_spill] sm:$0xff] %v12535_v58 }
 0xc2a   : > { %v4870_v44 = vmax.f32 %v4858_v6, %v4862_v59  ;;  %v4781_v50 = vadd.f32 %v4780_v10, %v4716_v20  ;;  %v4859_v59 = vmax.f32 %v4834_v43, 0.0  ;;  %v12560_v20 = vld [vmem:[%s13762_s10 + $0xd8] sm:$0xff] }
 0xc2b   : > { %5169 = vmatmul.f32.gmra.mxu3 %v12529_v35  ;;  %5724 = vmatmul.f32.gmra.mxu1 %v12535_v58  ;;  %v12545_v35 = vld [vmem:[%s13762_s10 + $0xd0] sm:$0xff] }
 0xc2c   : > { %v4874_v23 = vmax.f32 %v12367_v15, %v4870_v44  ;;  %v12554_v44 = vld [vmem:[%s13762_s10 + $0x8] sm:$0xff] }
 0xc2d   : > { %v4845_v54 = vpop.f32.mrf.mxu3 }
 0xc2e   : > { %4879 = vst.msk [vmem:[#allocation6 + $0x10] sm:$0xff] %vm4876_vm3, %v4874_v23  ;;  %5514 = vmatmul.f32.vlgmr.msrb.gmra.mxu2 %v14021_v51  ;;  %v4846_v6 = vadd.f32 %v4845_v54, %v4781_v50  ;;  %v5199_v28 = vpop.f32.mrf.mxu0  ;;  %v12549_v10 = vpop.f32.mrf.mxu1  ;;  %v12568_v23 = vld [vmem:[%s13762_s10 + $0x20] sm:$0xff]  ;;  %v12575_v51 = vld [vmem:[%s13762_s10 + $0xf0] sm:$0xff] }
 0xc2f   : > { %14022 = vst [vmem:[#allocation38_spill] sm:$0xff] %v12568_v23 }
 0xc30   : > { %v4863_v8 = vmax.f32 %v4846_v6, 0.0  ;;  %5662 = vmatmul.f32.gmra.mxu0 %v12545_v35  ;;  %14023 = vst [vmem:[#allocation40_spill] sm:$0xff] %v12575_v51 }
 0xc31   : > { %v5060_v58 = vpop.f32.mrf.mxu2 }
 0xc32   : > { %v4871_v16 = vmax.f32 %v4859_v59, %v4863_v8  ;;  %v5061_v15 = vadd.f32 %v5060_v58, %v12228_v63 }
 0xc33   : > { %5579 = vmatmul.f32.vlgmr.msrb.gmra.mxu3 %v12554_v44  ;;  %5727 = vmatmul.f32.gmra.mxu1 %v12560_v20 }
 0xc34   : > { %v4875_v43 = vmax.f32 %v12406_v33, %v4871_v16 }
 0xc35   : > { %v5125_v58 = vpop.f32.mrf.mxu3 }
 0xc36   : > { %4880 = vst.msk [vmem:[#allocation6 + $0x18] sm:$0xff] %vm4876_vm3, %v4875_v43  ;;  %5517 = vmatmul.f32.gmra.mxu2 %v12568_v23  ;;  %v5126_v50 = vadd.f32 %v5125_v58, %v5061_v15  ;;  %v5202_v8 = vpop.f32.mrf.mxu0  ;;  %v5267_v16 = vpop.f32.mrf.mxu1  ;;  %v12585_v15 = vld [vmem:[%s13762_s10 + $0x28] sm:$0xff] }
 0xc37   : > { %14024 = vst [vmem:[#allocation43_spill] sm:$0xff] %v12585_v15 }
 0xc38   : > { %v5191_v54 = vadd.f32 %v12444_v39, %v5126_v50  ;;  %5665 = vmatmul.f32.gmra.mxu0 %v12575_v51  ;;  %v12591_v39 = vld [vmem:[%s13762_s10 + $0xf8] sm:$0xff] }
 0xc39   : > { %v5063_v33 = vpop.f32.mrf.mxu2  ;;  %14025 = vst [vmem:[#allocation45_spill] sm:$0xff] %v12591_v39 }
 0xc3a   : > { %v5064_v6 = vadd.f32 %v5063_v33, %v12161_v40  ;;  %v12580_v59 = vadd.f32 %v12446_v55, %v5191_v54  ;;  %v12597_v55 = vld [vmem:[%s13762_s10 + $0x40] sm:$0xff]  ;;  %v12604_v54 = vld [vmem:[%s13762_s10 + $0x110] sm:$0xff] }
 0xc3b   : > { %5582 = vmatmul.f32.gmra.mxu3 %v12585_v15  ;;  %5730 = vmatmul.f32.gmra.mxu1 %v12591_v39  ;;  %14026 = vst [vmem:[#allocation44_spill] sm:$0xff] %v12597_v55 }
 0xc3c   : > { %14027 = vst [vmem:[#allocation46_spill] sm:$0xff] %v12604_v54 }
 0xc3d   : > { %v5128_v43 = vpop.f32.mrf.mxu3 }
 0xc3e   : > { %5520 = vmatmul.f32.gmra.mxu2 %v12597_v55  ;;  %v5129_v58 = vadd.f32 %v5128_v43, %v5064_v6  ;;  %v5205_v40 = vpop.f32.mrf.mxu0  ;;  %v5270_v51 = vpop.f32.mrf.mxu1  ;;  %v12614_v6 = vld [vmem:[%s13762_s10 + $0x48] sm:$0xff] }
 0xc3f   : > { %14028 = vst [vmem:[#allocation48_spill] sm:$0xff] %v12614_v6 }
 0xc40   : > { %v5194_v50 = vadd.f32 %v12484_v48, %v5129_v58  ;;  %5668 = vmatmul.f32.gmra.mxu0 %v12604_v54  ;;  %v12620_v48 = vld [vmem:[%s13762_s10 + $0x118] sm:$0xff] }
 0xc41   : > { %v5066_v33 = vpop.f32.mrf.mxu2  ;;  %14029 = vst [vmem:[#allocation50_spill] sm:$0xff] %v12620_v48 }
 0xc42   : > { %v5067_v39 = vadd.f32 %v5066_v33, %v12314_v53  ;;  %v12609_v15 = vadd.f32 %v12486_v56, %v5194_v50  ;;  %v12626_v56 = vld [vmem:[%s13762_s10 + $0x60] sm:$0xff]  ;;  %v12633_v33 = vld [vmem:[%s13762_s10 + $0x130] sm:$0xff] }
 0xc43   : > { %5585 = vmatmul.f32.gmra.mxu3 %v12614_v6  ;;  %5733 = vmatmul.f32.gmra.mxu1 %v12620_v48  ;;  %14030 = vst [vmem:[#allocation57_spill] sm:$0xff] %v12626_v56 }
 0xc44   : > { %14031 = vst [vmem:[#allocation58_spill] sm:$0xff] %v12633_v33 }
 0xc45   : > { %v5131_v43 = vpop.f32.mrf.mxu3 }
 0xc46   : > { %5523 = vmatmul.f32.gmra.mxu2 %v12626_v56  ;;  %v5132_v58 = vadd.f32 %v5131_v43, %v5067_v39  ;;  %v5208_v54 = vpop.f32.mrf.mxu0  ;;  %v5273_v55 = vpop.f32.mrf.mxu1  ;;  %v12643_v39 = vld [vmem:[%s13762_s10 + $0x68] sm:$0xff] }
 0xc47   : > { %14032 = vst [vmem:[#allocation59_spill] sm:$0xff] %v12643_v39 }
 0xc48   : > { %v5197_v50 = vadd.f32 %v12522_v14, %v5132_v58  ;;  %5671 = vmatmul.f32.gmra.mxu0 %v12633_v33  ;;  %v12649_v14 = vld [vmem:[%s13762_s10 + $0x138] sm:$0xff] }
 0xc49   : > { %v5069_v6 = vpop.f32.mrf.mxu2  ;;  %14033 = vst [vmem:[#allocation60_spill] sm:$0xff] %v12649_v14 }
 0xc4a   : > { %v5070_v48 = vadd.f32 %v5069_v6, %v12226_v4  ;;  %v12638_v53 = vadd.f32 %v12524_v9, %v5197_v50  ;;  %v12655_v9 = vld [vmem:[%s13762_s10 + $0x80] sm:$0xff]  ;;  %v12661_v50 = vld [vmem:[%s13762_s10 + $0x150] sm:$0xff]  ;;  %v14035_v4 = vld [vmem:[#allocation51_spill] sm:$0xff] }
 0xc4b   : > { %5588 = vmatmul.f32.gmra.mxu3 %v12643_v39  ;;  %5736 = vmatmul.f32.gmra.mxu1 %v12649_v14  ;;  %14034 = vst [vmem:[#allocation61_spill] sm:$0xff] %v12661_v50 }
 0xc4d   : > { %v5134_v6 = vpop.f32.mrf.mxu3 }
 0xc4e   : > { %5526 = vmatmul.f32.gmra.mxu2 %v12655_v9  ;;  %v5135_v43 = vadd.f32 %v5134_v6, %v5070_v48  ;;  %v5211_v56 = vpop.f32.mrf.mxu0  ;;  %v5276_v23 = vpop.f32.mrf.mxu1  ;;  %v12671_v48 = vld [vmem:[%s13762_s10 + $0x88] sm:$0xff] }
 0xc4f   : > { %14036 = vst [vmem:[#allocation62_spill] sm:$0xff] %v12671_v48 }
 0xc50   : > { %v5200_v58 = vadd.f32 %v5199_v28, %v5135_v43  ;;  %5674 = vmatmul.f32.gmra.mxu0 %v12661_v50 }
 0xc51   : > { %v5072_v39 = vpop.f32.mrf.mxu2 }
 0xc52   : > { %v5073_v14 = vadd.f32 %v5072_v39, %v14035_v4  ;;  %v12666_v33 = vadd.f32 %v12549_v10, %v5200_v58 }
 0xc53   : > { %5591 = vmatmul.f32.gmra.mxu3 %v12671_v48  ;;  %5739 = vmatmul.f32.gmra.mxu1 %v11940_v45  ;;  %v5303_v45 = vmax.f32 %v12580_v59, 0.0  ;;  %v5304_v59 = vmax.f32 %v12609_v15, 0.0  ;;  %v5305_v15 = vmax.f32 %v12638_v53, 0.0 }
 0xc55   : > { %v5137_v28 = vpop.f32.mrf.mxu3 }
 0xc56   : > { %5529 = vmatmul.f32.gmra.mxu2 %v12180_v24  ;;  %v5138_v6 = vadd.f32 %v5137_v28, %v5073_v14  ;;  %v12678_v4 = vpop.f32.mrf.mxu0  ;;  %v12680_v50 = vpop.f32.mrf.mxu1 }
 0xc58   : > { %v5203_v43 = vadd.f32 %v5202_v8, %v5138_v6  ;;  %5677 = vmatmul.f32.gmra.mxu0 %v11961_v27 }
 0xc59   : > { %v5075_v10 = vpop.f32.mrf.mxu2 }
 0xc5a   : > { %v5076_v39 = vadd.f32 %v5075_v10, %v12287_v21  ;;  %v5268_v58 = vadd.f32 %v5267_v16, %v5203_v43 }
 0xc5b   : > { %5594 = vmatmul.f32.gmra.mxu3 %v12193_v31  ;;  %5742 = vmatmul.f32.gmra.mxu1 %v11969_v41 }
 0xc5c   : > { %v5307_v48 = vmax.f32 %v5268_v58, 0.0 }
 0xc5d   : > { %v5140_v24 = vpop.f32.mrf.mxu3 }
 0xc5e   : > { %v12685_v14 = vmax.f32 %v5303_v45, %v5307_v48  ;;  %5532 = vmatmul.f32.gmra.mxu2 %v12202_v42  ;;  %v5141_v27 = vadd.f32 %v5140_v24, %v5076_v39  ;;  %v12689_v6 = vpop.f32.mrf.mxu0  ;;  %v12691_v43 = vpop.f32.mrf.mxu1 }
 0xc60   : > { %v5206_v8 = vadd.f32 %v5205_v40, %v5141_v27  ;;  %5680 = vmatmul.f32.gmra.mxu0 %v11988_v2 }
 0xc61   : > { %v5078_v16 = vpop.f32.mrf.mxu2 }
 0xc62   : > { %v5271_v28 = vadd.f32 %v5270_v51, %v5206_v8  ;;  %v5079_v41 = vadd.f32 %v5078_v16, %v12205_v0 }
 0xc63   : > { %5597 = vmatmul.f32.gmra.mxu3 %v12214_v12  ;;  %5745 = vmatmul.f32.gmra.mxu1 %v11997_v22 }
 0xc64   : > { %v5308_v48 = vmax.f32 %v5271_v28, 0.0 }
 0xc66   : > { %v12697_v10 = vmax.f32 %v5304_v59, %v5308_v48  ;;  %5535 = vmatmul.f32.gmra.mxu2 %v12223_v37  ;;  %v5143_v2 = vpop.f32.mrf.mxu3  ;;  %v12701_v39 = vpop.f32.mrf.mxu0 }
 0xc67   : > { %v5144_v40 = vadd.f32 %v5143_v2, %v5079_v41  ;;  %v12703_v58 = vpop.f32.mrf.mxu1 }
 0xc68   : > { %5683 = vmatmul.f32.gmra.mxu0 %v12018_v47 }
 0xc69   : > { %v5081_v24 = vpop.f32.mrf.mxu2  ;;  %v5209_v51 = vadd.f32 %v5208_v54, %v5144_v40 }
 0xc6a   : > { %v5082_v45 = vadd.f32 %v5081_v24, %v12355_v7 }
 0xc6b   : > { %v5274_v22 = vadd.f32 %v5273_v55, %v5209_v51  ;;  %5600 = vmatmul.f32.gmra.mxu3 %v12246_v60  ;;  %5748 = vmatmul.f32.gmra.mxu1 %v12028_v30  ;;  %v5306_v30 = vmax.f32 %v12666_v33, 0.0  ;;  %v14038_v51 = vld [vmem:[#allocation18_spill] sm:$0xff] }
 0xc6d   : > { %v5309_v27 = vmax.f32 %v5274_v22, 0.0 }
 0xc6e   : > { %5538 = vmatmul.f32.gmra.mxu2 %v12259_v32  ;;  %v5146_v8 = vpop.f32.mrf.mxu3  ;;  %v12713_v41 = vpop.f32.mrf.mxu0 }
 0xc6f   : > { %v12710_v47 = vmax.f32 %v5305_v15, %v5309_v27  ;;  %v5147_v54 = vadd.f32 %v5146_v8, %v5082_v45  ;;  %v12715_v55 = vpop.f32.mrf.mxu1  ;;  %v14040_v45 = vld [vmem:[#allocation20_spill] sm:$0xff] }
 0xc70   : > { %5686 = vmatmul.f32.gmra.mxu0 %v12039_v13  ;;  %v14037_v13 = vld [vmem:[#allocation47_spill] sm:$0xff]  ;;  %v14041_v15 = vld [vmem:[#allocation24_spill] sm:$0xff] }
 0xc71   : > { %v5084_v16 = vpop.f32.mrf.mxu2  ;;  %v5212_v28 = vadd.f32 %v5211_v56, %v5147_v54  ;;  %v14042_v8 = vld [vmem:[#allocation36_spill] sm:$0xff]  ;;  %v14043_v54 = vld [vmem:[#allocation37_spill] sm:$0xff] }
 0xc73   : > { %v5277_v59 = vadd.f32 %v5276_v23, %v5212_v28  ;;  %5603 = vmatmul.f32.gmra.mxu3 %v12275_v34  ;;  %5751 = vmatmul.f32.gmra.mxu1 %v12049_v1  ;;  %v14039_v23 = vld [vmem:[#allocation49_spill] sm:$0xff]  ;;  %v14048_v34 = vld [vmem:[#allocation26_spill] sm:$0xff] }
 0xc75   : > { %v5310_v53 = vmax.f32 %v5277_v59, 0.0 }
 0xc76   : > { %5541 = vmatmul.f32.gmra.mxu2 %v12284_v19  ;;  %v5149_v48 = vpop.f32.mrf.mxu3  ;;  %v5226_v40 = vpop.f32.mrf.mxu0 }
 0xc77   : > { %v12721_v2 = vmax.f32 %v5306_v30, %v5310_v53  ;;  %v5291_v24 = vpop.f32.mrf.mxu1  ;;  %v14044_v53 = vld [vmem:[#allocation33_spill] sm:$0xff] }
 0xc78   : > { %5689 = vmatmul.f32.gmra.mxu0 %v14037_v13 }
 0xc79   : > { %v5087_v56 = vpop.f32.mrf.mxu2 }
 0xc7b   : > { %5606 = vmatmul.f32.gmra.mxu3 %v14038_v51  ;;  %5754 = vmatmul.f32.gmra.mxu1 %v14039_v23  ;;  %v14046_v23 = vld [vmem:[#allocation56_spill] sm:$0xff] }
 0xc7e   : > { %5544 = vmatmul.f32.gmra.mxu2 %v14040_v45  ;;  %v5152_v1 = vpop.f32.mrf.mxu3  ;;  %v5229_v22 = vpop.f32.mrf.mxu0  ;;  %v5085_v45 = vadd.f32 %v5084_v16, %v14046_v23 }
 0xc7f   : > { %v5294_v27 = vpop.f32.mrf.mxu1 }
 0xc80   : > { %6099 = vmatmul.f32.vlgmr.msra.gmra.mxu0 %v12324_v11  ;;  %v14045_v11 = vld [vmem:[#allocation34_spill] sm:$0xff] }
 0xc81   : > { %v5090_v33 = vpop.f32.mrf.mxu2 }
 0xc83   : > { %5609 = vmatmul.f32.gmra.mxu3 %v14041_v15  ;;  %6164 = vmatmul.f32.vlgmr.msra.gmra.mxu1 %v14042_v8  ;;  %v14047_v15 = vld [vmem:[#allocation25_spill] sm:$0xff]  ;;  %v5150_v8 = vadd.f32 %v5149_v48, %v5085_v45 }
 0xc85   : > { %v5215_v16 = vadd.f32 %v12678_v4, %v5150_v8 }
 0xc86   : > { %5547 = vmatmul.f32.gmra.mxu2 %v14043_v54  ;;  %v5155_v28 = vpop.f32.mrf.mxu3  ;;  %v12732_v30 = vpop.f32.mrf.mxu0 }
 0xc87   : > { %v12735_v13 = vpop.f32.mrf.mxu1  ;;  %v5280_v48 = vadd.f32 %v12680_v50, %v5215_v16 }
 0xc88   : > { %6102 = vmatmul.f32.gmra.mxu0 %v12362_v46 }
 0xc89   : > { %v5093_v59 = vpop.f32.mrf.mxu2  ;;  %v5311_v4 = vmax.f32 %v5280_v48, 0.0 }
 0xc8b   : > { %5612 = vmatmul.f32.gmra.mxu3 %v14044_v53  ;;  %6167 = vmatmul.f32.gmra.mxu1 %v14045_v11  ;;  %v5088_v11 = vadd.f32 %v5087_v56, %v12183_v52 }
 0xc8d   : > { %v5153_v45 = vadd.f32 %v5152_v1, %v5088_v11  ;;  %v14049_v1 = vld [vmem:[#allocation27_spill] sm:$0xff] }
 0xc8e   : > { %5550 = vmatmul.f32.gmra.mxu2 %v14047_v15  ;;  %v5158_v51 = vpop.f32.mrf.mxu3  ;;  %v12741_v19 = vpop.f32.mrf.mxu0 }
 0xc8f   : > { %v12745_v53 = vpop.f32.mrf.mxu1 }
 0xc90   : > { %6105 = vmatmul.f32.gmra.mxu0 %v12401_v57 }
 0xc91   : > { %v5096_v54 = vpop.f32.mrf.mxu2 }
 0xc92   : > { %v5097_v46 = vadd.f32 %v5096_v54, %v12262_v17 }
 0xc93   : > { %5615 = vmatmul.f32.gmra.mxu3 %v12413_v49  ;;  %6170 = vmatmul.f32.gmra.mxu1 %v14048_v34 }
 0xc96   : > { %5553 = vmatmul.f32.gmra.mxu2 %v12428_v5  ;;  %v5161_v15 = vpop.f32.mrf.mxu3  ;;  %v12753_v49 = vpop.f32.mrf.mxu0 }
 0xc97   : > { %v5162_v57 = vadd.f32 %v5161_v15, %v5097_v46  ;;  %v12757_v56 = vpop.f32.mrf.mxu1  ;;  %v5091_v15 = vadd.f32 %v5090_v33, %v12318_v3 }
 0xc98   : > { %6108 = vmatmul.f32.gmra.mxu0 %v12437_v25  ;;  %v5218_v25 = vadd.f32 %v12689_v6, %v5153_v45  ;;  %v14050_v6 = vld [vmem:[#allocation30_spill] sm:$0xff]  ;;  %v14051_v45 = vld [vmem:[#allocation29_spill] sm:$0xff] }
 0xc99   : > { %v5099_v54 = vpop.f32.mrf.mxu2  ;;  %v5227_v17 = vadd.f32 %v5226_v40, %v5162_v57 }
 0xc9a   : > { %v5100_v23 = vadd.f32 %v5099_v54, %v12291_v26 }
 0xc9b   : > { %v5292_v34 = vadd.f32 %v5291_v24, %v5227_v17  ;;  %5618 = vmatmul.f32.gmra.mxu3 %v12451_v38  ;;  %6173 = vmatmul.f32.gmra.mxu1 %v12457_v29  ;;  %v5283_v17 = vadd.f32 %v12691_v43, %v5218_v25  ;;  %v5156_v24 = vadd.f32 %v5155_v28, %v5091_v15  ;;  %v14053_v43 = vld [vmem:[#allocation42_spill] sm:$0xff] }
 0xc9c   : > { %v5094_v28 = vadd.f32 %v5093_v59, %v14053_v43 }
 0xc9d   : > { %v5315_v50 = vmax.f32 %v5292_v34, 0.0 }
 0xc9e   : > { %5556 = vmatmul.f32.gmra.mxu2 %v14049_v1  ;;  %v5164_v40 = vpop.f32.mrf.mxu3  ;;  %v12766_v57 = vpop.f32.mrf.mxu0  ;;  %v5159_v25 = vadd.f32 %v5158_v51, %v5094_v28 }
 0xc9f   : > { %v5323_v8 = vmax.f32 %v5311_v4, %v5315_v50  ;;  %v5165_v46 = vadd.f32 %v5164_v40, %v5100_v23  ;;  %v12771_v54 = vpop.f32.mrf.mxu1  ;;  %v14052_v23 = vld [vmem:[#allocation32_spill] sm:$0xff] }
 0xca0   : > { %6111 = vmatmul.f32.gmra.mxu0 %v12479_v18  ;;  %v5312_v18 = vmax.f32 %v5283_v17, 0.0  ;;  %v14054_v17 = vld [vmem:[#allocation35_spill] sm:$0xff] }
 0xca1   : > { %v5327_v11 = vmax.f32 %v12685_v14, %v5323_v8  ;;  %v5102_v16 = vpop.f32.mrf.mxu2  ;;  %v5230_v29 = vadd.f32 %v5229_v22, %v5165_v46  ;;  %v5221_v14 = vadd.f32 %v12701_v39, %v5156_v24 }
 0xca2   : > { %v5103_v33 = vadd.f32 %v5102_v16, %v14050_v6 }
 0xca3   : > { %5332 = vst.msk [vmem:[#allocation6 + $0x20] sm:$0xff] %vm4876_vm3, %v5327_v11  ;;  %v5295_v48 = vadd.f32 %v5294_v27, %v5230_v29  ;;  %5621 = vmatmul.f32.gmra.mxu3 %v14051_v45  ;;  %6176 = vmatmul.f32.gmra.mxu1 %v14052_v23  ;;  %v5286_v27 = vadd.f32 %v12703_v58, %v5221_v14  ;;  %v14055_v11 = vld [vmem:[#allocation41_spill] sm:$0xff] }
 0xca4   : > { %v5224_v58 = vadd.f32 %v12713_v41, %v5159_v25 }
 0xca5   : > { %v5316_v34 = vmax.f32 %v5295_v48, 0.0 }
 0xca6   : > { %5559 = vmatmul.f32.gmra.mxu2 %v12509_v61  ;;  %v5167_v22 = vpop.f32.mrf.mxu3  ;;  %v5651_v46 = vpop.f32.mrf.mxu0 }
 0xca7   : > { %v5324_v4 = vmax.f32 %v5312_v18, %v5316_v34  ;;  %v5168_v15 = vadd.f32 %v5167_v22, %v5103_v33  ;;  %v5716_v24 = vpop.f32.mrf.mxu1 }
 0xca8   : > { %6114 = vmatmul.f32.gmra.mxu0 %v12518_v36  ;;  %v5313_v36 = vmax.f32 %v5286_v27, 0.0 }
 0xca9   : > { %v5328_v50 = vmax.f32 %v12697_v10, %v5324_v4  ;;  %v5105_v40 = vpop.f32.mrf.mxu2  ;;  %v5233_v8 = vadd.f32 %v12732_v30, %v5168_v15  ;;  %v8953_v10 = vld [vmem:[%s13762_s10] sm:$0xff]  ;;  %v14057_v4 = vld [vmem:[#allocation40_spill] sm:$0xff] }
 0xcaa   : > { %v5106_v39 = vadd.f32 %v5105_v40, %v12488_v62  ;;  %v14059_v40 = vld [vmem:[#allocation43_spill] sm:$0xff] }
 0xcab   : > { %5333 = vst.msk [vmem:[#allocation6 + $0x28] sm:$0xff] %vm4876_vm3, %v5328_v50  ;;  %v5298_v59 = vadd.f32 %v12735_v13, %v5233_v8  ;;  %5624 = vmatmul.f32.gmra.mxu3 %v14054_v17  ;;  %6179 = vmatmul.f32.gmra.mxu1 %v14055_v11  ;;  %v5289_v13 = vadd.f32 %v12715_v55, %v5224_v58  ;;  %v14056_v55 = vld [vmem:[#allocation38_spill] sm:$0xff] }
 0xcad   : > { %v5317_v51 = vmax.f32 %v5298_v59, 0.0  ;;  %v14061_v59 = vld [vmem:[#allocation44_spill] sm:$0xff] }
 0xcae   : > { %5969 = vmatmul.f32.vlgmr.msra.gmra.mxu2 %v8953_v10  ;;  %v5170_v30 = vpop.f32.mrf.mxu3  ;;  %v5654_v18 = vpop.f32.mrf.mxu0  ;;  %v14063_v10 = vld [vmem:[#allocation39_spill] sm:$0xff] }
 0xcaf   : > { %v5325_v16 = vmax.f32 %v5313_v36, %v5317_v51  ;;  %v5171_v29 = vadd.f32 %v5170_v30, %v5106_v39  ;;  %v5719_v14 = vpop.f32.mrf.mxu1  ;;  %v14060_v39 = vld [vmem:[#allocation45_spill] sm:$0xff] }
 0xcb0   : > { %6117 = vmatmul.f32.gmra.mxu0 %v12545_v35  ;;  %v5314_v35 = vmax.f32 %v5289_v13, 0.0  ;;  %v14065_v13 = vld [vmem:[#allocation50_spill] sm:$0xff] }
 0xcb1   : > { %v5329_v33 = vmax.f32 %v12710_v47, %v5325_v16  ;;  %v5236_v48 = vadd.f32 %v12741_v19, %v5171_v29  ;;  %v5515_v23 = vpop.f32.mrf.mxu2 }
 0xcb2   : > { %v5516_v41 = vadd.f32 %v5515_v23, %v12228_v63 }
 0xcb3   : > { %5334 = vst.msk [vmem:[#allocation6 + $0x30] sm:$0xff] %vm4876_vm3, %v5329_v33  ;;  %v5301_v28 = vadd.f32 %v12745_v53, %v5236_v48  ;;  %6034 = vmatmul.f32.vlgmr.msra.gmra.mxu3 %v12554_v44  ;;  %6182 = vmatmul.f32.gmra.mxu1 %v12560_v20  ;;  %v14058_v44 = vld [vmem:[#allocation52_spill] sm:$0xff]  ;;  %v14066_v33 = vld [vmem:[#allocation57_spill] sm:$0xff] }
 0xcb5   : > { %v5318_v34 = vmax.f32 %v5301_v28, 0.0 }
 0xcb6   : > { %5972 = vmatmul.f32.gmra.mxu2 %v14056_v55  ;;  %v5580_v47 = vpop.f32.mrf.mxu3  ;;  %v5657_v53 = vpop.f32.mrf.mxu0 }
 0xcb7   : > { %v5326_v22 = vmax.f32 %v5314_v35, %v5318_v34  ;;  %v5581_v19 = vadd.f32 %v5580_v47, %v5516_v41  ;;  %v5722_v8 = vpop.f32.mrf.mxu1  ;;  %v14067_v41 = vld [vmem:[#allocation58_spill] sm:$0xff] }
 0xcb8   : > { %6120 = vmatmul.f32.gmra.mxu0 %v14057_v4  ;;  %v14068_v34 = vld [vmem:[#allocation54_spill] sm:$0xff] }
 0xcb9   : > { %v5330_v15 = vmax.f32 %v12721_v2, %v5326_v22  ;;  %v5518_v27 = vpop.f32.mrf.mxu2  ;;  %v5646_v25 = vadd.f32 %v12753_v49, %v5581_v19  ;;  %v14062_v2 = vld [vmem:[#allocation46_spill] sm:$0xff]  ;;  %v14070_v19 = vld [vmem:[#allocation60_spill] sm:$0xff] }
 0xcba   : > { %v5519_v50 = vadd.f32 %v5518_v27, %v14058_v44  ;;  %v14071_v27 = vld [vmem:[#allocation61_spill] sm:$0xff] }
 0xcbb   : > { %5335 = vst.msk [vmem:[#allocation6 + $0x38] sm:$0xff] %vm4876_vm3, %v5330_v15  ;;  %v5711_v20 = vadd.f32 %v12757_v56, %v5646_v25  ;;  %6037 = vmatmul.f32.gmra.mxu3 %v14059_v40  ;;  %6185 = vmatmul.f32.gmra.mxu1 %v14060_v39  ;;  %v14064_v56 = vld [vmem:[#allocation48_spill] sm:$0xff] }
 0xcbe   : > { %5975 = vmatmul.f32.gmra.mxu2 %v14061_v59  ;;  %v5583_v11 = vpop.f32.mrf.mxu3  ;;  %v5660_v51 = vpop.f32.mrf.mxu0 }
 0xcbf   : > { %v5584_v36 = vadd.f32 %v5583_v11, %v5519_v50  ;;  %v5725_v29 = vpop.f32.mrf.mxu1 }
 0xcc0   : > { %6123 = vmatmul.f32.gmra.mxu0 %v14062_v2 }
 0xcc1   : > { %v5521_v58 = vpop.f32.mrf.mxu2  ;;  %v5649_v49 = vadd.f32 %v12766_v57, %v5584_v36  ;;  %v8954_v36 = vld [vmem:[%s13762_s10 + $0x158] sm:$0xff] }
 0xcc2   : > { %v5522_v30 = vadd.f32 %v5521_v58, %v14063_v10 }
 0xcc3   : > { %v12813_v16 = vadd.f32 %v12771_v54, %v5649_v49  ;;  %6040 = vmatmul.f32.gmra.mxu3 %v14064_v56  ;;  %6188 = vmatmul.f32.gmra.mxu1 %v14065_v13  ;;  %v14069_v54 = vld [vmem:[#allocation59_spill] sm:$0xff] }
 0xcc6   : > { %5978 = vmatmul.f32.gmra.mxu2 %v14066_v33  ;;  %v5586_v48 = vpop.f32.mrf.mxu3  ;;  %v5663_v57 = vpop.f32.mrf.mxu0 }
 0xcc7   : > { %v5587_v23 = vadd.f32 %v5586_v48, %v5522_v30  ;;  %v5728_v22 = vpop.f32.mrf.mxu1  ;;  %v8956_v48 = vld [vmem:[%s13762_s10 + $0x178] sm:$0xff] }
 0xcc8   : > { %6126 = vmatmul.f32.gmra.mxu0 %v14067_v41 }
 0xcc9   : > { %v5524_v28 = vpop.f32.mrf.mxu2  ;;  %v5652_v35 = vadd.f32 %v5651_v46, %v5587_v23  ;;  %v14072_v46 = vld [vmem:[#allocation51_spill] sm:$0xff]  ;;  %v5758_v23 = vmax.f32 %v5711_v20, 0.0 }
 0xcca   : > { %v5525_v55 = vadd.f32 %v5524_v28, %v14068_v34 }
 0xccb   : > { %v12820_v47 = vadd.f32 %v5716_v24, %v5652_v35  ;;  %6043 = vmatmul.f32.gmra.mxu3 %v14069_v54  ;;  %6191 = vmatmul.f32.gmra.mxu1 %v14070_v19  ;;  %v14073_v24 = vld [vmem:[#allocation62_spill] sm:$0xff] }
 0xcce   : > { %5981 = vmatmul.f32.gmra.mxu2 %v12655_v9  ;;  %v5589_v4 = vpop.f32.mrf.mxu3  ;;  %v12826_v40 = vpop.f32.mrf.mxu0  ;;  %v14074_v9 = vld [vmem:[#allocation53_spill] sm:$0xff] }
 0xccf   : > { %v5590_v15 = vadd.f32 %v5589_v4, %v5525_v55  ;;  %v5731_v11 = vpop.f32.mrf.mxu1 }
 0xcd0   : > { %6129 = vmatmul.f32.gmra.mxu0 %v14071_v27 }
 0xcd1   : > { %v5527_v25 = vpop.f32.mrf.mxu2  ;;  %v5655_v50 = vadd.f32 %v5654_v18, %v5590_v15  ;;  %v8955_v18 = vld [vmem:[%s13762_s10 + $0x170] sm:$0xff]  ;;  %v5759_v15 = vmax.f32 %v12813_v16, 0.0 }
 0xcd2   : > { %v5528_v39 = vadd.f32 %v5527_v25, %v14072_v46 }
 0xcd3   : > { %v12829_v59 = vadd.f32 %v5719_v14, %v5655_v50  ;;  %6046 = vmatmul.f32.gmra.mxu3 %v14073_v24  ;;  %6194 = vmatmul.f32.gmra.mxu1 %v8954_v36 }
 0xcd6   : > { %5984 = vmatmul.f32.gmra.mxu2 %v14074_v9  ;;  %v5592_v2 = vpop.f32.mrf.mxu3  ;;  %v12839_v30 = vpop.f32.mrf.mxu0 }
 0xcd7   : > { %v5593_v58 = vadd.f32 %v5592_v2, %v5528_v39  ;;  %v12843_v33 = vpop.f32.mrf.mxu1  ;;  %v5760_v2 = vmax.f32 %v12820_v47, 0.0 }
 0xcd8   : > { %6132 = vmatmul.f32.gmra.mxu0 %v8955_v18 }
 0xcd9   : > { %v5530_v49 = vpop.f32.mrf.mxu2  ;;  %v5658_v14 = vadd.f32 %v5657_v53, %v5593_v58 }
 0xcda   : > { %v5531_v56 = vadd.f32 %v5530_v49, %v12287_v21 }
 0xcdb   : > { %v5723_v13 = vadd.f32 %v5722_v8, %v5658_v14  ;;  %6049 = vmatmul.f32.gmra.mxu3 %v12193_v31  ;;  %6197 = vmatmul.f32.gmra.mxu1 %v8956_v48  ;;  %v8957_v8 = vld [vmem:[%s13762_s10 + $0x190] sm:$0xff]  ;;  %v14075_v48 = vld [vmem:[#allocation21_spill] sm:$0xff] }
 0xcdd   : > { %v5762_v41 = vmax.f32 %v5723_v13, 0.0 }
 0xcde   : > { %5987 = vmatmul.f32.gmra.mxu2 %v12202_v42  ;;  %v5595_v28 = vpop.f32.mrf.mxu3  ;;  %v12854_v54 = vpop.f32.mrf.mxu0  ;;  %v8958_v42 = vld [vmem:[%s13762_s10 + $0x198] sm:$0xff] }
 0xcdf   : > { %v12849_v53 = vmax.f32 %v5758_v23, %v5762_v41  ;;  %v5596_v35 = vadd.f32 %v5595_v28, %v5531_v56  ;;  %v12858_v20 = vpop.f32.mrf.mxu1  ;;  %v5761_v23 = vmax.f32 %v12829_v59, 0.0  ;;  %v14076_v28 = vld [vmem:[#allocation22_spill] sm:$0xff]  ;;  %v8964_v59 = vld [vmem:[%s13762_s10 + $0x1f8] sm:$0xff] }
 0xce0   : > { %6135 = vmatmul.f32.gmra.mxu0 %v8957_v8 }
 0xce1   : > { %v5533_v31 = vpop.f32.mrf.mxu2  ;;  %v5661_v55 = vadd.f32 %v5660_v51, %v5596_v35 }
 0xce2   : > { %v5534_v19 = vadd.f32 %v5533_v31, %v12205_v0 }
 0xce3   : > { %v5726_v4 = vadd.f32 %v5725_v29, %v5661_v55  ;;  %6052 = vmatmul.f32.gmra.mxu3 %v12214_v12  ;;  %6200 = vmatmul.f32.gmra.mxu1 %v8958_v42  ;;  %v8959_v12 = vld [vmem:[%s13762_s10 + $0x1b0] sm:$0xff]  ;;  %v14077_v55 = vld [vmem:[#allocation18_spill] sm:$0xff] }
 0xce5   : > { %v5763_v27 = vmax.f32 %v5726_v4, 0.0  ;;  %v14078_v4 = vld [vmem:[#allocation20_spill] sm:$0xff] }
 0xce6   : > { %5990 = vmatmul.f32.gmra.mxu2 %v12223_v37  ;;  %v5598_v51 = vpop.f32.mrf.mxu3  ;;  %v12870_v24 = vpop.f32.mrf.mxu0  ;;  %v8960_v37 = vld [vmem:[%s13762_s10 + $0x1b8] sm:$0xff] }
 0xce7   : > { %v12865_v25 = vmax.f32 %v5759_v15, %v5763_v27  ;;  %v5599_v50 = vadd.f32 %v5598_v51, %v5534_v19  ;;  %v12874_v16 = vpop.f32.mrf.mxu1  ;;  %v14079_v51 = vld [vmem:[#allocation24_spill] sm:$0xff] }
 0xce8   : > { %6138 = vmatmul.f32.gmra.mxu0 %v8959_v12  ;;  %v14080_v12 = vld [vmem:[#allocation37_spill] sm:$0xff] }
 0xce9   : > { %v5536_v29 = vpop.f32.mrf.mxu2  ;;  %v5664_v39 = vadd.f32 %v5663_v57, %v5599_v50 }
 0xcea   : > { %v5537_v36 = vadd.f32 %v5536_v29, %v12355_v7 }
 0xceb   : > { %v5729_v9 = vadd.f32 %v5728_v22, %v5664_v39  ;;  %6055 = vmatmul.f32.gmra.mxu3 %v12246_v60  ;;  %6203 = vmatmul.f32.gmra.mxu1 %v8960_v37  ;;  %v8961_v60 = vld [vmem:[%s13762_s10 + $0x1d0] sm:$0xff] }
 0xced   : > { %v5764_v58 = vmax.f32 %v5729_v9, 0.0  ;;  %v14081_v9 = vld [vmem:[#allocation33_spill] sm:$0xff] }
 0xcee   : > { %5993 = vmatmul.f32.gmra.mxu2 %v12259_v32  ;;  %v5601_v57 = vpop.f32.mrf.mxu3  ;;  %v12887_v56 = vpop.f32.mrf.mxu0  ;;  %v8962_v32 = vld [vmem:[%s13762_s10 + $0x1d8] sm:$0xff] }
 0xcef   : > { %v12881_v18 = vmax.f32 %v5760_v2, %v5764_v58  ;;  %v5602_v49 = vadd.f32 %v5601_v57, %v5537_v36  ;;  %v12890_v47 = vpop.f32.mrf.mxu1  ;;  %v14082_v2 = vld [vmem:[#allocation56_spill] sm:$0xff]  ;;  %v14083_v57 = vld [vmem:[#allocation25_spill] sm:$0xff] }
 0xcf0   : > { %6141 = vmatmul.f32.gmra.mxu0 %v8961_v60  ;;  %v14084_v60 = vld [vmem:[#allocation23_spill] sm:$0xff] }
 0xcf1   : > { %v5539_v22 = vpop.f32.mrf.mxu2  ;;  %v5667_v14 = vadd.f32 %v12826_v40, %v5602_v49  ;;  %v8963_v40 = vld [vmem:[%s13762_s10 + $0x1f0] sm:$0xff]  ;;  %8023 = vmatpush.msk.msrb.mxu3 %vm6310_vm5, %v14084_v60 }
 0xcf2   : > { %v5540_v58 = vadd.f32 %v5539_v22, %v14082_v2 }
 0xcf3   : > { %v5732_v13 = vadd.f32 %v5731_v11, %v5667_v14  ;;  %6058 = vmatmul.f32.gmra.mxu3 %v14075_v48  ;;  %6206 = vmatmul.f32.gmra.mxu1 %v8962_v32  ;;  %v14085_v14 = vld [vmem:[#allocation19_spill] sm:$0xff] }
 0xcf4   : > { %8006 = vmatpush.msk.msrb.mxu2 %vm6310_vm5, %v14085_v14 }
 0xcf5   : > { %v5765_v41 = vmax.f32 %v5732_v13, 0.0 }
 0xcf6   : > { %5996 = vmatmul.f32.gmra.mxu2 %v14076_v28  ;;  %v5604_v35 = vpop.f32.mrf.mxu3  ;;  %v5681_v31 = vpop.f32.mrf.mxu0  ;;  %v14087_v28 = vld [vmem:[#allocation31_spill] sm:$0xff] }
 0xcf7   : > { %v12897_v8 = vmax.f32 %v5761_v23, %v5765_v41  ;;  %v5746_v19 = vpop.f32.mrf.mxu1  ;;  %v5605_v13 = vadd.f32 %v5604_v35, %v5540_v58  ;;  %v14086_v23 = vld [vmem:[#allocation55_spill] sm:$0xff] }
 0xcf8   : > { %6144 = vmatmul.f32.gmra.mxu0 %v8963_v40 }
 0xcf9   : > { %v5542_v11 = vpop.f32.mrf.mxu2 }
 0xcfa   : > { %v5543_v22 = vadd.f32 %v5542_v11, %v12183_v52 }
 0xcfb   : > { %6061 = vmatmul.f32.gmra.mxu3 %v14077_v55  ;;  %6209 = vmatmul.f32.gmra.mxu1 %v8964_v59  ;;  %v5670_v55 = vadd.f32 %v12839_v30, %v5605_v13 }
 0xcfe   : > { %5999 = vmatmul.f32.gmra.mxu2 %v14078_v4  ;;  %v5607_v42 = vpop.f32.mrf.mxu3  ;;  %v5684_v27 = vpop.f32.mrf.mxu0 }
 0xcff   : > { %v5749_v50 = vpop.f32.mrf.mxu1  ;;  %v5608_v35 = vadd.f32 %v5607_v42, %v5543_v22 }
 0xd01   : > { %v5545_v15 = vpop.f32.mrf.mxu2 }
 0xd02   : > { %v5546_v30 = vadd.f32 %v5545_v15, %v12318_v3 }
 0xd03   : > { %6064 = vmatmul.f32.gmra.mxu3 %v14079_v51  ;;  %v5735_v51 = vadd.f32 %v12843_v33, %v5670_v55 }
 0xd05   : > { %v5766_v11 = vmax.f32 %v5735_v51, 0.0 }
 0xd06   : > { %6002 = vmatmul.f32.gmra.mxu2 %v14080_v12  ;;  %v5610_v29 = vpop.f32.mrf.mxu3  ;;  %v5687_v36 = vpop.f32.mrf.mxu0 }
 0xd07   : > { %v5752_v37 = vpop.f32.mrf.mxu1 }
 0xd09   : > { %v5548_v39 = vpop.f32.mrf.mxu2 }
 0xd0b   : > { %6067 = vmatmul.f32.gmra.mxu3 %v14081_v9 }
 0xd0e   : > { %6005 = vmatmul.f32.gmra.mxu2 %v14083_v57  ;;  %v5613_v49 = vpop.f32.mrf.mxu3  ;;  %v12914_v32 = vpop.f32.mrf.mxu0 }
 0xd0f   : > { %v12918_v40 = vpop.f32.mrf.mxu1 }
 0xd11   : > { %v5551_v48 = vpop.f32.mrf.mxu2 }
 0xd12   : > { %v5552_v41 = vadd.f32 %v5551_v48, %v14086_v23 }
 0xd13   : > { %6070 = vmatmul.f32.gmra.mxu3 %v14087_v28 }
 0xd16   : > { %6008 = vmatmul.f32.gmra.mxu2 %v12428_v5  ;;  %v5616_v59 = vpop.f32.mrf.mxu3  ;;  %v12924_v58 = vpop.f32.mrf.mxu0  ;;  %v5673_v5 = vadd.f32 %v12854_v54, %v5608_v35 }
 0xd17   : > { %v5617_v4 = vadd.f32 %v5616_v59, %v5552_v41  ;;  %v12928_v14 = vpop.f32.mrf.mxu1  ;;  %v5611_v41 = vadd.f32 %v5610_v29, %v5546_v30  ;;  %v5549_v59 = vadd.f32 %v5548_v39, %v14053_v43 }
 0xd18   : > { %v5738_v48 = vadd.f32 %v12858_v20, %v5673_v5 }
 0xd19   : > { %v5554_v12 = vpop.f32.mrf.mxu2  ;;  %v5682_v9 = vadd.f32 %v5681_v31, %v5617_v4  ;;  %v5676_v20 = vadd.f32 %v12870_v24, %v5611_v41  ;;  %v5614_v35 = vadd.f32 %v5613_v49, %v5549_v59 }
 0xd1a   : > { %v5555_v57 = vadd.f32 %v5554_v12, %v12291_v26  ;;  %v5767_v55 = vmax.f32 %v5738_v48, 0.0 }
 0xd1b   : > { %v5747_v60 = vadd.f32 %v5746_v19, %v5682_v9  ;;  %6073 = vmatmul.f32.gmra.mxu3 %v12451_v38  ;;  %v5741_v51 = vadd.f32 %v12874_v16, %v5676_v20  ;;  %v6249_v20 = vld [vmem:[#allocation6 + $0x18] sm:$0xff] }
 0xd1d   : > { %v5770_v13 = vmax.f32 %v5747_v60, 0.0  ;;  %v5768_v24 = vmax.f32 %v5741_v51, 0.0 }
 0xd1e   : > { %6011 = vmatmul.f32.gmra.mxu2 %v14049_v1  ;;  %v5619_v33 = vpop.f32.mrf.mxu3  ;;  %v12935_v22 = vpop.f32.mrf.mxu0 }
 0xd1f   : > { %v5778_v42 = vmax.f32 %v5766_v11, %v5770_v13  ;;  %v5620_v31 = vadd.f32 %v5619_v33, %v5555_v57  ;;  %v12940_v1 = vpop.f32.mrf.mxu1  ;;  %v6246_v11 = vld [vmem:[#allocation6] sm:$0xff] }
 0xd21   : > { %v5782_v19 = vmax.f32 %v12849_v53, %v5778_v42  ;;  %v5557_v28 = vpop.f32.mrf.mxu2  ;;  %v5685_v38 = vadd.f32 %v5684_v27, %v5620_v31  ;;  %v6247_v31 = vld [vmem:[#allocation6 + $0x8] sm:$0xff] }
 0xd22   : > { %v5558_v15 = vadd.f32 %v5557_v28, %v14050_v6  ;;  %v6248_v28 = vld [vmem:[#allocation6 + $0x10] sm:$0xff] }
 0xd23   : > { %5787 = vst.msk [vmem:[#allocation6 + $0x40] sm:$0xff] %vm4876_vm3, %v5782_v19  ;;  %v5750_v54 = vadd.f32 %v5749_v50, %v5685_v38  ;;  %6076 = vmatmul.f32.gmra.mxu3 %v14051_v45 }
 0xd25   : > { %v5771_v29 = vmax.f32 %v5750_v54, 0.0 }
 0xd26   : > { %6014 = vmatmul.f32.gmra.mxu2 %v12509_v61  ;;  %v5622_v53 = vpop.f32.mrf.mxu3  ;;  %v12949_v39 = vpop.f32.mrf.mxu0  ;;  %v5679_v61 = vadd.f32 %v12887_v56, %v5614_v35  ;;  %v6250_v35 = vld [vmem:[#allocation6 + $0x20] sm:$0xff] }
 0xd27   : > { %v5779_v27 = vmax.f32 %v5767_v55, %v5771_v29  ;;  %v5623_v4 = vadd.f32 %v5622_v53, %v5558_v15 }
 0xd29   : > { %v5783_v50 = vmax.f32 %v12865_v25, %v5779_v27  ;;  %v5560_v12 = vpop.f32.mrf.mxu2  ;;  %v5688_v45 = vadd.f32 %v5687_v36, %v5623_v4  ;;  %v12954_v25 = vpop.f32.mrf.mxu1 }
 0xd2a   : > { %v5561_v57 = vadd.f32 %v5560_v12, %v12488_v62 }
 0xd2b   : > { %5788 = vst.msk [vmem:[#allocation6 + $0x48] sm:$0xff] %vm4876_vm3, %v5783_v50  ;;  %v5753_v9 = vadd.f32 %v5752_v37, %v5688_v45  ;;  %6079 = vmatmul.f32.gmra.mxu3 %v14054_v17  ;;  %v5744_v37 = vadd.f32 %v12890_v47, %v5679_v61 }
 0xd2d   : > { %v5772_v60 = vmax.f32 %v5753_v9, 0.0  ;;  %v5769_v13 = vmax.f32 %v5744_v37, 0.0  ;;  %v6251_v9 = vld [vmem:[#allocation6 + $0x28] sm:$0xff] }
 0xd2e   : > { %8007 = vmatmul.msk.f32.vlgmr.msrb.gmra.mxu2 %vm4876_vm3, %v6246_v11  ;;  %v5625_v16 = vpop.f32.mrf.mxu3  ;;  %v12964_v47 = vpop.f32.mrf.mxu0 }
 0xd2f   : > { %v5780_v36 = vmax.f32 %v5768_v24, %v5772_v60  ;;  %v5626_v49 = vadd.f32 %v5625_v16, %v5561_v57 }
 0xd31   : > { %v5784_v17 = vmax.f32 %v12881_v18, %v5780_v36  ;;  %v5691_v30 = vadd.f32 %v12914_v32, %v5626_v49  ;;  %v5970_v5 = vpop.f32.mrf.mxu2  ;;  %v12968_v32 = vpop.f32.mrf.mxu1  ;;  %v6253_v49 = vld [vmem:[#allocation6 + $0x38] sm:$0xff] }
 0xd32   : > { %v5971_v33 = vadd.f32 %v5970_v5, %v12228_v63  ;;  %14088 = vst [vmem:[#allocation47_spill] sm:$0xff] %v12968_v32 }
 0xd33   : > { %5789 = vst.msk [vmem:[#allocation6 + $0x50] sm:$0xff] %vm4876_vm3, %v5784_v17  ;;  %v5756_v56 = vadd.f32 %v12918_v40, %v5691_v30  ;;  %8024 = vmatmul.msk.f32.vlgmr.msrb.gmra.mxu3 %vm4876_vm3, %v6246_v11 }
 0xd35   : > { %v5773_v42 = vmax.f32 %v5756_v56, 0.0  ;;  %v6254_v56 = vld [vmem:[#allocation6 + $0x40] sm:$0xff] }
 0xd36   : > { %8008 = vmatmul.msk.f32.gmra.mxu2 %vm4876_vm3, %v6247_v31  ;;  %v6035_v48 = vpop.f32.mrf.mxu3  ;;  %v12977_v54 = vpop.f32.mrf.mxu0 }
 0xd37   : > { %v5781_v18 = vmax.f32 %v5769_v13, %v5773_v42  ;;  %v12966_v41 = vadd.f32 %v6035_v48, %v5971_v33  ;;  %v6255_v48 = vld [vmem:[#allocation6 + $0x48] sm:$0xff] }
 0xd39   : > { %v5785_v19 = vmax.f32 %v12897_v8, %v5781_v18  ;;  %v5973_v40 = vpop.f32.mrf.mxu2  ;;  %v12979_v59 = vpop.f32.mrf.mxu1 }
 0xd3a   : > { %v5974_v63 = vadd.f32 %v5973_v40, %v14058_v44 }
 0xd3b   : > { %5790 = vst.msk [vmem:[#allocation6 + $0x58] sm:$0xff] %vm4876_vm3, %v5785_v19  ;;  %8025 = vmatmul.msk.f32.gmra.mxu3 %vm4876_vm3, %v6247_v31 }
 0xd3e   : > { %8009 = vmatmul.msk.f32.gmra.mxu2 %vm4876_vm3, %v6248_v28  ;;  %v6038_v38 = vpop.f32.mrf.mxu3  ;;  %v12986_v27 = vpop.f32.mrf.mxu0 }
 0xd3f   : > { %v12975_v15 = vadd.f32 %v6038_v38, %v5974_v63  ;;  %v6256_v63 = vld [vmem:[#allocation6 + $0x50] sm:$0xff] }
 0xd41   : > { %v5976_v55 = vpop.f32.mrf.mxu2  ;;  %v12989_v4 = vpop.f32.mrf.mxu1 }
 0xd42   : > { %v5977_v8 = vadd.f32 %v5976_v55, %v14063_v10 }
 0xd43   : > { %8026 = vmatmul.msk.f32.gmra.mxu3 %vm4876_vm3, %v6248_v28 }
 0xd46   : > { %8010 = vmatmul.msk.f32.gmra.mxu2 %vm4876_vm3, %v6249_v20  ;;  %v6041_v29 = vpop.f32.mrf.mxu3  ;;  %v12996_v45 = vpop.f32.mrf.mxu0 }
 0xd47   : > { %v12984_v44 = vadd.f32 %v6041_v29, %v5977_v8  ;;  %v6257_v8 = vld [vmem:[#allocation6 + $0x58] sm:$0xff] }
 0xd49   : > { %v5979_v53 = vpop.f32.mrf.mxu2  ;;  %v12999_v61 = vpop.f32.mrf.mxu1 }
 0xd4a   : > { %v5980_v51 = vadd.f32 %v5979_v53, %v14068_v34  ;;  %v6252_v34 = vld [vmem:[#allocation6 + $0x30] sm:$0xff] }
 0xd4b   : > { %8027 = vmatmul.msk.f32.gmra.mxu3 %vm4876_vm3, %v6249_v20 }
 0xd4e   : > { %8011 = vmatmul.msk.f32.gmra.mxu2 %vm4876_vm3, %v6250_v35  ;;  %v6044_v50 = vpop.f32.mrf.mxu3  ;;  %v13003_v11 = vpop.f32.mrf.mxu0 }
 0xd4f   : > { %v12993_v10 = vadd.f32 %v6044_v50, %v5980_v51 }
 0xd51   : > { %v5982_v12 = vpop.f32.mrf.mxu2  ;;  %v13005_v16 = vpop.f32.mrf.mxu1 }
 0xd52   : > { %14089 = vst [vmem:[#allocation49_spill] sm:$0xff] %v13005_v16 }
 0xd53   : > { %8028 = vmatmul.msk.f32.gmra.mxu3 %vm4876_vm3, %v6250_v35  ;;  %v5983_v35 = vadd.f32 %v5982_v12, %v14072_v46 }
 0xd56   : > { %8012 = vmatmul.msk.f32.gmra.mxu2 %vm4876_vm3, %v6251_v9  ;;  %v6047_v24 = vpop.f32.mrf.mxu3  ;;  %v6124_v17 = vpop.f32.mrf.mxu0 }
 0xd59   : > { %v5985_v57 = vpop.f32.mrf.mxu2  ;;  %v6189_v5 = vpop.f32.mrf.mxu1 }
 0xd5a   : > { %v5986_v16 = vadd.f32 %v5985_v57, %v12287_v21 }
 0xd5b   : > { %8029 = vmatmul.msk.f32.gmra.mxu3 %vm4876_vm3, %v6251_v9  ;;  %v6048_v9 = vadd.f32 %v6047_v24, %v5983_v35 }
 0xd5d   : > { %v6113_v32 = vadd.f32 %v12977_v54, %v6048_v9 }
 0xd5e   : > { %8013 = vmatmul.msk.f32.gmra.mxu2 %vm4876_vm3, %v6252_v34  ;;  %v6050_v60 = vpop.f32.mrf.mxu3  ;;  %v6127_v42 = vpop.f32.mrf.mxu0 }
 0xd5f   : > { %v6051_v46 = vadd.f32 %v6050_v60, %v5986_v16  ;;  %v6178_v24 = vadd.f32 %v12979_v59, %v6113_v32 }
 0xd61   : > { %v13007_v36 = vpop.f32.mrf.mxu2  ;;  %v13020_v31 = vpop.f32.mrf.mxu1  ;;  %v6217_v21 = vmax.f32 %v6178_v24, 0.0 }
 0xd62   : > { %v5989_v32 = vadd.f32 %v13007_v36, %v12205_v0 }
 0xd63   : > { %8030 = vmatmul.msk.f32.gmra.mxu3 %vm4876_vm3, %v6252_v34 }
 0xd66   : > { %8014 = vmatmul.msk.f32.gmra.mxu2 %vm4876_vm3, %v6253_v49  ;;  %v13011_v37 = vpop.f32.mrf.mxu3  ;;  %v13024_v40 = vpop.f32.mrf.mxu0 }
 0xd69   : > { %v13013_v30 = vpop.f32.mrf.mxu2  ;;  %v13027_v38 = vpop.f32.mrf.mxu1 }
 0xd6b   : > { %8031 = vmatmul.msk.f32.gmra.mxu3 %vm4876_vm3, %v6253_v49 }
 0xd6e   : > { %8015 = vmatmul.msk.f32.gmra.mxu2 %vm4876_vm3, %v6254_v56  ;;  %v13017_v13 = vpop.f32.mrf.mxu3  ;;  %v13031_v29 = vpop.f32.mrf.mxu0 }
 0xd71   : > { %v5994_v33 = vpop.f32.mrf.mxu2  ;;  %v13033_v53 = vpop.f32.mrf.mxu1 }
 0xd72   : > { %14090 = vst [vmem:[#allocation36_spill] sm:$0xff] %v13033_v53  ;;  %v5995_v34 = vadd.f32 %v5994_v33, %v14082_v2  ;;  %v6101_v53 = vadd.f32 %v12924_v58, %v12966_v41  ;;  %v6116_v58 = vadd.f32 %v12986_v27, %v6051_v46  ;;  %v6054_v27 = vadd.f32 %v13011_v37, %v5989_v32 }
 0xd73   : > { %8032 = vmatmul.msk.f32.gmra.mxu3 %vm4876_vm3, %v6254_v56 }
 0xd74   : > { %v6181_v16 = vadd.f32 %v12989_v4, %v6116_v58 }
 0xd76   : > { %8016 = vmatmul.msk.f32.gmra.mxu2 %vm4876_vm3, %v6255_v48  ;;  %v6059_v18 = vpop.f32.mrf.mxu3  ;;  %v6136_v49 = vpop.f32.mrf.mxu0 }
 0xd77   : > { %v6060_v56 = vadd.f32 %v6059_v18, %v5995_v34  ;;  %v6166_v18 = vadd.f32 %v12928_v14, %v6101_v53 }
 0xd79   : > { %v5997_v19 = vpop.f32.mrf.mxu2  ;;  %v6125_v62 = vadd.f32 %v6124_v17, %v6060_v56  ;;  %v6213_v17 = vmax.f32 %v6166_v18, 0.0 }
 0xd7a   : > { %v5998_v2 = vadd.f32 %v5997_v19, %v12183_v52 }
 0xd7b   : > { %8033 = vmatmul.msk.f32.gmra.mxu3 %vm4876_vm3, %v6255_v48  ;;  %v6190_v35 = vadd.f32 %v6189_v5, %v6125_v62  ;;  %v6229_v19 = vmax.f32 %v6213_v17, %v6217_v21 }
 0xd7d   : > { %v6221_v59 = vmax.f32 %v6190_v35, 0.0 }
 0xd7e   : > { %8017 = vmatmul.msk.f32.gmra.mxu2 %vm4876_vm3, %v6256_v63  ;;  %v6062_v28 = vpop.f32.mrf.mxu3  ;;  %v6139_v41 = vpop.f32.mrf.mxu0 }
 0xd7f   : > { %v6063_v34 = vadd.f32 %v6062_v28, %v5998_v2 }
 0xd81   : > { %v6000_v55 = vpop.f32.mrf.mxu2  ;;  %v6128_v60 = vadd.f32 %v6127_v42, %v6063_v34 }
 0xd82   : > { %v6001_v28 = vadd.f32 %v6000_v55, %v12318_v3  ;;  %v6107_v3 = vadd.f32 %v12949_v39, %v12984_v44  ;;  %v5992_v55 = vadd.f32 %v13013_v30, %v12355_v7 }
 0xd83   : > { %8034 = vmatmul.msk.f32.gmra.mxu3 %vm4876_vm3, %v6256_v63  ;;  %v6201_v63 = vpop.f32.mrf.mxu1  ;;  %v6193_v0 = vadd.f32 %v13020_v31, %v6128_v60 }
 0xd84   : > { %v6057_v2 = vadd.f32 %v13017_v13, %v5992_v55  ;;  %v6172_v7 = vadd.f32 %v12954_v25, %v6107_v3  ;;  %v6110_v25 = vadd.f32 %v12964_v47, %v12993_v10 }
 0xd86   : > { %8018 = vmatmul.msk.f32.gmra.mxu2 %vm4876_vm3, %v6257_v8  ;;  %v6065_v20 = vpop.f32.mrf.mxu3 }
 0xd89   : > { %v13035_v51 = vpop.f32.mrf.mxu2 }
 0xd8a   : > { %v6004_v39 = vadd.f32 %v13035_v51, %v14053_v43  ;;  %v6215_v43 = vmax.f32 %v6172_v7, 0.0 }
 0xd8b   : > { %8035 = vmatmul.msk.f32.gmra.mxu3 %vm4876_vm3, %v6257_v8  ;;  %v6204_v52 = vpop.f32.mrf.mxu1 }
 0xd8e   : > { %v13039_v50 = vpop.f32.mrf.mxu3 }
 0xd91   : > { %v6006_v48 = vpop.f32.mrf.mxu2 }
 0xd92   : > { %v6007_v8 = vadd.f32 %v6006_v48, %v14086_v23  ;;  %v6104_v23 = vadd.f32 %v12935_v22, %v12975_v15  ;;  %v6066_v15 = vadd.f32 %v6065_v20, %v6001_v28  ;;  %v6119_v48 = vadd.f32 %v12996_v45, %v6054_v27 }
 0xd93   : > { %v6207_v24 = vpop.f32.mrf.mxu1 }
 0xd94   : > { %v6169_v22 = vadd.f32 %v12940_v1, %v6104_v23  ;;  %v6142_v1 = vpop.f32.mrf.mxu0  ;;  %v6131_v31 = vadd.f32 %v13024_v40, %v6066_v15  ;;  %v6184_v45 = vadd.f32 %v12999_v61, %v6119_v48  ;;  %v6069_v40 = vadd.f32 %v13039_v50, %v6004_v39  ;;  %v14091_v50 = vld [vmem:[#allocation28_spill] sm:$0xff] }
 0xd96   : > { %v6071_v12 = vpop.f32.mrf.mxu3  ;;  %v6214_v37 = vmax.f32 %v6169_v22, 0.0  ;;  %v6196_v30 = vadd.f32 %v13027_v38, %v6131_v31  ;;  %v6219_v34 = vmax.f32 %v6184_v45, 0.0  ;;  %v6134_v51 = vadd.f32 %v13031_v29, %v6069_v40 }
 0xd97   : > { %v6072_v33 = vadd.f32 %v6071_v12, %v6007_v8 }
 0xd98   : > { %v6223_v38 = vmax.f32 %v6196_v30, 0.0 }
 0xd99   : > { %v6009_v54 = vpop.f32.mrf.mxu2  ;;  %v6137_v9 = vadd.f32 %v6136_v49, %v6072_v33 }
 0xd9a   : > { %v6010_v62 = vadd.f32 %v6009_v54, %v12291_v26  ;;  %v6218_v26 = vmax.f32 %v6181_v16, 0.0  ;;  %v6122_v54 = vadd.f32 %v13003_v11, %v6057_v2 }
 0xd9b   : > { %v6202_v57 = vadd.f32 %v6201_v63, %v6137_v9  ;;  %v6222_v63 = vmax.f32 %v6193_v0, 0.0 }
 0xd9c   : > { %v6230_v46 = vmax.f32 %v6214_v37, %v6218_v26  ;;  %v6145_v11 = vpop.f32.mrf.mxu0 }
 0xd9d   : > { %v6225_v14 = vmax.f32 %v6202_v57, 0.0  ;;  %v14092_v57 = vld [vmem:[#allocation49_spill] sm:$0xff] }
 0xd9e   : > { %v6074_v5 = vpop.f32.mrf.mxu3  ;;  %v6187_v17 = vadd.f32 %v14092_v57, %v6122_v54 }
 0xd9f   : > { %v6233_v53 = vmax.f32 %v6221_v59, %v6225_v14  ;;  %v6075_v49 = vadd.f32 %v6074_v5, %v6010_v62  ;;  %v14093_v59 = vld [vmem:[#allocation47_spill] sm:$0xff]  ;;  %v14094_v62 = vld [vmem:[#allocation36_spill] sm:$0xff] }
 0xda0   : > { %v6175_v60 = vadd.f32 %v14093_v59, %v6110_v25  ;;  %v6199_v14 = vadd.f32 %v14094_v62, %v6134_v51  ;;  %v6220_v27 = vmax.f32 %v6187_v17, 0.0 }
 0xda1   : > { %v6237_v36 = vmax.f32 %v6229_v19, %v6233_v53  ;;  %v6012_v42 = vpop.f32.mrf.mxu2  ;;  %v6140_v56 = vadd.f32 %v6139_v41, %v6075_v49  ;;  %v6231_v41 = vmax.f32 %v6215_v43, %v6219_v34 }
 0xda2   : > { %v6013_v20 = vadd.f32 %v6012_v42, %v14050_v6  ;;  %v6216_v19 = vmax.f32 %v6175_v60, 0.0  ;;  %v6224_v28 = vmax.f32 %v6199_v14, 0.0 }
 0xda3   : > { %6242 = vst.msk [vmem:[#allocation6 + $0x60] sm:$0xff] %vm4876_vm3, %v6237_v36  ;;  %v6205_v4 = vadd.f32 %v6204_v52, %v6140_v56  ;;  %v6210_v52 = vpop.f32.mrf.mxu1 }
 0xda4   : > { %v6232_v22 = vmax.f32 %v6216_v19, %v6220_v27 }
 0xda5   : > { %v6226_v8 = vmax.f32 %v6205_v4, 0.0 }
 0xda6   : > { %v6077_v12 = vpop.f32.mrf.mxu3 }
 0xda7   : > { %v6234_v44 = vmax.f32 %v6222_v63, %v6226_v8  ;;  %v6078_v33 = vadd.f32 %v6077_v12, %v6013_v20 }
 0xda9   : > { %v6238_v6 = vmax.f32 %v6230_v46, %v6234_v44  ;;  %v6015_v18 = vpop.f32.mrf.mxu2  ;;  %v6143_v35 = vadd.f32 %v6142_v1, %v6078_v33 }
 0xdaa   : > { %v6258_v61 = vld [vmem:[#allocation6 + $0x60] sm:$0xff]  ;;  %v6016_v9 = vadd.f32 %v6015_v18, %v14091_v50 }
 0xdab   : > { %6243 = vst.msk [vmem:[#allocation6 + $0x68] sm:$0xff] %vm4876_vm3, %v6238_v6  ;;  %v6208_v13 = vadd.f32 %v6207_v24, %v6143_v35  ;;  %8019 = vmatmul.msk.f32.gmra.mxu2 %vm4876_vm3, %v6258_v61  ;;  %8036 = vmatmul.msk.f32.gmra.mxu3 %vm4876_vm3, %v6258_v61 }
 0xdad   : > { %v6227_v58 = vmax.f32 %v6208_v13, 0.0 }
 0xdae   : > { %v6080_v21 = vpop.f32.mrf.mxu3 }
 0xdaf   : > { %v6235_v23 = vmax.f32 %v6223_v38, %v6227_v58  ;;  %v6081_v32 = vadd.f32 %v6080_v21, %v6016_v9 }
 0xdb1   : > { %v6239_v47 = vmax.f32 %v6231_v41, %v6235_v23  ;;  %v6146_v10 = vadd.f32 %v6145_v11, %v6081_v32  ;;  %v6331_v16 = vpop.f32.mrf.mxu2 }
 0xdb2   : > { %6380 = vst.msk [vmem:[#allocation16] sm:$0xff] %vm6379_vm6, %v6331_v16  ;;  %v6259_v29 = vld [vmem:[#allocation6 + $0x68] sm:$0xff] }
 0xdb3   : > { %6244 = vst.msk [vmem:[#allocation6 + $0x70] sm:$0xff] %vm4876_vm3, %v6239_v47  ;;  %v6211_v5 = vadd.f32 %v6210_v52, %v6146_v10  ;;  %8020 = vmatmul.msk.f32.gmra.mxu2 %vm4876_vm3, %v6259_v29  ;;  %8037 = vmatmul.msk.f32.gmra.mxu3 %vm4876_vm3, %v6259_v29 }
 0xdb5   : > { %v6228_v53 = vmax.f32 %v6211_v5, 0.0 }
 0xdb6   : > { %v6416_v49 = vpop.f32.mrf.mxu3 }
 0xdb7   : > { %v6236_v0 = vmax.f32 %v6224_v28, %v6228_v53  ;;  %6464 = vst.msk [vmem:[#allocation17] sm:$0xff] %vm6379_vm6, %v6416_v49 }
 0xdb9   : > { %v6240_v15 = vmax.f32 %v6232_v22, %v6236_v0  ;;  %v6334_v36 = vpop.f32.mrf.mxu2 }
 0xdba   : > { %6381 = vst.msk [vmem:[#allocation16 + $0x8] sm:$0xff] %vm6379_vm6, %v6334_v36  ;;  %v6260_v42 = vld [vmem:[#allocation6 + $0x70] sm:$0xff] }
 0xdbb   : > { %6245 = vst.msk [vmem:[#allocation6 + $0x78] sm:$0xff] %vm4876_vm3, %v6240_v15  ;;  %8021 = vmatmul.msk.f32.gmra.mxu2 %vm4876_vm3, %v6260_v42  ;;  %8038 = vmatmul.msk.f32.gmra.mxu3 %vm4876_vm3, %v6260_v42 }
 0xdbe   : > { %v6419_v56 = vpop.f32.mrf.mxu3 }
 0xdbf   : > { %6465 = vst.msk [vmem:[#allocation17 + $0x8] sm:$0xff] %vm6379_vm6, %v6419_v56 }
 0xdc1   : > { %v6337_v26 = vpop.f32.mrf.mxu2 }
 0xdc2   : > { %6382 = vst.msk [vmem:[#allocation16 + $0x10] sm:$0xff] %vm6379_vm6, %v6337_v26  ;;  %v6261_v48 = vld [vmem:[#allocation6 + $0x78] sm:$0xff]  ;;  %v6640_v26 = vld [vmem:[#allocation16] sm:$0xff] }
 0xdc3   : > { %8022 = vmatmul.msk.f32.gmra.mxu2 %vm4876_vm3, %v6261_v48  ;;  %8039 = vmatmul.msk.f32.gmra.mxu3 %vm4876_vm3, %v6261_v48 }
 0xdc6   : > { %v6422_v4 = vpop.f32.mrf.mxu3 }
 0xdc7   : > { %6466 = vst.msk [vmem:[#allocation17 + $0x10] sm:$0xff] %vm6379_vm6, %v6422_v4 }
 0xdc9   : > { %v6340_v37 = vpop.f32.mrf.mxu2 }
 0xdca   : > { %6383 = vst.msk [vmem:[#allocation16 + $0x18] sm:$0xff] %vm6379_vm6, %v6340_v37 }
 0xdce   : > { %v6425_v3 = vpop.f32.mrf.mxu3  ;;  %v6658_v15 = vld [vmem:[#allocation17 + $0x10] sm:$0xff] }
 0xdcf   : > { %6467 = vst.msk [vmem:[#allocation17 + $0x18] sm:$0xff] %vm6379_vm6, %v6425_v3  ;;  %v8861_v4 = vpack.i.bf16 %v6640_v26, %v6658_v15 }
 0xdd1   : > { %v6343_v55 = vpop.f32.mrf.mxu2  ;;  %v6643_v28 = vld [vmem:[#allocation16 + $0x18] sm:$0xff] }
 0xdd2   : > { %6384 = vst.msk [vmem:[#allocation16 + $0x20] sm:$0xff] %vm6379_vm6, %v6343_v55  ;;  %v6642_v55 = vld [vmem:[#allocation16 + $0x10] sm:$0xff] }
 0xdd6   : > { %v6428_v1 = vpop.f32.mrf.mxu3 }
 0xdd7   : > { %6468 = vst.msk [vmem:[#allocation17 + $0x20] sm:$0xff] %vm6379_vm6, %v6428_v1  ;;  %v6659_v1 = vld [vmem:[#allocation17 + $0x18] sm:$0xff] }
 0xdd9   : > { %v6346_v63 = vpop.f32.mrf.mxu2  ;;  %v6644_v48 = vld [vmem:[#allocation16 + $0x20] sm:$0xff] }
 0xdda   : > { %6385 = vst.msk [vmem:[#allocation16 + $0x28] sm:$0xff] %vm6379_vm6, %v6346_v63 }
 0xdde   : > { %v6431_v31 = vpop.f32.mrf.mxu3  ;;  %v6660_v3 = vld [vmem:[#allocation17 + $0x20] sm:$0xff] }
 0xddf   : > { %6469 = vst.msk [vmem:[#allocation17 + $0x28] sm:$0xff] %vm6379_vm6, %v6431_v31  ;;  %v8851_v63 = vpack.i.bf16 %v6642_v55, %v6660_v3  ;;  %v6641_v31 = vld [vmem:[#allocation16 + $0x8] sm:$0xff] }
 0xde1   : > { %v6349_v20 = vpop.f32.mrf.mxu2  ;;  %v6645_v36 = vld [vmem:[#allocation16 + $0x28] sm:$0xff] }
 0xde2   : > { %6386 = vst.msk [vmem:[#allocation16 + $0x30] sm:$0xff] %vm6379_vm6, %v6349_v20  ;;  %v8856_v20 = vpack.i.bf16 %v6641_v31, %v6659_v1 }
 0xde6   : > { %v6434_v8 = vpop.f32.mrf.mxu3  ;;  %v6661_v29 = vld [vmem:[#allocation17 + $0x28] sm:$0xff] }
 0xde7   : > { %6470 = vst.msk [vmem:[#allocation17 + $0x30] sm:$0xff] %vm6379_vm6, %v6434_v8  ;;  %v8846_v53 = vpack.i.bf16 %v6643_v28, %v6661_v29  ;;  %v6657_v8 = vld [vmem:[#allocation17 + $0x8] sm:$0xff] }
 0xde9   : > { %v6352_v46 = vpop.f32.mrf.mxu2  ;;  %v6646_v60 = vld [vmem:[#allocation16 + $0x30] sm:$0xff] }
 0xdea   : > { %6387 = vst.msk [vmem:[#allocation16 + $0x38] sm:$0xff] %vm6379_vm6, %v6352_v46  ;;  %v6656_v46 = vld [vmem:[#allocation17] sm:$0xff] }
 0xdee   : > { %v6437_v45 = vpop.f32.mrf.mxu3  ;;  %v6662_v42 = vld [vmem:[#allocation17 + $0x30] sm:$0xff] }
 0xdef   : > { %6471 = vst.msk [vmem:[#allocation17 + $0x38] sm:$0xff] %vm6379_vm6, %v6437_v45  ;;  %v8841_v37 = vpack.i.bf16 %v6644_v48, %v6662_v42  ;;  %v8866_v45 = vpack.i.bf16 %v6656_v46, %v6657_v8 }
 0xdf1   : > { %v6355_v12 = vpop.f32.mrf.mxu2  ;;  %v6647_v49 = vld [vmem:[#allocation16 + $0x38] sm:$0xff] }
 0xdf2   : > { %6388 = vst.msk [vmem:[#allocation16 + $0x40] sm:$0xff] %vm6379_vm6, %v6355_v12 }
 0xdf6   : > { %v6440_v24 = vpop.f32.mrf.mxu3  ;;  %v6663_v0 = vld [vmem:[#allocation17 + $0x38] sm:$0xff] }
 0xdf7   : > { %6472 = vst.msk [vmem:[#allocation17 + $0x40] sm:$0xff] %vm6379_vm6, %v6440_v24  ;;  %v8836_v56 = vpack.i.bf16 %v6645_v36, %v6663_v0 }
 0xdf9   : > { %v6358_v2 = vpop.f32.mrf.mxu2  ;;  %v6648_v27 = vld [vmem:[#allocation16 + $0x40] sm:$0xff] }
 0xdfa   : > { %6389 = vst.msk [vmem:[#allocation16 + $0x48] sm:$0xff] %vm6379_vm6, %v6358_v2 }
 0xdfe   : > { %v6443_v39 = vpop.f32.mrf.mxu3  ;;  %v6664_v23 = vld [vmem:[#allocation17 + $0x40] sm:$0xff] }
 0xdff   : > { %6473 = vst.msk [vmem:[#allocation17 + $0x48] sm:$0xff] %vm6379_vm6, %v6443_v39  ;;  %v8831_v47 = vpack.i.bf16 %v6646_v60, %v6664_v23 }
 0xe01   : > { %v6361_v44 = vpop.f32.mrf.mxu2  ;;  %v13119_v40 = vld [vmem:[#allocation16 + $0x48] sm:$0xff] }
 0xe02   : > { %6390 = vst.msk [vmem:[#allocation16 + $0x50] sm:$0xff] %vm6379_vm6, %v6361_v44 }
 0xe06   : > { %v6446_v33 = vpop.f32.mrf.mxu3  ;;  %v6665_v5 = vld [vmem:[#allocation17 + $0x48] sm:$0xff] }
 0xe07   : > { %6474 = vst.msk [vmem:[#allocation17 + $0x50] sm:$0xff] %vm6379_vm6, %v6446_v33  ;;  %v8826_v22 = vpack.i.bf16 %v6647_v49, %v6665_v5 }
 0xe09   : > { %v6364_v7 = vpop.f32.mrf.mxu2  ;;  %v6650_v13 = vld [vmem:[#allocation16 + $0x50] sm:$0xff] }
 0xe0a   : > { %6391 = vst.msk [vmem:[#allocation16 + $0x58] sm:$0xff] %vm6379_vm6, %v6364_v7 }
 0xe0e   : > { %v6449_v30 = vpop.f32.mrf.mxu3  ;;  %v6666_v16 = vld [vmem:[#allocation17 + $0x50] sm:$0xff] }
 0xe0f   : > { %6475 = vst.msk [vmem:[#allocation17 + $0x58] sm:$0xff] %vm6379_vm6, %v6449_v30  ;;  %v8816_v19 = vpack.i.bf16 %v6648_v27, %v6666_v16 }
 0xe11   : > { %v6651_v50 = vld [vmem:[#allocation16 + $0x58] sm:$0xff] }
 0xe16   : > { %v6667_v6 = vld [vmem:[#allocation17 + $0x58] sm:$0xff] }
 0xe17   : > { %v8791_v18 = vpack.i.bf16 %v13119_v40, %v6667_v6 }
 0xe19   : > { %8792 = vrot.lane.b32.xlu2 %v8791_v18, %s9015_s25 }
 0xe2e   : > { %v6367_v35 = vpop.f32.mrf.mxu2  ;;  %v6452_v34 = vpop.f32.mrf.mxu3 }
 0xe2f   : > { %6392 = vst.msk [vmem:[#allocation16 + $0x60] sm:$0xff] %vm6379_vm6, %v6367_v35  ;;  %v6480_v35 = vld [vmem:[%s13764_s12] sm:$0xff] }
 0xe30   : > { %6476 = vst.msk [vmem:[#allocation17 + $0x60] sm:$0xff] %vm6379_vm6, %v6452_v34 }
 0xe36   : > { %v6370_v61 = vpop.f32.mrf.mxu2  ;;  %v6455_v54 = vpop.f32.mrf.mxu3  ;;  %v6652_v11 = vld [vmem:[#allocation16 + $0x60] sm:$0xff] }
 0xe37   : > { %6393 = vst.msk [vmem:[#allocation16 + $0x68] sm:$0xff] %vm6379_vm6, %v6370_v61  ;;  %v6668_v43 = vld [vmem:[#allocation17 + $0x60] sm:$0xff]  ;;  %v6481_v61 = vld [vmem:[%s13764_s12 + $0x8] sm:$0xff] }
 0xe38   : > { %6477 = vst.msk [vmem:[#allocation17 + $0x68] sm:$0xff] %vm6379_vm6, %v6455_v54  ;;  %v8796_v25 = vpack.i.bf16 %v6650_v13, %v6668_v43 }
 0xe3a   : > { %8797 = vrot.lane.b32.xlu1 %v8796_v25, %s9015_s25 }
 0xe3e   : > { %v6373_v38 = vpop.f32.mrf.mxu2  ;;  %v6458_v51 = vpop.f32.mrf.mxu3  ;;  %v6653_v62 = vld [vmem:[#allocation16 + $0x68] sm:$0xff] }
 0xe3f   : > { %6394 = vst.msk [vmem:[#allocation16 + $0x70] sm:$0xff] %vm6379_vm6, %v6373_v38  ;;  %v6669_v9 = vld [vmem:[#allocation17 + $0x68] sm:$0xff] }
 0xe40   : > { %6478 = vst.msk [vmem:[#allocation17 + $0x70] sm:$0xff] %vm6379_vm6, %v6458_v51  ;;  %v8801_v58 = vpack.i.bf16 %v6651_v50, %v6669_v9 }
 0xe42   : > { %8802 = vrot.lane.b32.xlu0 %v8801_v58, %s9015_s25  ;;  %v6484_v58 = vld [vmem:[%s13764_s12 + $0x20] sm:$0xff] }
 0xe46   : > { %v6376_v41 = vpop.f32.mrf.mxu2  ;;  %v6461_v21 = vpop.f32.mrf.mxu3  ;;  %v6654_v52 = vld [vmem:[#allocation16 + $0x70] sm:$0xff] }
 0xe47   : > { %6395 = vst.msk [vmem:[#allocation16 + $0x78] sm:$0xff] %vm6379_vm6, %v6376_v41  ;;  %v6670_v57 = vld [vmem:[#allocation17 + $0x70] sm:$0xff] }
 0xe48   : > { %6479 = vst.msk [vmem:[#allocation17 + $0x78] sm:$0xff] %vm6379_vm6, %v6461_v21  ;;  %v8806_v17 = vpack.i.bf16 %v6652_v11, %v6670_v57 }
 0xe4a   : > { %8807 = vrot.lane.b32.xlu2 %v8806_v17, %s9015_s25 }
 0xe4e   : > { %v6655_v32 = vld [vmem:[#allocation16 + $0x78] sm:$0xff] }
 0xe4f   : > { %6800 = vmatpush.msrb.mxu0 %v6655_v32  ;;  %v6671_v59 = vld [vmem:[#allocation17 + $0x78] sm:$0xff]  ;;  %v8811_v14 = vpack.i.bf16 %v6654_v52, %v6655_v32 }
 0xe50   : > { %6913 = vmatpush.msrb.mxu1 %v6671_v59  ;;  %v8821_v10 = vpack.i.bf16 %v6653_v62, %v6671_v59 }
 0xe51   : > { %8812 = vrot.lane.b32.xlu0 %v8811_v14, %s9015_s25  ;;  %6801 = vmatpush.msrb.mxu0 %v6654_v52 }
 0xe52   : > { %6914 = vmatpush.msrb.mxu1 %v6670_v57  ;;  %8832 = vrot.lane.b32.xlu2 %v8831_v47, %s9015_s25  ;;  %v6488_v47 = vld [vmem:[%s13764_s12 + $0x40] sm:$0xff] }
 0xe53   : > { %8822 = vrot.lane.b32.xlu1 %v8821_v10, %s9015_s25  ;;  %6802 = vmatpush.msrb.mxu0 %v6653_v62 }
 0xe54   : > { %6915 = vmatpush.msrb.mxu1 %v6669_v9 }
 0xe55   : > { %6803 = vmatpush.msrb.mxu0 %v6652_v11  ;;  %v6485_v11 = vld [vmem:[%s13764_s12 + $0x28] sm:$0xff] }
 0xe56   : > { %6916 = vmatpush.msrb.mxu1 %v6668_v43 }
 0xe57   : > { %6804 = vmatpush.msrb.mxu0 %v6651_v50 }
 0xe58   : > { %6917 = vmatpush.msrb.mxu1 %v6667_v6 }
 0xe59   : > { %8817 = vrot.lane.b32.xlu0 %v8816_v19, %s9015_s25  ;;  %6805 = vmatpush.msrb.mxu0 %v6650_v13 }
 0xe5a   : > { %6918 = vmatpush.msrb.mxu1 %v6666_v16  ;;  %8847 = vrot.lane.b32.xlu2 %v8846_v53, %s9015_s25 }
 0xe5b   : > { %8827 = vrot.lane.b32.xlu1 %v8826_v22, %s9015_s25  ;;  %6806 = vmatpush.msrb.mxu0 %v13119_v40 }
 0xe5c   : > { %6919 = vmatpush.msrb.mxu1 %v6665_v5 }
 0xe5d   : > { %6807 = vmatpush.msrb.mxu0 %v6648_v27 }
 0xe5e   : > { %6920 = vmatpush.msrb.mxu1 %v6664_v23 }
 0xe5f   : > { %6808 = vmatpush.msrb.mxu0 %v6647_v49 }
 0xe60   : > { %6921 = vmatpush.msrb.mxu1 %v6663_v0 }
 0xe61   : > { %8837 = vrot.lane.b32.xlu0 %v8836_v56, %s9015_s25  ;;  %6809 = vmatpush.msrb.mxu0 %v6646_v60 }
 0xe62   : > { %6922 = vmatpush.msrb.mxu1 %v6662_v42  ;;  %8862 = vrot.lane.b32.xlu2 %v8861_v4, %s9015_s25  ;;  %v6482_v4 = vld [vmem:[%s13764_s12 + $0x10] sm:$0xff] }
 0xe63   : > { %8842 = vrot.lane.b32.xlu1 %v8841_v37, %s9015_s25  ;;  %6810 = vmatpush.msrb.mxu0 %v6645_v36  ;;  %v6492_v36 = vld [vmem:[%s13764_s12 + $0x60] sm:$0xff] }
 0xe64   : > { %6923 = vmatpush.msrb.mxu1 %v6661_v29  ;;  %v6489_v29 = vld [vmem:[%s13764_s12 + $0x48] sm:$0xff] }
 0xe65   : > { %6811 = vmatpush.msrb.mxu0 %v6644_v48 }
 0xe66   : > { %6924 = vmatpush.msrb.mxu1 %v6660_v3 }
 0xe67   : > { %6812 = vmatpush.msrb.mxu0 %v6643_v28 }
 0xe68   : > { %6925 = vmatpush.msrb.mxu1 %v6659_v1  ;;  %v6483_v1 = vld [vmem:[%s13764_s12 + $0x18] sm:$0xff] }
 0xe69   : > { %8852 = vrot.lane.b32.xlu0 %v8851_v63, %s9015_s25  ;;  %6813 = vmatpush.msrb.mxu0 %v6642_v55  ;;  %v6496_v63 = vld [vmem:[%s13764_s12 + $0x80] sm:$0xff] }
 0xe6a   : > { %6926 = vmatpush.msrb.mxu1 %v6658_v15 }
 0xe6b   : > { %8857 = vrot.lane.b32.xlu1 %v8856_v20, %s9015_s25  ;;  %6814 = vmatpush.msrb.mxu0 %v6641_v31  ;;  %v6497_v31 = vld [vmem:[%s13764_s12 + $0x88] sm:$0xff]  ;;  %v6486_v20 = vld [vmem:[%s13764_s12 + $0x30] sm:$0xff] }
 0xe6c   : > { %6927 = vmatpush.msrb.mxu1 %v6657_v8  ;;  %v6487_v8 = vld [vmem:[%s13764_s12 + $0x38] sm:$0xff] }
 0xe6d   : > { %6815 = vmatpush.msrb.mxu0 %v6640_v26  ;;  %v6493_v26 = vld [vmem:[%s13764_s12 + $0x68] sm:$0xff] }
 0xe6e   : > { %6928 = vmatpush.msrb.mxu1 %v6656_v46  ;;  %6816 = vmatmul.f32.vlgmr.msrb.gmra.mxu0 %v6480_v35  ;;  %v6500_v46 = vld [vmem:[%s13764_s12 + $0xa0] sm:$0xff]  ;;  %v6513_v35 = vld [vmem:[%s13764_s12 + $0x108] sm:$0xff] }
 0xe6f   : > { %6929 = vmatmul.f32.vlgmr.msrb.gmra.mxu1 %v6481_v61  ;;  %v6503_v61 = vld [vmem:[%s13764_s12 + $0xb8] sm:$0xff] }
 0xe71   : > { %8867 = vrot.lane.b32.xlu0 %v8866_v45, %s9015_s25  ;;  %v6501_v45 = vld [vmem:[%s13764_s12 + $0xa8] sm:$0xff] }
 0xe73   : > { %v8793_v12 = vpop.permute.xlu2 %8792 }
 0xe74   : > { %v8794_v50 = vunpack.i.l.bf16 %v8793_v12  ;;  %v8795_v41 = vunpack.i.h.bf16 %v8793_v12  ;;  %v6490_v12 = vld [vmem:[%s13764_s12 + $0x50] sm:$0xff] }
 0xe76   : > { %6819 = vmatmul.f32.gmra.mxu0 %v6484_v58  ;;  %v6524_v58 = vld [vmem:[%s13764_s12 + $0x160] sm:$0xff] }
 0xe77   : > { %6932 = vmatmul.f32.gmra.mxu1 %v6485_v11  ;;  %v6515_v11 = vld [vmem:[%s13764_s12 + $0x118] sm:$0xff] }
 0xe7e   : > { %6822 = vmatmul.f32.gmra.mxu0 %v6488_v47  ;;  %v6537_v47 = vld [vmem:[%s13764_s12 + $0x1c8] sm:$0xff] }
 0xe7f   : > { %6935 = vmatmul.f32.gmra.mxu1 %v6489_v29  ;;  %v6540_v29 = vld [vmem:[%s13764_s12 + $0x1e0] sm:$0xff] }
 0xe86   : > { %6825 = vmatmul.f32.gmra.mxu0 %v6492_v36 }
 0xe87   : > { %6938 = vmatmul.f32.gmra.mxu1 %v6493_v26  ;;  %v6549_v26 = vld [vmem:[%s13764_s12 + $0x228] sm:$0xff] }
 0xe8e   : > { %6828 = vmatmul.f32.gmra.mxu0 %v6496_v63  ;;  %v6542_v63 = vld [vmem:[%s13764_s12 + $0x1f0] sm:$0xff] }
 0xe8f   : > { %6941 = vmatmul.f32.gmra.mxu1 %v6497_v31  ;;  %v6543_v31 = vld [vmem:[%s13764_s12 + $0x1f8] sm:$0xff] }
 0xe96   : > { %6831 = vmatmul.f32.gmra.mxu0 %v6500_v46  ;;  %v6556_v46 = vld [vmem:[%s13764_s12 + $0x260] sm:$0xff] }
 0xe97   : > { %6944 = vmatmul.f32.gmra.mxu1 %v6501_v45 }
 0xea4   : > { %v8808_v39 = vpop.permute.xlu2 %8807 }
 0xea5   : > { %v8809_v6 = vunpack.i.l.bf16 %v8808_v39  ;;  %v8810_v54 = vunpack.i.h.bf16 %v8808_v39  ;;  %v6505_v39 = vld [vmem:[%s13764_s12 + $0xc8] sm:$0xff] }
 0xea6   : > { %6947 = vmatmul.f32.gmra.mxu1 %v6505_v39 }
 0xeac   : > { %v8798_v2 = vpop.permute.xlu1 %8797  ;;  %v8833_v34 = vpop.permute.xlu2 %8832 }
 0xead   : > { %v8799_v25 = vunpack.i.l.bf16 %v8798_v2  ;;  %v8800_v9 = vunpack.i.h.bf16 %v8798_v2  ;;  %v8834_v52 = vunpack.i.l.bf16 %v8833_v34  ;;  %v8835_v14 = vunpack.i.h.bf16 %v8833_v34  ;;  %v6504_v2 = vld [vmem:[%s13764_s12 + $0xc0] sm:$0xff]  ;;  %v6502_v34 = vld [vmem:[%s13764_s12 + $0xb0] sm:$0xff] }
 0xeae   : > { %6834 = vmatmul.f32.gmra.mxu0 %v6504_v2  ;;  %v6546_v2 = vld [vmem:[%s13764_s12 + $0x210] sm:$0xff] }
 0xeb4   : > { %v8803_v24 = vpop.permute.xlu0 %8802  ;;  %v8848_v23 = vpop.permute.xlu2 %8847 }
 0xeb5   : > { %v8804_v13 = vunpack.i.l.bf16 %v8803_v24  ;;  %v8805_v38 = vunpack.i.h.bf16 %v8803_v24  ;;  %v8849_v27 = vunpack.i.l.bf16 %v8848_v23  ;;  %v8850_v28 = vunpack.i.h.bf16 %v8848_v23  ;;  %v6491_v24 = vld [vmem:[%s13764_s12 + $0x58] sm:$0xff]  ;;  %v6518_v23 = vld [vmem:[%s13764_s12 + $0x130] sm:$0xff] }
 0xebc   : > { %v8863_v49 = vpop.permute.xlu2 %8862 }
 0xebd   : > { %v8864_v42 = vunpack.i.l.bf16 %v8863_v49  ;;  %v8865_v48 = vunpack.i.h.bf16 %v8863_v49 }
 0xec3   : > { %v8813_v44 = vpop.permute.xlu0 %8812 }
 0xec4   : > { %v8814_v33 = vunpack.i.l.bf16 %v8813_v44  ;;  %v8815_v40 = vunpack.i.h.bf16 %v8813_v44  ;;  %v6494_v44 = vld [vmem:[%s13764_s12 + $0x70] sm:$0xff] }
 0xec5   : > { %v8823_v7 = vpop.permute.xlu1 %8822 }
 0xec6   : > { %v8824_v30 = vunpack.i.l.bf16 %v8823_v7  ;;  %7026 = vmatpush.msra.mxu2 %v8814_v33  ;;  %v8825_v18 = vunpack.i.h.bf16 %v8823_v7  ;;  %v6495_v33 = vld [vmem:[%s13764_s12 + $0x78] sm:$0xff]  ;;  %v6508_v7 = vld [vmem:[%s13764_s12 + $0xe0] sm:$0xff] }
 0xec7   : > { %6837 = vmatmul.f32.gmra.mxu0 %v6508_v7 }
 0xec8   : > { %7139 = vmatpush.msra.mxu3 %v8824_v30  ;;  %7027 = vmatpush.msra.mxu2 %v8815_v40  ;;  %v6509_v30 = vld [vmem:[%s13764_s12 + $0xe8] sm:$0xff]  ;;  %v6498_v40 = vld [vmem:[%s13764_s12 + $0x90] sm:$0xff] }
 0xec9   : > { %6950 = vmatmul.f32.gmra.mxu1 %v6509_v30  ;;  %v6560_v30 = vld [vmem:[%s13764_s12 + $0x280] sm:$0xff] }
 0xeca   : > { %7140 = vmatpush.msra.mxu3 %v8809_v6  ;;  %7028 = vmatpush.msra.mxu2 %v8825_v18  ;;  %v6499_v6 = vld [vmem:[%s13764_s12 + $0x98] sm:$0xff]  ;;  %v6512_v18 = vld [vmem:[%s13764_s12 + $0x100] sm:$0xff] }
 0xecb   : > { %v8818_v43 = vpop.permute.xlu0 %8817 }
 0xecc   : > { %7141 = vmatpush.msra.mxu3 %v8804_v13  ;;  %7029 = vmatpush.msra.mxu2 %v8810_v54  ;;  %v8819_v21 = vunpack.i.l.bf16 %v8818_v43  ;;  %v8820_v17 = vunpack.i.h.bf16 %v8818_v43  ;;  %v6516_v54 = vld [vmem:[%s13764_s12 + $0x120] sm:$0xff]  ;;  %v6517_v13 = vld [vmem:[%s13764_s12 + $0x128] sm:$0xff]  ;;  %v6506_v43 = vld [vmem:[%s13764_s12 + $0xd0] sm:$0xff] }
 0xecd   : > { %v8828_v51 = vpop.permute.xlu1 %8827 }
 0xece   : > { %7142 = vmatpush.msra.mxu3 %v8799_v25  ;;  %7030 = vmatpush.msra.mxu2 %v8805_v38  ;;  %v8829_v57 = vunpack.i.l.bf16 %v8828_v51  ;;  %v8830_v59 = vunpack.i.h.bf16 %v8828_v51  ;;  %v6507_v25 = vld [vmem:[%s13764_s12 + $0xd8] sm:$0xff]  ;;  %v6520_v38 = vld [vmem:[%s13764_s12 + $0x140] sm:$0xff]  ;;  %v6521_v51 = vld [vmem:[%s13764_s12 + $0x148] sm:$0xff] }
 0xecf   : > { %6840 = vmatmul.f32.gmra.mxu0 %v6512_v18 }
 0xed0   : > { %7143 = vmatpush.msra.mxu3 %v8794_v50  ;;  %7031 = vmatpush.msra.mxu2 %v8800_v9  ;;  %v6510_v50 = vld [vmem:[%s13764_s12 + $0xf0] sm:$0xff]  ;;  %v6511_v9 = vld [vmem:[%s13764_s12 + $0xf8] sm:$0xff] }
 0xed1   : > { %6953 = vmatmul.f32.gmra.mxu1 %v6513_v35 }
 0xed2   : > { %7144 = vmatpush.msra.mxu3 %v8819_v21  ;;  %7032 = vmatpush.msra.mxu2 %v8795_v41  ;;  %v6525_v41 = vld [vmem:[%s13764_s12 + $0x168] sm:$0xff]  ;;  %v6514_v21 = vld [vmem:[%s13764_s12 + $0x110] sm:$0xff] }
 0xed3   : > { %v8838_v32 = vpop.permute.xlu0 %8837 }
 0xed4   : > { %7145 = vmatpush.msra.mxu3 %v8829_v57  ;;  %v8839_v60 = vunpack.i.l.bf16 %v8838_v32  ;;  %7033 = vmatpush.msra.mxu2 %v8820_v17  ;;  %v8840_v16 = vunpack.i.h.bf16 %v8838_v32  ;;  %v6528_v57 = vld [vmem:[%s13764_s12 + $0x180] sm:$0xff]  ;;  %v6529_v17 = vld [vmem:[%s13764_s12 + $0x188] sm:$0xff]  ;;  %v6519_v32 = vld [vmem:[%s13764_s12 + $0x138] sm:$0xff] }
 0xed5   : > { %v8843_v62 = vpop.permute.xlu1 %8842 }
 0xed6   : > { %7146 = vmatpush.msra.mxu3 %v8834_v52  ;;  %7034 = vmatpush.msra.mxu2 %v8830_v59  ;;  %v8844_v10 = vunpack.i.l.bf16 %v8843_v62  ;;  %v8845_v5 = vunpack.i.h.bf16 %v8843_v62  ;;  %v6532_v52 = vld [vmem:[%s13764_s12 + $0x1a0] sm:$0xff]  ;;  %v6533_v59 = vld [vmem:[%s13764_s12 + $0x1a8] sm:$0xff]  ;;  %v6523_v62 = vld [vmem:[%s13764_s12 + $0x158] sm:$0xff] }
 0xed7   : > { %6843 = vmatmul.f32.gmra.mxu0 %v6516_v54 }
 0xed8   : > { %7147 = vmatpush.msra.mxu3 %v8839_v60  ;;  %7035 = vmatpush.msra.mxu2 %v8835_v14  ;;  %v6522_v60 = vld [vmem:[%s13764_s12 + $0x150] sm:$0xff]  ;;  %v6536_v14 = vld [vmem:[%s13764_s12 + $0x1c0] sm:$0xff] }
 0xed9   : > { %6956 = vmatmul.f32.gmra.mxu1 %v6517_v13 }
 0xeda   : > { %7148 = vmatpush.msra.mxu3 %v8844_v10  ;;  %7036 = vmatpush.msra.mxu2 %v8840_v16  ;;  %v6526_v10 = vld [vmem:[%s13764_s12 + $0x170] sm:$0xff]  ;;  %v6527_v16 = vld [vmem:[%s13764_s12 + $0x178] sm:$0xff] }
 0xedb   : > { %v8853_v19 = vpop.permute.xlu0 %8852 }
 0xedc   : > { %7149 = vmatpush.msra.mxu3 %v8849_v27  ;;  %v8854_v53 = vunpack.i.l.bf16 %v8853_v19  ;;  %7037 = vmatpush.msra.mxu2 %v8845_v5  ;;  %v8855_v15 = vunpack.i.h.bf16 %v8853_v19  ;;  %v6541_v27 = vld [vmem:[%s13764_s12 + $0x1e8] sm:$0xff]  ;;  %v6530_v5 = vld [vmem:[%s13764_s12 + $0x190] sm:$0xff]  ;;  %v6531_v19 = vld [vmem:[%s13764_s12 + $0x198] sm:$0xff] }
 0xedd   : > { %v8858_v22 = vpop.permute.xlu1 %8857 }
 0xede   : > { %v8859_v0 = vunpack.i.l.bf16 %v8858_v22  ;;  %7038 = vmatpush.msra.mxu2 %v8850_v28  ;;  %7150 = vmatpush.msra.mxu3 %v8854_v53  ;;  %v8860_v56 = vunpack.i.h.bf16 %v8858_v22  ;;  %v6544_v53 = vld [vmem:[%s13764_s12 + $0x200] sm:$0xff]  ;;  %v6545_v22 = vld [vmem:[%s13764_s12 + $0x208] sm:$0xff] }
 0xedf   : > { %6846 = vmatmul.f32.gmra.mxu0 %v6520_v38  ;;  %v6610_v38 = vld [vmem:[%s13765_s13 + $0x10] sm:$0xff] }
 0xee0   : > { %7039 = vmatpush.msra.mxu2 %v8855_v15  ;;  %7151 = vmatpush.msra.mxu3 %v8859_v0  ;;  %v6534_v0 = vld [vmem:[%s13764_s12 + $0x1b0] sm:$0xff]  ;;  %v6535_v15 = vld [vmem:[%s13764_s12 + $0x1b8] sm:$0xff] }
 0xee1   : > { %6959 = vmatmul.f32.gmra.mxu1 %v6521_v51 }
 0xee2   : > { %7040 = vmatpush.msra.mxu2 %v8860_v56  ;;  %7152 = vmatpush.msra.mxu3 %v8864_v42  ;;  %v6548_v42 = vld [vmem:[%s13764_s12 + $0x220] sm:$0xff] }
 0xee3   : > { %v8868_v37 = vpop.permute.xlu0 %8867 }
 0xee4   : > { %v8869_v3 = vunpack.i.l.bf16 %v8868_v37  ;;  %7041 = vmatpush.msra.mxu2 %v8865_v48  ;;  %v8870_v55 = vunpack.i.h.bf16 %v8868_v37  ;;  %v6538_v48 = vld [vmem:[%s13764_s12 + $0x1d0] sm:$0xff] }
 0xee5   : > { %7042 = vmatmul.f32.vlgmr.msra.gmra.mxu2 %v6482_v4  ;;  %v6539_v4 = vld [vmem:[%s13764_s12 + $0x1d8] sm:$0xff] }
 0xee6   : > { %7153 = vmatpush.msra.mxu3 %v8869_v3  ;;  %v6552_v3 = vld [vmem:[%s13764_s12 + $0x240] sm:$0xff] }
 0xee7   : > { %6849 = vmatmul.f32.gmra.mxu0 %v6524_v58 }
 0xee8   : > { %7154 = vmatpush.msra.mxu3 %v8870_v55 }
 0xee9   : > { %7155 = vmatmul.f32.vlgmr.msra.gmra.mxu3 %v6483_v1  ;;  %6962 = vmatmul.f32.gmra.mxu1 %v6525_v41  ;;  %v6553_v1 = vld [vmem:[%s13764_s12 + $0x248] sm:$0xff] }
 0xeeb   : > { %v6817_v28 = vpop.f32.mrf.mxu0 }
 0xeec   : > { %v6930_v49 = vpop.f32.mrf.mxu1 }
 0xeed   : > { %7045 = vmatmul.f32.gmra.mxu2 %v6486_v20  ;;  %v6608_v20 = vld [vmem:[%s13765_s13] sm:$0xff] }
 0xeef   : > { %6852 = vmatmul.f32.gmra.mxu0 %v6528_v57  ;;  %v6554_v57 = vld [vmem:[%s13764_s12 + $0x250] sm:$0xff] }
 0xef1   : > { %7158 = vmatmul.f32.gmra.mxu3 %v6487_v8  ;;  %6965 = vmatmul.f32.gmra.mxu1 %v6529_v17 }
 0xef3   : > { %v6820_v36 = vpop.f32.mrf.mxu0 }
 0xef4   : > { %v6933_v56 = vpop.f32.mrf.mxu1 }
 0xef5   : > { %7048 = vmatmul.f32.gmra.mxu2 %v6490_v12  ;;  %v6818_v12 = vadd.f32 %v6817_v28, %v6608_v20 }
 0xef7   : > { %6855 = vmatmul.f32.gmra.mxu0 %v6532_v52  ;;  %v6931_v39 = vadd.f32 %v6930_v49, %v6818_v12  ;;  %v6555_v52 = vld [vmem:[%s13764_s12 + $0x258] sm:$0xff]  ;;  %v6612_v49 = vld [vmem:[%s13765_s13 + $0x20] sm:$0xff]  ;;  %v6577_v12 = vld [vmem:[%s13764_s12 + $0x308] sm:$0xff] }
 0xef9   : > { %7161 = vmatmul.f32.gmra.mxu3 %v6491_v24  ;;  %6968 = vmatmul.f32.gmra.mxu1 %v6533_v59  ;;  %v6557_v24 = vld [vmem:[%s13764_s12 + $0x268] sm:$0xff]  ;;  %v6611_v59 = vld [vmem:[%s13765_s13 + $0x18] sm:$0xff] }
 0xefb   : > { %v6823_v37 = vpop.f32.mrf.mxu0 }
 0xefc   : > { %v6936_v55 = vpop.f32.mrf.mxu1 }
 0xefd   : > { %7051 = vmatmul.f32.gmra.mxu2 %v6494_v44  ;;  %v6547_v44 = vld [vmem:[%s13764_s12 + $0x218] sm:$0xff] }
 0xeff   : > { %6858 = vmatmul.f32.gmra.mxu0 %v6536_v14 }
 0xf01   : > { %7164 = vmatmul.f32.gmra.mxu3 %v6495_v33  ;;  %6971 = vmatmul.f32.gmra.mxu1 %v6537_v47  ;;  %v6609_v33 = vld [vmem:[%s13765_s13 + $0x8] sm:$0xff] }
 0xf02   : > { %v6821_v35 = vadd.f32 %v6820_v36, %v6609_v33  ;;  %v6567_v33 = vld [vmem:[%s13764_s12 + $0x2b8] sm:$0xff] }
 0xf03   : > { %v6826_v8 = vpop.f32.mrf.mxu0 }
 0xf04   : > { %v6939_v45 = vpop.f32.mrf.mxu1 }
 0xf05   : > { %7054 = vmatmul.f32.gmra.mxu2 %v6498_v40 }
 0xf07   : > { %6861 = vmatmul.f32.gmra.mxu0 %v6540_v29  ;;  %v6569_v29 = vld [vmem:[%s13764_s12 + $0x2c8] sm:$0xff] }
 0xf09   : > { %7167 = vmatmul.f32.gmra.mxu3 %v6499_v6  ;;  %6974 = vmatmul.f32.gmra.mxu1 %v6541_v27  ;;  %v6558_v27 = vld [vmem:[%s13764_s12 + $0x270] sm:$0xff] }
 0xf0b   : > { %v6829_v7 = vpop.f32.mrf.mxu0 }
 0xf0c   : > { %v6942_v6 = vpop.f32.mrf.mxu1 }
 0xf0d   : > { %7057 = vmatmul.f32.gmra.mxu2 %v6502_v34  ;;  %v6561_v34 = vld [vmem:[%s13764_s12 + $0x288] sm:$0xff] }
 0xf0f   : > { %6864 = vmatmul.f32.gmra.mxu0 %v6544_v53  ;;  %v6559_v53 = vld [vmem:[%s13764_s12 + $0x278] sm:$0xff] }
 0xf11   : > { %7170 = vmatmul.f32.gmra.mxu3 %v6503_v61  ;;  %6977 = vmatmul.f32.gmra.mxu1 %v6545_v22  ;;  %v6550_v61 = vld [vmem:[%s13764_s12 + $0x230] sm:$0xff] }
 0xf13   : > { %v6832_v51 = vpop.f32.mrf.mxu0 }
 0xf14   : > { %v6945_v58 = vpop.f32.mrf.mxu1 }
 0xf15   : > { %7060 = vmatmul.f32.gmra.mxu2 %v6506_v43  ;;  %v6934_v43 = vadd.f32 %v6933_v56, %v6821_v35  ;;  %v6830_v56 = vadd.f32 %v6829_v7, %v6612_v49  ;;  %v6614_v7 = vld [vmem:[%s13765_s13 + $0x30] sm:$0xff] }
 0xf17   : > { %6867 = vmatmul.f32.gmra.mxu0 %v6548_v42 }
 0xf19   : > { %7173 = vmatmul.f32.gmra.mxu3 %v6507_v25  ;;  %6980 = vmatmul.f32.gmra.mxu1 %v6549_v26  ;;  %v6551_v25 = vld [vmem:[%s13764_s12 + $0x238] sm:$0xff]  ;;  %v6573_v26 = vld [vmem:[%s13764_s12 + $0x2e8] sm:$0xff] }
 0xf1d   : > { %7063 = vmatmul.f32.gmra.mxu2 %v6510_v50  ;;  %v6564_v50 = vld [vmem:[%s13764_s12 + $0x2a0] sm:$0xff] }
 0xf1f   : > { %6870 = vmatmul.f32.gmra.mxu0 %v6552_v3  ;;  %v6943_v3 = vadd.f32 %v6942_v6, %v6830_v56  ;;  %v6589_v56 = vld [vmem:[%s13764_s12 + $0x368] sm:$0xff] }
 0xf21   : > { %7176 = vmatmul.f32.gmra.mxu3 %v6511_v9  ;;  %6983 = vmatmul.f32.gmra.mxu1 %v6553_v1  ;;  %v6613_v1 = vld [vmem:[%s13765_s13 + $0x28] sm:$0xff] }
 0xf23   : > { %v13412_v47 = vpop.f32.mrf.mxu1 }
 0xf25   : > { %7066 = vmatmul.f32.gmra.mxu2 %v6514_v21  ;;  %v6824_v21 = vadd.f32 %v6823_v37, %v6610_v38 }
 0xf27   : > { %6873 = vmatmul.f32.gmra.mxu0 %v6556_v46 }
 0xf29   : > { %7179 = vmatmul.f32.gmra.mxu3 %v6515_v11  ;;  %6986 = vmatmul.f32.gmra.mxu1 %v6557_v24  ;;  %v6565_v11 = vld [vmem:[%s13764_s12 + $0x2a8] sm:$0xff]  ;;  %v6566_v24 = vld [vmem:[%s13764_s12 + $0x2b0] sm:$0xff] }
 0xf2d   : > { %7069 = vmatmul.f32.gmra.mxu2 %v6518_v23 }
 0xf2f   : > { %6876 = vmatmul.f32.gmra.mxu0 %v6560_v30 }
 0xf31   : > { %7182 = vmatmul.f32.gmra.mxu3 %v6519_v32  ;;  %6989 = vmatmul.f32.gmra.mxu1 %v6561_v34  ;;  %v6937_v32 = vadd.f32 %v6936_v55, %v6824_v21  ;;  %v6563_v55 = vld [vmem:[%s13764_s12 + $0x298] sm:$0xff] }
 0xf35   : > { %7072 = vmatmul.f32.gmra.mxu2 %v6522_v60  ;;  %v6835_v60 = vpop.f32.mrf.mxu0 }
 0xf36   : > { %v6836_v35 = vadd.f32 %v6835_v60, %v6614_v7  ;;  %v6584_v60 = vld [vmem:[%s13764_s12 + $0x340] sm:$0xff] }
 0xf37   : > { %6879 = vmatmul.f32.gmra.mxu0 %v6564_v50 }
 0xf39   : > { %7185 = vmatmul.f32.gmra.mxu3 %v6523_v62  ;;  %6992 = vmatmul.f32.gmra.mxu1 %v6565_v11  ;;  %v6568_v62 = vld [vmem:[%s13764_s12 + $0x2c0] sm:$0xff]  ;;  %v6618_v11 = vld [vmem:[%s13765_s13 + $0x50] sm:$0xff] }
 0xf3d   : > { %7075 = vmatmul.f32.gmra.mxu2 %v6526_v10 }
 0xf3f   : > { %6882 = vmatmul.f32.gmra.mxu0 %v6568_v62  ;;  %v6585_v62 = vld [vmem:[%s13764_s12 + $0x348] sm:$0xff] }
 0xf41   : > { %7188 = vmatmul.f32.gmra.mxu3 %v6527_v16  ;;  %v6827_v16 = vadd.f32 %v6826_v8, %v6611_v59  ;;  %6995 = vmatmul.f32.gmra.mxu1 %v6569_v29 }
 0xf43   : > { %v6940_v28 = vadd.f32 %v6939_v45, %v6827_v16  ;;  %v6833_v45 = vadd.f32 %v6832_v51, %v6613_v1  ;;  %v6579_v1 = vld [vmem:[%s13764_s12 + $0x318] sm:$0xff] }
 0xf44   : > { %v6838_v22 = vpop.f32.mrf.mxu0 }
 0xf45   : > { %7078 = vmatmul.f32.gmra.mxu2 %v6530_v5 }
 0xf46   : > { %v13431_v36 = vpop.f32.mrf.mxu1 }
 0xf49   : > { %7191 = vmatmul.f32.gmra.mxu3 %v6531_v19  ;;  %6998 = vmatmul.f32.gmra.mxu1 %v6573_v26  ;;  %v6578_v26 = vld [vmem:[%s13764_s12 + $0x310] sm:$0xff] }
 0xf4d   : > { %7081 = vmatmul.f32.gmra.mxu2 %v6534_v0  ;;  %v6572_v0 = vld [vmem:[%s13764_s12 + $0x2e0] sm:$0xff] }
 0xf4e   : > { %6885 = vmatmul.f32.gmra.mxu0 %v6572_v0  ;;  %v13450_v8 = vpop.f32.mrf.mxu1 }
 0xf51   : > { %7194 = vmatmul.f32.gmra.mxu3 %v6535_v15  ;;  %7001 = vmatmul.f32.gmra.mxu1 %v6577_v12 }
 0xf55   : > { %7084 = vmatmul.f32.gmra.mxu2 %v6538_v48  ;;  %v6562_v48 = vld [vmem:[%s13764_s12 + $0x290] sm:$0xff] }
 0xf59   : > { %7197 = vmatmul.f32.gmra.mxu3 %v6539_v4 }
 0xf5d   : > { %7087 = vmatmul.f32.gmra.mxu2 %v6542_v63  ;;  %v6841_v63 = vpop.f32.mrf.mxu0 }
 0xf61   : > { %7200 = vmatmul.f32.gmra.mxu3 %v6543_v31  ;;  %v6576_v31 = vld [vmem:[%s13764_s12 + $0x300] sm:$0xff] }
 0xf62   : > { %6888 = vmatmul.f32.gmra.mxu0 %v6576_v31  ;;  %v6620_v31 = vld [vmem:[%s13765_s13 + $0x60] sm:$0xff] }
 0xf65   : > { %7090 = vmatmul.f32.gmra.mxu2 %v6546_v2  ;;  %v6844_v6 = vpop.f32.mrf.mxu0 }
 0xf68   : > { %v7043_v40 = vpop.f32.mrf.mxu2 }
 0xf69   : > { %7203 = vmatmul.f32.gmra.mxu3 %v6547_v44  ;;  %v7044_v18 = vadd.f32 %v7043_v40, %v6931_v39  ;;  %v6946_v44 = vadd.f32 %v6945_v58, %v6833_v45  ;;  %v6617_v40 = vld [vmem:[%s13765_s13 + $0x48] sm:$0xff]  ;;  %v6571_v58 = vld [vmem:[%s13764_s12 + $0x2d8] sm:$0xff] }
 0xf6a   : > { %v6845_v34 = vadd.f32 %v6844_v6, %v6617_v40 }
 0xf6c   : > { %v7156_v54 = vpop.f32.mrf.mxu3 }
 0xf6d   : > { %v13384_v13 = vadd.f32 %v7156_v54, %v7044_v18  ;;  %7093 = vmatmul.f32.gmra.mxu2 %v6550_v61  ;;  %v6957_v61 = vpop.f32.mrf.mxu1  ;;  %v6580_v54 = vld [vmem:[%s13764_s12 + $0x320] sm:$0xff] }
 0xf6e   : > { %6891 = vmatmul.f32.gmra.mxu0 %v6580_v54  ;;  %v13478_v38 = vadd.f32 %v6957_v61, %v6845_v34 }
 0xf6f   : > { %v7252_v40 = vmax.f32 %v13384_v13, 0.0  ;;  %v6597_v13 = vld [vmem:[%s13764_s12 + $0x3a8] sm:$0xff] }
 0xf70   : > { %v7046_v9 = vpop.f32.mrf.mxu2 }
 0xf71   : > { %7206 = vmatmul.f32.gmra.mxu3 %v6551_v25  ;;  %v7047_v41 = vadd.f32 %v7046_v9, %v6934_v43  ;;  %v6581_v43 = vld [vmem:[%s13764_s12 + $0x328] sm:$0xff]  ;;  %v6570_v25 = vld [vmem:[%s13764_s12 + $0x2d0] sm:$0xff]  ;;  %v6949_v9 = vadd.f32 %v13412_v47, %v6836_v35 }
 0xf72   : > { %7004 = vmatmul.f32.gmra.mxu1 %v6581_v43  ;;  %v6621_v35 = vld [vmem:[%s13765_s13 + $0x68] sm:$0xff] }
 0xf74   : > { %v7159_v17 = vpop.f32.mrf.mxu3 }
 0xf75   : > { %v13401_v23 = vadd.f32 %v7159_v17, %v7047_v41  ;;  %7096 = vmatmul.f32.gmra.mxu2 %v6554_v57  ;;  %v6615_v41 = vld [vmem:[%s13765_s13 + $0x38] sm:$0xff]  ;;  %v6847_v57 = vpop.f32.mrf.mxu0  ;;  %v6960_v59 = vpop.f32.mrf.mxu1 }
 0xf76   : > { %6894 = vmatmul.f32.gmra.mxu0 %v6584_v60 }
 0xf78   : > { %v7049_v14 = vpop.f32.mrf.mxu2 }
 0xf79   : > { %7209 = vmatmul.f32.gmra.mxu3 %v6555_v52  ;;  %v7050_v10 = vadd.f32 %v7049_v14, %v6937_v32  ;;  %v6839_v32 = vadd.f32 %v6838_v22, %v6615_v41  ;;  %v6848_v52 = vadd.f32 %v6847_v57, %v6618_v11  ;;  %v6574_v14 = vld [vmem:[%s13764_s12 + $0x2f0] sm:$0xff]  ;;  %v7253_v11 = vmax.f32 %v13401_v23, 0.0  ;;  %v6601_v23 = vld [vmem:[%s13764_s12 + $0x3c8] sm:$0xff] }
 0xf7a   : > { %7007 = vmatmul.f32.gmra.mxu1 %v6585_v62 }
 0xf7b   : > { %v13501_v47 = vadd.f32 %v6960_v59, %v6848_v52  ;;  %v6952_v29 = vadd.f32 %v13431_v36, %v6839_v32  ;;  %v6588_v36 = vld [vmem:[%s13764_s12 + $0x360] sm:$0xff]  ;;  %v6622_v32 = vld [vmem:[%s13765_s13 + $0x70] sm:$0xff] }
 0xf7c   : > { %v7162_v5 = vpop.f32.mrf.mxu3 }
 0xf7d   : > { %v13420_v19 = vadd.f32 %v7162_v5, %v7050_v10  ;;  %7099 = vmatmul.f32.gmra.mxu2 %v6558_v27  ;;  %v6575_v27 = vld [vmem:[%s13764_s12 + $0x2f8] sm:$0xff]  ;;  %v6616_v5 = vld [vmem:[%s13765_s13 + $0x40] sm:$0xff]  ;;  %v6850_v49 = vpop.f32.mrf.mxu0 }
 0xf7e   : > { %v6842_v0 = vadd.f32 %v6841_v63, %v6616_v5  ;;  %6897 = vmatmul.f32.gmra.mxu0 %v6588_v36 }
 0xf80   : > { %v7052_v15 = vpop.f32.mrf.mxu2 }
 0xf81   : > { %7212 = vmatmul.f32.gmra.mxu3 %v6559_v53  ;;  %v7053_v42 = vadd.f32 %v7052_v15, %v6940_v28  ;;  %v6619_v53 = vld [vmem:[%s13765_s13 + $0x58] sm:$0xff] }
 0xf82   : > { %v6851_v15 = vadd.f32 %v6850_v49, %v6619_v53  ;;  %7010 = vmatmul.f32.gmra.mxu1 %v6589_v56  ;;  %v7254_v53 = vmax.f32 %v13420_v19, 0.0  ;;  %v6605_v19 = vld [vmem:[%s13764_s12 + $0x3e8] sm:$0xff] }
 0xf84   : > { %v7165_v4 = vpop.f32.mrf.mxu3 }
 0xf85   : > { %v13439_v37 = vadd.f32 %v7165_v4, %v7053_v42  ;;  %7102 = vmatmul.f32.gmra.mxu2 %v6562_v48  ;;  %v6963_v42 = vpop.f32.mrf.mxu1 }
 0xf86   : > { %v13524_v48 = vadd.f32 %v6963_v42, %v6851_v15 }
 0xf88   : > { %v7055_v20 = vpop.f32.mrf.mxu2 }
 0xf89   : > { %7215 = vmatmul.f32.gmra.mxu3 %v6563_v55  ;;  %v7056_v46 = vadd.f32 %v7055_v20, %v6943_v3  ;;  %v6955_v55 = vadd.f32 %v13450_v8, %v6842_v0  ;;  %v6853_v20 = vpop.f32.mrf.mxu0  ;;  %v6593_v8 = vld [vmem:[%s13764_s12 + $0x388] sm:$0xff]  ;;  %v6623_v0 = vld [vmem:[%s13765_s13 + $0x78] sm:$0xff] }
 0xf8a   : > { %v6854_v45 = vadd.f32 %v6853_v20, %v6620_v31  ;;  %7013 = vmatmul.f32.gmra.mxu1 %v6593_v8  ;;  %v7255_v20 = vmax.f32 %v13439_v37, 0.0 }
 0xf8c   : > { %v7168_v2 = vpop.f32.mrf.mxu3 }
 0xf8d   : > { %v13458_v39 = vadd.f32 %v7168_v2, %v7056_v46  ;;  %7105 = vmatmul.f32.gmra.mxu2 %v6566_v24  ;;  %v6966_v12 = vpop.f32.mrf.mxu1  ;;  %v6592_v24 = vld [vmem:[%s13764_s12 + $0x380] sm:$0xff]  ;;  %v6582_v2 = vld [vmem:[%s13764_s12 + $0x330] sm:$0xff] }
 0xf8e   : > { %6900 = vmatmul.f32.gmra.mxu0 %v6592_v24 }
 0xf90   : > { %v7058_v30 = vpop.f32.mrf.mxu2 }
 0xf91   : > { %7218 = vmatmul.f32.gmra.mxu3 %v6567_v33  ;;  %v7059_v18 = vadd.f32 %v7058_v30, %v6946_v44  ;;  %v13544_v44 = vadd.f32 %v6966_v12, %v6854_v45  ;;  %v6583_v30 = vld [vmem:[%s13764_s12 + $0x338] sm:$0xff]  ;;  %v6856_v34 = vpop.f32.mrf.mxu0  ;;  %v6624_v12 = vld [vmem:[%s13765_s13 + $0x80] sm:$0xff] }
 0xf92   : > { %v6857_v43 = vadd.f32 %v6856_v34, %v6621_v35  ;;  %7016 = vmatmul.f32.gmra.mxu1 %v6597_v13  ;;  %v7256_v35 = vmax.f32 %v13458_v39, 0.0 }
 0xf94   : > { %v7171_v51 = vpop.f32.mrf.mxu3 }
 0xf95   : > { %v13480_v50 = vadd.f32 %v7171_v51, %v7059_v18  ;;  %7108 = vmatmul.f32.gmra.mxu2 %v6570_v25  ;;  %v6969_v25 = vpop.f32.mrf.mxu1  ;;  %v6596_v51 = vld [vmem:[%s13764_s12 + $0x3a0] sm:$0xff] }
 0xf96   : > { %6903 = vmatmul.f32.gmra.mxu0 %v6596_v51 }
 0xf98   : > { %v7061_v21 = vpop.f32.mrf.mxu2 }
 0xf99   : > { %7221 = vmatmul.f32.gmra.mxu3 %v6571_v58  ;;  %v7062_v17 = vadd.f32 %v7061_v21, %v6949_v9  ;;  %v6586_v9 = vld [vmem:[%s13764_s12 + $0x350] sm:$0xff]  ;;  %v13565_v58 = vadd.f32 %v6969_v25, %v6857_v43  ;;  %v6587_v21 = vld [vmem:[%s13764_s12 + $0x358] sm:$0xff]  ;;  %v6859_v52 = vpop.f32.mrf.mxu0 }
 0xf9a   : > { %v6860_v62 = vadd.f32 %v6859_v52, %v6622_v32  ;;  %7019 = vmatmul.f32.gmra.mxu1 %v6601_v23  ;;  %v6606_v23 = vld [vmem:[%s13764_s12 + $0x3f0] sm:$0xff] }
 0xf9c   : > { %v7174_v10 = vpop.f32.mrf.mxu3 }
 0xf9d   : > { %v13503_v16 = vadd.f32 %v7174_v10, %v7062_v17  ;;  %7111 = vmatmul.f32.gmra.mxu2 %v6574_v14  ;;  %v6972_v14 = vpop.f32.mrf.mxu1  ;;  %v6600_v10 = vld [vmem:[%s13764_s12 + $0x3c0] sm:$0xff] }
 0xf9e   : > { %6906 = vmatmul.f32.gmra.mxu0 %v6600_v10 }
 0xfa0   : > { %v7064_v28 = vpop.f32.mrf.mxu2 }
 0xfa1   : > { %7224 = vmatmul.f32.gmra.mxu3 %v6575_v27  ;;  %v7065_v22 = vadd.f32 %v7064_v28, %v6952_v29  ;;  %v6590_v29 = vld [vmem:[%s13764_s12 + $0x370] sm:$0xff]  ;;  %v13586_v27 = vadd.f32 %v6972_v14, %v6860_v62  ;;  %v6591_v28 = vld [vmem:[%s13764_s12 + $0x378] sm:$0xff]  ;;  %v6862_v15 = vpop.f32.mrf.mxu0 }
 0xfa2   : > { %v6863_v56 = vadd.f32 %v6862_v15, %v6623_v0  ;;  %7022 = vmatmul.f32.gmra.mxu1 %v6605_v19 }
 0xfa4   : > { %v7177_v4 = vpop.f32.mrf.mxu3 }
 0xfa5   : > { %v13526_v3 = vadd.f32 %v7177_v4, %v7065_v22  ;;  %7114 = vmatmul.f32.gmra.mxu2 %v6578_v26  ;;  %v6975_v26 = vpop.f32.mrf.mxu1  ;;  %v6604_v4 = vld [vmem:[%s13764_s12 + $0x3e0] sm:$0xff] }
 0xfa6   : > { %6909 = vmatmul.f32.gmra.mxu0 %v6604_v4 }
 0xfa8   : > { %v7067_v63 = vpop.f32.mrf.mxu2 }
 0xfa9   : > { %7227 = vmatmul.f32.gmra.mxu3 %v6579_v1  ;;  %v7068_v46 = vadd.f32 %v7067_v63, %v6955_v55  ;;  %v6594_v55 = vld [vmem:[%s13764_s12 + $0x390] sm:$0xff]  ;;  %v6976_v1 = vadd.f32 %v6975_v26, %v6863_v56  ;;  %v6865_v24 = vpop.f32.mrf.mxu0 }
 0xfac   : > { %v7180_v33 = vpop.f32.mrf.mxu3 }
 0xfad   : > { %v7181_v7 = vadd.f32 %v7180_v33, %v7068_v46  ;;  %7117 = vmatmul.f32.gmra.mxu2 %v6582_v2  ;;  %v6866_v33 = vadd.f32 %v6865_v24, %v6624_v12 }
 0xfaf   : > { %v7260_v6 = vmax.f32 %v7181_v7, 0.0  ;;  %v6978_v7 = vpop.f32.mrf.mxu1 }
 0xfb0   : > { %v7070_v18 = vpop.f32.mrf.mxu2 }
 0xfb1   : > { %v13553_v61 = vmax.f32 %v7252_v40, %v7260_v6  ;;  %7230 = vmatmul.f32.gmra.mxu3 %v6583_v30  ;;  %v7071_v54 = vadd.f32 %v7070_v18, %v13478_v38  ;;  %v6598_v30 = vld [vmem:[%s13764_s12 + $0x3b0] sm:$0xff]  ;;  %v6979_v40 = vadd.f32 %v6978_v7, %v6866_v33  ;;  %v6599_v18 = vld [vmem:[%s13764_s12 + $0x3b8] sm:$0xff]  ;;  %v6868_v43 = vpop.f32.mrf.mxu0 }
 0xfb4   : > { %v7183_v41 = vpop.f32.mrf.mxu3 }
 0xfb5   : > { %v7184_v38 = vadd.f32 %v7183_v41, %v7071_v54  ;;  %7120 = vmatmul.f32.gmra.mxu2 %v6586_v9  ;;  %v6602_v41 = vld [vmem:[%s13764_s12 + $0x3d0] sm:$0xff] }
 0xfb7   : > { %v7261_v57 = vmax.f32 %v7184_v38, 0.0  ;;  %v6981_v9 = vpop.f32.mrf.mxu1 }
 0xfb8   : > { %v7073_v17 = vpop.f32.mrf.mxu2 }
 0xfb9   : > { %v13574_v59 = vmax.f32 %v7253_v11, %v7261_v57  ;;  %7233 = vmatmul.f32.gmra.mxu3 %v6587_v21  ;;  %v7074_v60 = vadd.f32 %v7073_v17, %v13501_v47  ;;  %v6603_v11 = vld [vmem:[%s13764_s12 + $0x3d8] sm:$0xff]  ;;  %v7257_v57 = vmax.f32 %v13480_v50, 0.0  ;;  %v6871_v52 = vpop.f32.mrf.mxu0 }
 0xfbc   : > { %v7186_v5 = vpop.f32.mrf.mxu3 }
 0xfbd   : > { %v7187_v47 = vadd.f32 %v7186_v5, %v7074_v60  ;;  %7123 = vmatmul.f32.gmra.mxu2 %v6590_v29 }
 0xfbf   : > { %v7262_v49 = vmax.f32 %v7187_v47, 0.0  ;;  %v6984_v10 = vpop.f32.mrf.mxu1  ;;  %v6607_v47 = vld [vmem:[%s13764_s12 + $0x3f8] sm:$0xff] }
 0xfc0   : > { %v7076_v22 = vpop.f32.mrf.mxu2 }
 0xfc1   : > { %v13595_v42 = vmax.f32 %v7254_v53, %v7262_v49  ;;  %7236 = vmatmul.f32.gmra.mxu3 %v6591_v28  ;;  %v7077_v36 = vadd.f32 %v7076_v22, %v13524_v48  ;;  %v6595_v48 = vld [vmem:[%s13764_s12 + $0x398] sm:$0xff]  ;;  %v7258_v28 = vmax.f32 %v13503_v16, 0.0  ;;  %v6874_v22 = vpop.f32.mrf.mxu0  ;;  %v6628_v16 = vld [vmem:[%s13765_s13 + $0xa0] sm:$0xff] }
 0xfc4   : > { %v7189_v63 = vpop.f32.mrf.mxu3 }
 0xfc5   : > { %v7190_v31 = vadd.f32 %v7189_v63, %v7077_v36  ;;  %7126 = vmatmul.f32.gmra.mxu2 %v6594_v55  ;;  %v7259_v55 = vmax.f32 %v13526_v3, 0.0  ;;  %v6629_v3 = vld [vmem:[%s13765_s13 + $0xa8] sm:$0xff] }
 0xfc7   : > { %v7263_v46 = vmax.f32 %v7190_v31, 0.0  ;;  %v6987_v56 = vpop.f32.mrf.mxu1 }
 0xfc8   : > { %v7079_v45 = vpop.f32.mrf.mxu2 }
 0xfc9   : > { %v13614_v8 = vmax.f32 %v7255_v20, %v7263_v46  ;;  %7239 = vmatmul.f32.gmra.mxu3 %v6595_v48  ;;  %v7080_v2 = vadd.f32 %v7079_v45, %v13544_v44  ;;  %v6625_v44 = vld [vmem:[%s13765_s13 + $0x88] sm:$0xff]  ;;  %v6877_v48 = vpop.f32.mrf.mxu0 }
 0xfca   : > { %v6869_v13 = vadd.f32 %v6868_v43, %v6625_v44  ;;  %v6878_v45 = vadd.f32 %v6877_v48, %v6628_v16 }
 0xfcc   : > { %v7192_v37 = vpop.f32.mrf.mxu3  ;;  %v6982_v38 = vadd.f32 %v6981_v9, %v6869_v13 }
 0xfcd   : > { %v7193_v6 = vadd.f32 %v7192_v37, %v7080_v2  ;;  %7129 = vmatmul.f32.gmra.mxu2 %v6598_v30 }
 0xfcf   : > { %v7264_v34 = vmax.f32 %v7193_v6, 0.0  ;;  %v6990_v12 = vpop.f32.mrf.mxu1 }
 0xfd0   : > { %v7082_v54 = vpop.f32.mrf.mxu2 }
 0xfd1   : > { %v13627_v25 = vmax.f32 %v7256_v35, %v7264_v34  ;;  %7242 = vmatmul.f32.gmra.mxu3 %v6599_v18  ;;  %v7083_v51 = vadd.f32 %v7082_v54, %v13565_v58  ;;  %v6626_v58 = vld [vmem:[%s13765_s13 + $0x90] sm:$0xff]  ;;  %v6880_v7 = vpop.f32.mrf.mxu0 }
 0xfd2   : > { %v6872_v14 = vadd.f32 %v6871_v52, %v6626_v58  ;;  %v6881_v37 = vadd.f32 %v6880_v7, %v6629_v3 }
 0xfd4   : > { %v7195_v39 = vpop.f32.mrf.mxu3  ;;  %v6985_v29 = vadd.f32 %v6984_v10, %v6872_v14 }
 0xfd5   : > { %v7196_v21 = vadd.f32 %v7195_v39, %v7083_v51  ;;  %7132 = vmatmul.f32.gmra.mxu2 %v6602_v41 }
 0xfd7   : > { %v7265_v17 = vmax.f32 %v7196_v21, 0.0  ;;  %v6993_v6 = vpop.f32.mrf.mxu1 }
 0xfd8   : > { %v7085_v32 = vpop.f32.mrf.mxu2  ;;  %v6994_v18 = vadd.f32 %v6993_v6, %v6881_v37  ;;  %v6634_v37 = vld [vmem:[%s13765_s13 + $0xd0] sm:$0xff] }
 0xfd9   : > { %v13640_v60 = vmax.f32 %v7257_v57, %v7265_v17  ;;  %7245 = vmatmul.f32.gmra.mxu3 %v6603_v11  ;;  %v7086_v62 = vadd.f32 %v7085_v32, %v13586_v27  ;;  %v6627_v27 = vld [vmem:[%s13765_s13 + $0x98] sm:$0xff]  ;;  %v6883_v54 = vpop.f32.mrf.mxu0 }
 0xfda   : > { %v6875_v36 = vadd.f32 %v6874_v22, %v6627_v27 }
 0xfdc   : > { %v7198_v50 = vpop.f32.mrf.mxu3  ;;  %v6988_v26 = vadd.f32 %v6987_v56, %v6875_v36 }
 0xfdd   : > { %v7199_v5 = vadd.f32 %v7198_v50, %v7086_v62  ;;  %7135 = vmatmul.f32.gmra.mxu2 %v6606_v23 }
 0xfdf   : > { %v7266_v53 = vmax.f32 %v7199_v5, 0.0  ;;  %v6996_v13 = vpop.f32.mrf.mxu1 }
 0xfe0   : > { %v7088_v49 = vpop.f32.mrf.mxu2 }
 0xfe1   : > { %v13653_v0 = vmax.f32 %v7258_v28, %v7266_v53  ;;  %7248 = vmatmul.f32.gmra.mxu3 %v6607_v47  ;;  %v7089_v15 = vadd.f32 %v7088_v49, %v6976_v1  ;;  %v6991_v1 = vadd.f32 %v6990_v12, %v6878_v45  ;;  %v6886_v11 = vpop.f32.mrf.mxu0  ;;  %v6633_v45 = vld [vmem:[%s13765_s13 + $0xc8] sm:$0xff] }
 0xfe4   : > { %v7201_v4 = vpop.f32.mrf.mxu3 }
 0xfe5   : > { %v7202_v19 = vadd.f32 %v7201_v4, %v7089_v15 }
 0xfe7   : > { %v7267_v63 = vmax.f32 %v7202_v19, 0.0  ;;  %v6999_v58 = vpop.f32.mrf.mxu1 }
 0xfe8   : > { %v7091_v31 = vpop.f32.mrf.mxu2 }
 0xfe9   : > { %v13659_v20 = vmax.f32 %v7259_v55, %v7267_v63  ;;  %v7092_v46 = vadd.f32 %v7091_v31, %v6979_v40  ;;  %v6630_v40 = vld [vmem:[%s13765_s13 + $0xb0] sm:$0xff]  ;;  %v6889_v5 = vpop.f32.mrf.mxu0 }
 0xfea   : > { %v6884_v51 = vadd.f32 %v6883_v54, %v6630_v40 }
 0xfec   : > { %v7204_v24 = vpop.f32.mrf.mxu3  ;;  %v6997_v9 = vadd.f32 %v6996_v13, %v6884_v51 }
 0xfed   : > { %v13661_v2 = vadd.f32 %v7204_v24, %v7092_v46 }
 0xfef   : > { %v7002_v53 = vpop.f32.mrf.mxu1 }
 0xff0   : > { %v7094_v33 = vpop.f32.mrf.mxu2 }
 0xff1   : > { %v7095_v30 = vadd.f32 %v7094_v33, %v6982_v38  ;;  %v6631_v38 = vld [vmem:[%s13765_s13 + $0xb8] sm:$0xff]  ;;  %v6892_v15 = vpop.f32.mrf.mxu0 }
 0xff2   : > { %v6887_v17 = vadd.f32 %v6886_v11, %v6631_v38  ;;  %v6893_v3 = vadd.f32 %v6892_v15, %v6633_v45 }
 0xff4   : > { %v7207_v35 = vpop.f32.mrf.mxu3  ;;  %v7000_v32 = vadd.f32 %v6999_v58, %v6887_v17 }
 0xff5   : > { %v13666_v34 = vadd.f32 %v7207_v35, %v7095_v30 }
 0xff7   : > { %v7005_v4 = vpop.f32.mrf.mxu1 }
 0xff8   : > { %v7097_v44 = vpop.f32.mrf.mxu2  ;;  %v7006_v30 = vadd.f32 %v7005_v4, %v6893_v3 }
 0xff9   : > { %v7098_v43 = vadd.f32 %v7097_v44, %v6985_v29  ;;  %v6895_v31 = vpop.f32.mrf.mxu0 }
 0xffc   : > { %v7210_v41 = vpop.f32.mrf.mxu3 }
 0xffd   : > { %v13671_v39 = vadd.f32 %v7210_v41, %v7098_v43  ;;  %v6896_v43 = vadd.f32 %v6895_v31, %v6634_v37 }
0x1000   : > { %v7100_v21 = vpop.f32.mrf.mxu2 }
0x1001   : > { %v7101_v57 = vadd.f32 %v7100_v21, %v6988_v26  ;;  %v6632_v26 = vld [vmem:[%s13765_s13 + $0xc0] sm:$0xff]  ;;  %v6898_v6 = vpop.f32.mrf.mxu0  ;;  %v6635_v21 = vld [vmem:[%s13765_s13 + $0xd8] sm:$0xff] }
0x1002   : > { %v6890_v63 = vadd.f32 %v6889_v5, %v6632_v26  ;;  %v6636_v5 = vld [vmem:[%s13765_s13 + $0xe0] sm:$0xff] }
0x1004   : > { %v7213_v52 = vpop.f32.mrf.mxu3  ;;  %v7003_v46 = vadd.f32 %v7002_v53, %v6890_v63 }
0x1005   : > { %v13676_v62 = vadd.f32 %v7213_v52, %v7101_v57  ;;  %v6899_v52 = vadd.f32 %v6898_v6, %v6635_v21 }
0x1008   : > { %v7103_v14 = vpop.f32.mrf.mxu2 }
0x1009   : > { %v7104_v10 = vadd.f32 %v7103_v14, %v6991_v1  ;;  %v7008_v1 = vpop.f32.mrf.mxu1 }
0x100a   : > { %v7009_v38 = vadd.f32 %v7008_v1, %v6896_v43  ;;  %v6639_v43 = vld [vmem:[%s13765_s13 + $0xf8] sm:$0xff] }
0x100b   : > { %v6901_v17 = vpop.f32.mrf.mxu0 }
0x100c   : > { %v7216_v23 = vpop.f32.mrf.mxu3 }
0x100d   : > { %v13678_v29 = vadd.f32 %v7216_v23, %v7104_v10 }
0x1010   : > { %v7106_v50 = vpop.f32.mrf.mxu2 }
0x1011   : > { %v7107_v47 = vadd.f32 %v7106_v50, %v6994_v18  ;;  %v7268_v18 = vmax.f32 %v13661_v2, 0.0  ;;  %v7011_v51 = vpop.f32.mrf.mxu1  ;;  %v7269_v2 = vmax.f32 %v13666_v34, 0.0  ;;  %v7270_v34 = vmax.f32 %v13671_v39, 0.0 }
0x1012   : > { %v7012_v50 = vadd.f32 %v7011_v51, %v6899_v52  ;;  %v7271_v39 = vmax.f32 %v13676_v62, 0.0 }
0x1013   : > { %v6904_v15 = vpop.f32.mrf.mxu0 }
0x1014   : > { %v7219_v28 = vpop.f32.mrf.mxu3 }
0x1015   : > { %v13680_v27 = vadd.f32 %v7219_v28, %v7107_v47 }
0x1018   : > { %v7109_v49 = vpop.f32.mrf.mxu2 }
0x1019   : > { %v7110_v22 = vadd.f32 %v7109_v49, %v6997_v9  ;;  %v7014_v10 = vpop.f32.mrf.mxu1 }
0x101b   : > { %v6907_v1 = vpop.f32.mrf.mxu0 }
0x101c   : > { %v7222_v36 = vpop.f32.mrf.mxu3 }
0x101d   : > { %v13682_v56 = vadd.f32 %v7222_v36, %v7110_v22  ;;  %v6902_v22 = vadd.f32 %v6901_v17, %v6636_v5 }
0x101f   : > { %v7015_v4 = vadd.f32 %v7014_v10, %v6902_v22  ;;  %v7326_v22 = vld [vmem:[%s13766_s14 + $0x8] sm:$0x7f] }
0x1020   : > { %v7112_v19 = vpop.f32.mrf.mxu2 }
0x1021   : > { %v7113_v55 = vadd.f32 %v7112_v19, %v7000_v32  ;;  %v6637_v19 = vld [vmem:[%s13765_s13 + $0xe8] sm:$0xff] }
0x1022   : > { %v6905_v45 = vadd.f32 %v6904_v15, %v6637_v19 }
0x1023   : > { %v6910_v51 = vpop.f32.mrf.mxu0 }
0x1024   : > { %v7225_v16 = vpop.f32.mrf.mxu3  ;;  %v6911_v21 = vadd.f32 %v6910_v51, %v6639_v43 }
0x1025   : > { %v13687_v48 = vadd.f32 %v7225_v16, %v7113_v55  ;;  %v7017_v55 = vpop.f32.mrf.mxu1 }
0x1026   : > { %v7018_v3 = vadd.f32 %v7017_v55, %v6905_v45 }
0x1028   : > { %v7115_v12 = vpop.f32.mrf.mxu2 }
0x1029   : > { %v7116_v24 = vadd.f32 %v7115_v12, %v7003_v46 }
0x102c   : > { %v7228_v33 = vpop.f32.mrf.mxu3 }
0x102d   : > { %v7229_v7 = vadd.f32 %v7228_v33, %v7116_v24  ;;  %v6638_v33 = vld [vmem:[%s13765_s13 + $0xf0] sm:$0xff]  ;;  %v7020_v37 = vpop.f32.mrf.mxu1 }
0x102f   : > { %v7276_v35 = vmax.f32 %v7229_v7, 0.0  ;;  %v7272_v7 = vmax.f32 %v13678_v29, 0.0  ;;  %v7273_v29 = vmax.f32 %v13680_v27, 0.0 }
0x1030   : > { %v7118_v40 = vpop.f32.mrf.mxu2 }
0x1031   : > { %v7292_v44 = vmax.f32 %v7268_v18, %v7276_v35  ;;  %v7119_v54 = vadd.f32 %v7118_v40, %v7006_v30  ;;  %v6908_v35 = vadd.f32 %v6907_v1, %v6638_v33 }
0x1033   : > { %v7300_v13 = vmax.f32 %v13553_v61, %v7292_v44 }
0x1034   : > { %v7231_v9 = vpop.f32.mrf.mxu3 }
0x1035   : > { %7309 = vst.msk [vmem:[#allocation7] sm:$0xff] %vm7308_vm7, %v7300_v13  ;;  %v7232_v41 = vadd.f32 %v7231_v9, %v7119_v54  ;;  %v7021_v54 = vadd.f32 %v7020_v37, %v6908_v35 }
0x1037   : > { %v7277_v11 = vmax.f32 %v7232_v41, 0.0 }
0x1038   : > { %v7121_v57 = vpop.f32.mrf.mxu2 }
0x1039   : > { %v7293_v58 = vmax.f32 %v7269_v2, %v7277_v11  ;;  %v7122_v32 = vadd.f32 %v7121_v57, %v7009_v38  ;;  %v7023_v2 = vpop.f32.mrf.mxu1 }
0x103a   : > { %v7024_v17 = vadd.f32 %v7023_v2, %v6911_v21 }
0x103b   : > { %v7301_v14 = vmax.f32 %v13574_v59, %v7293_v58  ;;  %v7274_v58 = vmax.f32 %v13682_v56, 0.0 }
0x103c   : > { %v7234_v61 = vpop.f32.mrf.mxu3  ;;  %v7317_v15 = vld [vmem:[#allocation7] sm:$0xff] }
0x103d   : > { %7310 = vst.msk [vmem:[#allocation7 + $0x8] sm:$0xff] %vm7308_vm7, %v7301_v14  ;;  %v7235_v23 = vadd.f32 %v7234_v61, %v7122_v32 }
0x103f   : > { %v7278_v47 = vmax.f32 %v7235_v23, 0.0 }
0x1040   : > { %v7124_v28 = vpop.f32.mrf.mxu2 }
0x1041   : > { %v7294_v53 = vmax.f32 %v7270_v34, %v7278_v47  ;;  %v7125_v49 = vadd.f32 %v7124_v28, %v7012_v50  ;;  %v7275_v50 = vmax.f32 %v13687_v48, 0.0 }
0x1043   : > { %v7302_v59 = vmax.f32 %v13595_v42, %v7294_v53 }
0x1044   : > { %v7237_v36 = vpop.f32.mrf.mxu3 }
0x1045   : > { %7311 = vst.msk [vmem:[#allocation7 + $0x10] sm:$0xff] %vm7308_vm7, %v7302_v59  ;;  %v7238_v26 = vadd.f32 %v7237_v36, %v7125_v49  ;;  %v7325_v49 = vld [vmem:[%s13766_s14] sm:$0xff]  ;;  %v7328_v36 = vld [vmem:[%s13767_s15 + $0x8] sm:$0x7f] }
0x1046   : > { %v7327_v59 = vld [vmem:[%s13767_s15] sm:$0xff] }
0x1047   : > { %v7279_v63 = vmax.f32 %v7238_v26, 0.0 }
0x1048   : > { %v7127_v16 = vpop.f32.mrf.mxu2 }
0x1049   : > { %v7295_v31 = vmax.f32 %v7271_v39, %v7279_v63  ;;  %v7128_v46 = vadd.f32 %v7127_v16, %v7015_v4 }
0x104b   : > { %v7303_v12 = vmax.f32 %v13614_v8, %v7295_v31 }
0x104c   : > { %v7240_v42 = vpop.f32.mrf.mxu3  ;;  %v7319_v48 = vld [vmem:[#allocation7 + $0x10] sm:$0xff] }
0x104d   : > { %7312 = vst.msk [vmem:[#allocation7 + $0x18] sm:$0xff] %vm7308_vm7, %v7303_v12  ;;  %v7241_v24 = vadd.f32 %v7240_v42, %v7128_v46 }
0x104f   : > { %v7280_v62 = vmax.f32 %v7241_v24, 0.0 }
0x1050   : > { %v7130_v30 = vpop.f32.mrf.mxu2 }
0x1051   : > { %v7296_v6 = vmax.f32 %v7272_v7, %v7280_v62  ;;  %v7131_v18 = vadd.f32 %v7130_v30, %v7018_v3 }
0x1053   : > { %v7304_v8 = vmax.f32 %v13627_v25, %v7296_v6 }
0x1054   : > { %v7243_v40 = vpop.f32.mrf.mxu3  ;;  %v7320_v53 = vld [vmem:[#allocation7 + $0x18] sm:$0xff] }
0x1055   : > { %7313 = vst.msk [vmem:[#allocation7 + $0x20] sm:$0xff] %vm7308_vm7, %v7304_v8  ;;  %v7244_v44 = vadd.f32 %v7243_v40, %v7131_v18 }
0x1057   : > { %v7281_v13 = vmax.f32 %v7244_v44, 0.0 }
0x1058   : > { %v7133_v9 = vpop.f32.mrf.mxu2 }
0x1059   : > { %v7297_v41 = vmax.f32 %v7273_v29, %v7281_v13  ;;  %v7134_v38 = vadd.f32 %v7133_v9, %v7021_v54 }
0x105b   : > { %v7305_v25 = vmax.f32 %v13640_v60, %v7297_v41 }
0x105c   : > { %v7246_v11 = vpop.f32.mrf.mxu3 }
0x105d   : > { %7314 = vst.msk [vmem:[#allocation7 + $0x28] sm:$0xff] %vm7308_vm7, %v7305_v25  ;;  %v7247_v57 = vadd.f32 %v7246_v11, %v7134_v38 }
0x105f   : > { %v7282_v32 = vmax.f32 %v7247_v57, 0.0 }
0x1060   : > { %v7136_v52 = vpop.f32.mrf.mxu2 }
0x1061   : > { %v7298_v14 = vmax.f32 %v7274_v58, %v7282_v32  ;;  %v7137_v61 = vadd.f32 %v7136_v52, %v7024_v17 }
0x1063   : > { %v7306_v27 = vmax.f32 %v13653_v0, %v7298_v14  ;;  %v7321_v0 = vld [vmem:[#allocation7 + $0x20] sm:$0xff] }
0x1064   : > { %v7249_v10 = vpop.f32.mrf.mxu3  ;;  %v7322_v28 = vld [vmem:[#allocation7 + $0x28] sm:$0xff] }
0x1065   : > { %7315 = vst.msk [vmem:[#allocation7 + $0x30] sm:$0xff] %vm7308_vm7, %v7306_v27  ;;  %v7250_v23 = vadd.f32 %v7249_v10, %v7137_v61 }
0x1067   : > { %v7283_v60 = vmax.f32 %v7250_v23, 0.0 }
0x1069   : > { %v7299_v5 = vmax.f32 %v7275_v50, %v7283_v60 }
0x106b   : > { %v7307_v34 = vmax.f32 %v13659_v20, %v7299_v5  ;;  %v7318_v20 = vld [vmem:[#allocation7 + $0x8] sm:$0xff] }
0x106c   : > { %v7323_v56 = vld [vmem:[#allocation7 + $0x30] sm:$0xff] }
0x106d   : > { %7316 = vst.msk [vmem:[#allocation7 + $0x38] sm:$0xff] %vm7308_vm7, %v7307_v34 }
0x1074   : > { %v7324_v47 = vld [vmem:[#allocation7 + $0x38] sm:$0xff] }
0x1075   : > { %7344 = vmatpush.msra.mxu0 %v7324_v47  ;;  %8295 = vmatpush.msra.mxu1 %v7324_v47 }
0x1077   : > { %7345 = vmatpush.msra.mxu0 %v7323_v56  ;;  %8296 = vmatpush.msra.mxu1 %v7323_v56 }
0x1079   : > { %7346 = vmatpush.msra.mxu0 %v7322_v28  ;;  %8297 = vmatpush.msra.mxu1 %v7322_v28 }
0x107b   : > { %7347 = vmatpush.msra.mxu0 %v7321_v0  ;;  %8298 = vmatpush.msra.mxu1 %v7321_v0 }
0x107d   : > { %7348 = vmatpush.msra.mxu0 %v7320_v53  ;;  %8299 = vmatpush.msra.mxu1 %v7320_v53 }
0x107f   : > { %7349 = vmatpush.msra.mxu0 %v7319_v48  ;;  %8300 = vmatpush.msra.mxu1 %v7319_v48 }
0x1081   : > { %7350 = vmatpush.msra.mxu0 %v7318_v20  ;;  %8301 = vmatpush.msra.mxu1 %v7318_v20 }
0x1083   : > { %7351 = vmatpush.msra.mxu0 %v7317_v15  ;;  %8302 = vmatpush.msra.mxu1 %v7317_v15 }
0x1084   : > { %8040 = vmatmul.msk.f32.vlgmr.msra.gmra.mxu0 %vm7329_vm12, %v7325_v49  ;;  %8041 = vmatmul.msk.f32.vlgmr.msra.gmra.mxu1 %vm7329_vm12, %v7326_v22 }
0x1101   : > { %v7353_v26 = vpop.f32.mrf.mxu0  ;;  %v7356_v4 = vpop.f32.mrf.mxu1 }
0x1102   : > { %v7354_v19 = vadd.f32 %v7353_v26, %v7327_v59  ;;  %v7357_v55 = vadd.f32 %v7356_v4, %v7328_v36 }
0x1104   : > { %7359 = vst.msk [vmem:[%s9153_s30] sm:$0xff] %vm7308_vm7, %v7354_v19 }
0x1105   : > { %7361 = vst.msk [vmem:[%s9153_s30 + $0x8] sm:$0x7f] %vm7360_vm8, %v7357_v55 }
0x1106 PF: > { %s26_s21 = sadd.s32 1, %s8987_s21  }
0x1107   : > { %p23_p8 = scmp.ge.s32.totalorder %s26_s21, 4  }
0x1109   :  { %25 = sbr.rel (!%p23_p8) target bundleno = 3 (0x3), region = 210 }

</bundles_post_ra>
